<compile_context>
chip_gen: v6e
topology: v6e:2x2x1
jax: 0.10.0
libtpu: 0.0.40
codegen_flags: <defaults>
</compile_context>

<pallas_src>
import functools

import jax
import jax.numpy as jnp
from jax.experimental import pallas as pl
from jax.experimental.pallas import tpu as pltpu


ACT_DTYPE = jnp.bfloat16          # activation / matmul-operand storage dtype
VMEM_LIMIT = 32 * 1024 * 1024     # safe on v5e/v6e (128 MiB phys) and v7x (64 MiB phys)


def _cparams(sem):
    return pltpu.CompilerParams(dimension_semantics=sem,
                                vmem_limit_bytes=VMEM_LIMIT)


# ----------------------------------------------------------------------------
# Pallas kernels
# ----------------------------------------------------------------------------

def _pw_kernel(x_ref, w_ref, bias_ref, o_ref, *, relu):
    # x: (Cin, TM) bf16, w: (Cout, Cin) bf16 (BN scale folded), bias: (Cout, 1) f32
    y = jnp.dot(w_ref[...], x_ref[...], preferred_element_type=jnp.float32)
    y = y + bias_ref[...]
    if relu:
        y = jnp.maximum(y, 0.0)
    o_ref[...] = y.astype(o_ref.dtype)


def _dw3x3_s1_kernel(x_ref, w_ref, bias_ref, o_ref):
    # x: (C, H+2, W+2), w: (9, C, 1, 1) (BN scale folded), bias: (C, 1, 1), o: (C, H, W)
    c, ho, wo = o_ref.shape
    acc = x_ref[:, 0:ho, 0:wo].astype(jnp.float32) * w_ref[0]   # tap (0, 0)
    for k in range(1, 9):
        ky, kx = k // 3, k % 3
        tap = x_ref[:, ky:ky + ho, kx:kx + wo].astype(jnp.float32)
        acc = acc + tap * w_ref[k]
    o_ref[...] = (acc + bias_ref[...]).astype(o_ref.dtype)


def _dw3x3_s2_kernel(p_ee, p_eo, p_oe, p_oo, w_ref, bias_ref, o_ref):
    # phases: (C, Ho+1, Wo+1) each; o: (C, Ho, Wo).  Each stride-2 tap is a contiguous
    # slice of one even/odd phase array (no strided VMEM access).
    c, ho, wo = o_ref.shape
    phases = ((p_ee, p_eo), (p_oe, p_oo))
    acc = p_ee[:, 0:ho, 0:wo].astype(jnp.float32) * w_ref[0]    # tap (0, 0)
    for k in range(1, 9):
        ky, kx = k // 3, k % 3
        src = phases[ky % 2][kx % 2]
        tap = src[:, ky // 2:ky // 2 + ho, kx // 2:kx // 2 + wo].astype(jnp.float32)
        acc = acc + tap * w_ref[k]
    o_ref[...] = (acc + bias_ref[...]).astype(o_ref.dtype)


def _maxpool_s2_kernel(p_ee, p_eo, p_oe, p_oo, o_ref):
    c, ho, wo = o_ref.shape
    phases = ((p_ee, p_eo), (p_oe, p_oo))
    acc = p_ee[:, 0:ho, 0:wo].astype(jnp.float32)               # tap (0, 0)
    for k in range(1, 9):
        ky, kx = k // 3, k % 3
        src = phases[ky % 2][kx % 2]
        tap = src[:, ky // 2:ky // 2 + ho, kx // 2:kx // 2 + wo].astype(jnp.float32)
        acc = jnp.maximum(acc, tap)
    o_ref[...] = acc.astype(o_ref.dtype)


# ----------------------------------------------------------------------------
# pallas_call wrappers
# ----------------------------------------------------------------------------

def _choose_tile_m(m, target=1024):
    """Largest lane-tile (multiple of 128) dividing m, capped at `target`.

    Falls back to the full extent (always legal w.r.t. the (8,128) rule)."""
    if m <= target:
        return m
    for t in range(target, 0, -128):
        if m % t == 0:
            return t
    return m


def _pw_call(x2d, w, bias, relu):
    # x2d: (K, M), w: (Cout, K), bias: (Cout, 1) -> (Cout, M)
    k, m = x2d.shape
    cout = w.shape[0]
    tm = _choose_tile_m(m)
    kern = functools.partial(_pw_kernel, relu=relu)
    return pl.pallas_call(
        kern,
        out_shape=jax.ShapeDtypeStruct((cout, m), ACT_DTYPE),
        grid=(m // tm,),
        in_specs=[
            pl.BlockSpec((k, tm), lambda i: (0, i)),        # activations: tiled over M
            pl.BlockSpec((cout, k), lambda i: (0, 0)),      # weights: VMEM-resident
            pl.BlockSpec((cout, 1), lambda i: (0, 0)),      # bias: VMEM-resident
        ],
        out_specs=pl.BlockSpec((cout, tm), lambda i: (0, i)),  # lane-dense output
        compiler_params=_cparams(("parallel",)),
    )(x2d.astype(ACT_DTYPE), w.astype(ACT_DTYPE), bias)


def conv1x1_bn(x, w, bias, relu=True):
    # x: (Cin, N, H, W) -> (Cout, N, H, W)
    cin, n, h, wd = x.shape
    y = _pw_call(x.reshape(cin, n * h * wd), w, bias, relu)
    return y.reshape(w.shape[0], n, h, wd)


def conv3x3_bn_relu_s2(x, w, bias):
    # Stem: im2col (stride 2, pad 1) then MXU matmul. x: (3, N, H, W).
    c, n, h, wd = x.shape
    assert h % 2 == 0 and wd % 2 == 0
    ho, wo = h // 2, wd // 2
    xp = jnp.pad(x, ((0, 0), (0, 0), (1, 1), (1, 1)))
    taps = [xp[:, :, ky:ky + 2 * ho:2, kx:kx + 2 * wo:2]
            for ky in range(3) for kx in range(3)]
    patches = jnp.concatenate(taps, axis=0).reshape(9 * c, n * ho * wo)
    kpad = w.shape[1] - patches.shape[0]          # K padded 27 -> 32 for alignment
    if kpad > 0:
        patches = jnp.pad(patches, ((0, kpad), (0, 0)))
    y = _pw_call(patches, w, bias, relu=True)
    return y.reshape(w.shape[0], n, ho, wo)


def dwconv3x3_bn_s1(x, w, bias):
    # x: (C, N, H, W); padded image passed once, taps formed inside the kernel.
    c, n, h, wd = x.shape
    xp = jnp.pad(x, ((0, 0), (0, 0), (1, 1), (1, 1)))
    return pl.pallas_call(
        _dw3x3_s1_kernel,
        out_shape=jax.ShapeDtypeStruct((c, n, h, wd), x.dtype),
        grid=(n,),
        in_specs=[
            pl.BlockSpec((c, None, h + 2, wd + 2), lambda i: (0, i, 0, 0)),
            pl.BlockSpec((9, c, 1, 1), lambda i: (0, 0, 0, 0)),
            pl.BlockSpec((c, 1, 1), lambda i: (0, 0, 0)),
        ],
        out_specs=pl.BlockSpec((c, None, h, wd), lambda i: (0, i, 0, 0)),
        compiler_params=_cparams(("parallel",)),
    )(xp, w, bias)


def _phase_split(xp):
    # xp: (C, N, Hp, Wp) with Hp, Wp even -> 4 even/odd phase arrays (total bytes == input)
    return (xp[:, :, 0::2, 0::2], xp[:, :, 0::2, 1::2],
            xp[:, :, 1::2, 0::2], xp[:, :, 1::2, 1::2])


def dwconv3x3_bn_s2(x, w, bias):
    c, n, h, wd = x.shape
    assert h % 2 == 0 and wd % 2 == 0, "stride-2 phase split assumes even spatial dims"
    ho, wo = h // 2, wd // 2
    xp = jnp.pad(x, ((0, 0), (0, 0), (1, 1), (1, 1)))
    phases = _phase_split(xp)
    phase_spec = pl.BlockSpec((c, None, ho + 1, wo + 1), lambda i: (0, i, 0, 0))
    return pl.pallas_call(
        _dw3x3_s2_kernel,
        out_shape=jax.ShapeDtypeStruct((c, n, ho, wo), x.dtype),
        grid=(n,),
        in_specs=[phase_spec] * 4 + [
            pl.BlockSpec((9, c, 1, 1), lambda i: (0, 0, 0, 0)),
            pl.BlockSpec((c, 1, 1), lambda i: (0, 0, 0)),
        ],
        out_specs=pl.BlockSpec((c, None, ho, wo), lambda i: (0, i, 0, 0)),
        compiler_params=_cparams(("parallel",)),
    )(*phases, w, bias)


def maxpool3x3_s2(x):
    c, n, h, wd = x.shape
    assert h % 2 == 0 and wd % 2 == 0
    ho, wo = h // 2, wd // 2
    xp = jnp.pad(x, ((0, 0), (0, 0), (1, 1), (1, 1)), constant_values=-jnp.inf)
    phases = _phase_split(xp)
    phase_spec = pl.BlockSpec((c, None, ho + 1, wo + 1), lambda i: (0, i, 0, 0))
    return pl.pallas_call(
        _maxpool_s2_kernel,
        out_shape=jax.ShapeDtypeStruct((c, n, ho, wo), x.dtype),
        grid=(n,),
        in_specs=[phase_spec] * 4,
        out_specs=pl.BlockSpec((c, None, ho, wo), lambda i: (0, i, 0, 0)),
        compiler_params=_cparams(("parallel",)),
    )(*phases)


# ----------------------------------------------------------------------------
# Parameter initialization (synthetic; BN running stats + gamma folded at init)
# ----------------------------------------------------------------------------

def _bn_params(key, c):
    k1, k2, k3, k4 = jax.random.split(key, 4)
    gamma = jax.random.uniform(k1, (c,), minval=0.5, maxval=1.5)
    beta = jax.random.normal(k2, (c,)) * 0.1
    mean = jax.random.normal(k3, (c,)) * 0.1
    var = jax.random.uniform(k4, (c,), minval=0.5, maxval=1.5)
    scale = gamma / jnp.sqrt(var + 1e-5)
    bias = beta - mean * scale
    return scale.astype(jnp.float32), bias.astype(jnp.float32)


def _pw_conv_bn(key, cin, cout):
    kw, kb = jax.random.split(key)
    w = jax.random.normal(kw, (cout, cin)) * 0.1
    scale, bias = _bn_params(kb, cout)
    w = (w * scale[:, None]).astype(ACT_DTYPE)            # fold BN scale into weights
    return w, bias.reshape(cout, 1)


def _dw_conv_bn(key, c):
    kw, kb = jax.random.split(key)
    w = jax.random.normal(kw, (9, c)) * 0.1
    scale, bias = _bn_params(kb, c)
    w = (w * scale[None, :]).astype(jnp.float32).reshape(9, c, 1, 1)
    return w, bias.reshape(c, 1, 1)


def _stem_conv_bn(key, cin, cout):
    kw, kb = jax.random.split(key)
    w = jax.random.normal(kw, (cout, 9 * cin)) * 0.1       # im2col layout (tap-major, then cin)
    scale, bias = _bn_params(kb, cout)
    w = w * scale[:, None]
    kpad = (-w.shape[1]) % 16                              # pad K 27 -> 32
    w = jnp.pad(w, ((0, 0), (0, kpad))).astype(ACT_DTYPE)
    return w, bias.reshape(cout, 1)


def _init_inverted_residual(key, inp, oup, stride):
    assert 1 <= stride <= 3
    bf = oup // 2
    assert stride != 1 or inp == bf * 2
    keys = jax.random.split(key, 5)
    p = {}
    if stride > 1:
        p["b1_dw_w"], p["b1_dw_bias"] = _dw_conv_bn(keys[0], inp)
        p["b1_pw_w"], p["b1_pw_bias"] = _pw_conv_bn(keys[1], inp, bf)
    in2 = inp if stride > 1 else bf
    p["b2_pw1_w"], p["b2_pw1_bias"] = _pw_conv_bn(keys[2], in2, bf)
    p["b2_dw_w"], p["b2_dw_bias"] = _dw_conv_bn(keys[3], bf)
    p["b2_pw2_w"], p["b2_pw2_bias"] = _pw_conv_bn(keys[4], bf, bf)
    return p


def init_shufflenet_v2(key, stages_repeats, stages_out_channels):
    params = {}
    keys = jax.random.split(key, 1 + sum(stages_repeats))
    input_channels = 3
    output_channels = stages_out_channels[0]
    params["conv1_w"], params["conv1_bias"] = _stem_conv_bn(keys[0], input_channels,
                                                            output_channels)
    ki = 1
    input_channels = output_channels
    for name, repeats, output_channels in zip(
            ["stage2", "stage3"], stages_repeats, stages_out_channels[1:]):
        blocks = [_init_inverted_residual(keys[ki], input_channels, output_channels, 2)]
        ki += 1
        for _ in range(repeats - 1):
            blocks.append(_init_inverted_residual(keys[ki], output_channels,
                                                  output_channels, 1))
            ki += 1
        params[name] = blocks
        input_channels = output_channels
    return params


# ----------------------------------------------------------------------------
# Forward pass
# ----------------------------------------------------------------------------

def _branch2(p, x, stride):
    y = conv1x1_bn(x, p["b2_pw1_w"], p["b2_pw1_bias"], relu=True)
    if stride == 1:
        y = dwconv3x3_bn_s1(y, p["b2_dw_w"], p["b2_dw_bias"])
    else:
        y = dwconv3x3_bn_s2(y, p["b2_dw_w"], p["b2_dw_bias"])
    y = conv1x1_bn(y, p["b2_pw2_w"], p["b2_pw2_bias"], relu=True)
    return y


def _inverted_residual_forward(p, x, stride):
    if stride == 1:
        c = x.shape[0]
        a, b = x[: c // 2], _branch2(p, x[c // 2:], stride)
    else:
        b1 = dwconv3x3_bn_s2(x, p["b1_dw_w"], p["b1_dw_bias"])
        b1 = conv1x1_bn(b1, p["b1_pw_w"], p["b1_pw_bias"], relu=True)
        a, b = b1, _branch2(p, x, stride)
    # concat(channels) + channel_shuffle(groups=2) == interleave the two halves on the
    # (major) channel axis: out[2k] = a[k], out[2k+1] = b[k].  No lane permutes needed.
    out = jnp.stack([a, b], axis=1).reshape(a.shape[0] * 2, *a.shape[1:])
    return out


def shufflenet_v2_forward(params, x_nchw):
    # Public interface keeps PyTorch NCHW; internally activations are (C, N, H, W) so
    # every 1x1 conv sees a lane-dense (C, N*H*W) matmul view.
    x = jnp.transpose(x_nchw, (1, 0, 2, 3)).astype(ACT_DTYPE)
    x = conv3x3_bn_relu_s2(x, params["conv1_w"], params["conv1_bias"])
    x = maxpool3x3_s2(x)
    for stage in ("stage2", "stage3"):
        for bi, blk in enumerate(params[stage]):
            x = _inverted_residual_forward(blk, x, stride=2 if bi == 0 else 1)
    return jnp.transpose(x, (1, 0, 2, 3)).astype(jnp.float32)


# ----------------------------------------------------------------------------
# Main
# ----------------------------------------------------------------------------

if __name__ == "__main__":
    key = jax.random.PRNGKey(0)
    k_params, k_x = jax.random.split(key)

    # Small synthetic config matching the module: stages_repeats=[2, 2],
    # stages_out_channels=[8, 16, 32].  Spatial 32 keeps every feature map
    # non-degenerate through the four stride-2 reductions: 32 -> 16 -> 8 -> 4 -> 2.
    stages_repeats = [2, 2]
    stages_out_channels = [8, 16, 32]
    params = init_shufflenet_v2(k_params, stages_repeats, stages_out_channels)

    x = jax.random.normal(k_x, (2, 3, 32, 32), dtype=jnp.float32)

    fwd = jax.jit(shufflenet_v2_forward)
    out = jax.block_until_ready(fwd(params, x))

    assert out.shape == (2, stages_out_channels[-1], 2, 2), out.shape
    assert bool(jnp.all(jnp.isfinite(out)))
    print("KERNEL_OK")
</pallas_src>

<mosaic_0001>
module attributes {stable_mosaic.version = 11 : i64} {
  func.func @_pw_kernel(%arg0: i32, %arg1: memref<32x512xbf16, #tpu.memory_space<vmem>>, %arg2: memref<8x32xbf16, #tpu.memory_space<vmem>>, %arg3: memref<8x1xf32, #tpu.memory_space<vmem>>, %arg4: memref<8x512xbf16, #tpu.memory_space<vmem>>) attributes {dimension_semantics = [#tpu.dimension_semantics<parallel>], iteration_bounds = array<i64: 1>, scalar_prefetch = 0 : i64, scratch_operands = 0 : i64, tpu.core_type = #tpu.core_type<tc>, window_params = [{transform_indices = @transform_0, window_bounds = array<i64: 32, 512>}, {pipeline_mode = #tpu.pipeline_mode<synchronous>, transform_indices = @transform_1, window_bounds = array<i64: 8, 32>}, {pipeline_mode = #tpu.pipeline_mode<synchronous>, transform_indices = @transform_2, window_bounds = array<i64: 8, 1>}, {transform_indices = @transform_3, window_bounds = array<i64: 8, 512>}]} {
    %c0 = arith.constant 0 : index
    %c0_0 = arith.constant 0 : index
    %0 = vector.load %arg2[%c0, %c0_0] : memref<8x32xbf16, #tpu.memory_space<vmem>>, vector<8x32xbf16>
    %c0_1 = arith.constant 0 : index
    %c0_2 = arith.constant 0 : index
    %1 = vector.load %arg1[%c0_1, %c0_2] : memref<32x512xbf16, #tpu.memory_space<vmem>>, vector<32x512xbf16>
    %cst = arith.constant dense<0.000000e+00> : vector<8x512xf32>
    %2 = tpu.matmul %0, %1, %cst {dimension_numbers = #tpu.dot_dimension_numbers<[1], [0], [0], [1], [0, 0, 1, 1], [], []>} : vector<8x32xbf16>, vector<32x512xbf16>, vector<8x512xf32> -> vector<8x512xf32>
    %c0_3 = arith.constant 0 : index
    %c0_4 = arith.constant 0 : index
    %3 = vector.load %arg3[%c0_3, %c0_4] : memref<8x1xf32, #tpu.memory_space<vmem>>, vector<8x1xf32>
    %4 = vector.broadcast %3 : vector<8x1xf32> to vector<8x512xf32>
    %5 = arith.addf %2, %4 : vector<8x512xf32>
    %cst_5 = arith.constant 0.000000e+00 : f32
    %6 = vector.broadcast %cst_5 : f32 to vector<8x512xf32>
    %7 = arith.maximumf %5, %6 : vector<8x512xf32>
    %8 = arith.truncf %7 : vector<8x512xf32> to vector<8x512xbf16>
    %c0_6 = arith.constant 0 : index
    %c0_7 = arith.constant 0 : index
    %9 = vector.load %arg4[%c0_6, %c0_7] : memref<8x512xbf16, #tpu.memory_space<vmem>>, vector<8x512xbf16>
    tpu.vector_store %arg4[%c0_6, %c0_7], %8 {strides = array<i32>} : memref<8x512xbf16, #tpu.memory_space<vmem>>, vector<8x512xbf16>,
    return
  }
  func.func @transform_0(%arg0: i32) -> (i32, i32) {
    %c0_i32 = arith.constant 0 : i32
    %c0_i32_0 = arith.constant 0 : i32
    return %c0_i32, %arg0 : i32, i32
  }
  func.func @transform_1(%arg0: i32) -> (i32, i32) {
    %c0_i32 = arith.constant 0 : i32
    %c0_i32_0 = arith.constant 0 : i32
    %c0_i32_1 = arith.constant 0 : i32
    return %c0_i32, %c0_i32_0 : i32, i32
  }
  func.func @transform_2(%arg0: i32) -> (i32, i32) {
    %c0_i32 = arith.constant 0 : i32
    %c0_i32_0 = arith.constant 0 : i32
    %c0_i32_1 = arith.constant 0 : i32
    return %c0_i32, %c0_i32_0 : i32, i32
  }
  func.func @transform_3(%arg0: i32) -> (i32, i32) {
    %c0_i32 = arith.constant 0 : i32
    %c0_i32_0 = arith.constant 0 : i32
    return %c0_i32, %arg0 : i32, i32
  }
}

module attributes {stable_mosaic.version = 11 : i64} {
  func.func @_maxpool_s2_kernel(%arg0: i32, %arg1: memref<8x1x9x9xbf16, #tpu.memory_space<vmem>>, %arg2: memref<8x1x9x9xbf16, #tpu.memory_space<vmem>>, %arg3: memref<8x1x9x9xbf16, #tpu.memory_space<vmem>>, %arg4: memref<8x1x9x9xbf16, #tpu.memory_space<vmem>>, %arg5: memref<8x1x8x8xbf16, #tpu.memory_space<vmem>>) attributes {dimension_semantics = [#tpu.dimension_semantics<parallel>], iteration_bounds = array<i64: 2>, scalar_prefetch = 0 : i64, scratch_operands = 0 : i64, tpu.core_type = #tpu.core_type<tc>, window_params = [{transform_indices = @transform_0, window_bounds = array<i64: 8, 1, 9, 9>}, {transform_indices = @transform_1, window_bounds = array<i64: 8, 1, 9, 9>}, {transform_indices = @transform_2, window_bounds = array<i64: 8, 1, 9, 9>}, {transform_indices = @transform_3, window_bounds = array<i64: 8, 1, 9, 9>}, {transform_indices = @transform_4, window_bounds = array<i64: 8, 1, 8, 8>}]} {
    %c0 = arith.constant 0 : index
    %c0_0 = arith.constant 0 : index
    %c0_1 = arith.constant 0 : index
    %c0_2 = arith.constant 0 : index
    %0 = vector.load %arg1[%c0, %c0_0, %c0_1, %c0_2] : memref<8x1x9x9xbf16, #tpu.memory_space<vmem>>, vector<8x1x8x8xbf16>
    %1 = vector.shape_cast %0 : vector<8x1x8x8xbf16> to vector<8x8x8xbf16>
    %2 = arith.extf %1 : vector<8x8x8xbf16> to vector<8x8x8xf32>
    %c0_3 = arith.constant 0 : index
    %c0_4 = arith.constant 0 : index
    %c0_5 = arith.constant 0 : index
    %c0_6 = arith.constant 0 : index
    %3 = vector.load %arg2[%c0_3, %c0_4, %c0_5, %c0_6] : memref<8x1x9x9xbf16, #tpu.memory_space<vmem>>, vector<8x1x8x8xbf16>
    %4 = vector.shape_cast %3 : vector<8x1x8x8xbf16> to vector<8x8x8xbf16>
    %5 = arith.extf %4 : vector<8x8x8xbf16> to vector<8x8x8xf32>
    %6 = arith.maximumf %2, %5 : vector<8x8x8xf32>
    %c0_7 = arith.constant 0 : index
    %c0_8 = arith.constant 0 : index
    %c0_9 = arith.constant 0 : index
    %c1 = arith.constant 1 : index
    %7 = vector.load %arg1[%c0_7, %c0_8, %c0_9, %c1] : memref<8x1x9x9xbf16, #tpu.memory_space<vmem>>, vector<8x1x8x8xbf16>
    %8 = vector.shape_cast %7 : vector<8x1x8x8xbf16> to vector<8x8x8xbf16>
    %9 = arith.extf %8 : vector<8x8x8xbf16> to vector<8x8x8xf32>
    %10 = arith.maximumf %6, %9 : vector<8x8x8xf32>
    %c0_10 = arith.constant 0 : index
    %c0_11 = arith.constant 0 : index
    %c0_12 = arith.constant 0 : index
    %c0_13 = arith.constant 0 : index
    %11 = vector.load %arg3[%c0_10, %c0_11, %c0_12, %c0_13] : memref<8x1x9x9xbf16, #tpu.memory_space<vmem>>, vector<8x1x8x8xbf16>
    %12 = vector.shape_cast %11 : vector<8x1x8x8xbf16> to vector<8x8x8xbf16>
    %13 = arith.extf %12 : vector<8x8x8xbf16> to vector<8x8x8xf32>
    %14 = arith.maximumf %10, %13 : vector<8x8x8xf32>
    %c0_14 = arith.constant 0 : index
    %c0_15 = arith.constant 0 : index
    %c0_16 = arith.constant 0 : index
    %c0_17 = arith.constant 0 : index
    %15 = vector.load %arg4[%c0_14, %c0_15, %c0_16, %c0_17] : memref<8x1x9x9xbf16, #tpu.memory_space<vmem>>, vector<8x1x8x8xbf16>
    %16 = vector.shape_cast %15 : vector<8x1x8x8xbf16> to vector<8x8x8xbf16>
    %17 = arith.extf %16 : vector<8x8x8xbf16> to vector<8x8x8xf32>
    %18 = arith.maximumf %14, %17 : vector<8x8x8xf32>
    %c0_18 = arith.constant 0 : index
    %c0_19 = arith.constant 0 : index
    %c0_20 = arith.constant 0 : index
    %c1_21 = arith.constant 1 : index
    %19 = vector.load %arg3[%c0_18, %c0_19, %c0_20, %c1_21] : memref<8x1x9x9xbf16, #tpu.memory_space<vmem>>, vector<8x1x8x8xbf16>
    %20 = vector.shape_cast %19 : vector<8x1x8x8xbf16> to vector<8x8x8xbf16>
    %21 = arith.extf %20 : vector<8x8x8xbf16> to vector<8x8x8xf32>
    %22 = arith.maximumf %18, %21 : vector<8x8x8xf32>
    %c0_22 = arith.constant 0 : index
    %c0_23 = arith.constant 0 : index
    %c1_24 = arith.constant 1 : index
    %c0_25 = arith.constant 0 : index
    %23 = vector.load %arg1[%c0_22, %c0_23, %c1_24, %c0_25] : memref<8x1x9x9xbf16, #tpu.memory_space<vmem>>, vector<8x1x8x8xbf16>
    %24 = vector.shape_cast %23 : vector<8x1x8x8xbf16> to vector<8x8x8xbf16>
    %25 = arith.extf %24 : vector<8x8x8xbf16> to vector<8x8x8xf32>
    %26 = arith.maximumf %22, %25 : vector<8x8x8xf32>
    %c0_26 = arith.constant 0 : index
    %c0_27 = arith.constant 0 : index
    %c1_28 = arith.constant 1 : index
    %c0_29 = arith.constant 0 : index
    %27 = vector.load %arg2[%c0_26, %c0_27, %c1_28, %c0_29] : memref<8x1x9x9xbf16, #tpu.memory_space<vmem>>, vector<8x1x8x8xbf16>
    %28 = vector.shape_cast %27 : vector<8x1x8x8xbf16> to vector<8x8x8xbf16>
    %29 = arith.extf %28 : vector<8x8x8xbf16> to vector<8x8x8xf32>
    %30 = arith.maximumf %26, %29 : vector<8x8x8xf32>
    %c0_30 = arith.constant 0 : index
    %c0_31 = arith.constant 0 : index
    %c1_32 = arith.constant 1 : index
    %c1_33 = arith.constant 1 : index
    %31 = vector.load %arg1[%c0_30, %c0_31, %c1_32, %c1_33] : memref<8x1x9x9xbf16, #tpu.memory_space<vmem>>, vector<8x1x8x8xbf16>
    %32 = vector.shape_cast %31 : vector<8x1x8x8xbf16> to vector<8x8x8xbf16>
    %33 = arith.extf %32 : vector<8x8x8xbf16> to vector<8x8x8xf32>
    %34 = arith.maximumf %30, %33 : vector<8x8x8xf32>
    %35 = arith.truncf %34 : vector<8x8x8xf32> to vector<8x8x8xbf16>
    %c0_34 = arith.constant 0 : index
    %c0_35 = arith.constant 0 : index
    %c0_36 = arith.constant 0 : index
    %c0_37 = arith.constant 0 : index
    %36 = vector.load %arg5[%c0_34, %c0_35, %c0_36, %c0_37] : memref<8x1x8x8xbf16, #tpu.memory_space<vmem>>, vector<8x1x8x8xbf16>
    %37 = vector.shape_cast %36 : vector<8x1x8x8xbf16> to vector<8x8x8xbf16>
    %38 = vector.shape_cast %35 : vector<8x8x8xbf16> to vector<8x1x8x8xbf16>
    tpu.vector_store %arg5[%c0_34, %c0_35, %c0_36, %c0_37], %38 {strides = array<i32>} : memref<8x1x8x8xbf16, #tpu.memory_space<vmem>>, vector<8x1x8x8xbf16>,
    return
  }
  func.func @transform_0(%arg0: i32) -> (i32, i32, i32, i32) {
    %c0_i32 = arith.constant 0 : i32
    %c0_i32_0 = arith.constant 0 : i32
    %c0_i32_1 = arith.constant 0 : i32
    %c0_i32_2 = arith.constant 0 : i32
    return %c0_i32, %arg0, %c0_i32_0, %c0_i32_1 : i32, i32, i32, i32
  }
  func.func @transform_1(%arg0: i32) -> (i32, i32, i32, i32) {
    %c0_i32 = arith.constant 0 : i32
    %c0_i32_0 = arith.constant 0 : i32
    %c0_i32_1 = arith.constant 0 : i32
    %c0_i32_2 = arith.constant 0 : i32
    return %c0_i32, %arg0, %c0_i32_0, %c0_i32_1 : i32, i32, i32, i32
  }
  func.func @transform_2(%arg0: i32) -> (i32, i32, i32, i32) {
    %c0_i32 = arith.constant 0 : i32
    %c0_i32_0 = arith.constant 0 : i32
    %c0_i32_1 = arith.constant 0 : i32
    %c0_i32_2 = arith.constant 0 : i32
    return %c0_i32, %arg0, %c0_i32_0, %c0_i32_1 : i32, i32, i32, i32
  }
  func.func @transform_3(%arg0: i32) -> (i32, i32, i32, i32) {
    %c0_i32 = arith.constant 0 : i32
    %c0_i32_0 = arith.constant 0 : i32
    %c0_i32_1 = arith.constant 0 : i32
    %c0_i32_2 = arith.constant 0 : i32
    return %c0_i32, %arg0, %c0_i32_0, %c0_i32_1 : i32, i32, i32, i32
  }
  func.func @transform_4(%arg0: i32) -> (i32, i32, i32, i32) {
    %c0_i32 = arith.constant 0 : i32
    %c0_i32_0 = arith.constant 0 : i32
    %c0_i32_1 = arith.constant 0 : i32
    %c0_i32_2 = arith.constant 0 : i32
    return %c0_i32, %arg0, %c0_i32_0, %c0_i32_1 : i32, i32, i32, i32
  }
}

module attributes {stable_mosaic.version = 11 : i64} {
  func.func @_dw3x3_s2_kernel(%arg0: i32, %arg1: memref<8x1x5x5xbf16, #tpu.memory_space<vmem>>, %arg2: memref<8x1x5x5xbf16, #tpu.memory_space<vmem>>, %arg3: memref<8x1x5x5xbf16, #tpu.memory_space<vmem>>, %arg4: memref<8x1x5x5xbf16, #tpu.memory_space<vmem>>, %arg5: memref<9x8x1x1xf32, #tpu.memory_space<vmem>>, %arg6: memref<8x1x1xf32, #tpu.memory_space<vmem>>, %arg7: memref<8x1x4x4xbf16, #tpu.memory_space<vmem>>) attributes {dimension_semantics = [#tpu.dimension_semantics<parallel>], iteration_bounds = array<i64: 2>, scalar_prefetch = 0 : i64, scratch_operands = 0 : i64, tpu.core_type = #tpu.core_type<tc>, window_params = [{transform_indices = @transform_0, window_bounds = array<i64: 8, 1, 5, 5>}, {transform_indices = @transform_1, window_bounds = array<i64: 8, 1, 5, 5>}, {transform_indices = @transform_2, window_bounds = array<i64: 8, 1, 5, 5>}, {transform_indices = @transform_3, window_bounds = array<i64: 8, 1, 5, 5>}, {pipeline_mode = #tpu.pipeline_mode<synchronous>, transform_indices = @transform_4, window_bounds = array<i64: 9, 8, 1, 1>}, {pipeline_mode = #tpu.pipeline_mode<synchronous>, transform_indices = @transform_5, window_bounds = array<i64: 8, 1, 1>}, {transform_indices = @transform_6, window_bounds = array<i64: 8, 1, 4, 4>}]} {
    %c0 = arith.constant 0 : index
    %c0_0 = arith.constant 0 : index
    %c0_1 = arith.constant 0 : index
    %c0_2 = arith.constant 0 : index
    %0 = vector.load %arg1[%c0, %c0_0, %c0_1, %c0_2] : memref<8x1x5x5xbf16, #tpu.memory_space<vmem>>, vector<8x1x4x4xbf16>
    %1 = vector.shape_cast %0 : vector<8x1x4x4xbf16> to vector<8x4x4xbf16>
    %2 = arith.extf %1 : vector<8x4x4xbf16> to vector<8x4x4xf32>
    %c0_3 = arith.constant 0 : index
    %c0_4 = arith.constant 0 : index
    %c0_5 = arith.constant 0 : index
    %c0_6 = arith.constant 0 : index
    %3 = vector.load %arg5[%c0_3, %c0_4, %c0_5, %c0_6] : memref<9x8x1x1xf32, #tpu.memory_space<vmem>>, vector<1x8x1x1xf32>
    %4 = vector.shape_cast %3 : vector<1x8x1x1xf32> to vector<8x1x1xf32>
    %5 = vector.broadcast %4 : vector<8x1x1xf32> to vector<8x4x4xf32>
    %6 = arith.mulf %2, %5 : vector<8x4x4xf32>
    %c0_7 = arith.constant 0 : index
    %c0_8 = arith.constant 0 : index
    %c0_9 = arith.constant 0 : index
    %c0_10 = arith.constant 0 : index
    %7 = vector.load %arg2[%c0_7, %c0_8, %c0_9, %c0_10] : memref<8x1x5x5xbf16, #tpu.memory_space<vmem>>, vector<8x1x4x4xbf16>
    %8 = vector.shape_cast %7 : vector<8x1x4x4xbf16> to vector<8x4x4xbf16>
    %9 = arith.extf %8 : vector<8x4x4xbf16> to vector<8x4x4xf32>
    %c1 = arith.constant 1 : index
    %c0_11 = arith.constant 0 : index
    %c0_12 = arith.constant 0 : index
    %c0_13 = arith.constant 0 : index
    %10 = vector.load %arg5[%c1, %c0_11, %c0_12, %c0_13] : memref<9x8x1x1xf32, #tpu.memory_space<vmem>>, vector<1x8x1x1xf32>
    %11 = vector.shape_cast %10 : vector<1x8x1x1xf32> to vector<8x1x1xf32>
    %12 = vector.broadcast %11 : vector<8x1x1xf32> to vector<8x4x4xf32>
    %13 = arith.mulf %9, %12 : vector<8x4x4xf32>
    %14 = arith.addf %6, %13 : vector<8x4x4xf32>
    %c0_14 = arith.constant 0 : index
    %c0_15 = arith.constant 0 : index
    %c0_16 = arith.constant 0 : index
    %c1_17 = arith.constant 1 : index
    %15 = vector.load %arg1[%c0_14, %c0_15, %c0_16, %c1_17] : memref<8x1x5x5xbf16, #tpu.memory_space<vmem>>, vector<8x1x4x4xbf16>
    %16 = vector.shape_cast %15 : vector<8x1x4x4xbf16> to vector<8x4x4xbf16>
    %17 = arith.extf %16 : vector<8x4x4xbf16> to vector<8x4x4xf32>
    %c2 = arith.constant 2 : index
    %c0_18 = arith.constant 0 : index
    %c0_19 = arith.constant 0 : index
    %c0_20 = arith.constant 0 : index
    %18 = vector.load %arg5[%c2, %c0_18, %c0_19, %c0_20] : memref<9x8x1x1xf32, #tpu.memory_space<vmem>>, vector<1x8x1x1xf32>
    %19 = vector.shape_cast %18 : vector<1x8x1x1xf32> to vector<8x1x1xf32>
    %20 = vector.broadcast %19 : vector<8x1x1xf32> to vector<8x4x4xf32>
    %21 = arith.mulf %17, %20 : vector<8x4x4xf32>
    %22 = arith.addf %14, %21 : vector<8x4x4xf32>
    %c0_21 = arith.constant 0 : index
    %c0_22 = arith.constant 0 : index
    %c0_23 = arith.constant 0 : index
    %c0_24 = arith.constant 0 : index
    %23 = vector.load %arg3[%c0_21, %c0_22, %c0_23, %c0_24] : memref<8x1x5x5xbf16, #tpu.memory_space<vmem>>, vector<8x1x4x4xbf16>
    %24 = vector.shape_cast %23 : vector<8x1x4x4xbf16> to vector<8x4x4xbf16>
    %25 = arith.extf %24 : vector<8x4x4xbf16> to vector<8x4x4xf32>
    %c3 = arith.constant 3 : index
    %c0_25 = arith.constant 0 : index
    %c0_26 = arith.constant 0 : index
    %c0_27 = arith.constant 0 : index
    %26 = vector.load %arg5[%c3, %c0_25, %c0_26, %c0_27] : memref<9x8x1x1xf32, #tpu.memory_space<vmem>>, vector<1x8x1x1xf32>
    %27 = vector.shape_cast %26 : vector<1x8x1x1xf32> to vector<8x1x1xf32>
    %28 = vector.broadcast %27 : vector<8x1x1xf32> to vector<8x4x4xf32>
    %29 = arith.mulf %25, %28 : vector<8x4x4xf32>
    %30 = arith.addf %22, %29 : vector<8x4x4xf32>
    %c0_28 = arith.constant 0 : index
    %c0_29 = arith.constant 0 : index
    %c0_30 = arith.constant 0 : index
    %c0_31 = arith.constant 0 : index
    %31 = vector.load %arg4[%c0_28, %c0_29, %c0_30, %c0_31] : memref<8x1x5x5xbf16, #tpu.memory_space<vmem>>, vector<8x1x4x4xbf16>
    %32 = vector.shape_cast %31 : vector<8x1x4x4xbf16> to vector<8x4x4xbf16>
    %33 = arith.extf %32 : vector<8x4x4xbf16> to vector<8x4x4xf32>
    %c4 = arith.constant 4 : index
    %c0_32 = arith.constant 0 : index
    %c0_33 = arith.constant 0 : index
    %c0_34 = arith.constant 0 : index
    %34 = vector.load %arg5[%c4, %c0_32, %c0_33, %c0_34] : memref<9x8x1x1xf32, #tpu.memory_space<vmem>>, vector<1x8x1x1xf32>
    %35 = vector.shape_cast %34 : vector<1x8x1x1xf32> to vector<8x1x1xf32>
    %36 = vector.broadcast %35 : vector<8x1x1xf32> to vector<8x4x4xf32>
    %37 = arith.mulf %33, %36 : vector<8x4x4xf32>
    %38 = arith.addf %30, %37 : vector<8x4x4xf32>
    %c0_35 = arith.constant 0 : index
    %c0_36 = arith.constant 0 : index
    %c0_37 = arith.constant 0 : index
    %c1_38 = arith.constant 1 : index
    %39 = vector.load %arg3[%c0_35, %c0_36, %c0_37, %c1_38] : memref<8x1x5x5xbf16, #tpu.memory_space<vmem>>, vector<8x1x4x4xbf16>
    %40 = vector.shape_cast %39 : vector<8x1x4x4xbf16> to vector<8x4x4xbf16>
    %41 = arith.extf %40 : vector<8x4x4xbf16> to vector<8x4x4xf32>
    %c5 = arith.constant 5 : index
    %c0_39 = arith.constant 0 : index
    %c0_40 = arith.constant 0 : index
    %c0_41 = arith.constant 0 : index
    %42 = vector.load %arg5[%c5, %c0_39, %c0_40, %c0_41] : memref<9x8x1x1xf32, #tpu.memory_space<vmem>>, vector<1x8x1x1xf32>
    %43 = vector.shape_cast %42 : vector<1x8x1x1xf32> to vector<8x1x1xf32>
    %44 = vector.broadcast %43 : vector<8x1x1xf32> to vector<8x4x4xf32>
    %45 = arith.mulf %41, %44 : vector<8x4x4xf32>
    %46 = arith.addf %38, %45 : vector<8x4x4xf32>
    %c0_42 = arith.constant 0 : index
    %c0_43 = arith.constant 0 : index
    %c1_44 = arith.constant 1 : index
    %c0_45 = arith.constant 0 : index
    %47 = vector.load %arg1[%c0_42, %c0_43, %c1_44, %c0_45] : memref<8x1x5x5xbf16, #tpu.memory_space<vmem>>, vector<8x1x4x4xbf16>
    %48 = vector.shape_cast %47 : vector<8x1x4x4xbf16> to vector<8x4x4xbf16>
    %49 = arith.extf %48 : vector<8x4x4xbf16> to vector<8x4x4xf32>
    %c6 = arith.constant 6 : index
    %c0_46 = arith.constant 0 : index
    %c0_47 = arith.constant 0 : index
    %c0_48 = arith.constant 0 : index
    %50 = vector.load %arg5[%c6, %c0_46, %c0_47, %c0_48] : memref<9x8x1x1xf32, #tpu.memory_space<vmem>>, vector<1x8x1x1xf32>
    %51 = vector.shape_cast %50 : vector<1x8x1x1xf32> to vector<8x1x1xf32>
    %52 = vector.broadcast %51 : vector<8x1x1xf32> to vector<8x4x4xf32>
    %53 = arith.mulf %49, %52 : vector<8x4x4xf32>
    %54 = arith.addf %46, %53 : vector<8x4x4xf32>
    %c0_49 = arith.constant 0 : index
    %c0_50 = arith.constant 0 : index
    %c1_51 = arith.constant 1 : index
    %c0_52 = arith.constant 0 : index
    %55 = vector.load %arg2[%c0_49, %c0_50, %c1_51, %c0_52] : memref<8x1x5x5xbf16, #tpu.memory_space<vmem>>, vector<8x1x4x4xbf16>
    %56 = vector.shape_cast %55 : vector<8x1x4x4xbf16> to vector<8x4x4xbf16>
    %57 = arith.extf %56 : vector<8x4x4xbf16> to vector<8x4x4xf32>
    %c7 = arith.constant 7 : index
    %c0_53 = arith.constant 0 : index
    %c0_54 = arith.constant 0 : index
    %c0_55 = arith.constant 0 : index
    %58 = vector.load %arg5[%c7, %c0_53, %c0_54, %c0_55] : memref<9x8x1x1xf32, #tpu.memory_space<vmem>>, vector<1x8x1x1xf32>
    %59 = vector.shape_cast %58 : vector<1x8x1x1xf32> to vector<8x1x1xf32>
    %60 = vector.broadcast %59 : vector<8x1x1xf32> to vector<8x4x4xf32>
    %61 = arith.mulf %57, %60 : vector<8x4x4xf32>
    %62 = arith.addf %54, %61 : vector<8x4x4xf32>
    %c0_56 = arith.constant 0 : index
    %c0_57 = arith.constant 0 : index
    %c1_58 = arith.constant 1 : index
    %c1_59 = arith.constant 1 : index
    %63 = vector.load %arg1[%c0_56, %c0_57, %c1_58, %c1_59] : memref<8x1x5x5xbf16, #tpu.memory_space<vmem>>, vector<8x1x4x4xbf16>
    %64 = vector.shape_cast %63 : vector<8x1x4x4xbf16> to vector<8x4x4xbf16>
    %65 = arith.extf %64 : vector<8x4x4xbf16> to vector<8x4x4xf32>
    %c8 = arith.constant 8 : index
    %c0_60 = arith.constant 0 : index
    %c0_61 = arith.constant 0 : index
    %c0_62 = arith.constant 0 : index
    %66 = vector.load %arg5[%c8, %c0_60, %c0_61, %c0_62] : memref<9x8x1x1xf32, #tpu.memory_space<vmem>>, vector<1x8x1x1xf32>
    %67 = vector.shape_cast %66 : vector<1x8x1x1xf32> to vector<8x1x1xf32>
    %68 = vector.broadcast %67 : vector<8x1x1xf32> to vector<8x4x4xf32>
    %69 = arith.mulf %65, %68 : vector<8x4x4xf32>
    %70 = arith.addf %62, %69 : vector<8x4x4xf32>
    %c0_63 = arith.constant 0 : index
    %c0_64 = arith.constant 0 : index
    %c0_65 = arith.constant 0 : index
    %71 = vector.load %arg6[%c0_63, %c0_64, %c0_65] : memref<8x1x1xf32, #tpu.memory_space<vmem>>, vector<8x1x1xf32>
    %72 = vector.broadcast %71 : vector<8x1x1xf32> to vector<8x4x4xf32>
    %73 = arith.addf %70, %72 : vector<8x4x4xf32>
    %74 = arith.truncf %73 : vector<8x4x4xf32> to vector<8x4x4xbf16>
    %c0_66 = arith.constant 0 : index
    %c0_67 = arith.constant 0 : index
    %c0_68 = arith.constant 0 : index
    %c0_69 = arith.constant 0 : index
    %75 = vector.load %arg7[%c0_66, %c0_67, %c0_68, %c0_69] : memref<8x1x4x4xbf16, #tpu.memory_space<vmem>>, vector<8x1x4x4xbf16>
    %76 = vector.shape_cast %75 : vector<8x1x4x4xbf16> to vector<8x4x4xbf16>
    %77 = vector.shape_cast %74 : vector<8x4x4xbf16> to vector<8x1x4x4xbf16>
    tpu.vector_store %arg7[%c0_66, %c0_67, %c0_68, %c0_69], %77 {strides = array<i32>} : memref<8x1x4x4xbf16, #tpu.memory_space<vmem>>, vector<8x1x4x4xbf16>,
    return
  }
  func.func @transform_0(%arg0: i32) -> (i32, i32, i32, i32) {
    %c0_i32 = arith.constant 0 : i32
    %c0_i32_0 = arith.constant 0 : i32
    %c0_i32_1 = arith.constant 0 : i32
    %c0_i32_2 = arith.constant 0 : i32
    return %c0_i32, %arg0, %c0_i32_0, %c0_i32_1 : i32, i32, i32, i32
  }
  func.func @transform_1(%arg0: i32) -> (i32, i32, i32, i32) {
    %c0_i32 = arith.constant 0 : i32
    %c0_i32_0 = arith.constant 0 : i32
    %c0_i32_1 = arith.constant 0 : i32
    %c0_i32_2 = arith.constant 0 : i32
    return %c0_i32, %arg0, %c0_i32_0, %c0_i32_1 : i32, i32, i32, i32
  }
  func.func @transform_2(%arg0: i32) -> (i32, i32, i32, i32) {
    %c0_i32 = arith.constant 0 : i32
    %c0_i32_0 = arith.constant 0 : i32
    %c0_i32_1 = arith.constant 0 : i32
    %c0_i32_2 = arith.constant 0 : i32
    return %c0_i32, %arg0, %c0_i32_0, %c0_i32_1 : i32, i32, i32, i32
  }
  func.func @transform_3(%arg0: i32) -> (i32, i32, i32, i32) {
    %c0_i32 = arith.constant 0 : i32
    %c0_i32_0 = arith.constant 0 : i32
    %c0_i32_1 = arith.constant 0 : i32
    %c0_i32_2 = arith.constant 0 : i32
    return %c0_i32, %arg0, %c0_i32_0, %c0_i32_1 : i32, i32, i32, i32
  }
  func.func @transform_4(%arg0: i32) -> (i32, i32, i32, i32) {
    %c0_i32 = arith.constant 0 : i32
    %c0_i32_0 = arith.constant 0 : i32
    %c0_i32_1 = arith.constant 0 : i32
    %c0_i32_2 = arith.constant 0 : i32
    %c0_i32_3 = arith.constant 0 : i32
    return %c0_i32, %c0_i32_0, %c0_i32_1, %c0_i32_2 : i32, i32, i32, i32
  }
  func.func @transform_5(%arg0: i32) -> (i32, i32, i32) {
    %c0_i32 = arith.constant 0 : i32
    %c0_i32_0 = arith.constant 0 : i32
    %c0_i32_1 = arith.constant 0 : i32
    %c0_i32_2 = arith.constant 0 : i32
    return %c0_i32, %c0_i32_0, %c0_i32_1 : i32, i32, i32
  }
  func.func @transform_6(%arg0: i32) -> (i32, i32, i32, i32) {
    %c0_i32 = arith.constant 0 : i32
    %c0_i32_0 = arith.constant 0 : i32
    %c0_i32_1 = arith.constant 0 : i32
    %c0_i32_2 = arith.constant 0 : i32
    return %c0_i32, %arg0, %c0_i32_0, %c0_i32_1 : i32, i32, i32, i32
  }
}

module attributes {stable_mosaic.version = 11 : i64} {
  func.func @_pw_kernel(%arg0: i32, %arg1: memref<8x32xbf16, #tpu.memory_space<vmem>>, %arg2: memref<8x8xbf16, #tpu.memory_space<vmem>>, %arg3: memref<8x1xf32, #tpu.memory_space<vmem>>, %arg4: memref<8x32xbf16, #tpu.memory_space<vmem>>) attributes {dimension_semantics = [#tpu.dimension_semantics<parallel>], iteration_bounds = array<i64: 1>, scalar_prefetch = 0 : i64, scratch_operands = 0 : i64, tpu.core_type = #tpu.core_type<tc>, window_params = [{transform_indices = @transform_0, window_bounds = array<i64: 8, 32>}, {pipeline_mode = #tpu.pipeline_mode<synchronous>, transform_indices = @transform_1, window_bounds = array<i64: 8, 8>}, {pipeline_mode = #tpu.pipeline_mode<synchronous>, transform_indices = @transform_2, window_bounds = array<i64: 8, 1>}, {transform_indices = @transform_3, window_bounds = array<i64: 8, 32>}]} {
    %c0 = arith.constant 0 : index
    %c0_0 = arith.constant 0 : index
    %0 = vector.load %arg2[%c0, %c0_0] : memref<8x8xbf16, #tpu.memory_space<vmem>>, vector<8x8xbf16>
    %c0_1 = arith.constant 0 : index
    %c0_2 = arith.constant 0 : index
    %1 = vector.load %arg1[%c0_1, %c0_2] : memref<8x32xbf16, #tpu.memory_space<vmem>>, vector<8x32xbf16>
    %cst = arith.constant dense<0.000000e+00> : vector<8x32xf32>
    %2 = tpu.matmul %0, %1, %cst {dimension_numbers = #tpu.dot_dimension_numbers<[1], [0], [0], [1], [0, 0, 1, 1], [], []>} : vector<8x8xbf16>, vector<8x32xbf16>, vector<8x32xf32> -> vector<8x32xf32>
    %c0_3 = arith.constant 0 : index
    %c0_4 = arith.constant 0 : index
    %3 = vector.load %arg3[%c0_3, %c0_4] : memref<8x1xf32, #tpu.memory_space<vmem>>, vector<8x1xf32>
    %4 = vector.broadcast %3 : vector<8x1xf32> to vector<8x32xf32>
    %5 = arith.addf %2, %4 : vector<8x32xf32>
    %cst_5 = arith.constant 0.000000e+00 : f32
    %6 = vector.broadcast %cst_5 : f32 to vector<8x32xf32>
    %7 = arith.maximumf %5, %6 : vector<8x32xf32>
    %8 = arith.truncf %7 : vector<8x32xf32> to vector<8x32xbf16>
    %c0_6 = arith.constant 0 : index
    %c0_7 = arith.constant 0 : index
    %9 = vector.load %arg4[%c0_6, %c0_7] : memref<8x32xbf16, #tpu.memory_space<vmem>>, vector<8x32xbf16>
    tpu.vector_store %arg4[%c0_6, %c0_7], %8 {strides = array<i32>} : memref<8x32xbf16, #tpu.memory_space<vmem>>, vector<8x32xbf16>,
    return
  }
  func.func @transform_0(%arg0: i32) -> (i32, i32) {
    %c0_i32 = arith.constant 0 : i32
    %c0_i32_0 = arith.constant 0 : i32
    return %c0_i32, %arg0 : i32, i32
  }
  func.func @transform_1(%arg0: i32) -> (i32, i32) {
    %c0_i32 = arith.constant 0 : i32
    %c0_i32_0 = arith.constant 0 : i32
    %c0_i32_1 = arith.constant 0 : i32
    return %c0_i32, %c0_i32_0 : i32, i32
  }
  func.func @transform_2(%arg0: i32) -> (i32, i32) {
    %c0_i32 = arith.constant 0 : i32
    %c0_i32_0 = arith.constant 0 : i32
    %c0_i32_1 = arith.constant 0 : i32
    return %c0_i32, %c0_i32_0 : i32, i32
  }
  func.func @transform_3(%arg0: i32) -> (i32, i32) {
    %c0_i32 = arith.constant 0 : i32
    %c0_i32_0 = arith.constant 0 : i32
    return %c0_i32, %arg0 : i32, i32
  }
}

module attributes {stable_mosaic.version = 11 : i64} {
  func.func @_pw_kernel(%arg0: i32, %arg1: memref<8x128xbf16, #tpu.memory_space<vmem>>, %arg2: memref<8x8xbf16, #tpu.memory_space<vmem>>, %arg3: memref<8x1xf32, #tpu.memory_space<vmem>>, %arg4: memref<8x128xbf16, #tpu.memory_space<vmem>>) attributes {dimension_semantics = [#tpu.dimension_semantics<parallel>], iteration_bounds = array<i64: 1>, scalar_prefetch = 0 : i64, scratch_operands = 0 : i64, tpu.core_type = #tpu.core_type<tc>, window_params = [{transform_indices = @transform_0, window_bounds = array<i64: 8, 128>}, {pipeline_mode = #tpu.pipeline_mode<synchronous>, transform_indices = @transform_1, window_bounds = array<i64: 8, 8>}, {pipeline_mode = #tpu.pipeline_mode<synchronous>, transform_indices = @transform_2, window_bounds = array<i64: 8, 1>}, {transform_indices = @transform_3, window_bounds = array<i64: 8, 128>}]} {
    %c0 = arith.constant 0 : index
    %c0_0 = arith.constant 0 : index
    %0 = vector.load %arg2[%c0, %c0_0] : memref<8x8xbf16, #tpu.memory_space<vmem>>, vector<8x8xbf16>
    %c0_1 = arith.constant 0 : index
    %c0_2 = arith.constant 0 : index
    %1 = vector.load %arg1[%c0_1, %c0_2] : memref<8x128xbf16, #tpu.memory_space<vmem>>, vector<8x128xbf16>
    %cst = arith.constant dense<0.000000e+00> : vector<8x128xf32>
    %2 = tpu.matmul %0, %1, %cst {dimension_numbers = #tpu.dot_dimension_numbers<[1], [0], [0], [1], [0, 0, 1, 1], [], []>} : vector<8x8xbf16>, vector<8x128xbf16>, vector<8x128xf32> -> vector<8x128xf32>
    %c0_3 = arith.constant 0 : index
    %c0_4 = arith.constant 0 : index
    %3 = vector.load %arg3[%c0_3, %c0_4] : memref<8x1xf32, #tpu.memory_space<vmem>>, vector<8x1xf32>
    %4 = vector.broadcast %3 : vector<8x1xf32> to vector<8x128xf32>
    %5 = arith.addf %2, %4 : vector<8x128xf32>
    %cst_5 = arith.constant 0.000000e+00 : f32
    %6 = vector.broadcast %cst_5 : f32 to vector<8x128xf32>
    %7 = arith.maximumf %5, %6 : vector<8x128xf32>
    %8 = arith.truncf %7 : vector<8x128xf32> to vector<8x128xbf16>
    %c0_6 = arith.constant 0 : index
    %c0_7 = arith.constant 0 : index
    %9 = vector.load %arg4[%c0_6, %c0_7] : memref<8x128xbf16, #tpu.memory_space<vmem>>, vector<8x128xbf16>
    tpu.vector_store %arg4[%c0_6, %c0_7], %8 {strides = array<i32>} : memref<8x128xbf16, #tpu.memory_space<vmem>>, vector<8x128xbf16>,
    return
  }
  func.func @transform_0(%arg0: i32) -> (i32, i32) {
    %c0_i32 = arith.constant 0 : i32
    %c0_i32_0 = arith.constant 0 : i32
    return %c0_i32, %arg0 : i32, i32
  }
  func.func @transform_1(%arg0: i32) -> (i32, i32) {
    %c0_i32 = arith.constant 0 : i32
    %c0_i32_0 = arith.constant 0 : i32
    %c0_i32_1 = arith.constant 0 : i32
    return %c0_i32, %c0_i32_0 : i32, i32
  }
  func.func @transform_2(%arg0: i32) -> (i32, i32) {
    %c0_i32 = arith.constant 0 : i32
    %c0_i32_0 = arith.constant 0 : i32
    %c0_i32_1 = arith.constant 0 : i32
    return %c0_i32, %c0_i32_0 : i32, i32
  }
  func.func @transform_3(%arg0: i32) -> (i32, i32) {
    %c0_i32 = arith.constant 0 : i32
    %c0_i32_0 = arith.constant 0 : i32
    return %c0_i32, %arg0 : i32, i32
  }
}

module attributes {stable_mosaic.version = 11 : i64} {
  func.func @_dw3x3_s1_kernel(%arg0: i32, %arg1: memref<8x1x6x6xbf16, #tpu.memory_space<vmem>>, %arg2: memref<9x8x1x1xf32, #tpu.memory_space<vmem>>, %arg3: memref<8x1x1xf32, #tpu.memory_space<vmem>>, %arg4: memref<8x1x4x4xbf16, #tpu.memory_space<vmem>>) attributes {dimension_semantics = [#tpu.dimension_semantics<parallel>], iteration_bounds = array<i64: 2>, scalar_prefetch = 0 : i64, scratch_operands = 0 : i64, tpu.core_type = #tpu.core_type<tc>, window_params = [{transform_indices = @transform_0, window_bounds = array<i64: 8, 1, 6, 6>}, {pipeline_mode = #tpu.pipeline_mode<synchronous>, transform_indices = @transform_1, window_bounds = array<i64: 9, 8, 1, 1>}, {pipeline_mode = #tpu.pipeline_mode<synchronous>, transform_indices = @transform_2, window_bounds = array<i64: 8, 1, 1>}, {transform_indices = @transform_3, window_bounds = array<i64: 8, 1, 4, 4>}]} {
    %c0 = arith.constant 0 : index
    %c0_0 = arith.constant 0 : index
    %c0_1 = arith.constant 0 : index
    %c0_2 = arith.constant 0 : index
    %0 = vector.load %arg1[%c0, %c0_0, %c0_1, %c0_2] : memref<8x1x6x6xbf16, #tpu.memory_space<vmem>>, vector<8x1x4x4xbf16>
    %1 = vector.shape_cast %0 : vector<8x1x4x4xbf16> to vector<8x4x4xbf16>
    %2 = arith.extf %1 : vector<8x4x4xbf16> to vector<8x4x4xf32>
    %c0_3 = arith.constant 0 : index
    %c0_4 = arith.constant 0 : index
    %c0_5 = arith.constant 0 : index
    %c0_6 = arith.constant 0 : index
    %3 = vector.load %arg2[%c0_3, %c0_4, %c0_5, %c0_6] : memref<9x8x1x1xf32, #tpu.memory_space<vmem>>, vector<1x8x1x1xf32>
    %4 = vector.shape_cast %3 : vector<1x8x1x1xf32> to vector<8x1x1xf32>
    %5 = vector.broadcast %4 : vector<8x1x1xf32> to vector<8x4x4xf32>
    %6 = arith.mulf %2, %5 : vector<8x4x4xf32>
    %c0_7 = arith.constant 0 : index
    %c0_8 = arith.constant 0 : index
    %c0_9 = arith.constant 0 : index
    %c1 = arith.constant 1 : index
    %7 = vector.load %arg1[%c0_7, %c0_8, %c0_9, %c1] : memref<8x1x6x6xbf16, #tpu.memory_space<vmem>>, vector<8x1x4x4xbf16>
    %8 = vector.shape_cast %7 : vector<8x1x4x4xbf16> to vector<8x4x4xbf16>
    %9 = arith.extf %8 : vector<8x4x4xbf16> to vector<8x4x4xf32>
    %c1_10 = arith.constant 1 : index
    %c0_11 = arith.constant 0 : index
    %c0_12 = arith.constant 0 : index
    %c0_13 = arith.constant 0 : index
    %10 = vector.load %arg2[%c1_10, %c0_11, %c0_12, %c0_13] : memref<9x8x1x1xf32, #tpu.memory_space<vmem>>, vector<1x8x1x1xf32>
    %11 = vector.shape_cast %10 : vector<1x8x1x1xf32> to vector<8x1x1xf32>
    %12 = vector.broadcast %11 : vector<8x1x1xf32> to vector<8x4x4xf32>
    %13 = arith.mulf %9, %12 : vector<8x4x4xf32>
    %14 = arith.addf %6, %13 : vector<8x4x4xf32>
    %c0_14 = arith.constant 0 : index
    %c0_15 = arith.constant 0 : index
    %c0_16 = arith.constant 0 : index
    %c2 = arith.constant 2 : index
    %15 = vector.load %arg1[%c0_14, %c0_15, %c0_16, %c2] : memref<8x1x6x6xbf16, #tpu.memory_space<vmem>>, vector<8x1x4x4xbf16>
    %16 = vector.shape_cast %15 : vector<8x1x4x4xbf16> to vector<8x4x4xbf16>
    %17 = arith.extf %16 : vector<8x4x4xbf16> to vector<8x4x4xf32>
    %c2_17 = arith.constant 2 : index
    %c0_18 = arith.constant 0 : index
    %c0_19 = arith.constant 0 : index
    %c0_20 = arith.constant 0 : index
    %18 = vector.load %arg2[%c2_17, %c0_18, %c0_19, %c0_20] : memref<9x8x1x1xf32, #tpu.memory_space<vmem>>, vector<1x8x1x1xf32>
    %19 = vector.shape_cast %18 : vector<1x8x1x1xf32> to vector<8x1x1xf32>
    %20 = vector.broadcast %19 : vector<8x1x1xf32> to vector<8x4x4xf32>
    %21 = arith.mulf %17, %20 : vector<8x4x4xf32>
    %22 = arith.addf %14, %21 : vector<8x4x4xf32>
    %c0_21 = arith.constant 0 : index
    %c0_22 = arith.constant 0 : index
    %c1_23 = arith.constant 1 : index
    %c0_24 = arith.constant 0 : index
    %23 = vector.load %arg1[%c0_21, %c0_22, %c1_23, %c0_24] : memref<8x1x6x6xbf16, #tpu.memory_space<vmem>>, vector<8x1x4x4xbf16>
    %24 = vector.shape_cast %23 : vector<8x1x4x4xbf16> to vector<8x4x4xbf16>
    %25 = arith.extf %24 : vector<8x4x4xbf16> to vector<8x4x4xf32>
    %c3 = arith.constant 3 : index
    %c0_25 = arith.constant 0 : index
    %c0_26 = arith.constant 0 : index
    %c0_27 = arith.constant 0 : index
    %26 = vector.load %arg2[%c3, %c0_25, %c0_26, %c0_27] : memref<9x8x1x1xf32, #tpu.memory_space<vmem>>, vector<1x8x1x1xf32>
    %27 = vector.shape_cast %26 : vector<1x8x1x1xf32> to vector<8x1x1xf32>
    %28 = vector.broadcast %27 : vector<8x1x1xf32> to vector<8x4x4xf32>
    %29 = arith.mulf %25, %28 : vector<8x4x4xf32>
    %30 = arith.addf %22, %29 : vector<8x4x4xf32>
    %c0_28 = arith.constant 0 : index
    %c0_29 = arith.constant 0 : index
    %c1_30 = arith.constant 1 : index
    %c1_31 = arith.constant 1 : index
    %31 = vector.load %arg1[%c0_28, %c0_29, %c1_30, %c1_31] : memref<8x1x6x6xbf16, #tpu.memory_space<vmem>>, vector<8x1x4x4xbf16>
    %32 = vector.shape_cast %31 : vector<8x1x4x4xbf16> to vector<8x4x4xbf16>
    %33 = arith.extf %32 : vector<8x4x4xbf16> to vector<8x4x4xf32>
    %c4 = arith.constant 4 : index
    %c0_32 = arith.constant 0 : index
    %c0_33 = arith.constant 0 : index
    %c0_34 = arith.constant 0 : index
    %34 = vector.load %arg2[%c4, %c0_32, %c0_33, %c0_34] : memref<9x8x1x1xf32, #tpu.memory_space<vmem>>, vector<1x8x1x1xf32>
    %35 = vector.shape_cast %34 : vector<1x8x1x1xf32> to vector<8x1x1xf32>
    %36 = vector.broadcast %35 : vector<8x1x1xf32> to vector<8x4x4xf32>
    %37 = arith.mulf %33, %36 : vector<8x4x4xf32>
    %38 = arith.addf %30, %37 : vector<8x4x4xf32>
    %c0_35 = arith.constant 0 : index
    %c0_36 = arith.constant 0 : index
    %c1_37 = arith.constant 1 : index
    %c2_38 = arith.constant 2 : index
    %39 = vector.load %arg1[%c0_35, %c0_36, %c1_37, %c2_38] : memref<8x1x6x6xbf16, #tpu.memory_space<vmem>>, vector<8x1x4x4xbf16>
    %40 = vector.shape_cast %39 : vector<8x1x4x4xbf16> to vector<8x4x4xbf16>
    %41 = arith.extf %40 : vector<8x4x4xbf16> to vector<8x4x4xf32>
    %c5 = arith.constant 5 : index
    %c0_39 = arith.constant 0 : index
    %c0_40 = arith.constant 0 : index
    %c0_41 = arith.constant 0 : index
    %42 = vector.load %arg2[%c5, %c0_39, %c0_40, %c0_41] : memref<9x8x1x1xf32, #tpu.memory_space<vmem>>, vector<1x8x1x1xf32>
    %43 = vector.shape_cast %42 : vector<1x8x1x1xf32> to vector<8x1x1xf32>
    %44 = vector.broadcast %43 : vector<8x1x1xf32> to vector<8x4x4xf32>
    %45 = arith.mulf %41, %44 : vector<8x4x4xf32>
    %46 = arith.addf %38, %45 : vector<8x4x4xf32>
    %c0_42 = arith.constant 0 : index
    %c0_43 = arith.constant 0 : index
    %c2_44 = arith.constant 2 : index
    %c0_45 = arith.constant 0 : index
    %47 = vector.load %arg1[%c0_42, %c0_43, %c2_44, %c0_45] : memref<8x1x6x6xbf16, #tpu.memory_space<vmem>>, vector<8x1x4x4xbf16>
    %48 = vector.shape_cast %47 : vector<8x1x4x4xbf16> to vector<8x4x4xbf16>
    %49 = arith.extf %48 : vector<8x4x4xbf16> to vector<8x4x4xf32>
    %c6 = arith.constant 6 : index
    %c0_46 = arith.constant 0 : index
    %c0_47 = arith.constant 0 : index
    %c0_48 = arith.constant 0 : index
    %50 = vector.load %arg2[%c6, %c0_46, %c0_47, %c0_48] : memref<9x8x1x1xf32, #tpu.memory_space<vmem>>, vector<1x8x1x1xf32>
    %51 = vector.shape_cast %50 : vector<1x8x1x1xf32> to vector<8x1x1xf32>
    %52 = vector.broadcast %51 : vector<8x1x1xf32> to vector<8x4x4xf32>
    %53 = arith.mulf %49, %52 : vector<8x4x4xf32>
    %54 = arith.addf %46, %53 : vector<8x4x4xf32>
    %c0_49 = arith.constant 0 : index
    %c0_50 = arith.constant 0 : index
    %c2_51 = arith.constant 2 : index
    %c1_52 = arith.constant 1 : index
    %55 = vector.load %arg1[%c0_49, %c0_50, %c2_51, %c1_52] : memref<8x1x6x6xbf16, #tpu.memory_space<vmem>>, vector<8x1x4x4xbf16>
    %56 = vector.shape_cast %55 : vector<8x1x4x4xbf16> to vector<8x4x4xbf16>
    %57 = arith.extf %56 : vector<8x4x4xbf16> to vector<8x4x4xf32>
    %c7 = arith.constant 7 : index
    %c0_53 = arith.constant 0 : index
    %c0_54 = arith.constant 0 : index
    %c0_55 = arith.constant 0 : index
    %58 = vector.load %arg2[%c7, %c0_53, %c0_54, %c0_55] : memref<9x8x1x1xf32, #tpu.memory_space<vmem>>, vector<1x8x1x1xf32>
    %59 = vector.shape_cast %58 : vector<1x8x1x1xf32> to vector<8x1x1xf32>
    %60 = vector.broadcast %59 : vector<8x1x1xf32> to vector<8x4x4xf32>
    %61 = arith.mulf %57, %60 : vector<8x4x4xf32>
    %62 = arith.addf %54, %61 : vector<8x4x4xf32>
    %c0_56 = arith.constant 0 : index
    %c0_57 = arith.constant 0 : index
    %c2_58 = arith.constant 2 : index
    %c2_59 = arith.constant 2 : index
    %63 = vector.load %arg1[%c0_56, %c0_57, %c2_58, %c2_59] : memref<8x1x6x6xbf16, #tpu.memory_space<vmem>>, vector<8x1x4x4xbf16>
    %64 = vector.shape_cast %63 : vector<8x1x4x4xbf16> to vector<8x4x4xbf16>
    %65 = arith.extf %64 : vector<8x4x4xbf16> to vector<8x4x4xf32>
    %c8 = arith.constant 8 : index
    %c0_60 = arith.constant 0 : index
    %c0_61 = arith.constant 0 : index
    %c0_62 = arith.constant 0 : index
    %66 = vector.load %arg2[%c8, %c0_60, %c0_61, %c0_62] : memref<9x8x1x1xf32, #tpu.memory_space<vmem>>, vector<1x8x1x1xf32>
    %67 = vector.shape_cast %66 : vector<1x8x1x1xf32> to vector<8x1x1xf32>
    %68 = vector.broadcast %67 : vector<8x1x1xf32> to vector<8x4x4xf32>
    %69 = arith.mulf %65, %68 : vector<8x4x4xf32>
    %70 = arith.addf %62, %69 : vector<8x4x4xf32>
    %c0_63 = arith.constant 0 : index
    %c0_64 = arith.constant 0 : index
    %c0_65 = arith.constant 0 : index
    %71 = vector.load %arg3[%c0_63, %c0_64, %c0_65] : memref<8x1x1xf32, #tpu.memory_space<vmem>>, vector<8x1x1xf32>
    %72 = vector.broadcast %71 : vector<8x1x1xf32> to vector<8x4x4xf32>
    %73 = arith.addf %70, %72 : vector<8x4x4xf32>
    %74 = arith.truncf %73 : vector<8x4x4xf32> to vector<8x4x4xbf16>
    %c0_66 = arith.constant 0 : index
    %c0_67 = arith.constant 0 : index
    %c0_68 = arith.constant 0 : index
    %c0_69 = arith.constant 0 : index
    %75 = vector.load %arg4[%c0_66, %c0_67, %c0_68, %c0_69] : memref<8x1x4x4xbf16, #tpu.memory_space<vmem>>, vector<8x1x4x4xbf16>
    %76 = vector.shape_cast %75 : vector<8x1x4x4xbf16> to vector<8x4x4xbf16>
    %77 = vector.shape_cast %74 : vector<8x4x4xbf16> to vector<8x1x4x4xbf16>
    tpu.vector_store %arg4[%c0_66, %c0_67, %c0_68, %c0_69], %77 {strides = array<i32>} : memref<8x1x4x4xbf16, #tpu.memory_space<vmem>>, vector<8x1x4x4xbf16>,
    return
  }
  func.func @transform_0(%arg0: i32) -> (i32, i32, i32, i32) {
    %c0_i32 = arith.constant 0 : i32
    %c0_i32_0 = arith.constant 0 : i32
    %c0_i32_1 = arith.constant 0 : i32
    %c0_i32_2 = arith.constant 0 : i32
    return %c0_i32, %arg0, %c0_i32_0, %c0_i32_1 : i32, i32, i32, i32
  }
  func.func @transform_1(%arg0: i32) -> (i32, i32, i32, i32) {
    %c0_i32 = arith.constant 0 : i32
    %c0_i32_0 = arith.constant 0 : i32
    %c0_i32_1 = arith.constant 0 : i32
    %c0_i32_2 = arith.constant 0 : i32
    %c0_i32_3 = arith.constant 0 : i32
    return %c0_i32, %c0_i32_0, %c0_i32_1, %c0_i32_2 : i32, i32, i32, i32
  }
  func.func @transform_2(%arg0: i32) -> (i32, i32, i32) {
    %c0_i32 = arith.constant 0 : i32
    %c0_i32_0 = arith.constant 0 : i32
    %c0_i32_1 = arith.constant 0 : i32
    %c0_i32_2 = arith.constant 0 : i32
    return %c0_i32, %c0_i32_0, %c0_i32_1 : i32, i32, i32
  }
  func.func @transform_3(%arg0: i32) -> (i32, i32, i32, i32) {
    %c0_i32 = arith.constant 0 : i32
    %c0_i32_0 = arith.constant 0 : i32
    %c0_i32_1 = arith.constant 0 : i32
    %c0_i32_2 = arith.constant 0 : i32
    return %c0_i32, %arg0, %c0_i32_0, %c0_i32_1 : i32, i32, i32, i32
  }
}

module attributes {stable_mosaic.version = 11 : i64} {
  func.func @_pw_kernel(%arg0: i32, %arg1: memref<16x8xbf16, #tpu.memory_space<vmem>>, %arg2: memref<16x16xbf16, #tpu.memory_space<vmem>>, %arg3: memref<16x1xf32, #tpu.memory_space<vmem>>, %arg4: memref<16x8xbf16, #tpu.memory_space<vmem>>) attributes {dimension_semantics = [#tpu.dimension_semantics<parallel>], iteration_bounds = array<i64: 1>, scalar_prefetch = 0 : i64, scratch_operands = 0 : i64, tpu.core_type = #tpu.core_type<tc>, window_params = [{transform_indices = @transform_0, window_bounds = array<i64: 16, 8>}, {pipeline_mode = #tpu.pipeline_mode<synchronous>, transform_indices = @transform_1, window_bounds = array<i64: 16, 16>}, {pipeline_mode = #tpu.pipeline_mode<synchronous>, transform_indices = @transform_2, window_bounds = array<i64: 16, 1>}, {transform_indices = @transform_3, window_bounds = array<i64: 16, 8>}]} {
    %c0 = arith.constant 0 : index
    %c0_0 = arith.constant 0 : index
    %0 = vector.load %arg2[%c0, %c0_0] : memref<16x16xbf16, #tpu.memory_space<vmem>>, vector<16x16xbf16>
    %c0_1 = arith.constant 0 : index
    %c0_2 = arith.constant 0 : index
    %1 = vector.load %arg1[%c0_1, %c0_2] : memref<16x8xbf16, #tpu.memory_space<vmem>>, vector<16x8xbf16>
    %cst = arith.constant dense<0.000000e+00> : vector<16x8xf32>
    %2 = tpu.matmul %0, %1, %cst {dimension_numbers = #tpu.dot_dimension_numbers<[1], [0], [0], [1], [0, 0, 1, 1], [], []>} : vector<16x16xbf16>, vector<16x8xbf16>, vector<16x8xf32> -> vector<16x8xf32>
    %c0_3 = arith.constant 0 : index
    %c0_4 = arith.constant 0 : index
    %3 = vector.load %arg3[%c0_3, %c0_4] : memref<16x1xf32, #tpu.memory_space<vmem>>, vector<16x1xf32>
    %4 = vector.broadcast %3 : vector<16x1xf32> to vector<16x8xf32>
    %5 = arith.addf %2, %4 : vector<16x8xf32>
    %cst_5 = arith.constant 0.000000e+00 : f32
    %6 = vector.broadcast %cst_5 : f32 to vector<16x8xf32>
    %7 = arith.maximumf %5, %6 : vector<16x8xf32>
    %8 = arith.truncf %7 : vector<16x8xf32> to vector<16x8xbf16>
    %c0_6 = arith.constant 0 : index
    %c0_7 = arith.constant 0 : index
    %9 = vector.load %arg4[%c0_6, %c0_7] : memref<16x8xbf16, #tpu.memory_space<vmem>>, vector<16x8xbf16>
    tpu.vector_store %arg4[%c0_6, %c0_7], %8 {strides = array<i32>} : memref<16x8xbf16, #tpu.memory_space<vmem>>, vector<16x8xbf16>,
    return
  }
  func.func @transform_0(%arg0: i32) -> (i32, i32) {
    %c0_i32 = arith.constant 0 : i32
    %c0_i32_0 = arith.constant 0 : i32
    return %c0_i32, %arg0 : i32, i32
  }
  func.func @transform_1(%arg0: i32) -> (i32, i32) {
    %c0_i32 = arith.constant 0 : i32
    %c0_i32_0 = arith.constant 0 : i32
    %c0_i32_1 = arith.constant 0 : i32
    return %c0_i32, %c0_i32_0 : i32, i32
  }
  func.func @transform_2(%arg0: i32) -> (i32, i32) {
    %c0_i32 = arith.constant 0 : i32
    %c0_i32_0 = arith.constant 0 : i32
    %c0_i32_1 = arith.constant 0 : i32
    return %c0_i32, %c0_i32_0 : i32, i32
  }
  func.func @transform_3(%arg0: i32) -> (i32, i32) {
    %c0_i32 = arith.constant 0 : i32
    %c0_i32_0 = arith.constant 0 : i32
    return %c0_i32, %arg0 : i32, i32
  }
}

module attributes {stable_mosaic.version = 11 : i64} {
  func.func @_dw3x3_s2_kernel(%arg0: i32, %arg1: memref<16x1x3x3xbf16, #tpu.memory_space<vmem>>, %arg2: memref<16x1x3x3xbf16, #tpu.memory_space<vmem>>, %arg3: memref<16x1x3x3xbf16, #tpu.memory_space<vmem>>, %arg4: memref<16x1x3x3xbf16, #tpu.memory_space<vmem>>, %arg5: memref<9x16x1x1xf32, #tpu.memory_space<vmem>>, %arg6: memref<16x1x1xf32, #tpu.memory_space<vmem>>, %arg7: memref<16x1x2x2xbf16, #tpu.memory_space<vmem>>) attributes {dimension_semantics = [#tpu.dimension_semantics<parallel>], iteration_bounds = array<i64: 2>, scalar_prefetch = 0 : i64, scratch_operands = 0 : i64, tpu.core_type = #tpu.core_type<tc>, window_params = [{transform_indices = @transform_0, window_bounds = array<i64: 16, 1, 3, 3>}, {transform_indices = @transform_1, window_bounds = array<i64: 16, 1, 3, 3>}, {transform_indices = @transform_2, window_bounds = array<i64: 16, 1, 3, 3>}, {transform_indices = @transform_3, window_bounds = array<i64: 16, 1, 3, 3>}, {pipeline_mode = #tpu.pipeline_mode<synchronous>, transform_indices = @transform_4, window_bounds = array<i64: 9, 16, 1, 1>}, {pipeline_mode = #tpu.pipeline_mode<synchronous>, transform_indices = @transform_5, window_bounds = array<i64: 16, 1, 1>}, {transform_indices = @transform_6, window_bounds = array<i64: 16, 1, 2, 2>}]} {
    %c0 = arith.constant 0 : index
    %c0_0 = arith.constant 0 : index
    %c0_1 = arith.constant 0 : index
    %c0_2 = arith.constant 0 : index
    %0 = vector.load %arg1[%c0, %c0_0, %c0_1, %c0_2] : memref<16x1x3x3xbf16, #tpu.memory_space<vmem>>, vector<16x1x2x2xbf16>
    %1 = vector.shape_cast %0 : vector<16x1x2x2xbf16> to vector<16x2x2xbf16>
    %2 = arith.extf %1 : vector<16x2x2xbf16> to vector<16x2x2xf32>
    %c0_3 = arith.constant 0 : index
    %c0_4 = arith.constant 0 : index
    %c0_5 = arith.constant 0 : index
    %c0_6 = arith.constant 0 : index
    %3 = vector.load %arg5[%c0_3, %c0_4, %c0_5, %c0_6] : memref<9x16x1x1xf32, #tpu.memory_space<vmem>>, vector<1x16x1x1xf32>
    %4 = vector.shape_cast %3 : vector<1x16x1x1xf32> to vector<16x1x1xf32>
    %5 = vector.broadcast %4 : vector<16x1x1xf32> to vector<16x2x2xf32>
    %6 = arith.mulf %2, %5 : vector<16x2x2xf32>
    %c0_7 = arith.constant 0 : index
    %c0_8 = arith.constant 0 : index
    %c0_9 = arith.constant 0 : index
    %c0_10 = arith.constant 0 : index
    %7 = vector.load %arg2[%c0_7, %c0_8, %c0_9, %c0_10] : memref<16x1x3x3xbf16, #tpu.memory_space<vmem>>, vector<16x1x2x2xbf16>
    %8 = vector.shape_cast %7 : vector<16x1x2x2xbf16> to vector<16x2x2xbf16>
    %9 = arith.extf %8 : vector<16x2x2xbf16> to vector<16x2x2xf32>
    %c1 = arith.constant 1 : index
    %c0_11 = arith.constant 0 : index
    %c0_12 = arith.constant 0 : index
    %c0_13 = arith.constant 0 : index
    %10 = vector.load %arg5[%c1, %c0_11, %c0_12, %c0_13] : memref<9x16x1x1xf32, #tpu.memory_space<vmem>>, vector<1x16x1x1xf32>
    %11 = vector.shape_cast %10 : vector<1x16x1x1xf32> to vector<16x1x1xf32>
    %12 = vector.broadcast %11 : vector<16x1x1xf32> to vector<16x2x2xf32>
    %13 = arith.mulf %9, %12 : vector<16x2x2xf32>
    %14 = arith.addf %6, %13 : vector<16x2x2xf32>
    %c0_14 = arith.constant 0 : index
    %c0_15 = arith.constant 0 : index
    %c0_16 = arith.constant 0 : index
    %c1_17 = arith.constant 1 : index
    %15 = vector.load %arg1[%c0_14, %c0_15, %c0_16, %c1_17] : memref<16x1x3x3xbf16, #tpu.memory_space<vmem>>, vector<16x1x2x2xbf16>
    %16 = vector.shape_cast %15 : vector<16x1x2x2xbf16> to vector<16x2x2xbf16>
    %17 = arith.extf %16 : vector<16x2x2xbf16> to vector<16x2x2xf32>
    %c2 = arith.constant 2 : index
    %c0_18 = arith.constant 0 : index
    %c0_19 = arith.constant 0 : index
    %c0_20 = arith.constant 0 : index
    %18 = vector.load %arg5[%c2, %c0_18, %c0_19, %c0_20] : memref<9x16x1x1xf32, #tpu.memory_space<vmem>>, vector<1x16x1x1xf32>
    %19 = vector.shape_cast %18 : vector<1x16x1x1xf32> to vector<16x1x1xf32>
    %20 = vector.broadcast %19 : vector<16x1x1xf32> to vector<16x2x2xf32>
    %21 = arith.mulf %17, %20 : vector<16x2x2xf32>
    %22 = arith.addf %14, %21 : vector<16x2x2xf32>
    %c0_21 = arith.constant 0 : index
    %c0_22 = arith.constant 0 : index
    %c0_23 = arith.constant 0 : index
    %c0_24 = arith.constant 0 : index
    %23 = vector.load %arg3[%c0_21, %c0_22, %c0_23, %c0_24] : memref<16x1x3x3xbf16, #tpu.memory_space<vmem>>, vector<16x1x2x2xbf16>
    %24 = vector.shape_cast %23 : vector<16x1x2x2xbf16> to vector<16x2x2xbf16>
    %25 = arith.extf %24 : vector<16x2x2xbf16> to vector<16x2x2xf32>
    %c3 = arith.constant 3 : index
    %c0_25 = arith.constant 0 : index
    %c0_26 = arith.constant 0 : index
    %c0_27 = arith.constant 0 : index
    %26 = vector.load %arg5[%c3, %c0_25, %c0_26, %c0_27] : memref<9x16x1x1xf32, #tpu.memory_space<vmem>>, vector<1x16x1x1xf32>
    %27 = vector.shape_cast %26 : vector<1x16x1x1xf32> to vector<16x1x1xf32>
    %28 = vector.broadcast %27 : vector<16x1x1xf32> to vector<16x2x2xf32>
    %29 = arith.mulf %25, %28 : vector<16x2x2xf32>
    %30 = arith.addf %22, %29 : vector<16x2x2xf32>
    %c0_28 = arith.constant 0 : index
    %c0_29 = arith.constant 0 : index
    %c0_30 = arith.constant 0 : index
    %c0_31 = arith.constant 0 : index
    %31 = vector.load %arg4[%c0_28, %c0_29, %c0_30, %c0_31] : memref<16x1x3x3xbf16, #tpu.memory_space<vmem>>, vector<16x1x2x2xbf16>
    %32 = vector.shape_cast %31 : vector<16x1x2x2xbf16> to vector<16x2x2xbf16>
    %33 = arith.extf %32 : vector<16x2x2xbf16> to vector<16x2x2xf32>
    %c4 = arith.constant 4 : index
    %c0_32 = arith.constant 0 : index
    %c0_33 = arith.constant 0 : index
    %c0_34 = arith.constant 0 : index
    %34 = vector.load %arg5[%c4, %c0_32, %c0_33, %c0_34] : memref<9x16x1x1xf32, #tpu.memory_space<vmem>>, vector<1x16x1x1xf32>
    %35 = vector.shape_cast %34 : vector<1x16x1x1xf32> to vector<16x1x1xf32>
    %36 = vector.broadcast %35 : vector<16x1x1xf32> to vector<16x2x2xf32>
    %37 = arith.mulf %33, %36 : vector<16x2x2xf32>
    %38 = arith.addf %30, %37 : vector<16x2x2xf32>
    %c0_35 = arith.constant 0 : index
    %c0_36 = arith.constant 0 : index
    %c0_37 = arith.constant 0 : index
    %c1_38 = arith.constant 1 : index
    %39 = vector.load %arg3[%c0_35, %c0_36, %c0_37, %c1_38] : memref<16x1x3x3xbf16, #tpu.memory_space<vmem>>, vector<16x1x2x2xbf16>
    %40 = vector.shape_cast %39 : vector<16x1x2x2xbf16> to vector<16x2x2xbf16>
    %41 = arith.extf %40 : vector<16x2x2xbf16> to vector<16x2x2xf32>
    %c5 = arith.constant 5 : index
    %c0_39 = arith.constant 0 : index
    %c0_40 = arith.constant 0 : index
    %c0_41 = arith.constant 0 : index
    %42 = vector.load %arg5[%c5, %c0_39, %c0_40, %c0_41] : memref<9x16x1x1xf32, #tpu.memory_space<vmem>>, vector<1x16x1x1xf32>
    %43 = vector.shape_cast %42 : vector<1x16x1x1xf32> to vector<16x1x1xf32>
    %44 = vector.broadcast %43 : vector<16x1x1xf32> to vector<16x2x2xf32>
    %45 = arith.mulf %41, %44 : vector<16x2x2xf32>
    %46 = arith.addf %38, %45 : vector<16x2x2xf32>
    %c0_42 = arith.constant 0 : index
    %c0_43 = arith.constant 0 : index
    %c1_44 = arith.constant 1 : index
    %c0_45 = arith.constant 0 : index
    %47 = vector.load %arg1[%c0_42, %c0_43, %c1_44, %c0_45] : memref<16x1x3x3xbf16, #tpu.memory_space<vmem>>, vector<16x1x2x2xbf16>
    %48 = vector.shape_cast %47 : vector<16x1x2x2xbf16> to vector<16x2x2xbf16>
    %49 = arith.extf %48 : vector<16x2x2xbf16> to vector<16x2x2xf32>
    %c6 = arith.constant 6 : index
    %c0_46 = arith.constant 0 : index
    %c0_47 = arith.constant 0 : index
    %c0_48 = arith.constant 0 : index
    %50 = vector.load %arg5[%c6, %c0_46, %c0_47, %c0_48] : memref<9x16x1x1xf32, #tpu.memory_space<vmem>>, vector<1x16x1x1xf32>
    %51 = vector.shape_cast %50 : vector<1x16x1x1xf32> to vector<16x1x1xf32>
    %52 = vector.broadcast %51 : vector<16x1x1xf32> to vector<16x2x2xf32>
    %53 = arith.mulf %49, %52 : vector<16x2x2xf32>
    %54 = arith.addf %46, %53 : vector<16x2x2xf32>
    %c0_49 = arith.constant 0 : index
    %c0_50 = arith.constant 0 : index
    %c1_51 = arith.constant 1 : index
    %c0_52 = arith.constant 0 : index
    %55 = vector.load %arg2[%c0_49, %c0_50, %c1_51, %c0_52] : memref<16x1x3x3xbf16, #tpu.memory_space<vmem>>, vector<16x1x2x2xbf16>
    %56 = vector.shape_cast %55 : vector<16x1x2x2xbf16> to vector<16x2x2xbf16>
    %57 = arith.extf %56 : vector<16x2x2xbf16> to vector<16x2x2xf32>
    %c7 = arith.constant 7 : index
    %c0_53 = arith.constant 0 : index
    %c0_54 = arith.constant 0 : index
    %c0_55 = arith.constant 0 : index
    %58 = vector.load %arg5[%c7, %c0_53, %c0_54, %c0_55] : memref<9x16x1x1xf32, #tpu.memory_space<vmem>>, vector<1x16x1x1xf32>
    %59 = vector.shape_cast %58 : vector<1x16x1x1xf32> to vector<16x1x1xf32>
    %60 = vector.broadcast %59 : vector<16x1x1xf32> to vector<16x2x2xf32>
    %61 = arith.mulf %57, %60 : vector<16x2x2xf32>
    %62 = arith.addf %54, %61 : vector<16x2x2xf32>
    %c0_56 = arith.constant 0 : index
    %c0_57 = arith.constant 0 : index
    %c1_58 = arith.constant 1 : index
    %c1_59 = arith.constant 1 : index
    %63 = vector.load %arg1[%c0_56, %c0_57, %c1_58, %c1_59] : memref<16x1x3x3xbf16, #tpu.memory_space<vmem>>, vector<16x1x2x2xbf16>
    %64 = vector.shape_cast %63 : vector<16x1x2x2xbf16> to vector<16x2x2xbf16>
    %65 = arith.extf %64 : vector<16x2x2xbf16> to vector<16x2x2xf32>
    %c8 = arith.constant 8 : index
    %c0_60 = arith.constant 0 : index
    %c0_61 = arith.constant 0 : index
    %c0_62 = arith.constant 0 : index
    %66 = vector.load %arg5[%c8, %c0_60, %c0_61, %c0_62] : memref<9x16x1x1xf32, #tpu.memory_space<vmem>>, vector<1x16x1x1xf32>
    %67 = vector.shape_cast %66 : vector<1x16x1x1xf32> to vector<16x1x1xf32>
    %68 = vector.broadcast %67 : vector<16x1x1xf32> to vector<16x2x2xf32>
    %69 = arith.mulf %65, %68 : vector<16x2x2xf32>
    %70 = arith.addf %62, %69 : vector<16x2x2xf32>
    %c0_63 = arith.constant 0 : index
    %c0_64 = arith.constant 0 : index
    %c0_65 = arith.constant 0 : index
    %71 = vector.load %arg6[%c0_63, %c0_64, %c0_65] : memref<16x1x1xf32, #tpu.memory_space<vmem>>, vector<16x1x1xf32>
    %72 = vector.broadcast %71 : vector<16x1x1xf32> to vector<16x2x2xf32>
    %73 = arith.addf %70, %72 : vector<16x2x2xf32>
    %74 = arith.truncf %73 : vector<16x2x2xf32> to vector<16x2x2xbf16>
    %c0_66 = arith.constant 0 : index
    %c0_67 = arith.constant 0 : index
    %c0_68 = arith.constant 0 : index
    %c0_69 = arith.constant 0 : index
    %75 = vector.load %arg7[%c0_66, %c0_67, %c0_68, %c0_69] : memref<16x1x2x2xbf16, #tpu.memory_space<vmem>>, vector<16x1x2x2xbf16>
    %76 = vector.shape_cast %75 : vector<16x1x2x2xbf16> to vector<16x2x2xbf16>
    %77 = vector.shape_cast %74 : vector<16x2x2xbf16> to vector<16x1x2x2xbf16>
    tpu.vector_store %arg7[%c0_66, %c0_67, %c0_68, %c0_69], %77 {strides = array<i32>} : memref<16x1x2x2xbf16, #tpu.memory_space<vmem>>, vector<16x1x2x2xbf16>,
    return
  }
  func.func @transform_0(%arg0: i32) -> (i32, i32, i32, i32) {
    %c0_i32 = arith.constant 0 : i32
    %c0_i32_0 = arith.constant 0 : i32
    %c0_i32_1 = arith.constant 0 : i32
    %c0_i32_2 = arith.constant 0 : i32
    return %c0_i32, %arg0, %c0_i32_0, %c0_i32_1 : i32, i32, i32, i32
  }
  func.func @transform_1(%arg0: i32) -> (i32, i32, i32, i32) {
    %c0_i32 = arith.constant 0 : i32
    %c0_i32_0 = arith.constant 0 : i32
    %c0_i32_1 = arith.constant 0 : i32
    %c0_i32_2 = arith.constant 0 : i32
    return %c0_i32, %arg0, %c0_i32_0, %c0_i32_1 : i32, i32, i32, i32
  }
  func.func @transform_2(%arg0: i32) -> (i32, i32, i32, i32) {
    %c0_i32 = arith.constant 0 : i32
    %c0_i32_0 = arith.constant 0 : i32
    %c0_i32_1 = arith.constant 0 : i32
    %c0_i32_2 = arith.constant 0 : i32
    return %c0_i32, %arg0, %c0_i32_0, %c0_i32_1 : i32, i32, i32, i32
  }
  func.func @transform_3(%arg0: i32) -> (i32, i32, i32, i32) {
    %c0_i32 = arith.constant 0 : i32
    %c0_i32_0 = arith.constant 0 : i32
    %c0_i32_1 = arith.constant 0 : i32
    %c0_i32_2 = arith.constant 0 : i32
    return %c0_i32, %arg0, %c0_i32_0, %c0_i32_1 : i32, i32, i32, i32
  }
  func.func @transform_4(%arg0: i32) -> (i32, i32, i32, i32) {
    %c0_i32 = arith.constant 0 : i32
    %c0_i32_0 = arith.constant 0 : i32
    %c0_i32_1 = arith.constant 0 : i32
    %c0_i32_2 = arith.constant 0 : i32
    %c0_i32_3 = arith.constant 0 : i32
    return %c0_i32, %c0_i32_0, %c0_i32_1, %c0_i32_2 : i32, i32, i32, i32
  }
  func.func @transform_5(%arg0: i32) -> (i32, i32, i32) {
    %c0_i32 = arith.constant 0 : i32
    %c0_i32_0 = arith.constant 0 : i32
    %c0_i32_1 = arith.constant 0 : i32
    %c0_i32_2 = arith.constant 0 : i32
    return %c0_i32, %c0_i32_0, %c0_i32_1 : i32, i32, i32
  }
  func.func @transform_6(%arg0: i32) -> (i32, i32, i32, i32) {
    %c0_i32 = arith.constant 0 : i32
    %c0_i32_0 = arith.constant 0 : i32
    %c0_i32_1 = arith.constant 0 : i32
    %c0_i32_2 = arith.constant 0 : i32
    return %c0_i32, %arg0, %c0_i32_0, %c0_i32_1 : i32, i32, i32, i32
  }
}

module attributes {stable_mosaic.version = 11 : i64} {
  func.func @_pw_kernel(%arg0: i32, %arg1: memref<16x32xbf16, #tpu.memory_space<vmem>>, %arg2: memref<16x16xbf16, #tpu.memory_space<vmem>>, %arg3: memref<16x1xf32, #tpu.memory_space<vmem>>, %arg4: memref<16x32xbf16, #tpu.memory_space<vmem>>) attributes {dimension_semantics = [#tpu.dimension_semantics<parallel>], iteration_bounds = array<i64: 1>, scalar_prefetch = 0 : i64, scratch_operands = 0 : i64, tpu.core_type = #tpu.core_type<tc>, window_params = [{transform_indices = @transform_0, window_bounds = array<i64: 16, 32>}, {pipeline_mode = #tpu.pipeline_mode<synchronous>, transform_indices = @transform_1, window_bounds = array<i64: 16, 16>}, {pipeline_mode = #tpu.pipeline_mode<synchronous>, transform_indices = @transform_2, window_bounds = array<i64: 16, 1>}, {transform_indices = @transform_3, window_bounds = array<i64: 16, 32>}]} {
    %c0 = arith.constant 0 : index
    %c0_0 = arith.constant 0 : index
    %0 = vector.load %arg2[%c0, %c0_0] : memref<16x16xbf16, #tpu.memory_space<vmem>>, vector<16x16xbf16>
    %c0_1 = arith.constant 0 : index
    %c0_2 = arith.constant 0 : index
    %1 = vector.load %arg1[%c0_1, %c0_2] : memref<16x32xbf16, #tpu.memory_space<vmem>>, vector<16x32xbf16>
    %cst = arith.constant dense<0.000000e+00> : vector<16x32xf32>
    %2 = tpu.matmul %0, %1, %cst {dimension_numbers = #tpu.dot_dimension_numbers<[1], [0], [0], [1], [0, 0, 1, 1], [], []>} : vector<16x16xbf16>, vector<16x32xbf16>, vector<16x32xf32> -> vector<16x32xf32>
    %c0_3 = arith.constant 0 : index
    %c0_4 = arith.constant 0 : index
    %3 = vector.load %arg3[%c0_3, %c0_4] : memref<16x1xf32, #tpu.memory_space<vmem>>, vector<16x1xf32>
    %4 = vector.broadcast %3 : vector<16x1xf32> to vector<16x32xf32>
    %5 = arith.addf %2, %4 : vector<16x32xf32>
    %cst_5 = arith.constant 0.000000e+00 : f32
    %6 = vector.broadcast %cst_5 : f32 to vector<16x32xf32>
    %7 = arith.maximumf %5, %6 : vector<16x32xf32>
    %8 = arith.truncf %7 : vector<16x32xf32> to vector<16x32xbf16>
    %c0_6 = arith.constant 0 : index
    %c0_7 = arith.constant 0 : index
    %9 = vector.load %arg4[%c0_6, %c0_7] : memref<16x32xbf16, #tpu.memory_space<vmem>>, vector<16x32xbf16>
    tpu.vector_store %arg4[%c0_6, %c0_7], %8 {strides = array<i32>} : memref<16x32xbf16, #tpu.memory_space<vmem>>, vector<16x32xbf16>,
    return
  }
  func.func @transform_0(%arg0: i32) -> (i32, i32) {
    %c0_i32 = arith.constant 0 : i32
    %c0_i32_0 = arith.constant 0 : i32
    return %c0_i32, %arg0 : i32, i32
  }
  func.func @transform_1(%arg0: i32) -> (i32, i32) {
    %c0_i32 = arith.constant 0 : i32
    %c0_i32_0 = arith.constant 0 : i32
    %c0_i32_1 = arith.constant 0 : i32
    return %c0_i32, %c0_i32_0 : i32, i32
  }
  func.func @transform_2(%arg0: i32) -> (i32, i32) {
    %c0_i32 = arith.constant 0 : i32
    %c0_i32_0 = arith.constant 0 : i32
    %c0_i32_1 = arith.constant 0 : i32
    return %c0_i32, %c0_i32_0 : i32, i32
  }
  func.func @transform_3(%arg0: i32) -> (i32, i32) {
    %c0_i32 = arith.constant 0 : i32
    %c0_i32_0 = arith.constant 0 : i32
    return %c0_i32, %arg0 : i32, i32
  }
}

module attributes {stable_mosaic.version = 11 : i64} {
  func.func @_dw3x3_s1_kernel(%arg0: i32, %arg1: memref<16x1x4x4xbf16, #tpu.memory_space<vmem>>, %arg2: memref<9x16x1x1xf32, #tpu.memory_space<vmem>>, %arg3: memref<16x1x1xf32, #tpu.memory_space<vmem>>, %arg4: memref<16x1x2x2xbf16, #tpu.memory_space<vmem>>) attributes {dimension_semantics = [#tpu.dimension_semantics<parallel>], iteration_bounds = array<i64: 2>, scalar_prefetch = 0 : i64, scratch_operands = 0 : i64, tpu.core_type = #tpu.core_type<tc>, window_params = [{transform_indices = @transform_0, window_bounds = array<i64: 16, 1, 4, 4>}, {pipeline_mode = #tpu.pipeline_mode<synchronous>, transform_indices = @transform_1, window_bounds = array<i64: 9, 16, 1, 1>}, {pipeline_mode = #tpu.pipeline_mode<synchronous>, transform_indices = @transform_2, window_bounds = array<i64: 16, 1, 1>}, {transform_indices = @transform_3, window_bounds = array<i64: 16, 1, 2, 2>}]} {
    %c0 = arith.constant 0 : index
    %c0_0 = arith.constant 0 : index
    %c0_1 = arith.constant 0 : index
    %c0_2 = arith.constant 0 : index
    %0 = vector.load %arg1[%c0, %c0_0, %c0_1, %c0_2] : memref<16x1x4x4xbf16, #tpu.memory_space<vmem>>, vector<16x1x2x2xbf16>
    %1 = vector.shape_cast %0 : vector<16x1x2x2xbf16> to vector<16x2x2xbf16>
    %2 = arith.extf %1 : vector<16x2x2xbf16> to vector<16x2x2xf32>
    %c0_3 = arith.constant 0 : index
    %c0_4 = arith.constant 0 : index
    %c0_5 = arith.constant 0 : index
    %c0_6 = arith.constant 0 : index
    %3 = vector.load %arg2[%c0_3, %c0_4, %c0_5, %c0_6] : memref<9x16x1x1xf32, #tpu.memory_space<vmem>>, vector<1x16x1x1xf32>
    %4 = vector.shape_cast %3 : vector<1x16x1x1xf32> to vector<16x1x1xf32>
    %5 = vector.broadcast %4 : vector<16x1x1xf32> to vector<16x2x2xf32>
    %6 = arith.mulf %2, %5 : vector<16x2x2xf32>
    %c0_7 = arith.constant 0 : index
    %c0_8 = arith.constant 0 : index
    %c0_9 = arith.constant 0 : index
    %c1 = arith.constant 1 : index
    %7 = vector.load %arg1[%c0_7, %c0_8, %c0_9, %c1] : memref<16x1x4x4xbf16, #tpu.memory_space<vmem>>, vector<16x1x2x2xbf16>
    %8 = vector.shape_cast %7 : vector<16x1x2x2xbf16> to vector<16x2x2xbf16>
    %9 = arith.extf %8 : vector<16x2x2xbf16> to vector<16x2x2xf32>
    %c1_10 = arith.constant 1 : index
    %c0_11 = arith.constant 0 : index
    %c0_12 = arith.constant 0 : index
    %c0_13 = arith.constant 0 : index
    %10 = vector.load %arg2[%c1_10, %c0_11, %c0_12, %c0_13] : memref<9x16x1x1xf32, #tpu.memory_space<vmem>>, vector<1x16x1x1xf32>
    %11 = vector.shape_cast %10 : vector<1x16x1x1xf32> to vector<16x1x1xf32>
    %12 = vector.broadcast %11 : vector<16x1x1xf32> to vector<16x2x2xf32>
    %13 = arith.mulf %9, %12 : vector<16x2x2xf32>
    %14 = arith.addf %6, %13 : vector<16x2x2xf32>
    %c0_14 = arith.constant 0 : index
    %c0_15 = arith.constant 0 : index
    %c0_16 = arith.constant 0 : index
    %c2 = arith.constant 2 : index
    %15 = vector.load %arg1[%c0_14, %c0_15, %c0_16, %c2] : memref<16x1x4x4xbf16, #tpu.memory_space<vmem>>, vector<16x1x2x2xbf16>
    %16 = vector.shape_cast %15 : vector<16x1x2x2xbf16> to vector<16x2x2xbf16>
    %17 = arith.extf %16 : vector<16x2x2xbf16> to vector<16x2x2xf32>
    %c2_17 = arith.constant 2 : index
    %c0_18 = arith.constant 0 : index
    %c0_19 = arith.constant 0 : index
    %c0_20 = arith.constant 0 : index
    %18 = vector.load %arg2[%c2_17, %c0_18, %c0_19, %c0_20] : memref<9x16x1x1xf32, #tpu.memory_space<vmem>>, vector<1x16x1x1xf32>
    %19 = vector.shape_cast %18 : vector<1x16x1x1xf32> to vector<16x1x1xf32>
    %20 = vector.broadcast %19 : vector<16x1x1xf32> to vector<16x2x2xf32>
    %21 = arith.mulf %17, %20 : vector<16x2x2xf32>
    %22 = arith.addf %14, %21 : vector<16x2x2xf32>
    %c0_21 = arith.constant 0 : index
    %c0_22 = arith.constant 0 : index
    %c1_23 = arith.constant 1 : index
    %c0_24 = arith.constant 0 : index
    %23 = vector.load %arg1[%c0_21, %c0_22, %c1_23, %c0_24] : memref<16x1x4x4xbf16, #tpu.memory_space<vmem>>, vector<16x1x2x2xbf16>
    %24 = vector.shape_cast %23 : vector<16x1x2x2xbf16> to vector<16x2x2xbf16>
    %25 = arith.extf %24 : vector<16x2x2xbf16> to vector<16x2x2xf32>
    %c3 = arith.constant 3 : index
    %c0_25 = arith.constant 0 : index
    %c0_26 = arith.constant 0 : index
    %c0_27 = arith.constant 0 : index
    %26 = vector.load %arg2[%c3, %c0_25, %c0_26, %c0_27] : memref<9x16x1x1xf32, #tpu.memory_space<vmem>>, vector<1x16x1x1xf32>
    %27 = vector.shape_cast %26 : vector<1x16x1x1xf32> to vector<16x1x1xf32>
    %28 = vector.broadcast %27 : vector<16x1x1xf32> to vector<16x2x2xf32>
    %29 = arith.mulf %25, %28 : vector<16x2x2xf32>
    %30 = arith.addf %22, %29 : vector<16x2x2xf32>
    %c0_28 = arith.constant 0 : index
    %c0_29 = arith.constant 0 : index
    %c1_30 = arith.constant 1 : index
    %c1_31 = arith.constant 1 : index
    %31 = vector.load %arg1[%c0_28, %c0_29, %c1_30, %c1_31] : memref<16x1x4x4xbf16, #tpu.memory_space<vmem>>, vector<16x1x2x2xbf16>
    %32 = vector.shape_cast %31 : vector<16x1x2x2xbf16> to vector<16x2x2xbf16>
    %33 = arith.extf %32 : vector<16x2x2xbf16> to vector<16x2x2xf32>
    %c4 = arith.constant 4 : index
    %c0_32 = arith.constant 0 : index
    %c0_33 = arith.constant 0 : index
    %c0_34 = arith.constant 0 : index
    %34 = vector.load %arg2[%c4, %c0_32, %c0_33, %c0_34] : memref<9x16x1x1xf32, #tpu.memory_space<vmem>>, vector<1x16x1x1xf32>
    %35 = vector.shape_cast %34 : vector<1x16x1x1xf32> to vector<16x1x1xf32>
    %36 = vector.broadcast %35 : vector<16x1x1xf32> to vector<16x2x2xf32>
    %37 = arith.mulf %33, %36 : vector<16x2x2xf32>
    %38 = arith.addf %30, %37 : vector<16x2x2xf32>
    %c0_35 = arith.constant 0 : index
    %c0_36 = arith.constant 0 : index
    %c1_37 = arith.constant 1 : index
    %c2_38 = arith.constant 2 : index
    %39 = vector.load %arg1[%c0_35, %c0_36, %c1_37, %c2_38] : memref<16x1x4x4xbf16, #tpu.memory_space<vmem>>, vector<16x1x2x2xbf16>
    %40 = vector.shape_cast %39 : vector<16x1x2x2xbf16> to vector<16x2x2xbf16>
    %41 = arith.extf %40 : vector<16x2x2xbf16> to vector<16x2x2xf32>
    %c5 = arith.constant 5 : index
    %c0_39 = arith.constant 0 : index
    %c0_40 = arith.constant 0 : index
    %c0_41 = arith.constant 0 : index
    %42 = vector.load %arg2[%c5, %c0_39, %c0_40, %c0_41] : memref<9x16x1x1xf32, #tpu.memory_space<vmem>>, vector<1x16x1x1xf32>
    %43 = vector.shape_cast %42 : vector<1x16x1x1xf32> to vector<16x1x1xf32>
    %44 = vector.broadcast %43 : vector<16x1x1xf32> to vector<16x2x2xf32>
    %45 = arith.mulf %41, %44 : vector<16x2x2xf32>
    %46 = arith.addf %38, %45 : vector<16x2x2xf32>
    %c0_42 = arith.constant 0 : index
    %c0_43 = arith.constant 0 : index
    %c2_44 = arith.constant 2 : index
    %c0_45 = arith.constant 0 : index
    %47 = vector.load %arg1[%c0_42, %c0_43, %c2_44, %c0_45] : memref<16x1x4x4xbf16, #tpu.memory_space<vmem>>, vector<16x1x2x2xbf16>
    %48 = vector.shape_cast %47 : vector<16x1x2x2xbf16> to vector<16x2x2xbf16>
    %49 = arith.extf %48 : vector<16x2x2xbf16> to vector<16x2x2xf32>
    %c6 = arith.constant 6 : index
    %c0_46 = arith.constant 0 : index
    %c0_47 = arith.constant 0 : index
    %c0_48 = arith.constant 0 : index
    %50 = vector.load %arg2[%c6, %c0_46, %c0_47, %c0_48] : memref<9x16x1x1xf32, #tpu.memory_space<vmem>>, vector<1x16x1x1xf32>
    %51 = vector.shape_cast %50 : vector<1x16x1x1xf32> to vector<16x1x1xf32>
    %52 = vector.broadcast %51 : vector<16x1x1xf32> to vector<16x2x2xf32>
    %53 = arith.mulf %49, %52 : vector<16x2x2xf32>
    %54 = arith.addf %46, %53 : vector<16x2x2xf32>
    %c0_49 = arith.constant 0 : index
    %c0_50 = arith.constant 0 : index
    %c2_51 = arith.constant 2 : index
    %c1_52 = arith.constant 1 : index
    %55 = vector.load %arg1[%c0_49, %c0_50, %c2_51, %c1_52] : memref<16x1x4x4xbf16, #tpu.memory_space<vmem>>, vector<16x1x2x2xbf16>
    %56 = vector.shape_cast %55 : vector<16x1x2x2xbf16> to vector<16x2x2xbf16>
    %57 = arith.extf %56 : vector<16x2x2xbf16> to vector<16x2x2xf32>
    %c7 = arith.constant 7 : index
    %c0_53 = arith.constant 0 : index
    %c0_54 = arith.constant 0 : index
    %c0_55 = arith.constant 0 : index
    %58 = vector.load %arg2[%c7, %c0_53, %c0_54, %c0_55] : memref<9x16x1x1xf32, #tpu.memory_space<vmem>>, vector<1x16x1x1xf32>
    %59 = vector.shape_cast %58 : vector<1x16x1x1xf32> to vector<16x1x1xf32>
    %60 = vector.broadcast %59 : vector<16x1x1xf32> to vector<16x2x2xf32>
    %61 = arith.mulf %57, %60 : vector<16x2x2xf32>
    %62 = arith.addf %54, %61 : vector<16x2x2xf32>
    %c0_56 = arith.constant 0 : index
    %c0_57 = arith.constant 0 : index
    %c2_58 = arith.constant 2 : index
    %c2_59 = arith.constant 2 : index
    %63 = vector.load %arg1[%c0_56, %c0_57, %c2_58, %c2_59] : memref<16x1x4x4xbf16, #tpu.memory_space<vmem>>, vector<16x1x2x2xbf16>
    %64 = vector.shape_cast %63 : vector<16x1x2x2xbf16> to vector<16x2x2xbf16>
    %65 = arith.extf %64 : vector<16x2x2xbf16> to vector<16x2x2xf32>
    %c8 = arith.constant 8 : index
    %c0_60 = arith.constant 0 : index
    %c0_61 = arith.constant 0 : index
    %c0_62 = arith.constant 0 : index
    %66 = vector.load %arg2[%c8, %c0_60, %c0_61, %c0_62] : memref<9x16x1x1xf32, #tpu.memory_space<vmem>>, vector<1x16x1x1xf32>
    %67 = vector.shape_cast %66 : vector<1x16x1x1xf32> to vector<16x1x1xf32>
    %68 = vector.broadcast %67 : vector<16x1x1xf32> to vector<16x2x2xf32>
    %69 = arith.mulf %65, %68 : vector<16x2x2xf32>
    %70 = arith.addf %62, %69 : vector<16x2x2xf32>
    %c0_63 = arith.constant 0 : index
    %c0_64 = arith.constant 0 : index
    %c0_65 = arith.constant 0 : index
    %71 = vector.load %arg3[%c0_63, %c0_64, %c0_65] : memref<16x1x1xf32, #tpu.memory_space<vmem>>, vector<16x1x1xf32>
    %72 = vector.broadcast %71 : vector<16x1x1xf32> to vector<16x2x2xf32>
    %73 = arith.addf %70, %72 : vector<16x2x2xf32>
    %74 = arith.truncf %73 : vector<16x2x2xf32> to vector<16x2x2xbf16>
    %c0_66 = arith.constant 0 : index
    %c0_67 = arith.constant 0 : index
    %c0_68 = arith.constant 0 : index
    %c0_69 = arith.constant 0 : index
    %75 = vector.load %arg4[%c0_66, %c0_67, %c0_68, %c0_69] : memref<16x1x2x2xbf16, #tpu.memory_space<vmem>>, vector<16x1x2x2xbf16>
    %76 = vector.shape_cast %75 : vector<16x1x2x2xbf16> to vector<16x2x2xbf16>
    %77 = vector.shape_cast %74 : vector<16x2x2xbf16> to vector<16x1x2x2xbf16>
    tpu.vector_store %arg4[%c0_66, %c0_67, %c0_68, %c0_69], %77 {strides = array<i32>} : memref<16x1x2x2xbf16, #tpu.memory_space<vmem>>, vector<16x1x2x2xbf16>,
    return
  }
  func.func @transform_0(%arg0: i32) -> (i32, i32, i32, i32) {
    %c0_i32 = arith.constant 0 : i32
    %c0_i32_0 = arith.constant 0 : i32
    %c0_i32_1 = arith.constant 0 : i32
    %c0_i32_2 = arith.constant 0 : i32
    return %c0_i32, %arg0, %c0_i32_0, %c0_i32_1 : i32, i32, i32, i32
  }
  func.func @transform_1(%arg0: i32) -> (i32, i32, i32, i32) {
    %c0_i32 = arith.constant 0 : i32
    %c0_i32_0 = arith.constant 0 : i32
    %c0_i32_1 = arith.constant 0 : i32
    %c0_i32_2 = arith.constant 0 : i32
    %c0_i32_3 = arith.constant 0 : i32
    return %c0_i32, %c0_i32_0, %c0_i32_1, %c0_i32_2 : i32, i32, i32, i32
  }
  func.func @transform_2(%arg0: i32) -> (i32, i32, i32) {
    %c0_i32 = arith.constant 0 : i32
    %c0_i32_0 = arith.constant 0 : i32
    %c0_i32_1 = arith.constant 0 : i32
    %c0_i32_2 = arith.constant 0 : i32
    return %c0_i32, %c0_i32_0, %c0_i32_1 : i32, i32, i32
  }
  func.func @transform_3(%arg0: i32) -> (i32, i32, i32, i32) {
    %c0_i32 = arith.constant 0 : i32
    %c0_i32_0 = arith.constant 0 : i32
    %c0_i32_1 = arith.constant 0 : i32
    %c0_i32_2 = arith.constant 0 : i32
    return %c0_i32, %arg0, %c0_i32_0, %c0_i32_1 : i32, i32, i32, i32
  }
}

</mosaic_0001>

<bundles_post_ra>
// kernel: shufflenet_v2_forward.18
= control target key start
LH: loop header
LB: loop body
LE: loop exit
PB: predicated region body
PF: predicated region fallthrough
CT: control target
= control target key end

     0   :  { %v210_v1 = vmov 0   ;;  %vm70_vm0 = vcmask 261120   ;;  %s267_s0 = inlined_call_operand.vmem [shape: bf16[32,512], index: 0, kind: input, shape index: {}]   ;;  %s268_s2 = inlined_call_operand.vmem [shape: f32[8,1], index: 2, kind: input, shape index: {}]   ;;  %s269_s1 = inlined_call_operand.vmem [shape: bf16[8,32], index: 1, kind: input, shape index: {}]   ;;  %s270_s3 = inlined_call_operand.vmem [shape: bf16[8,512], index: 3, kind: output, shape index: {}]  }
   0x1   :  { %v198_v0 = vld [vmem:[%s267_s0 + $0x24] ss:$16 sps:$4 sm:$0xff]   ;;  %106 = vmatprep.mubr.bf16.mxu0 %v210_v1  ;;  %147 = vmatprep.mubr.bf16.mxu1 %v210_v1  ;;  %v200_v2 = vld [vmem:[%s267_s0 + $0x2c] ss:$16 sps:$4 sm:$0xff]   ;;  %v202_v3 = vld [vmem:[%s267_s0 + $0x20] ss:$16 sps:$4 sm:$0xff]  }
   0x2   :  { %197 = vset.pattern.permute.xlu0 %v210_v1  ;;  %86 = vmatprep.subr.bf16.mxu0 %v198_v0  ;;  %v203_v4 = vld [vmem:[%s267_s0 + $0x28] ss:$16 sps:$4 sm:$0xff]   ;;  %v204_v5 = vld [vmem:[%s267_s0 + $0x4] ss:$16 sps:$4 sm:$0xff]   ;;  %v206_v6 = vld [vmem:[%s267_s0 + $0xc] ss:$16 sps:$4 sm:$0xff]  }
   0x3   :  { %127 = vmatprep.subr.bf16.mxu1 %v200_v2  ;;  %87 = vmatpush1.bf16.msra.mxu0 %v202_v3  ;;  %v208_v7 = vld [vmem:[%s267_s0] ss:$16 sps:$4 sm:$0xff]   ;;  %v209_v8 = vld [vmem:[%s267_s0 + $0x8] ss:$16 sps:$4 sm:$0xff]  }
   0x4   :  { %128 = vmatpush1.bf16.msra.mxu1 %v203_v4  ;;  %88 = vmatprep.subr.bf16.mxu0 %v204_v5  ;;  %v24_v9 = vld [vmem:[%s268_s2] sm:$0xff] }
   0x5   :  { %129 = vmatprep.subr.bf16.mxu1 %v206_v6  ;;  %27 = vperm.xlu0 %197, %v24_v9   ;;  %v15_v10 = vld [vmem:[%s269_s1] sm:$0xf] }
   0x7   :  { %89 = vmatpush1.bf16.msra.mxu0 %v208_v7 }
   0x8   :  { %130 = vmatpush1.bf16.msra.mxu1 %v209_v8 }
   0xa   :  { %190 = vmatmul.mubr.msk.bf16.vlgmr.msra.gmra.mxu0 %vm70_vm0, %v15_v10 }
   0xb   :  { %191 = vmatmul.mubr.msk.bf16.vlgmr.msra.gmra.mxu1 %vm70_vm0, %v15_v10 }
  0x80   :  { %v28_v11 = vpop.permute.xlu0 %27 }
  0xca   :  { %v108_v12 = vpop.f32.mrf.mxu0 }
  0xcb   :  { %v149_v13 = vpop.f32.mrf.mxu1  ;;  %v109_v14 = vadd.f32 %v108_v12, %v28_v11 }
  0xcc   :  { %v150_v15 = vadd.f32 %v149_v13, %v28_v11  ;;  %v110_v16 = vpop.f32.mrf.mxu0 }
  0xcd   :  { %v151_v17 = vpop.f32.mrf.mxu1  ;;  %v111_v18 = vadd.f32 %v110_v16, %v28_v11  ;;  %v156_v22 = vmax.f32 %v109_v14, 0.0 }
  0xce   :  { %v152_v19 = vadd.f32 %v151_v17, %v28_v11  ;;  %v112_v20 = vpop.f32.mrf.mxu0  ;;  %v158_v23 = vmax.f32 %v150_v15, 0.0 }
  0xcf   :  { %v153_v21 = vpop.f32.mrf.mxu1  ;;  %v157_v24 = vmax.f32 %v111_v18, 0.0 }
  0xd0   :  { %v159_v25 = vmax.f32 %v152_v19, 0.0  ;;  %v113_v26 = vpop.f32.mrf.mxu0 }
  0xd1   :  { %v154_v27 = vpop.f32.mrf.mxu1  ;;  %v194_v28 = vpack.c.bf16 %v157_v24, %v156_v22 }
  0xd2   :  { %v195_v29 = vpack.c.bf16 %v159_v25, %v158_v23 }
  0xd3   :  { %176 = vst [vmem:[%s270_s3] sm:$0xff] %v194_v28 }
  0xd4   :  { %177 = vst [vmem:[%s270_s3 + $0x8] sm:$0xff] %v195_v29 }

// kernel: shufflenet_v2_forward.19
= control target key start
LH: loop header
LB: loop body
LE: loop exit
PB: predicated region body
PF: predicated region fallthrough
CT: control target
= control target key end

     0   :  { %s1375_s15 = smov 0   ;;  %s1377_s16 = smov 0   ;;  %s1704_s0 = inlined_call_operand.vmem [shape: bf16[8,2,9,9], index: 0, kind: input, shape index: {}]   ;;  %s1705_s1 = inlined_call_operand.vmem [shape: bf16[8,2,9,9], index: 1, kind: input, shape index: {}]   ;;  %s1706_s2 = inlined_call_operand.vmem [shape: bf16[8,2,9,9], index: 2, kind: input, shape index: {}]   ;;  %s1707_s3 = inlined_call_operand.vmem [shape: bf16[8,2,9,9], index: 3, kind: input, shape index: {}]   ;;  %s1708_s4 = inlined_call_operand.vmem [shape: bf16[8,2,8,8], index: 4, kind: output, shape index: {}]  }
   0x1   :  { %s1379_s17 = smov 0  }
   0x2 LB: > { %s1210_s18 = sadd.s32 4294967295, %s1347_s17   ;;  %s1392_s19 = sadd.s32 1, %s1347_s17   ;;  %s1347_s17 = sphi %s1379_s17, %s1713_s17   ;;  %s1343_s16 = sphi %s1377_s16, %s1712_s16   ;;  %s1339_s15 = sphi %s1375_s15, %s1711_s15  }
   0x3   : > { %s18_s20 = ssub.s32 %s1347_s17, %s1392_s19  ;;  %s21_s21 = sadd.s32 1, %s1343_s16 }
   0x4   : > { %p19_p0 = scmp.eq.s32.totalorder %s18_s20, 0  ;;  %p28_p1 = scmp.ne.s32.totalorder %s1343_s16, %s1339_s15 }
   0x5   : > { %p29_p2 = scmp.eq.s32.totalorder %s1347_s17, 0  ;;  %p136_p3 = scmp.eq.s32.totalorder %s1210_s18, 1 }
   0x6   : > { %s1403_s22 = scalar_select %p19_p0, %s1343_s16, %s21_s21  }
   0x7   : > { %p1405_p4 = por %p29_p2, %p28_p1  ;;  %p1409_p5 = por %p136_p3, %p28_p1 }
   0x8   : > { %p1213_p6 = scmp.ge.s32.totalorder %s1347_s17, 2 }
   0xa   : > { %158 = sbr.rel (%p1213_p6) target bundleno = 47 (0x2f), region = 16 }
   0xf   : > { %161 = sbr.rel (!%p1405_p4) target bundleno = 23 (0x17), region = 20  ;;  %s163_s25 = sand.u32 (%p1405_p4), 1, %s1343_s16  }
  0x10   : > { %s1236_s26 = sshll.u32 (%p1405_p4), %s1347_s17, 3  ;;  %s1214_s27 = sshll.u32 (%p1405_p4), %s163_s25, 6 }
  0x11   : > { %s168_s30 = scalar_lea.vmem (%p1405_p4), %s1704_s0, %s1236_s26  ;;  %s165_s5 = scalar_lea.vmem (%p1405_p4), [#allocation2], %s1214_s27 }
  0x12   : > { %v185_v0 = vld [vmem:[%s168_s30] sm:$0xff] (%p1405_p4)   ;;  %v189_v1 = vld [vmem:[%s168_s30 + $0x10] sm:$0xff] (%p1405_p4)  }
  0x13   : > { %v193_v2 = vld [vmem:[%s168_s30 + $0x20] sm:$0xff] (%p1405_p4)   ;;  %186 = vst [vmem:[%s165_s5] sm:$0xff] (%p1405_p4), %v185_v0   ;;  %190 = vst [vmem:[%s165_s5 + $0x8] sm:$0xff] (%p1405_p4), %v189_v1   ;;  %v197_v3 = vld [vmem:[%s168_s30 + $0x30] sm:$0xff] (%p1405_p4)  }
  0x14   : > { %194 = vst [vmem:[%s165_s5 + $0x10] sm:$0xff] %v193_v2   ;;  %v201_v4 = vld [vmem:[%s168_s30 + $0x40] sm:$0xff]   ;;  %v205_v5 = vld [vmem:[%s168_s30 + $0x50] sm:$0xff]   ;;  %198 = vst [vmem:[%s165_s5 + $0x18] sm:$0xff] %v197_v3  }
  0x15   : > { %202 = vst [vmem:[%s165_s5 + $0x20] sm:$0xff] %v201_v4   ;;  %206 = vst [vmem:[%s165_s5 + $0x28] sm:$0xff] %v205_v5   ;;  %v209_v6 = vld [vmem:[%s168_s30 + $0x60] sm:$0xff]   ;;  %v213_v7 = vld [vmem:[%s168_s30 + $0x70] sm:$0xff]  }
  0x16   : > { %210 = vst [vmem:[%s165_s5 + $0x30] sm:$0xff] %v209_v6   ;;  %214 = vst [vmem:[%s165_s5 + $0x38] sm:$0xff] %v213_v7  }
  0x17 PF: > { %272 = sbr.rel (!%p1405_p4) target bundleno = 31 (0x1f), region = 61  ;;  %s274_s6 = sand.u32 (%p1405_p4), 1, %s1343_s16  }
  0x18   : > { %s1237_s7 = sshll.u32 (%p1405_p4), %s1347_s17, 3  ;;  %s1217_s8 = sshll.u32 (%p1405_p4), %s274_s6, 6 }
  0x19   : > { %s279_s11 = scalar_lea.vmem (%p1405_p4), %s1705_s1, %s1237_s7  ;;  %s276_s12 = scalar_lea.vmem (%p1405_p4), [#allocation3], %s1217_s8 }
  0x1a   : > { %v296_v8 = vld [vmem:[%s279_s11] sm:$0xff] (%p1405_p4)   ;;  %v300_v9 = vld [vmem:[%s279_s11 + $0x10] sm:$0xff] (%p1405_p4)  }
  0x1b   : > { %v304_v10 = vld [vmem:[%s279_s11 + $0x20] sm:$0xff] (%p1405_p4)   ;;  %297 = vst [vmem:[%s276_s12] sm:$0xff] (%p1405_p4), %v296_v8   ;;  %301 = vst [vmem:[%s276_s12 + $0x8] sm:$0xff] (%p1405_p4), %v300_v9   ;;  %v308_v11 = vld [vmem:[%s279_s11 + $0x30] sm:$0xff] (%p1405_p4)  }
  0x1c   : > { %305 = vst [vmem:[%s276_s12 + $0x10] sm:$0xff] %v304_v10   ;;  %v312_v12 = vld [vmem:[%s279_s11 + $0x40] sm:$0xff]   ;;  %v316_v13 = vld [vmem:[%s279_s11 + $0x50] sm:$0xff]   ;;  %309 = vst [vmem:[%s276_s12 + $0x18] sm:$0xff] %v308_v11  }
  0x1d   : > { %313 = vst [vmem:[%s276_s12 + $0x20] sm:$0xff] %v312_v12   ;;  %317 = vst [vmem:[%s276_s12 + $0x28] sm:$0xff] %v316_v13   ;;  %v320_v14 = vld [vmem:[%s279_s11 + $0x60] sm:$0xff]   ;;  %v324_v15 = vld [vmem:[%s279_s11 + $0x70] sm:$0xff]  }
  0x1e   : > { %321 = vst [vmem:[%s276_s12 + $0x30] sm:$0xff] %v320_v14   ;;  %325 = vst [vmem:[%s276_s12 + $0x38] sm:$0xff] %v324_v15  }
  0x1f PF: > { %383 = sbr.rel (!%p1405_p4) target bundleno = 39 (0x27), region = 102  ;;  %s385_s13 = sand.u32 (%p1405_p4), 1, %s1343_s16  }
  0x20   : > { %s1238_s14 = sshll.u32 (%p1405_p4), %s1347_s17, 3  ;;  %s1220_s20 = sshll.u32 (%p1405_p4), %s385_s13, 6 }
  0x21   : > { %s390_s26 = scalar_lea.vmem (%p1405_p4), %s1706_s2, %s1238_s14  ;;  %s387_s27 = scalar_lea.vmem (%p1405_p4), [#allocation4], %s1220_s20 }
  0x22   : > { %v407_v16 = vld [vmem:[%s390_s26] sm:$0xff] (%p1405_p4)   ;;  %v411_v17 = vld [vmem:[%s390_s26 + $0x10] sm:$0xff] (%p1405_p4)  }
  0x23   : > { %v415_v18 = vld [vmem:[%s390_s26 + $0x20] sm:$0xff] (%p1405_p4)   ;;  %408 = vst [vmem:[%s387_s27] sm:$0xff] (%p1405_p4), %v407_v16   ;;  %412 = vst [vmem:[%s387_s27 + $0x8] sm:$0xff] (%p1405_p4), %v411_v17   ;;  %v419_v19 = vld [vmem:[%s390_s26 + $0x30] sm:$0xff] (%p1405_p4)  }
  0x24   : > { %416 = vst [vmem:[%s387_s27 + $0x10] sm:$0xff] %v415_v18   ;;  %v423_v20 = vld [vmem:[%s390_s26 + $0x40] sm:$0xff]   ;;  %v427_v21 = vld [vmem:[%s390_s26 + $0x50] sm:$0xff]   ;;  %420 = vst [vmem:[%s387_s27 + $0x18] sm:$0xff] %v419_v19  }
  0x25   : > { %424 = vst [vmem:[%s387_s27 + $0x20] sm:$0xff] %v423_v20   ;;  %428 = vst [vmem:[%s387_s27 + $0x28] sm:$0xff] %v427_v21   ;;  %v431_v22 = vld [vmem:[%s390_s26 + $0x60] sm:$0xff]   ;;  %v435_v23 = vld [vmem:[%s390_s26 + $0x70] sm:$0xff]  }
  0x26   : > { %432 = vst [vmem:[%s387_s27 + $0x30] sm:$0xff] %v431_v22   ;;  %436 = vst [vmem:[%s387_s27 + $0x38] sm:$0xff] %v435_v23  }
  0x27 PF: > { %494 = sbr.rel (!%p1405_p4) target bundleno = 47 (0x2f), region = 143  ;;  %s496_s28 = sand.u32 (%p1405_p4), 1, %s1343_s16  }
  0x28   : > { %s1239_s29 = sshll.u32 (%p1405_p4), %s1347_s17, 3  ;;  %s1223_s30 = sshll.u32 (%p1405_p4), %s496_s28, 6 }
  0x29   : > { %s501_s7 = scalar_lea.vmem (%p1405_p4), %s1707_s3, %s1239_s29  ;;  %s498_s8 = scalar_lea.vmem (%p1405_p4), [#allocation5], %s1223_s30 }
  0x2a   : > { %v518_v24 = vld [vmem:[%s501_s7] sm:$0xff] (%p1405_p4)   ;;  %v522_v25 = vld [vmem:[%s501_s7 + $0x10] sm:$0xff] (%p1405_p4)  }
  0x2b   : > { %v526_v26 = vld [vmem:[%s501_s7 + $0x20] sm:$0xff] (%p1405_p4)   ;;  %519 = vst [vmem:[%s498_s8] sm:$0xff] (%p1405_p4), %v518_v24   ;;  %523 = vst [vmem:[%s498_s8 + $0x8] sm:$0xff] (%p1405_p4), %v522_v25   ;;  %v530_v27 = vld [vmem:[%s501_s7 + $0x30] sm:$0xff] (%p1405_p4)  }
  0x2c   : > { %527 = vst [vmem:[%s498_s8 + $0x10] sm:$0xff] %v526_v26   ;;  %v534_v28 = vld [vmem:[%s501_s7 + $0x40] sm:$0xff]   ;;  %v538_v29 = vld [vmem:[%s501_s7 + $0x50] sm:$0xff]   ;;  %531 = vst [vmem:[%s498_s8 + $0x18] sm:$0xff] %v530_v27  }
  0x2d   : > { %535 = vst [vmem:[%s498_s8 + $0x20] sm:$0xff] %v534_v28   ;;  %539 = vst [vmem:[%s498_s8 + $0x28] sm:$0xff] %v538_v29   ;;  %v542_v30 = vld [vmem:[%s501_s7 + $0x60] sm:$0xff]   ;;  %v546_v31 = vld [vmem:[%s501_s7 + $0x70] sm:$0xff]  }
  0x2e   : > { %543 = vst [vmem:[%s498_s8 + $0x30] sm:$0xff] %v542_v30   ;;  %547 = vst [vmem:[%s498_s8 + $0x38] sm:$0xff] %v546_v31  }
  0x2f PF: > { %p1226_p7 = scmp.ge.s32.totalorder %s1347_s17, 1  ;;  %p604_p8 = scmp.lt.s32.totalorder %s1347_s17, 3 }
  0x31   : > { %p605_p9 = pnand %p1226_p7, %p604_p8 }
  0x32   : > { %s611_s23 = sand.u32 (!%p605_p9), 1, %s1339_s15   ;;  %s1349_s12 = smov (!%p605_p9), 127  }
  0x33   : > { %608 = sbr.rel (%p605_p9) target bundleno = 214 (0xd6), region = 184  ;;  %s1447_s9 = sshll.u32 (!%p605_p9), %s611_s23, 6 }
  0x34   : > { %s1450_s10 = scalar_lea.vmem (!%p605_p9), [#allocation2], %s1447_s9  ;;  %s627_s11 = scalar_lea.vmem (!%p605_p9), [#allocation4], %s1447_s9 }
  0x35   : > { %s1536_s13 = scalar_lea.vmem (!%p605_p9), [#allocation3], %s1447_s9  ;;  %s634_s14 = scalar_lea.vmem (!%p605_p9), [#allocation5], %s1447_s9 }
  0x36   : > { %s1231_s20 = sshll.u32 (!%p605_p9), %s611_s23, 5 }
  0x37   : > { %s667_s15 = scalar_lea.vmem (!%p605_p9), [#allocation6], %s1231_s20 }
  0x38   : > { %v672_v32 = vld [vmem:[%s1450_s10 + $0x20] ss:$8 sps:$4 sm:$0xff]   ;;  %v674_v34 = vld [vmem:[%s1450_s10 + $0x30] ss:$8 sps:$4 sm:$0xff]   ;;  %v838_v52 = vld [vmem:[%s1450_s10 + $0x14] sm:$0x1] }
  0x39   : > { %v668_v33 = vld [vmem:[%s1450_s10] ss:$8 sps:$4 sm:$0xff]   ;;  %v1455_v35 = vunpack.c.l.bf16 %v672_v32  ;;  %v1457_v36 = vunpack.c.h.bf16 %v672_v32  ;;  %v670_v39 = vld [vmem:[%s1450_s10 + $0x10] ss:$8 sps:$4 sm:$0xff]   ;;  %v1469_v42 = vunpack.c.l.bf16 %v674_v34  ;;  %v1471_v43 = vunpack.c.h.bf16 %v674_v34  ;;  %v839_v53 = vld [vmem:[%s1450_s10 + $0x1c] sm:$0x1] }
  0x3a   : > { %v1459_v37 = vunpack.c.l.bf16 %v668_v33  ;;  %v1461_v38 = vunpack.c.h.bf16 %v668_v33  ;;  %v1465_v40 = vld [vmem:[%s627_s11 + $0x10] ss:$8 sps:$4 sm:$0xff]   ;;  %v1467_v41 = vld [vmem:[%s627_s11] ss:$8 sps:$4 sm:$0xff]   ;;  %v1473_v44 = vunpack.c.l.bf16 %v670_v39  ;;  %v1475_v45 = vunpack.c.h.bf16 %v670_v39  ;;  %v836_v56 = vld [vmem:[%s1450_s10 + $0x4] sm:$0x1] }
  0x3b   : > { %v1477_v46 = vld [vmem:[%s627_s11 + $0x30] ss:$8 sps:$4 sm:$0xff]   ;;  %v1275_v47 = vpack.i.bf16 %v1457_v36, %v1455_v35  ;;  %v758_v49 = vunpack.c.l.bf16 %v1465_v40  ;;  %v759_v50 = vunpack.c.h.bf16 %v1465_v40  ;;  %v1485_v51 = vld [vmem:[%s627_s11 + $0x20] ss:$8 sps:$4 sm:$0xff]   ;;  %v756_v54 = vunpack.c.l.bf16 %v1467_v41  ;;  %v837_v61 = vld [vmem:[%s1450_s10 + $0xc] sm:$0x1] }
  0x3c   : > { %v1265_v48 = vpack.i.bf16 %v1461_v38, %v1459_v37  ;;  %v757_v55 = vunpack.c.h.bf16 %v1467_v41  ;;  %vm860_vm0 = vcmask 1046528   ;;  %v1280_v57 = vpack.i.bf16 %v1471_v43, %v1469_v42  ;;  %v842_v2 = vld [vmem:[%s1450_s10 + $0x34] sm:$0x1]  ;;  %v843_v7 = vld [vmem:[%s1450_s10 + $0x3c] sm:$0x1]  ;;  %s1233_s21 = sshll.u32 (%p1409_p5), %s1210_s18, 2 }
  0x3d   : > { %1276 = vrot.lane.b32.xlu1 %v1275_v47, %s1349_s12  ;;  %v1270_v58 = vpack.i.bf16 %v1475_v45, %v1473_v44  ;;  %v1290_v59 = vpack.i.bf16 %v759_v50, %v758_v49  ;;  %v762_v60 = vunpack.c.l.bf16 %v1477_v46  ;;  %v763_v62 = vunpack.c.h.bf16 %v1477_v46  ;;  %v840_v16 = vld [vmem:[%s1450_s10 + $0x24] sm:$0x1]  ;;  %v841_v19 = vld [vmem:[%s1450_s10 + $0x2c] sm:$0x1]  ;;  %v688_v24 = vld [vmem:[%s1536_s13 + $0x20] ss:$8 sps:$4 sm:$0xff]   ;;  %s1030_s27 = scalar_lea.vmem (%p1409_p5), %s1708_s4, %s1233_s21 }
  0x3e   : > { %1266 = vrot.lane.b32.xlu0 %v1265_v48, %s1349_s12  ;;  %v760_v63 = vunpack.c.l.bf16 %v1485_v51  ;;  %v846_v0 = vunpack.c.l.bf16 %v838_v52  ;;  %v847_v1 = vunpack.c.l.bf16 %v839_v53  ;;  %v761_v3 = vunpack.c.h.bf16 %v1485_v51  ;;  %v684_v29 = vld [vmem:[%s1536_s13] ss:$8 sps:$4 sm:$0xff]  }
  0x3f   : > { %v867_v4 = vrot.slane %v1473_v44, 1  ;;  %v870_v5 = vrot.slane %v1475_v45, 1  ;;  %v844_v6 = vunpack.c.l.bf16 %v836_v56  ;;  %v1285_v8 = vpack.i.bf16 %v757_v55, %v756_v54 }
  0x40   : > { %v868_v9 = vrot.slane %v846_v0, 1  ;;  %v871_v10 = vrot.slane %v847_v1, 1  ;;  %v845_v11 = vunpack.c.l.bf16 %v837_v61  ;;  %v861_v12 = vrot.slane %v1459_v37, 1  ;;  %v690_v0 = vld [vmem:[%s1536_s13 + $0x30] ss:$8 sps:$4 sm:$0xff]  }
  0x41   : > { %1281 = vrot.lane.b32.xlu1 %v1280_v57, %s1349_s12  ;;  %v862_v13 = vrot.slane %v844_v6, 1  ;;  %v864_v14 = vrot.slane %v1461_v38, 1  ;;  %v850_v15 = vunpack.c.l.bf16 %v842_v2  ;;  %v851_v18 = vunpack.c.l.bf16 %v843_v7  ;;  %v686_v1 = vld [vmem:[%s1536_s13 + $0x10] ss:$8 sps:$4 sm:$0xff]  }
  0x42   : > { %1271 = vrot.lane.b32.xlu0 %v1270_v58, %s1349_s12  ;;  %v865_v17 = vrot.slane %v845_v11, 1  ;;  %v1300_v20 = vpack.i.bf16 %v763_v62, %v762_v60  ;;  %v1295_v21 = vpack.i.bf16 %v761_v3, %v760_v63  ;;  %v1530_v22 = vsel %vm860_vm0, %v867_v4, %v868_v9 }
  0x43   : > { %v1533_v23 = vsel %vm860_vm0, %v870_v5, %v871_v10  ;;  %v1540_v25 = vsel %vm860_vm0, %v861_v12, %v862_v13  ;;  %v879_v26 = vrot.slane %v1469_v42, 1  ;;  %v880_v27 = vrot.slane %v850_v15, 1  ;;  %v903_v13 = vld [vmem:[%s1536_s13 + $0x14] sm:$0x1]  ;;  %v901_v15 = vld [vmem:[%s1536_s13 + $0x4] sm:$0x1] }
  0x44   : > { %v848_v28 = vunpack.c.l.bf16 %v840_v16  ;;  %v1547_v30 = vsel %vm860_vm0, %v864_v14, %v865_v17  ;;  %v882_v31 = vrot.slane %v1471_v43, 1  ;;  %v883_v32 = vrot.slane %v851_v18, 1  ;;  %v904_v14 = vld [vmem:[%s1536_s13 + $0x1c] sm:$0x1]  ;;  %v902_v18 = vld [vmem:[%s1536_s13 + $0xc] sm:$0x1] }
  0x45   : > { %1291 = vrot.lane.b32.xlu1 %v1290_v59, %s1349_s12  ;;  %v849_v33 = vunpack.c.l.bf16 %v841_v19  ;;  %v873_v34 = vrot.slane %v1455_v35, 1  ;;  %v876_v47 = vrot.slane %v1457_v36, 1  ;;  %v696_v48 = vunpack.c.l.bf16 %v688_v24  ;;  %v907_v19 = vld [vmem:[%s1536_s13 + $0x34] sm:$0x1] }
  0x46   : > { %1286 = vrot.lane.b32.xlu0 %v1285_v8, %s1349_s12  ;;  %v874_v39 = vrot.slane %v848_v28, 1  ;;  %v697_v53 = vunpack.c.h.bf16 %v688_v24  ;;  %v692_v56 = vunpack.c.l.bf16 %v684_v29  ;;  %v1310_v57 = vpack.i.bf16 %v1533_v23, %v1530_v22  ;;  %v905_v28 = vld [vmem:[%s1536_s13 + $0x24] sm:$0x1] }
  0x47   : > { %v877_v52 = vrot.slane %v849_v33, 1  ;;  %v1305_v58 = vpack.i.bf16 %v1547_v30, %v1540_v25  ;;  %v1557_v59 = vmax.f32 %v1455_v35, %v696_v48  ;;  %v693_v61 = vunpack.c.h.bf16 %v684_v29  ;;  %v906_v33 = vld [vmem:[%s1536_s13 + $0x2c] sm:$0x1] }
  0x48   : > { %v1564_v2 = vsel %vm860_vm0, %v879_v26, %v880_v27  ;;  %v1567_v4 = vsel %vm860_vm0, %v882_v31, %v883_v32  ;;  %v1570_v5 = vmax.f32 %v1457_v36, %v697_v53  ;;  %v1573_v35 = vsel %vm860_vm0, %v873_v34, %v874_v39  ;;  %v908_v27 = vld [vmem:[%s1536_s13 + $0x3c] sm:$0x1] }
  0x49   : > { %1301 = vrot.lane.b32.xlu1 %v1300_v20, %s1349_s12  ;;  %v1576_v6 = vsel %vm860_vm0, %v876_v47, %v877_v52  ;;  %v1579_v7 = vmax.f32 %v1461_v38, %v693_v61  ;;  %v1582_v8 = vmax.f32 %v1459_v37, %v692_v56  ;;  %v698_v9 = vunpack.c.l.bf16 %v690_v0 }
  0x4a   : > { %1296 = vrot.lane.b32.xlu0 %v1295_v21, %s1349_s12  ;;  %v699_v10 = vunpack.c.h.bf16 %v690_v0  ;;  %v694_v11 = vunpack.c.l.bf16 %v686_v1  ;;  %v695_v12 = vunpack.c.h.bf16 %v686_v1  ;;  %v1320_v36 = vpack.i.bf16 %v1567_v4, %v1564_v2 }
  0x4b   : > { %v1315_v37 = vpack.i.bf16 %v1576_v6, %v1573_v35  ;;  %v945_v38 = vrot.slane %v696_v48, 1  ;;  %v1594_v16 = vmax.f32 %v1469_v42, %v698_v9  ;;  %v948_v20 = vrot.slane %v697_v53, 1 }
  0x4c   : > { %v1597_v17 = vmax.f32 %v1471_v43, %v699_v10  ;;  %v933_v21 = vrot.slane %v692_v56, 1  ;;  %v1602_v24 = vmax.f32 %v1473_v44, %v694_v11  ;;  %v1605_v26 = vmax.f32 %v1475_v45, %v695_v12 }
  0x4d   : > { %1311 = vrot.lane.b32.xlu1 %v1310_v57, %s1349_s12  ;;  %v936_v29 = vrot.slane %v693_v61, 1  ;;  %v951_v31 = vrot.slane %v698_v9, 1  ;;  %v954_v32 = vrot.slane %v699_v10, 1  ;;  %v939_v42 = vrot.slane %v694_v11, 1 }
  0x4e   : > { %1306 = vrot.lane.b32.xlu0 %v1305_v58, %s1349_s12  ;;  %v942_v34 = vrot.slane %v695_v12, 1  ;;  %v911_v43 = vunpack.c.l.bf16 %v903_v13  ;;  %v912_v39 = vunpack.c.l.bf16 %v904_v14  ;;  %v909_v47 = vunpack.c.l.bf16 %v901_v15 }
  0x4f   : > { %v910_v44 = vunpack.c.l.bf16 %v902_v18  ;;  %v915_v48 = vunpack.c.l.bf16 %v907_v19  ;;  %v916_v52 = vunpack.c.l.bf16 %v908_v27  ;;  %v913_v45 = vunpack.c.l.bf16 %v905_v28  ;;  %v772_v19 = vld [vmem:[%s634_s14] ss:$8 sps:$4 sm:$0xff]  }
  0x50   : > { %v940_v53 = vrot.slane %v911_v43, 1  ;;  %v943_v56 = vrot.slane %v912_v39, 1  ;;  %v934_v57 = vrot.slane %v909_v47, 1  ;;  %v914_v58 = vunpack.c.l.bf16 %v906_v33  ;;  %v778_v43 = vld [vmem:[%s634_s14 + $0x30] ss:$8 sps:$4 sm:$0xff]  }
  0x51   : > { %1321 = vrot.lane.b32.xlu1 %v1320_v36, %s1349_s12  ;;  %v937_v61 = vrot.slane %v910_v44, 1  ;;  %v952_v0 = vrot.slane %v915_v48, 1  ;;  %v955_v1 = vrot.slane %v916_v52, 1  ;;  %v946_v9 = vrot.slane %v913_v45, 1 }
  0x52   : > { %1316 = vrot.lane.b32.xlu0 %v1315_v37, %s1349_s12  ;;  %v1613_v10 = vsel %vm860_vm0, %v939_v42, %v940_v53  ;;  %v1616_v11 = vsel %vm860_vm0, %v942_v34, %v943_v56  ;;  %v1619_v12 = vsel %vm860_vm0, %v933_v21, %v934_v57  ;;  %v949_v36 = vrot.slane %v914_v58, 1  ;;  %v776_v21 = vld [vmem:[%s634_s14 + $0x20] ss:$8 sps:$4 sm:$0xff]  }
  0x53   : > { %v1622_v13 = vsel %vm860_vm0, %v936_v29, %v937_v61  ;;  %v1625_v14 = vsel %vm860_vm0, %v951_v31, %v952_v0  ;;  %v1628_v15 = vsel %vm860_vm0, %v954_v32, %v955_v1  ;;  %v1631_v37 = vsel %vm860_vm0, %v945_v38, %v946_v9  ;;  %v774_v31 = vld [vmem:[%s634_s14 + $0x10] ss:$8 sps:$4 sm:$0xff]  }
  0x54   : > { %v1634_v18 = vsel %vm860_vm0, %v948_v20, %v949_v36  ;;  %v780_v39 = vunpack.c.l.bf16 %v772_v19  ;;  %v781_v32 = vunpack.c.h.bf16 %v772_v19  ;;  %v784_v47 = vunpack.c.l.bf16 %v776_v21 }
  0x55   : > { %v785_v44 = vunpack.c.h.bf16 %v776_v21  ;;  %v782_v56 = vunpack.c.l.bf16 %v774_v31  ;;  %v783_v57 = vunpack.c.h.bf16 %v774_v31  ;;  %v786_v58 = vunpack.c.l.bf16 %v778_v43 }
  0x56   : > { %v787_v61 = vunpack.c.h.bf16 %v778_v43  ;;  %vm1013_vm1 = vcmask 60416  }
  0xaf   : > { %v1277_v27 = vpop.permute.xlu1 %1276 }
  0xb0   : > { %v1267_v28 = vpop.permute.xlu0 %1266  ;;  %v1279_v42 = vunpack.i.h.bf16 %v1277_v27  ;;  %v1278_v29 = vunpack.i.l.bf16 %v1277_v27 }
  0xb1   : > { %v1269_v33 = vunpack.i.h.bf16 %v1267_v28  ;;  %v1268_v34 = vunpack.i.l.bf16 %v1267_v28 }
  0xb2   : > { %v745_v38 = vmax.f32 %v1570_v5, %v1279_v42  ;;  %v744_v20 = vmax.f32 %v1557_v59, %v1278_v29 }
  0xb3   : > { %v741_v48 = vmax.f32 %v1579_v7, %v1269_v33  ;;  %v740_v52 = vmax.f32 %v1582_v8, %v1268_v34  ;;  %v1282_v45 = vpop.permute.xlu1 %1281 }
  0xb4   : > { %v1272_v53 = vpop.permute.xlu0 %1271  ;;  %v769_v0 = vmax.f32 %v745_v38, %v761_v3  ;;  %v768_v1 = vmax.f32 %v744_v20, %v760_v63  ;;  %v1284_v7 = vunpack.i.h.bf16 %v1282_v45  ;;  %v1283_v8 = vunpack.i.l.bf16 %v1282_v45 }
  0xb5   : > { %v765_v5 = vmax.f32 %v741_v48, %v757_v55  ;;  %v764_v59 = vmax.f32 %v740_v52, %v756_v54  ;;  %v1274_v9 = vunpack.i.h.bf16 %v1272_v53  ;;  %v1273_v36 = vunpack.i.l.bf16 %v1272_v53 }
  0xb6   : > { %v792_v27 = vmax.f32 %v768_v1, %v784_v47  ;;  %v793_v28 = vmax.f32 %v769_v0, %v785_v44  ;;  %v747_v42 = vmax.f32 %v1597_v17, %v1284_v7  ;;  %v746_v3 = vmax.f32 %v1594_v16, %v1283_v8 }
  0xb7   : > { %v788_v19 = vmax.f32 %v764_v59, %v780_v39  ;;  %v789_v21 = vmax.f32 %v765_v5, %v781_v32  ;;  %v743_v51 = vmax.f32 %v1605_v26, %v1274_v9  ;;  %v742_v63 = vmax.f32 %v1602_v24, %v1273_v36  ;;  %v1292_v55 = vpop.permute.xlu1 %1291 }
  0xb8   : > { %v1287_v29 = vpop.permute.xlu0 %1286  ;;  %v771_v33 = vmax.f32 %v747_v42, %v763_v62  ;;  %v770_v34 = vmax.f32 %v746_v3, %v762_v60  ;;  %v1294_v17 = vunpack.i.h.bf16 %v1292_v55  ;;  %v1293_v26 = vunpack.i.l.bf16 %v1292_v55 }
  0xb9   : > { %v1289_v41 = vunpack.i.h.bf16 %v1287_v29  ;;  %v1288_v54 = vunpack.i.l.bf16 %v1287_v29  ;;  %v767_v31 = vmax.f32 %v743_v51, %v759_v50  ;;  %v766_v16 = vmax.f32 %v742_v63, %v758_v49 }
  0xba   : > { %v794_v44 = vmax.f32 %v770_v34, %v786_v58  ;;  %v795_v38 = vmax.f32 %v771_v33, %v787_v61 }
  0xbb   : > { %v828_v43 = vmax.f32 %v788_v19, %v1288_v54  ;;  %v829_v24 = vmax.f32 %v789_v21, %v1289_v41  ;;  %v790_v39 = vmax.f32 %v766_v16, %v782_v56  ;;  %v791_v32 = vmax.f32 %v767_v31, %v783_v57  ;;  %v1302_v47 = vpop.permute.xlu1 %1301 }
  0xbc   : > { %v1297_v20 = vpop.permute.xlu0 %1296  ;;  %v1304_v60 = vunpack.i.h.bf16 %v1302_v47  ;;  %v1303_v48 = vunpack.i.l.bf16 %v1302_v47 }
  0xbd   : > { %v893_v62 = vmax.f32 %v828_v43, %v1540_v25  ;;  %v894_v46 = vmax.f32 %v829_v24, %v1547_v30  ;;  %v830_v50 = vmax.f32 %v790_v39, %v1293_v26  ;;  %v831_v40 = vmax.f32 %v791_v32, %v1294_v17 }
  0xbe   : > { %v1299_v49 = vunpack.i.h.bf16 %v1297_v20  ;;  %v1298_v52 = vunpack.i.l.bf16 %v1297_v20  ;;  %v834_v45 = vmax.f32 %v794_v44, %v1303_v48  ;;  %v835_v53 = vmax.f32 %v795_v38, %v1304_v60 }
  0xbf   : > { %v966_v56 = vmax.f32 %v894_v46, %v1622_v13  ;;  %v965_v57 = vmax.f32 %v893_v62, %v1619_v12  ;;  %v895_v58 = vmax.f32 %v830_v50, %v1530_v22  ;;  %v896_v25 = vmax.f32 %v831_v40, %v1533_v23  ;;  %v1312_v0 = vpop.permute.xlu1 %1311 }
  0xc0   : > { %v833_v61 = vmax.f32 %v793_v28, %v1299_v49  ;;  %v832_v30 = vmax.f32 %v792_v27, %v1298_v52  ;;  %v1307_v1 = vpop.permute.xlu0 %1306  ;;  %v899_v5 = vmax.f32 %v834_v45, %v1564_v2  ;;  %v900_v59 = vmax.f32 %v835_v53, %v1567_v4 }
  0xc1   : > { %v1314_v7 = vunpack.i.h.bf16 %v1312_v0  ;;  %v1313_v8 = vunpack.i.l.bf16 %v1312_v0  ;;  %v967_v22 = vmax.f32 %v895_v58, %v1613_v10  ;;  %v968_v23 = vmax.f32 %v896_v25, %v1616_v11 }
  0xc2   : > { %v898_v9 = vmax.f32 %v833_v61, %v1576_v6  ;;  %v897_v13 = vmax.f32 %v832_v30, %v1573_v35  ;;  %v1309_v12 = vunpack.i.h.bf16 %v1307_v1  ;;  %v1308_v36 = vunpack.i.l.bf16 %v1307_v1 }
  0xc3   : > { %v971_v19 = vmax.f32 %v899_v5, %v1625_v14  ;;  %v972_v2 = vmax.f32 %v900_v59, %v1628_v15  ;;  %v999_v21 = vmax.f32 %v967_v22, %v1313_v8  ;;  %v1000_v4 = vmax.f32 %v968_v23, %v1314_v7  ;;  %v1322_v27 = vpop.permute.xlu1 %1321 }
  0xc4   : > { %v969_v28 = vmax.f32 %v897_v13, %v1631_v37  ;;  %v970_v6 = vmax.f32 %v898_v9, %v1634_v18  ;;  %v1317_v35 = vpop.permute.xlu0 %1316  ;;  %v998_v42 = vmax.f32 %v966_v56, %v1309_v12  ;;  %v997_v3 = vmax.f32 %v965_v57, %v1308_v36 }
  0xc5   : > { %v1324_v51 = vunpack.i.h.bf16 %v1322_v27  ;;  %v1323_v10 = vunpack.i.l.bf16 %v1322_v27  ;;  %v1007_v63 = vpack.c.bf16 %v999_v21, %v999_v21  ;;  %v1008_v11 = vpack.c.bf16 %v1000_v4, %v1000_v4 }
  0xc6   : > { %v1319_v55 = vunpack.i.h.bf16 %v1317_v35  ;;  %v1318_v29 = vunpack.i.l.bf16 %v1317_v35  ;;  %v1006_v41 = vpack.c.bf16 %v998_v42, %v998_v42  ;;  %v1005_v14 = vpack.c.bf16 %v997_v3, %v997_v3 }
  0xc7   : > { %v1004_v54 = vmax.f32 %v972_v2, %v1324_v51  ;;  %v1003_v15 = vmax.f32 %v971_v19, %v1323_v10  ;;  %1016 = vst.msk [vmem:[%s667_s15 + $0x8] sm:$0xf] %vm1013_vm1, %v1007_v63  ;;  %1017 = vst.msk [vmem:[%s667_s15 + $0xc] sm:$0xf] %vm1013_vm1, %v1008_v11 }
  0xc8   : > { %v1002_v37 = vmax.f32 %v970_v6, %v1319_v55  ;;  %v1001_v18 = vmax.f32 %v969_v28, %v1318_v29  ;;  %1015 = vst.msk [vmem:[%s667_s15 + $0x4] sm:$0xf] %vm1013_vm1, %v1006_v41  ;;  %1014 = vst.msk [vmem:[%s667_s15] sm:$0xf] %vm1013_vm1, %v1005_v14  ;;  %1028 = sbr.rel (!%p1409_p5) target bundleno = 214 (0xd6), region = 204 }
  0xc9   : > { %v1012_v33 = vpack.c.bf16 %v1004_v54, %v1004_v54  ;;  %v1011_v34 = vpack.c.bf16 %v1003_v15, %v1003_v15 }
  0xca   : > { %v1010_v31 = vpack.c.bf16 %v1002_v37, %v1002_v37  ;;  %v1009_v16 = vpack.c.bf16 %v1001_v18, %v1001_v18 }
  0xcb   : > { %1021 = vst.msk [vmem:[%s667_s15 + $0x1c] sm:$0xf] %vm1013_vm1, %v1012_v33  ;;  %1020 = vst.msk [vmem:[%s667_s15 + $0x18] sm:$0xf] %vm1013_vm1, %v1011_v34 }
  0xcc   : > { %1019 = vst.msk [vmem:[%s667_s15 + $0x14] sm:$0xf] %vm1013_vm1, %v1010_v31  ;;  %1018 = vst.msk [vmem:[%s667_s15 + $0x10] sm:$0xf] %vm1013_vm1, %v1009_v16 }
  0xce   : > { %v1051_v43 = vld [vmem:[%s667_s15 + $0x8] sm:$0xf]  ;;  %v1053_v24 = vld [vmem:[%s667_s15 + $0xc] sm:$0xf] }
  0xcf   : > { %v1047_v17 = vld [vmem:[%s667_s15] sm:$0xf]  ;;  %v1049_v26 = vld [vmem:[%s667_s15 + $0x4] sm:$0xf]  ;;  %1052 = vst [vmem:[%s1030_s27 + $0x10] sm:$0xf] %v1051_v43 }
  0xd0   : > { %1048 = vst [vmem:[%s1030_s27] sm:$0xf] %v1047_v17  ;;  %1050 = vst [vmem:[%s1030_s27 + $0x8] sm:$0xf] %v1049_v26 }
  0xd1   : > { %1054 = vst [vmem:[%s1030_s27 + $0x18] sm:$0xf] %v1053_v24 }
  0xd2   : > { %v1059_v47 = vld [vmem:[%s667_s15 + $0x18] sm:$0xf]  ;;  %v1061_v44 = vld [vmem:[%s667_s15 + $0x1c] sm:$0xf] }
  0xd3   : > { %v1055_v39 = vld [vmem:[%s667_s15 + $0x10] sm:$0xf]  ;;  %v1057_v32 = vld [vmem:[%s667_s15 + $0x14] sm:$0xf]  ;;  %1060 = vst [vmem:[%s1030_s27 + $0x30] sm:$0xf] %v1059_v47 }
  0xd4   : > { %1056 = vst [vmem:[%s1030_s27 + $0x20] sm:$0xf] %v1055_v39  ;;  %1058 = vst [vmem:[%s1030_s27 + $0x28] sm:$0xf] %v1057_v32 }
  0xd5   : > { %1062 = vst [vmem:[%s1030_s27 + $0x38] sm:$0xf] %v1061_v44 }
  0xd6 PF: > { %p11_p10 = scmp.ge.s32.totalorder %s1392_s19, 4   ;;  %s1711_s15 = smov %s1343_s16 }
  0xd7   : > { %s1712_s16 = smov %s1403_s22  ;;  %s1713_s17 = smov %s1392_s19 }
  0xd8   :  { %13 = sbr.rel (!%p11_p10) target bundleno = 2 (0x2), region = 300 }

// kernel: shufflenet_v2_forward.21
= control target key start
LH: loop header
LB: loop body
LE: loop exit
PB: predicated region body
PF: predicated region fallthrough
CT: control target
= control target key end

     0   :  { %vm27_vm0 = vcmask 1043456   ;;  %v92_v0 = vmov 0.0   ;;  %vm93_vm1 = vmmov 0   ;;  %v94_v4 = vmov 0   ;;  %s127_s0 = inlined_call_operand.vmem [shape: bf16[8,32], index: 0, kind: input, shape index: {}]   ;;  %s128_s1 = inlined_call_operand.vmem [shape: bf16[8,8], index: 1, kind: input, shape index: {}]   ;;  %s129_s2 = inlined_call_operand.vmem [shape: f32[8,1], index: 2, kind: input, shape index: {}]   ;;  %s130_s3 = inlined_call_operand.vmem [shape: bf16[8,32], index: 3, kind: output, shape index: {}]  }
   0x1   :  { %82 = vmatprep.subr.bf16.mxu0 %v92_v0  ;;  %v16_v1 = vld [vmem:[%s127_s0] sm:$0xf]  ;;  %84 = vmatprep.mubr.msk.bf16.mxu0 %vm93_vm1, %v92_v0  ;;  %vm23_vm2 = vcmask 64512   ;;  %vm73_vm3 = vcmask 257024  }
   0x2   :  { %v17_v2 = vld [vmem:[%s129_s2] sm:$0xff]  ;;  %v29_v3 = vsel %vm27_vm0, %v16_v1, 0  ;;  %91 = vset.pattern.permute.xlu0 %v94_v4 }
   0x3   :  { %83 = vmatpush3.bf16.msra.mxu0 %v29_v3  ;;  %v15_v5 = vld [vmem:[%s128_s1] sm:$0xf]  ;;  %20 = vperm.xlu0 %91, %v17_v2  }
   0x6   :  { %85 = vmatmul.mubr.msk.bf16.vlgmr.msra.gmra.mxu0 %vm23_vm2, %v15_v5 }
  0x7e   :  { %v21_v6 = vpop.permute.xlu0 %20 }
  0xc6   :  { %v65_v7 = vpop.f32.mrf.mxu0 }
  0xc7   :  { %v66_v8 = vadd.f32 %v65_v7, %v21_v6 }
  0xc8   :  { %v86_v9 = vpop.f32.mrf.mxu0 }
  0xc9   :  { %v71_v10 = vmax.f32 %v66_v8, 0.0 }
  0xca   :  { %v68_v11 = vpop.f32.mrf.mxu0 }
  0xcb   :  { %v72_v12 = vpack.c.bf16 %v71_v10, %v71_v10 }
  0xcc   :  { %v87_v13 = vpop.f32.mrf.mxu0 }
  0xcd   :  { %74 = vst.msk [vmem:[%s130_s3] sm:$0xf] %vm73_vm3, %v72_v12 }

// kernel: shufflenet_v2_forward.22
= control target key start
LH: loop header
LB: loop body
LE: loop exit
PB: predicated region body
PF: predicated region fallthrough
CT: control target
= control target key end

     0   :  { %vm27_vm0 = vcmask 1043456   ;;  %v91_v0 = vmov 0.0   ;;  %vm92_vm1 = vmmov 0   ;;  %v93_v4 = vmov 0   ;;  %s126_s0 = inlined_call_operand.vmem [shape: bf16[8,128], index: 0, kind: input, shape index: {}]   ;;  %s127_s1 = inlined_call_operand.vmem [shape: bf16[8,8], index: 1, kind: input, shape index: {}]   ;;  %s128_s2 = inlined_call_operand.vmem [shape: f32[8,1], index: 2, kind: input, shape index: {}]   ;;  %s129_s3 = inlined_call_operand.vmem [shape: bf16[8,128], index: 3, kind: output, shape index: {}]  }
   0x1   :  { %81 = vmatprep.subr.bf16.mxu0 %v91_v0  ;;  %v16_v1 = vld [vmem:[%s126_s0] sm:$0xf]  ;;  %83 = vmatprep.mubr.msk.bf16.mxu0 %vm92_vm1, %v91_v0  ;;  %vm23_vm2 = vcmask 64512  }
   0x2   :  { %v17_v2 = vld [vmem:[%s128_s2] sm:$0xff]  ;;  %v29_v3 = vsel %vm27_vm0, %v16_v1, 0  ;;  %90 = vset.pattern.permute.xlu0 %v93_v4 }
   0x3   :  { %82 = vmatpush3.bf16.msra.mxu0 %v29_v3  ;;  %v15_v5 = vld [vmem:[%s127_s1] sm:$0xf]  ;;  %20 = vperm.xlu0 %90, %v17_v2  }
   0x6   :  { %84 = vmatmul.mubr.msk.bf16.vlgmr.msra.gmra.mxu0 %vm23_vm2, %v15_v5 }
  0x7e   :  { %v21_v6 = vpop.permute.xlu0 %20 }
  0xc6   :  { %v65_v7 = vpop.f32.mrf.mxu0 }
  0xc7   :  { %v66_v8 = vadd.f32 %v65_v7, %v21_v6 }
  0xc8   :  { %v85_v9 = vpop.f32.mrf.mxu0 }
  0xc9   :  { %v71_v10 = vmax.f32 %v66_v8, 0.0 }
  0xca   :  { %v68_v11 = vpop.f32.mrf.mxu0 }
  0xcb   :  { %v72_v12 = vpack.c.bf16 %v71_v10, %v71_v10 }
  0xcc   :  { %v86_v13 = vpop.f32.mrf.mxu0 }
  0xcd   :  { %73 = vst [vmem:[%s129_s3] sm:$0xf] %v72_v12 }

// kernel: shufflenet_v2_forward.20
= control target key start
LH: loop header
LB: loop body
LE: loop exit
PB: predicated region body
PF: predicated region fallthrough
CT: control target
= control target key end

     0   :  { %s2250_s21 = smov 0   ;;  %s2252_s22 = smov 0   ;;  %s2835_s0 = inlined_call_operand.vmem [shape: bf16[8,2,5,5], index: 0, kind: input, shape index: {}]   ;;  %s2836_s1 = inlined_call_operand.vmem [shape: bf16[8,2,5,5], index: 1, kind: input, shape index: {}]   ;;  %s2837_s2 = inlined_call_operand.vmem [shape: bf16[8,2,5,5], index: 2, kind: input, shape index: {}]   ;;  %s2838_s3 = inlined_call_operand.vmem [shape: bf16[8,2,5,5], index: 3, kind: input, shape index: {}]   ;;  %s2839_s4 = inlined_call_operand.vmem [shape: f32[9,8,1,1], index: 4, kind: input, shape index: {}]   ;;  %s2840_s5 = inlined_call_operand.vmem [shape: f32[8,1,1], index: 5, kind: input, shape index: {}]   ;;  %s2841_s6 = inlined_call_operand.vmem [shape: bf16[8,2,4,4], index: 6, kind: output, shape index: {}]  }
   0x1   :  { %s2254_s23 = smov 0  }
   0x2 LB: > { %s1995_s24 = sadd.s32 4294967295, %s2211_s23   ;;  %s2267_s25 = sadd.s32 1, %s2211_s23   ;;  %s2211_s23 = sphi %s2254_s23, %s2846_s23   ;;  %s2207_s22 = sphi %s2252_s22, %s2845_s22   ;;  %s2203_s21 = sphi %s2250_s21, %s2844_s21  }
   0x3   : > { %s20_s26 = ssub.s32 %s2211_s23, %s2267_s25  ;;  %s23_s27 = sadd.s32 1, %s2207_s22 }
   0x4   : > { %p21_p0 = scmp.eq.s32.totalorder %s20_s26, 0  ;;  %p30_p1 = scmp.ne.s32.totalorder %s2207_s22, %s2203_s21 }
   0x5   : > { %p31_p2 = scmp.eq.s32.totalorder %s2211_s23, 0  ;;  %p180_p3 = scmp.eq.s32.totalorder %s1995_s24, 1 }
   0x6   : > { %s2278_s28 = scalar_select %p21_p0, %s2207_s22, %s23_s27  }
   0x7   : > { %p2280_p4 = por %p31_p2, %p30_p1  ;;  %p2284_p5 = por %p180_p3, %p30_p1 }
   0x8   : > { %p1998_p6 = scmp.ge.s32.totalorder %s2211_s23, 2 }
   0xa   : > { %208 = sbr.rel (%p1998_p6) target bundleno = 51 (0x33), region = 24 }
   0xf   : > { %211 = sbr.rel (!%p2280_p4) target bundleno = 24 (0x18), region = 28  ;;  %s213_s7 = sand.u32 (%p2280_p4), 1, %s2207_s22  }
  0x10   : > { %s2000_s8 = sshll.u32 (%p2280_p4), %s2211_s23, 2  ;;  %s1999_s9 = sshll.u32 (%p2280_p4), %s213_s7, 5 }
  0x11   : > { %s217_s12 = scalar_lea.vmem (%p2280_p4), %s2835_s0, %s2000_s8  ;;  %s215_s13 = scalar_lea.vmem (%p2280_p4), [#allocation2], %s1999_s9 }
  0x12   : > { %v234_v0 = vld [vmem:[%s217_s12] sm:$0xf] (%p2280_p4)  ;;  %v236_v1 = vld [vmem:[%s217_s12 + $0x8] sm:$0xf] (%p2280_p4)  ;;  %v238_v2 = vld [vmem:[%s217_s12 + $0x10] sm:$0xf] (%p2280_p4) }
  0x13   : > { %235 = vst [vmem:[%s215_s13] sm:$0xf] (%p2280_p4), %v234_v0  ;;  %237 = vst [vmem:[%s215_s13 + $0x4] sm:$0xf] (%p2280_p4), %v236_v1  ;;  %v240_v3 = vld [vmem:[%s217_s12 + $0x18] sm:$0xf] (%p2280_p4) }
  0x14   : > { %v242_v4 = vld [vmem:[%s217_s12 + $0x20] sm:$0xf]  ;;  %239 = vst [vmem:[%s215_s13 + $0x8] sm:$0xf] %v238_v2  ;;  %241 = vst [vmem:[%s215_s13 + $0xc] sm:$0xf] %v240_v3 }
  0x15   : > { %243 = vst [vmem:[%s215_s13 + $0x10] sm:$0xf] %v242_v4  ;;  %v244_v5 = vld [vmem:[%s217_s12 + $0x28] sm:$0xf]  ;;  %v246_v6 = vld [vmem:[%s217_s12 + $0x30] sm:$0xf] }
  0x16   : > { %v248_v7 = vld [vmem:[%s217_s12 + $0x38] sm:$0xf]  ;;  %245 = vst [vmem:[%s215_s13 + $0x14] sm:$0xf] %v244_v5  ;;  %247 = vst [vmem:[%s215_s13 + $0x18] sm:$0xf] %v246_v6 }
  0x17   : > { %249 = vst [vmem:[%s215_s13 + $0x1c] sm:$0xf] %v248_v7 }
  0x18 PF: > { %289 = sbr.rel (!%p2280_p4) target bundleno = 33 (0x21), region = 69  ;;  %s291_s14 = sand.u32 (%p2280_p4), 1, %s2207_s22  }
  0x19   : > { %s2002_s15 = sshll.u32 (%p2280_p4), %s2211_s23, 2  ;;  %s2001_s16 = sshll.u32 (%p2280_p4), %s291_s14, 5 }
  0x1a   : > { %s295_s19 = scalar_lea.vmem (%p2280_p4), %s2836_s1, %s2002_s15  ;;  %s293_s20 = scalar_lea.vmem (%p2280_p4), [#allocation3], %s2001_s16 }
  0x1b   : > { %v312_v8 = vld [vmem:[%s295_s19] sm:$0xf] (%p2280_p4)  ;;  %v314_v9 = vld [vmem:[%s295_s19 + $0x8] sm:$0xf] (%p2280_p4)  ;;  %v316_v10 = vld [vmem:[%s295_s19 + $0x10] sm:$0xf] (%p2280_p4) }
  0x1c   : > { %313 = vst [vmem:[%s293_s20] sm:$0xf] (%p2280_p4), %v312_v8  ;;  %315 = vst [vmem:[%s293_s20 + $0x4] sm:$0xf] (%p2280_p4), %v314_v9  ;;  %v318_v11 = vld [vmem:[%s295_s19 + $0x18] sm:$0xf] (%p2280_p4) }
  0x1d   : > { %v320_v12 = vld [vmem:[%s295_s19 + $0x20] sm:$0xf]  ;;  %317 = vst [vmem:[%s293_s20 + $0x8] sm:$0xf] %v316_v10  ;;  %319 = vst [vmem:[%s293_s20 + $0xc] sm:$0xf] %v318_v11 }
  0x1e   : > { %321 = vst [vmem:[%s293_s20 + $0x10] sm:$0xf] %v320_v12  ;;  %v322_v13 = vld [vmem:[%s295_s19 + $0x28] sm:$0xf]  ;;  %v324_v14 = vld [vmem:[%s295_s19 + $0x30] sm:$0xf] }
  0x1f   : > { %v326_v15 = vld [vmem:[%s295_s19 + $0x38] sm:$0xf]  ;;  %323 = vst [vmem:[%s293_s20 + $0x14] sm:$0xf] %v322_v13  ;;  %325 = vst [vmem:[%s293_s20 + $0x18] sm:$0xf] %v324_v14 }
  0x20   : > { %327 = vst [vmem:[%s293_s20 + $0x1c] sm:$0xf] %v326_v15 }
  0x21 PF: > { %367 = sbr.rel (!%p2280_p4) target bundleno = 42 (0x2a), region = 110  ;;  %s369_s26 = sand.u32 (%p2280_p4), 1, %s2207_s22  }
  0x22   : > { %s2004_s27 = sshll.u32 (%p2280_p4), %s2211_s23, 2  ;;  %s2003_s7 = sshll.u32 (%p2280_p4), %s369_s26, 5 }
  0x23   : > { %s373_s10 = scalar_lea.vmem (%p2280_p4), %s2837_s2, %s2004_s27  ;;  %s371_s11 = scalar_lea.vmem (%p2280_p4), [#allocation4], %s2003_s7 }
  0x24   : > { %v390_v16 = vld [vmem:[%s373_s10] sm:$0xf] (%p2280_p4)  ;;  %v392_v17 = vld [vmem:[%s373_s10 + $0x8] sm:$0xf] (%p2280_p4)  ;;  %v394_v18 = vld [vmem:[%s373_s10 + $0x10] sm:$0xf] (%p2280_p4) }
  0x25   : > { %391 = vst [vmem:[%s371_s11] sm:$0xf] (%p2280_p4), %v390_v16  ;;  %393 = vst [vmem:[%s371_s11 + $0x4] sm:$0xf] (%p2280_p4), %v392_v17  ;;  %v396_v19 = vld [vmem:[%s373_s10 + $0x18] sm:$0xf] (%p2280_p4) }
  0x26   : > { %v398_v20 = vld [vmem:[%s373_s10 + $0x20] sm:$0xf]  ;;  %395 = vst [vmem:[%s371_s11 + $0x8] sm:$0xf] %v394_v18  ;;  %397 = vst [vmem:[%s371_s11 + $0xc] sm:$0xf] %v396_v19 }
  0x27   : > { %399 = vst [vmem:[%s371_s11 + $0x10] sm:$0xf] %v398_v20  ;;  %v400_v21 = vld [vmem:[%s373_s10 + $0x28] sm:$0xf]  ;;  %v402_v22 = vld [vmem:[%s373_s10 + $0x30] sm:$0xf] }
  0x28   : > { %v404_v23 = vld [vmem:[%s373_s10 + $0x38] sm:$0xf]  ;;  %401 = vst [vmem:[%s371_s11 + $0x14] sm:$0xf] %v400_v21  ;;  %403 = vst [vmem:[%s371_s11 + $0x18] sm:$0xf] %v402_v22 }
  0x29   : > { %405 = vst [vmem:[%s371_s11 + $0x1c] sm:$0xf] %v404_v23 }
  0x2a PF: > { %445 = sbr.rel (!%p2280_p4) target bundleno = 51 (0x33), region = 151  ;;  %s447_s12 = sand.u32 (%p2280_p4), 1, %s2207_s22  }
  0x2b   : > { %s2006_s13 = sshll.u32 (%p2280_p4), %s2211_s23, 2  ;;  %s2005_s14 = sshll.u32 (%p2280_p4), %s447_s12, 5 }
  0x2c   : > { %s451_s17 = scalar_lea.vmem (%p2280_p4), %s2838_s3, %s2006_s13  ;;  %s449_s18 = scalar_lea.vmem (%p2280_p4), [#allocation5], %s2005_s14 }
  0x2d   : > { %v468_v24 = vld [vmem:[%s451_s17] sm:$0xf] (%p2280_p4)  ;;  %v470_v25 = vld [vmem:[%s451_s17 + $0x8] sm:$0xf] (%p2280_p4)  ;;  %v472_v26 = vld [vmem:[%s451_s17 + $0x10] sm:$0xf] (%p2280_p4) }
  0x2e   : > { %469 = vst [vmem:[%s449_s18] sm:$0xf] (%p2280_p4), %v468_v24  ;;  %471 = vst [vmem:[%s449_s18 + $0x4] sm:$0xf] (%p2280_p4), %v470_v25  ;;  %v474_v27 = vld [vmem:[%s451_s17 + $0x18] sm:$0xf] (%p2280_p4) }
  0x2f   : > { %v476_v28 = vld [vmem:[%s451_s17 + $0x20] sm:$0xf]  ;;  %473 = vst [vmem:[%s449_s18 + $0x8] sm:$0xf] %v472_v26  ;;  %475 = vst [vmem:[%s449_s18 + $0xc] sm:$0xf] %v474_v27 }
  0x30   : > { %477 = vst [vmem:[%s449_s18 + $0x10] sm:$0xf] %v476_v28  ;;  %v478_v29 = vld [vmem:[%s451_s17 + $0x28] sm:$0xf]  ;;  %v480_v30 = vld [vmem:[%s451_s17 + $0x30] sm:$0xf] }
  0x31   : > { %v482_v31 = vld [vmem:[%s451_s17 + $0x38] sm:$0xf]  ;;  %479 = vst [vmem:[%s449_s18 + $0x14] sm:$0xf] %v478_v29  ;;  %481 = vst [vmem:[%s449_s18 + $0x18] sm:$0xf] %v480_v30 }
  0x32   : > { %483 = vst [vmem:[%s449_s18 + $0x1c] sm:$0xf] %v482_v31 }
  0x33 PF: > { %p2007_p7 = scmp.ge.s32.totalorder %s2211_s23, 1  ;;  %p522_p8 = scmp.lt.s32.totalorder %s2211_s23, 3 }
  0x35   : > { %p523_p9 = pnand %p2007_p7, %p522_p8 }
  0x36   : > { %s529_s17 = sand.u32 (!%p523_p9), 1, %s2203_s21   ;;  %s2214_s20 = smov (!%p523_p9), 127  }
  0x37   : > { %526 = sbr.rel (%p523_p9) target bundleno = 558 (0x22e), region = 192  ;;  %s2472_s18 = sshll.u32 (!%p523_p9), %s529_s17, 5 }
  0x38   : > { %s2475_s29 = scalar_lea.vmem (!%p523_p9), [#allocation2], %s2472_s18  ;;  %s2492_s19 = scalar_lea.vmem (!%p523_p9), [#allocation3], %s2472_s18 }
  0x39   : > { %s545_s26 = scalar_lea.vmem (!%p523_p9), [#allocation4], %s2472_s18  ;;  %s552_s27 = scalar_lea.vmem (!%p523_p9), [#allocation5], %s2472_s18 }
  0x3c   : > { %v2015_v32 = vld [vmem:[%s2839_s4 + $0x2] ss:$0 sm:$0xff]  ;;  %v2013_v33 = vld [vmem:[%s2839_s4] ss:$0 sm:$0xff]  ;;  %v2213_v34 = vmov 0   ;;  %vm1798_vm0 = vcmask 25600  }
  0x3d   : > { %2188 = vset.pattern.permute.xlu1 %v2213_v34  ;;  %2187 = vset.pattern.permute.xlu0 %v2213_v34  ;;  %v2016_v35 = vld [vmem:[%s2839_s4 + $0x3] ss:$0 sm:$0xff]  ;;  %v2014_v36 = vld [vmem:[%s2839_s4 + $0x1] ss:$0 sm:$0xff]  ;;  %v2018_v37 = vld [vmem:[%s2839_s4 + $0x5] ss:$0 sm:$0xff] }
  0x3e   : > { %663 = vperm.xlu1 %2188, %v2015_v32   ;;  %655 = vperm.xlu0 %2187, %v2013_v33   ;;  %v2017_v38 = vld [vmem:[%s2839_s4 + $0x4] ss:$0 sm:$0xff]  ;;  %v2020_v39 = vld [vmem:[%s2839_s4 + $0x7] ss:$0 sm:$0xff]  ;;  %v2019_v40 = vld [vmem:[%s2839_s4 + $0x6] ss:$0 sm:$0xff] }
  0x3f   : > { %v2030_v41 = vld [vmem:[%s2839_s4 + $0x9] ss:$0 sm:$0xff]  ;;  %v2029_v42 = vld [vmem:[%s2839_s4 + $0x8] ss:$0 sm:$0xff]  ;;  %v2032_v43 = vld [vmem:[%s2839_s4 + $0xb] ss:$0 sm:$0xff] }
  0x40   : > { %v2031_v44 = vld [vmem:[%s2839_s4 + $0xa] ss:$0 sm:$0xff]  ;;  %v2034_v45 = vld [vmem:[%s2839_s4 + $0xd] ss:$0 sm:$0xff]  ;;  %v2033_v46 = vld [vmem:[%s2839_s4 + $0xc] ss:$0 sm:$0xff] }
  0x41   : > { %v2036_v47 = vld [vmem:[%s2839_s4 + $0xf] ss:$0 sm:$0xff]  ;;  %v2035_v48 = vld [vmem:[%s2839_s4 + $0xe] ss:$0 sm:$0xff]  ;;  %v2046_v49 = vld [vmem:[%s2839_s4 + $0x11] ss:$0 sm:$0xff] }
  0x42   : > { %667 = vperm.xlu1 %2188, %v2016_v35   ;;  %659 = vperm.xlu0 %2187, %v2014_v36   ;;  %v2045_v50 = vld [vmem:[%s2839_s4 + $0x10] ss:$0 sm:$0xff]  ;;  %v2048_v51 = vld [vmem:[%s2839_s4 + $0x13] ss:$0 sm:$0xff]  ;;  %v2047_v52 = vld [vmem:[%s2839_s4 + $0x12] ss:$0 sm:$0xff] }
  0x43   : > { %v2050_v53 = vld [vmem:[%s2839_s4 + $0x15] ss:$0 sm:$0xff]  ;;  %v2049_v54 = vld [vmem:[%s2839_s4 + $0x14] ss:$0 sm:$0xff]  ;;  %v2052_v55 = vld [vmem:[%s2839_s4 + $0x17] ss:$0 sm:$0xff] }
  0x44   : > { %v2051_v56 = vld [vmem:[%s2839_s4 + $0x16] ss:$0 sm:$0xff]  ;;  %v2062_v57 = vld [vmem:[%s2839_s4 + $0x19] ss:$0 sm:$0xff]  ;;  %v2061_v58 = vld [vmem:[%s2839_s4 + $0x18] ss:$0 sm:$0xff] }
  0x45   : > { %v2064_v59 = vld [vmem:[%s2839_s4 + $0x1b] ss:$0 sm:$0xff]  ;;  %v2063_v60 = vld [vmem:[%s2839_s4 + $0x1a] ss:$0 sm:$0xff]  ;;  %v2066_v61 = vld [vmem:[%s2839_s4 + $0x1d] ss:$0 sm:$0xff] }
  0x46   : > { %675 = vperm.xlu1 %2188, %v2018_v37   ;;  %671 = vperm.xlu0 %2187, %v2017_v38   ;;  %v2065_v62 = vld [vmem:[%s2839_s4 + $0x1c] ss:$0 sm:$0xff]  ;;  %v2068_v63 = vld [vmem:[%s2839_s4 + $0x1f] ss:$0 sm:$0xff]  ;;  %v2067_v0 = vld [vmem:[%s2839_s4 + $0x1e] ss:$0 sm:$0xff] }
  0x47   : > { %v2078_v1 = vld [vmem:[%s2839_s4 + $0x21] ss:$0 sm:$0xff]  ;;  %v2077_v2 = vld [vmem:[%s2839_s4 + $0x20] ss:$0 sm:$0xff]  ;;  %v2080_v3 = vld [vmem:[%s2839_s4 + $0x23] ss:$0 sm:$0xff] }
  0x48   : > { %v2079_v4 = vld [vmem:[%s2839_s4 + $0x22] ss:$0 sm:$0xff]  ;;  %v2082_v5 = vld [vmem:[%s2839_s4 + $0x25] ss:$0 sm:$0xff]  ;;  %v2081_v6 = vld [vmem:[%s2839_s4 + $0x24] ss:$0 sm:$0xff] }
  0x49   : > { %v2084_v7 = vld [vmem:[%s2839_s4 + $0x27] ss:$0 sm:$0xff]  ;;  %v2083_v8 = vld [vmem:[%s2839_s4 + $0x26] ss:$0 sm:$0xff]  ;;  %v2094_v9 = vld [vmem:[%s2839_s4 + $0x29] ss:$0 sm:$0xff] }
  0x4a   : > { %683 = vperm.xlu1 %2188, %v2020_v39   ;;  %679 = vperm.xlu0 %2187, %v2019_v40   ;;  %v2093_v10 = vld [vmem:[%s2839_s4 + $0x28] ss:$0 sm:$0xff]  ;;  %v2096_v11 = vld [vmem:[%s2839_s4 + $0x2b] ss:$0 sm:$0xff]  ;;  %v2095_v12 = vld [vmem:[%s2839_s4 + $0x2a] ss:$0 sm:$0xff] }
  0x4b   : > { %v2098_v13 = vld [vmem:[%s2839_s4 + $0x2d] ss:$0 sm:$0xff]  ;;  %v2097_v14 = vld [vmem:[%s2839_s4 + $0x2c] ss:$0 sm:$0xff]  ;;  %v2100_v15 = vld [vmem:[%s2839_s4 + $0x2f] ss:$0 sm:$0xff] }
  0x4c   : > { %v2099_v16 = vld [vmem:[%s2839_s4 + $0x2e] ss:$0 sm:$0xff]  ;;  %v2110_v17 = vld [vmem:[%s2839_s4 + $0x31] ss:$0 sm:$0xff]  ;;  %v2109_v18 = vld [vmem:[%s2839_s4 + $0x30] ss:$0 sm:$0xff] }
  0x4d   : > { %v2478_v23 = vld [vmem:[%s2475_s29 + $0x1c] sm:$0x3]  ;;  %v2481_v24 = vld [vmem:[%s2475_s29 + $0x18] sm:$0x3]  ;;  %v2484_v27 = vld [vmem:[%s2475_s29] sm:$0x3] }
  0x4e   : > { %764 = vperm.xlu1 %2188, %v2030_v41   ;;  %760 = vperm.xlu0 %2187, %v2029_v42   ;;  %v2487_v28 = vld [vmem:[%s2475_s29 + $0x4] sm:$0x3]  ;;  %v605_v29 = vunpack.c.l.bf16 %v2478_v23  ;;  %v604_v30 = vunpack.c.l.bf16 %v2481_v24  ;;  %v694_v32 = vld [vmem:[%s2492_s19] sm:$0x3]  ;;  %v2497_v33 = vld [vmem:[%s2475_s29 + $0x8] sm:$0x3]  ;;  %v598_v34 = vunpack.c.l.bf16 %v2484_v27 }
  0x4f   : > { %v695_v31 = vld [vmem:[%s2492_s19 + $0x4] sm:$0x3]  ;;  %v599_v35 = vunpack.c.l.bf16 %v2487_v28  ;;  %v2502_v38 = vld [vmem:[%s2475_s29 + $0xc] sm:$0x3]  ;;  %v702_v42 = vunpack.c.l.bf16 %v694_v32  ;;  %s2158_s21 = sshll.u32 (%p2284_p5), %s1995_s24, 1 }
  0x50   : > { %v703_v41 = vunpack.c.l.bf16 %v695_v31  ;;  %s1815_s15 = scalar_lea.vmem (%p2284_p5), %s2841_s6, %s2158_s21 }
  0x52   : > { %772 = vperm.xlu1 %2188, %v2032_v43   ;;  %768 = vperm.xlu0 %2187, %v2031_v44   ;;  %v697_v43 = vld [vmem:[%s2492_s19 + $0xc] sm:$0x3]  ;;  %v696_v44 = vld [vmem:[%s2492_s19 + $0x8] sm:$0x3] }
  0x56   : > { %780 = vperm.xlu1 %2188, %v2034_v45   ;;  %776 = vperm.xlu0 %2187, %v2033_v46   ;;  %v600_v45 = vunpack.c.l.bf16 %v2497_v33  ;;  %v601_v46 = vunpack.c.l.bf16 %v2502_v38 }
  0x5a   : > { %788 = vperm.xlu1 %2188, %v2036_v47   ;;  %784 = vperm.xlu0 %2187, %v2035_v48   ;;  %v595_v47 = vld [vmem:[%s2475_s29 + $0x14] sm:$0x3] }
  0x5e   : > { %861 = vperm.xlu1 %2188, %v2046_v49   ;;  %857 = vperm.xlu0 %2187, %v2045_v50   ;;  %v705_v50 = vunpack.c.l.bf16 %v697_v43 }
  0x62   : > { %869 = vperm.xlu1 %2188, %v2048_v51   ;;  %865 = vperm.xlu0 %2187, %v2047_v52   ;;  %v704_v51 = vunpack.c.l.bf16 %v696_v44 }
  0x66   : > { %877 = vperm.xlu1 %2188, %v2050_v53   ;;  %873 = vperm.xlu0 %2187, %v2049_v54   ;;  %v594_v54 = vld [vmem:[%s2475_s29 + $0x10] sm:$0x3] }
  0x6a   : > { %885 = vperm.xlu1 %2188, %v2052_v55   ;;  %881 = vperm.xlu0 %2187, %v2051_v56  }
  0x6e   : > { %1006 = vperm.xlu1 %2188, %v2062_v57   ;;  %1002 = vperm.xlu0 %2187, %v2061_v58   ;;  %v699_v57 = vld [vmem:[%s2492_s19 + $0x14] sm:$0x3]  ;;  %v698_v58 = vld [vmem:[%s2492_s19 + $0x10] sm:$0x3] }
  0x72   : > { %1014 = vperm.xlu1 %2188, %v2064_v59   ;;  %1010 = vperm.xlu0 %2187, %v2063_v60  }
  0x76   : > { %1022 = vperm.xlu1 %2188, %v2066_v61   ;;  %1018 = vperm.xlu0 %2187, %v2065_v62   ;;  %v603_v61 = vunpack.c.l.bf16 %v595_v47  ;;  %v602_v62 = vunpack.c.l.bf16 %v594_v54 }
  0x7a   : > { %1030 = vperm.xlu1 %2188, %v2068_v63   ;;  %1026 = vperm.xlu0 %2187, %v2067_v0  }
  0x7e   : > { %1119 = vperm.xlu1 %2188, %v2078_v1   ;;  %1115 = vperm.xlu0 %2187, %v2077_v2   ;;  %v707_v1 = vunpack.c.l.bf16 %v699_v57  ;;  %v706_v2 = vunpack.c.l.bf16 %v698_v58 }
  0x82   : > { %1127 = vperm.xlu1 %2188, %v2080_v3   ;;  %1123 = vperm.xlu0 %2187, %v2079_v4  }
  0x86   : > { %1135 = vperm.xlu1 %2188, %v2082_v5   ;;  %1131 = vperm.xlu0 %2187, %v2081_v6  }
  0x8a   : > { %1143 = vperm.xlu1 %2188, %v2084_v7   ;;  %1139 = vperm.xlu0 %2187, %v2083_v8   ;;  %v701_v7 = vld [vmem:[%s2492_s19 + $0x1c] sm:$0x3]  ;;  %v700_v8 = vld [vmem:[%s2492_s19 + $0x18] sm:$0x3] }
  0x8e   : > { %1216 = vperm.xlu1 %2188, %v2094_v9   ;;  %1212 = vperm.xlu0 %2187, %v2093_v10  }
  0x92   : > { %1224 = vperm.xlu1 %2188, %v2096_v11   ;;  %1220 = vperm.xlu0 %2187, %v2095_v12  }
  0x96   : > { %1232 = vperm.xlu1 %2188, %v2098_v13   ;;  %1228 = vperm.xlu0 %2187, %v2097_v14   ;;  %v709_v13 = vunpack.c.l.bf16 %v701_v7  ;;  %v708_v14 = vunpack.c.l.bf16 %v700_v8 }
  0x9a   : > { %1240 = vperm.xlu1 %2188, %v2100_v15   ;;  %1236 = vperm.xlu0 %2187, %v2099_v16  }
  0x9e   : > { %1361 = vperm.xlu1 %2188, %v2110_v17   ;;  %1357 = vperm.xlu0 %2187, %v2109_v18  }
  0xb9   : > { %v664_v19 = vpop.permute.xlu1 %663  ;;  %v656_v20 = vpop.permute.xlu0 %655 }
  0xba   : > { %v686_v52 = vmul.f32 %v656_v20, %v598_v34  ;;  %v688_v3 = vmul.f32 %v664_v19, %v600_v45 }
  0xbd   : > { %v668_v21 = vpop.permute.xlu1 %667  ;;  %v660_v22 = vpop.permute.xlu0 %659 }
  0xbe   : > { %v687_v53 = vmul.f32 %v660_v22, %v599_v35  ;;  %v689_v4 = vmul.f32 %v668_v21, %v601_v46 }
  0xc1   : > { %v676_v25 = vpop.permute.xlu1 %675  ;;  %v672_v26 = vpop.permute.xlu0 %671 }
  0xc2   : > { %v691_v15 = vmul.f32 %v676_v25, %v603_v61  ;;  %v690_v16 = vmul.f32 %v672_v26, %v602_v62 }
  0xc5   : > { %v684_v36 = vpop.permute.xlu1 %683  ;;  %v680_v37 = vpop.permute.xlu0 %679 }
  0xc6   : > { %v693_v39 = vmul.f32 %v684_v36, %v605_v29  ;;  %v692_v40 = vmul.f32 %v680_v37, %v604_v30 }
  0xc9   : > { %v765_v48 = vpop.permute.xlu1 %764  ;;  %v761_v49 = vpop.permute.xlu0 %760 }
  0xca   : > { %v792_v55 = vmul.f32 %v765_v48, %v703_v41  ;;  %v791_v56 = vmul.f32 %v761_v49, %v702_v42 }
  0xcc   : > { %v2516_v59 = vadd.f32 %v792_v55, %v687_v53  ;;  %v2518_v60 = vadd.f32 %v791_v56, %v686_v52  ;;  %v2553_v52 = vld [vmem:[%s545_s26 + $0x8] sm:$0x3]  ;;  %v2567_v55 = vld [vmem:[%s545_s26 + $0x14] sm:$0x3]  ;;  %v2569_v56 = vld [vmem:[%s545_s26 + $0x10] sm:$0x3] }
  0xcd   : > { %v773_v63 = vpop.permute.xlu1 %772  ;;  %v769_v0 = vpop.permute.xlu0 %768 }
  0xce   : > { %v794_v5 = vmul.f32 %v773_v63, %v705_v50  ;;  %v793_v6 = vmul.f32 %v769_v0, %v704_v51  ;;  %v2551_v51 = vld [vmem:[%s545_s26 + $0xc] sm:$0x3]  ;;  %v949_v63 = vunpack.c.l.bf16 %v2567_v55  ;;  %v948_v0 = vunpack.c.l.bf16 %v2569_v56 }
  0xd0   : > { %v2522_v9 = vadd.f32 %v794_v5, %v689_v4  ;;  %v2524_v10 = vadd.f32 %v793_v6, %v688_v3 }
  0xd1   : > { %v781_v11 = vpop.permute.xlu1 %780  ;;  %v777_v12 = vpop.permute.xlu0 %776 }
  0xd2   : > { %v796_v17 = vmul.f32 %v781_v11, %v707_v1  ;;  %v795_v18 = vmul.f32 %v777_v12, %v706_v2  ;;  %v2581_v1 = vld [vmem:[%s545_s26 + $0x1c] sm:$0x3]  ;;  %v2583_v2 = vld [vmem:[%s545_s26 + $0x18] sm:$0x3]  ;;  %v1050_v11 = vld [vmem:[%s552_s27 + $0x4] sm:$0x3] }
  0xd3   : > { %v951_v7 = vunpack.c.l.bf16 %v2581_v1  ;;  %v950_v8 = vunpack.c.l.bf16 %v2583_v2  ;;  %v1049_v12 = vld [vmem:[%s552_s27] sm:$0x3] }
  0xd4   : > { %v2526_v20 = vadd.f32 %v796_v17, %v691_v15  ;;  %v2528_v19 = vadd.f32 %v795_v18, %v690_v16  ;;  %v1058_v17 = vunpack.c.l.bf16 %v1050_v11  ;;  %v1057_v18 = vunpack.c.l.bf16 %v1049_v12 }
  0xd5   : > { %v789_v21 = vpop.permute.xlu1 %788  ;;  %v785_v22 = vpop.permute.xlu0 %784 }
  0xd6   : > { %v798_v27 = vmul.f32 %v789_v21, %v709_v13  ;;  %v797_v28 = vmul.f32 %v785_v22, %v708_v14  ;;  %v1052_v21 = vld [vmem:[%s552_s27 + $0xc] sm:$0x3]  ;;  %v1051_v22 = vld [vmem:[%s552_s27 + $0x8] sm:$0x3] }
  0xd8   : > { %v2530_v31 = vadd.f32 %v798_v27, %v693_v39  ;;  %v2532_v32 = vadd.f32 %v797_v28, %v692_v40 }
  0xd9   : > { %v862_v33 = vpop.permute.xlu1 %861  ;;  %v858_v36 = vpop.permute.xlu0 %857 }
  0xda   : > { %v889_v37 = vmul.f32 %v862_v33, %v599_v35  ;;  %v888_v25 = vmul.f32 %v858_v36, %v598_v34  ;;  %v2539_v35 = vld [vmem:[%s545_s26 + $0x4] sm:$0x3]  ;;  %v2541_v34 = vld [vmem:[%s545_s26] sm:$0x3] }
  0xdb   : > { %v945_v49 = vunpack.c.l.bf16 %v2539_v35  ;;  %v944_v50 = vunpack.c.l.bf16 %v2541_v34 }
  0xdc   : > { %906 = vrot.lane.b32.xlu1 %v889_v37, %s2214_s20  ;;  %904 = vrot.lane.b32.xlu0 %v888_v25, %s2214_s20  ;;  %v1060_v37 = vunpack.c.l.bf16 %v1052_v21  ;;  %v1059_v25 = vunpack.c.l.bf16 %v1051_v22 }
  0xdd   : > { %v870_v26 = vpop.permute.xlu1 %869  ;;  %v866_v38 = vpop.permute.xlu0 %865 }
  0xde   : > { %v891_v41 = vmul.f32 %v870_v26, %v601_v46  ;;  %v890_v42 = vmul.f32 %v866_v38, %v600_v45  ;;  %v1054_v26 = vld [vmem:[%s552_s27 + $0x14] sm:$0x3]  ;;  %v1053_v38 = vld [vmem:[%s552_s27 + $0x10] sm:$0x3] }
  0xe0   : > { %910 = vrot.lane.b32.xlu1 %v891_v41, %s2214_s20  ;;  %908 = vrot.lane.b32.xlu0 %v890_v42, %s2214_s20 }
  0xe1   : > { %v878_v39 = vpop.permute.xlu1 %877  ;;  %v874_v40 = vpop.permute.xlu0 %873 }
  0xe2   : > { %v893_v43 = vmul.f32 %v878_v39, %v603_v61  ;;  %v892_v44 = vmul.f32 %v874_v40, %v602_v62 }
  0xe4   : > { %914 = vrot.lane.b32.xlu1 %v893_v43, %s2214_s20  ;;  %912 = vrot.lane.b32.xlu0 %v892_v44, %s2214_s20  ;;  %v1062_v43 = vunpack.c.l.bf16 %v1054_v26  ;;  %v1061_v44 = vunpack.c.l.bf16 %v1053_v38  ;;  %v2114_v26 = vld [vmem:[%s2839_s4 + $0x35] ss:$0 sm:$0xff]  ;;  %v2113_v38 = vld [vmem:[%s2839_s4 + $0x34] ss:$0 sm:$0xff] }
  0xe5   : > { %v886_v47 = vpop.permute.xlu1 %885  ;;  %v882_v46 = vpop.permute.xlu0 %881 }
  0xe6   : > { %v895_v45 = vmul.f32 %v886_v47, %v605_v29  ;;  %v894_v48 = vmul.f32 %v882_v46, %v604_v30  ;;  %v947_v29 = vunpack.c.l.bf16 %v2551_v51  ;;  %v946_v30 = vunpack.c.l.bf16 %v2553_v52  ;;  %v1056_v47 = vld [vmem:[%s552_s27 + $0x1c] sm:$0x3]  ;;  %v1055_v46 = vld [vmem:[%s552_s27 + $0x18] sm:$0x3]  ;;  %v2112_v52 = vld [vmem:[%s2839_s4 + $0x33] ss:$0 sm:$0xff] }
  0xe7   : > { %v1064_v55 = vunpack.c.l.bf16 %v1056_v47  ;;  %v1063_v56 = vunpack.c.l.bf16 %v1055_v46  ;;  %v2128_v47 = vld [vmem:[%s2839_s4 + $0x3b] ss:$0 sm:$0xff]  ;;  %v2127_v46 = vld [vmem:[%s2839_s4 + $0x3a] ss:$0 sm:$0xff] }
  0xe8   : > { %918 = vrot.lane.b32.xlu1 %v895_v45, %s2214_s20  ;;  %916 = vrot.lane.b32.xlu0 %v894_v48, %s2214_s20 }
  0xe9   : > { %v1007_v53 = vpop.permute.xlu1 %1006  ;;  %v1003_v54 = vpop.permute.xlu0 %1002 }
  0xea   : > { %v2559_v23 = vmul.f32 %v1007_v53, %v945_v49  ;;  %v2563_v24 = vmul.f32 %v1003_v54, %v944_v50 }
  0xed   : > { %v1015_v57 = vpop.permute.xlu1 %1014  ;;  %v1011_v58 = vpop.permute.xlu0 %1010 }
  0xee   : > { %v2573_v61 = vmul.f32 %v1015_v57, %v947_v29  ;;  %v2577_v62 = vmul.f32 %v1011_v58, %v946_v30 }
  0xf1   : > { %v1023_v3 = vpop.permute.xlu1 %1022  ;;  %v1019_v4 = vpop.permute.xlu0 %1018 }
  0xf2   : > { %v2585_v5 = vmul.f32 %v1023_v3, %v949_v63  ;;  %v2587_v6 = vmul.f32 %v1019_v4, %v948_v0 }
  0xf5   : > { %v1031_v13 = vpop.permute.xlu1 %1030  ;;  %v1027_v14 = vpop.permute.xlu0 %1026 }
  0xf6   : > { %v2592_v15 = vmul.f32 %v1031_v13, %v951_v7  ;;  %v2594_v16 = vmul.f32 %v1027_v14, %v950_v8 }
  0xf9   : > { %v1120_v27 = vpop.permute.xlu1 %1119  ;;  %v1116_v28 = vpop.permute.xlu0 %1115 }
  0xfa   : > { %v2596_v33 = vmul.f32 %v1120_v27, %v1058_v17  ;;  %v2598_v36 = vmul.f32 %v1116_v28, %v1057_v18  ;;  %v2145_v28 = vld [vmem:[%s2839_s4 + $0x44] ss:$0 sm:$0xff] }
  0xfd   : > { %v1128_v41 = vpop.permute.xlu1 %1127  ;;  %v1124_v42 = vpop.permute.xlu0 %1123 }
  0xfe   : > { %v2600_v39 = vmul.f32 %v1128_v41, %v1060_v37  ;;  %v2602_v40 = vmul.f32 %v1124_v42, %v1059_v25  ;;  %v2148_v37 = vld [vmem:[%s2839_s4 + $0x47] ss:$0 sm:$0xff]  ;;  %v2147_v25 = vld [vmem:[%s2839_s4 + $0x46] ss:$0 sm:$0xff]  ;;  %v2116_v41 = vld [vmem:[%s2839_s4 + $0x37] ss:$0 sm:$0xff] }
  0xff   : > { %v2115_v42 = vld [vmem:[%s2839_s4 + $0x36] ss:$0 sm:$0xff] }
 0x101   : > { %v1136_v45 = vpop.permute.xlu1 %1135  ;;  %v1132_v48 = vpop.permute.xlu0 %1131 }
 0x102   : > { %v2604_v53 = vmul.f32 %v1136_v45, %v1062_v43  ;;  %v2606_v54 = vmul.f32 %v1132_v48, %v1061_v44  ;;  %v2126_v43 = vld [vmem:[%s2839_s4 + $0x39] ss:$0 sm:$0xff]  ;;  %v2125_v44 = vld [vmem:[%s2839_s4 + $0x38] ss:$0 sm:$0xff]  ;;  %v2130_v45 = vld [vmem:[%s2839_s4 + $0x3d] ss:$0 sm:$0xff] }
 0x103   : > { %v2129_v48 = vld [vmem:[%s2839_s4 + $0x3c] ss:$0 sm:$0xff] }
 0x105   : > { %v1144_v57 = vpop.permute.xlu1 %1143  ;;  %v1140_v58 = vpop.permute.xlu0 %1139 }
 0x106   : > { %v2608_v1 = vmul.f32 %v1144_v57, %v1064_v55  ;;  %v2610_v2 = vmul.f32 %v1140_v58, %v1063_v56  ;;  %v2132_v55 = vld [vmem:[%s2839_s4 + $0x3f] ss:$0 sm:$0xff]  ;;  %v2131_v56 = vld [vmem:[%s2839_s4 + $0x3e] ss:$0 sm:$0xff]  ;;  %v2150_v57 = vld [vmem:[%s2840_s5 + $0x1] ss:$0 sm:$0xff] }
 0x107   : > { %v2149_v58 = vld [vmem:[%s2840_s5] ss:$0 sm:$0xff] }
 0x109   : > { %v1217_v3 = vpop.permute.xlu1 %1216  ;;  %v1213_v4 = vpop.permute.xlu0 %1212 }
 0x10a   : > { %v1244_v11 = vmul.f32 %v1217_v3, %v945_v49  ;;  %v1243_v12 = vmul.f32 %v1213_v4, %v944_v50  ;;  %v2152_v3 = vld [vmem:[%s2840_s5 + $0x3] ss:$0 sm:$0xff]  ;;  %v2151_v4 = vld [vmem:[%s2840_s5 + $0x2] ss:$0 sm:$0xff] }
 0x10c   : > { %1261 = vrot.lane.b32.xlu1 %v1244_v11, %s2214_s20  ;;  %1259 = vrot.lane.b32.xlu0 %v1243_v12, %s2214_s20 }
 0x10d   : > { %v1225_v13 = vpop.permute.xlu1 %1224  ;;  %v1221_v14 = vpop.permute.xlu0 %1220 }
 0x10e   : > { %v1246_v17 = vmul.f32 %v1225_v13, %v947_v29  ;;  %v1245_v18 = vmul.f32 %v1221_v14, %v946_v30  ;;  %v2111_v29 = vld [vmem:[%s2839_s4 + $0x32] ss:$0 sm:$0xff]  ;;  %v2142_v30 = vld [vmem:[%s2839_s4 + $0x41] ss:$0 sm:$0xff]  ;;  %v2154_v13 = vld [vmem:[%s2840_s5 + $0x5] ss:$0 sm:$0xff] }
 0x10f   : > { %v2153_v14 = vld [vmem:[%s2840_s5 + $0x4] ss:$0 sm:$0xff] }
 0x110   : > { %1265 = vrot.lane.b32.xlu1 %v1246_v17, %s2214_s20  ;;  %1263 = vrot.lane.b32.xlu0 %v1245_v18, %s2214_s20 }
 0x111   : > { %v1233_v35 = vpop.permute.xlu1 %1232  ;;  %v1229_v49 = vpop.permute.xlu0 %1228 }
 0x112   : > { %v1248_v34 = vmul.f32 %v1233_v35, %v949_v63  ;;  %v1247_v50 = vmul.f32 %v1229_v49, %v948_v0  ;;  %v2141_v63 = vld [vmem:[%s2839_s4 + $0x40] ss:$0 sm:$0xff]  ;;  %v2144_v0 = vld [vmem:[%s2839_s4 + $0x43] ss:$0 sm:$0xff] }
 0x114   : > { %1269 = vrot.lane.b32.xlu1 %v1248_v34, %s2214_s20  ;;  %1267 = vrot.lane.b32.xlu0 %v1247_v50, %s2214_s20 }
 0x115   : > { %v1241_v21 = vpop.permute.xlu1 %1240  ;;  %v1237_v22 = vpop.permute.xlu0 %1236 }
 0x116   : > { %v1250_v27 = vmul.f32 %v1241_v21, %v951_v7  ;;  %v1249_v51 = vmul.f32 %v1237_v22, %v950_v8  ;;  %v2143_v7 = vld [vmem:[%s2839_s4 + $0x42] ss:$0 sm:$0xff]  ;;  %v2146_v8 = vld [vmem:[%s2839_s4 + $0x45] ss:$0 sm:$0xff]  ;;  %v2156_v21 = vld [vmem:[%s2840_s5 + $0x7] ss:$0 sm:$0xff] }
 0x117   : > { %v2155_v22 = vld [vmem:[%s2840_s5 + $0x6] ss:$0 sm:$0xff] }
 0x118   : > { %1273 = vrot.lane.b32.xlu1 %v1250_v27, %s2214_s20  ;;  %1271 = vrot.lane.b32.xlu0 %v1249_v51, %s2214_s20 }
 0x119   : > { %v1362_v11 = vpop.permute.xlu1 %1361  ;;  %v1358_v12 = vpop.permute.xlu0 %1357 }
 0x11c   : > { %1369 = vperm.xlu1 %2188, %v2112_v52   ;;  %1365 = vperm.xlu0 %2187, %v2111_v29  }
 0x120   : > { %1619 = vperm.xlu1 %2188, %v2142_v30   ;;  %1615 = vperm.xlu0 %2187, %v2141_v63  }
 0x124   : > { %1627 = vperm.xlu1 %2188, %v2144_v0   ;;  %1623 = vperm.xlu0 %2187, %v2143_v7  }
 0x128   : > { %1635 = vperm.xlu1 %2188, %v2146_v8   ;;  %1631 = vperm.xlu0 %2187, %v2145_v28  }
 0x12c   : > { %1643 = vperm.xlu1 %2188, %v2148_v37   ;;  %1639 = vperm.xlu0 %2187, %v2147_v25   ;;  %v1292_v25 = vld [vmem:[%s2475_s29 + $0x4] sm:$0x7] }
 0x130   : > { %1377 = vperm.xlu1 %2188, %v2114_v26   ;;  %1373 = vperm.xlu0 %2187, %v2113_v38   ;;  %v1300_v26 = vunpack.c.l.bf16 %v1292_v25 }
 0x134   : > { %1385 = vperm.xlu1 %2188, %v2116_v41   ;;  %1381 = vperm.xlu0 %2187, %v2115_v42   ;;  %v1389_v41 = vmul.f32 %v1362_v11, %v1300_v26  ;;  %v1294_v11 = vld [vmem:[%s2475_s29 + $0xc] sm:$0x7] }
 0x138   : > { %1498 = vperm.xlu1 %2188, %v2126_v43   ;;  %1494 = vperm.xlu0 %2187, %v2125_v44   ;;  %v1405_v43 = vrot.slane %v1389_v41, 1 }
 0x13c   : > { %1506 = vperm.xlu1 %2188, %v2128_v47   ;;  %1502 = vperm.xlu0 %2187, %v2127_v46  }
 0x140   : > { %1514 = vperm.xlu1 %2188, %v2130_v45   ;;  %1510 = vperm.xlu0 %2187, %v2129_v48  }
 0x144   : > { %1522 = vperm.xlu1 %2188, %v2132_v55   ;;  %1518 = vperm.xlu0 %2187, %v2131_v56  }
 0x148   : > { %1755 = vperm.xlu1 %2188, %v2150_v57   ;;  %1751 = vperm.xlu0 %2187, %v2149_v58  }
 0x14c   : > { %1763 = vperm.xlu1 %2188, %v2152_v3   ;;  %1759 = vperm.xlu0 %2187, %v2151_v4  }
 0x14e   : > { %v907_v17 = vpop.permute.xlu1 %906  ;;  %v905_v18 = vpop.permute.xlu0 %904 }
 0x14f   : > { %v929_v35 = vadd.f32 %v907_v17, %v2516_v59  ;;  %v928_v49 = vadd.f32 %v905_v18, %v2518_v60 }
 0x150   : > { %1771 = vperm.xlu1 %2188, %v2154_v13   ;;  %1767 = vperm.xlu0 %2187, %v2153_v14   ;;  %v1302_v13 = vunpack.c.l.bf16 %v1294_v11 }
 0x151   : > { %v1042_v34 = vadd.f32 %v2559_v23, %v929_v35  ;;  %v1041_v50 = vadd.f32 %v2563_v24, %v928_v49 }
 0x152   : > { %v911_v27 = vpop.permute.xlu1 %910  ;;  %v909_v51 = vpop.permute.xlu0 %908 }
 0x153   : > { %v931_v59 = vadd.f32 %v911_v27, %v2522_v9  ;;  %v930_v60 = vadd.f32 %v909_v51, %v2524_v10  ;;  %v1155_v52 = vadd.f32 %v2596_v33, %v1042_v34  ;;  %v1154_v23 = vadd.f32 %v2598_v36, %v1041_v50 }
 0x154   : > { %1779 = vperm.xlu1 %2188, %v2156_v21   ;;  %1775 = vperm.xlu0 %2187, %v2155_v22  }
 0x155   : > { %v1044_v24 = vadd.f32 %v2573_v61, %v931_v59  ;;  %v1043_v29 = vadd.f32 %v2577_v62, %v930_v60 }
 0x156   : > { %v915_v30 = vpop.permute.xlu1 %914  ;;  %v913_v63 = vpop.permute.xlu0 %912 }
 0x157   : > { %v933_v0 = vadd.f32 %v915_v30, %v2526_v20  ;;  %v932_v7 = vadd.f32 %v913_v63, %v2528_v19  ;;  %v1157_v9 = vadd.f32 %v2600_v39, %v1044_v24  ;;  %v1156_v10 = vadd.f32 %v2602_v40, %v1043_v29 }
 0x159   : > { %v1046_v33 = vadd.f32 %v2585_v5, %v933_v0  ;;  %v1045_v36 = vadd.f32 %v2587_v6, %v932_v7  ;;  %v1291_v6 = vld [vmem:[%s2475_s29] sm:$0x7] }
 0x15a   : > { %v919_v8 = vpop.permute.xlu1 %918  ;;  %v917_v61 = vpop.permute.xlu0 %916  ;;  %v1299_v38 = vunpack.c.l.bf16 %v1291_v6 }
 0x15b   : > { %v935_v62 = vadd.f32 %v919_v8, %v2530_v31  ;;  %v934_v28 = vadd.f32 %v917_v61, %v2532_v32  ;;  %v1159_v20 = vadd.f32 %v2604_v53, %v1046_v33  ;;  %v1158_v37 = vadd.f32 %v2606_v54, %v1045_v36  ;;  %v1298_v33 = vld [vmem:[%s2475_s29 + $0x1c] sm:$0x7]  ;;  %v1297_v36 = vld [vmem:[%s2475_s29 + $0x18] sm:$0x7] }
 0x15c   : > { %v1388_v31 = vmul.f32 %v1358_v12, %v1299_v38  ;;  %v1293_v12 = vld [vmem:[%s2475_s29 + $0x8] sm:$0x7] }
 0x15d   : > { %v1048_v19 = vadd.f32 %v2592_v15, %v935_v62  ;;  %v1047_v39 = vadd.f32 %v2594_v16, %v934_v28  ;;  %v1301_v14 = vunpack.c.l.bf16 %v1293_v12 }
 0x15e   : > { %v1404_v53 = vrot.slane %v1388_v31, 1 }
 0x15f   : > { %v1161_v40 = vadd.f32 %v2608_v1, %v1048_v19  ;;  %v1160_v5 = vadd.f32 %v2610_v2, %v1047_v39  ;;  %v1306_v19 = vunpack.c.l.bf16 %v1298_v33  ;;  %v1305_v39 = vunpack.c.l.bf16 %v1297_v36 }
 0x17e   : > { %v1262_v42 = vpop.permute.xlu1 %1261  ;;  %v1260_v32 = vpop.permute.xlu0 %1259 }
 0x17f   : > { %v1284_v44 = vadd.f32 %v1262_v42, %v1155_v52  ;;  %v1283_v54 = vadd.f32 %v1260_v32, %v1154_v23  ;;  %v1296_v52 = vld [vmem:[%s2475_s29 + $0x14] sm:$0x7]  ;;  %v1295_v23 = vld [vmem:[%s2475_s29 + $0x10] sm:$0x7]  ;;  %s2012_s29 = sshll.u32 %s529_s17, 4 }
 0x181   : > { %v2744_v15 = vadd.f32 %v1405_v43, %v1284_v44  ;;  %v2746_v16 = vadd.f32 %v1404_v53, %v1283_v54  ;;  %v1429_v44 = vld [vmem:[%s2492_s19 + $0x4] sm:$0x7]  ;;  %v1428_v54 = vld [vmem:[%s2492_s19] sm:$0x7] }
 0x182   : > { %v1266_v1 = vpop.permute.xlu1 %1265  ;;  %v1264_v2 = vpop.permute.xlu0 %1263 }
 0x183   : > { %v1286_v47 = vadd.f32 %v1266_v1, %v1157_v9  ;;  %v1285_v46 = vadd.f32 %v1264_v2, %v1156_v10  ;;  %v1304_v9 = vunpack.c.l.bf16 %v1296_v52  ;;  %v1303_v10 = vunpack.c.l.bf16 %v1295_v23 }
 0x186   : > { %v1270_v45 = vpop.permute.xlu1 %1269  ;;  %v1268_v48 = vpop.permute.xlu0 %1267 }
 0x187   : > { %v2748_v55 = vadd.f32 %v1270_v45, %v1159_v20  ;;  %v2750_v56 = vadd.f32 %v1268_v48, %v1158_v37  ;;  %v1437_v45 = vunpack.c.l.bf16 %v1429_v44  ;;  %v1436_v48 = vunpack.c.l.bf16 %v1428_v54 }
 0x18a   : > { %v1274_v57 = vpop.permute.xlu1 %1273  ;;  %v1272_v58 = vpop.permute.xlu0 %1271 }
 0x18b   : > { %v2752_v3 = vadd.f32 %v1274_v57, %v1161_v40  ;;  %v2754_v4 = vadd.f32 %v1272_v58, %v1160_v5 }
 0x197   : > { %v1370_v17 = vpop.permute.xlu1 %1369  ;;  %v1366_v18 = vpop.permute.xlu0 %1365 }
 0x198   : > { %v1391_v35 = vmul.f32 %v1370_v17, %v1302_v13  ;;  %v1390_v49 = vmul.f32 %v1366_v18, %v1301_v14 }
 0x19a   : > { %v1407_v34 = vrot.slane %v1391_v35, 1  ;;  %v1406_v50 = vrot.slane %v1390_v49, 1 }
 0x19b   : > { %v1620_v21 = vpop.permute.xlu1 %1619  ;;  %v1616_v22 = vpop.permute.xlu0 %1615 }
 0x19c   : > { %v2758_v27 = vadd.f32 %v1407_v34, %v1286_v47  ;;  %v2760_v51 = vadd.f32 %v1406_v50, %v1285_v46  ;;  %v1647_v59 = vmul.f32 %v1620_v21, %v1300_v26  ;;  %v1646_v60 = vmul.f32 %v1616_v22, %v1299_v38 }
 0x19e   : > { %v1663_v24 = vrot.slane %v1647_v59, 1  ;;  %v1662_v29 = vrot.slane %v1646_v60, 1  ;;  %v1432_v60 = vld [vmem:[%s2492_s19 + $0x10] sm:$0x7] }
 0x19f   : > { %v1628_v30 = vpop.permute.xlu1 %1627  ;;  %v1624_v63 = vpop.permute.xlu0 %1623 }
 0x1a0   : > { %v1649_v0 = vmul.f32 %v1628_v30, %v1302_v13  ;;  %v1648_v7 = vmul.f32 %v1624_v63, %v1301_v14  ;;  %1672 = vrot.lane.b32.xlu1 %v1663_v24, %s2214_s20  ;;  %1670 = vrot.lane.b32.xlu0 %v1662_v29, %s2214_s20  ;;  %v1431_v13 = vld [vmem:[%s2492_s19 + $0xc] sm:$0x7]  ;;  %v1430_v14 = vld [vmem:[%s2492_s19 + $0x8] sm:$0x7]  ;;  %v1440_v63 = vunpack.c.l.bf16 %v1432_v60 }
 0x1a1   : > { %v1439_v34 = vunpack.c.l.bf16 %v1431_v13  ;;  %v1438_v50 = vunpack.c.l.bf16 %v1430_v14 }
 0x1a2   : > { %v1665_v8 = vrot.slane %v1649_v0, 1  ;;  %v1664_v61 = vrot.slane %v1648_v7, 1 }
 0x1a3   : > { %v1636_v62 = vpop.permute.xlu1 %1635  ;;  %v1632_v28 = vpop.permute.xlu0 %1631 }
 0x1a4   : > { %v1651_v20 = vmul.f32 %v1636_v62, %v1304_v9  ;;  %v1650_v37 = vmul.f32 %v1632_v28, %v1303_v10  ;;  %1676 = vrot.lane.b32.xlu1 %v1665_v8, %s2214_s20  ;;  %1674 = vrot.lane.b32.xlu0 %v1664_v61, %s2214_s20 }
 0x1a6   : > { %v1667_v40 = vrot.slane %v1651_v20, 1  ;;  %v1666_v5 = vrot.slane %v1650_v37, 1 }
 0x1a7   : > { %v1644_v25 = vpop.permute.xlu1 %1643  ;;  %v1640_v6 = vpop.permute.xlu0 %1639 }
 0x1a8   : > { %v1653_v26 = vmul.f32 %v1644_v25, %v1306_v19  ;;  %v1652_v38 = vmul.f32 %v1640_v6, %v1305_v39  ;;  %1680 = vrot.lane.b32.xlu1 %v1667_v40, %s2214_s20  ;;  %1678 = vrot.lane.b32.xlu0 %v1666_v5, %s2214_s20 }
 0x1aa   : > { %v1669_v41 = vrot.slane %v1653_v26, 1  ;;  %v1668_v31 = vrot.slane %v1652_v38, 1 }
 0x1ab   : > { %v1378_v42 = vpop.permute.xlu1 %1377  ;;  %v1374_v32 = vpop.permute.xlu0 %1373 }
 0x1ac   : > { %v1393_v43 = vmul.f32 %v1378_v42, %v1304_v9  ;;  %v1392_v53 = vmul.f32 %v1374_v32, %v1303_v10  ;;  %1684 = vrot.lane.b32.xlu1 %v1669_v41, %s2214_s20  ;;  %1682 = vrot.lane.b32.xlu0 %v1668_v31, %s2214_s20  ;;  %v1435_v9 = vld [vmem:[%s2492_s19 + $0x1c] sm:$0x7]  ;;  %v1434_v10 = vld [vmem:[%s2492_s19 + $0x18] sm:$0x7] }
 0x1ad   : > { %v1443_v62 = vunpack.c.l.bf16 %v1435_v9  ;;  %v1442_v28 = vunpack.c.l.bf16 %v1434_v10 }
 0x1ae   : > { %v1409_v1 = vrot.slane %v1393_v43, 1  ;;  %v1408_v2 = vrot.slane %v1392_v53, 1 }
 0x1af   : > { %v1386_v47 = vpop.permute.xlu1 %1385  ;;  %v1382_v46 = vpop.permute.xlu0 %1381 }
 0x1b0   : > { %v1425_v57 = vadd.f32 %v1409_v1, %v2748_v55  ;;  %v1424_v58 = vadd.f32 %v1408_v2, %v2750_v56  ;;  %v1395_v11 = vmul.f32 %v1386_v47, %v1306_v19  ;;  %v1394_v12 = vmul.f32 %v1382_v46, %v1305_v39  ;;  %v1433_v56 = vld [vmem:[%s2492_s19 + $0x14] sm:$0x7]  ;;  %s2792_s19 = scalar_lea.vmem [#allocation6], %s2012_s29 }
 0x1b1   : > { %v1441_v30 = vunpack.c.l.bf16 %v1433_v56 }
 0x1b2   : > { %v1411_v17 = vrot.slane %v1395_v11, 1  ;;  %v1410_v18 = vrot.slane %v1394_v12, 1 }
 0x1b3   : > { %v1499_v35 = vpop.permute.xlu1 %1498  ;;  %v1495_v49 = vpop.permute.xlu0 %1494 }
 0x1b4   : > { %v1427_v21 = vadd.f32 %v1411_v17, %v2752_v3  ;;  %v1426_v55 = vadd.f32 %v1410_v18, %v2754_v4  ;;  %v1526_v22 = vmul.f32 %v1499_v35, %v1437_v45  ;;  %v1525_v59 = vmul.f32 %v1495_v49, %v1436_v48 }
 0x1b6   : > { %v1542_v52 = vrot.slane %v1526_v22, 1  ;;  %v1541_v23 = vrot.slane %v1525_v59, 1 }
 0x1b7   : > { %v1507_v24 = vpop.permute.xlu1 %1506  ;;  %v1503_v29 = vpop.permute.xlu0 %1502 }
 0x1b8   : > { %v1528_v0 = vmul.f32 %v1507_v24, %v1439_v34  ;;  %v1527_v7 = vmul.f32 %v1503_v29, %v1438_v50  ;;  %v1558_v33 = vadd.f32 %v1542_v52, %v2744_v15  ;;  %v1557_v3 = vadd.f32 %v1541_v23, %v2746_v16 }
 0x1ba   : > { %v1544_v36 = vrot.slane %v1528_v0, 1  ;;  %v1543_v4 = vrot.slane %v1527_v7, 1 }
 0x1bb   : > { %v1515_v8 = vpop.permute.xlu1 %1514  ;;  %v1511_v61 = vpop.permute.xlu0 %1510 }
 0x1bc   : > { %v1530_v20 = vmul.f32 %v1515_v8, %v1441_v30  ;;  %v1529_v37 = vmul.f32 %v1511_v61, %v1440_v63  ;;  %v1560_v19 = vadd.f32 %v1544_v36, %v2758_v27  ;;  %v1559_v39 = vadd.f32 %v1543_v4, %v2760_v51 }
 0x1be   : > { %v1546_v40 = vrot.slane %v1530_v20, 1  ;;  %v1545_v5 = vrot.slane %v1529_v37, 1 }
 0x1bf   : > { %v1523_v25 = vpop.permute.xlu1 %1522  ;;  %v1519_v6 = vpop.permute.xlu0 %1518 }
 0x1c0   : > { %v1532_v26 = vmul.f32 %v1523_v25, %v1443_v62  ;;  %v1531_v15 = vmul.f32 %v1519_v6, %v1442_v28  ;;  %v1562_v38 = vadd.f32 %v1546_v40, %v1425_v57  ;;  %v1561_v16 = vadd.f32 %v1545_v5, %v1424_v58 }
 0x1c2   : > { %v1548_v41 = vrot.slane %v1532_v26, 1  ;;  %v1547_v31 = vrot.slane %v1531_v15, 1 }
 0x1c3   : > { %v1756_v43 = vpop.permute.xlu1 %1755  ;;  %v1752_v53 = vpop.permute.xlu0 %1751 }
 0x1c4   : > { %v1564_v42 = vadd.f32 %v1548_v41, %v1427_v21  ;;  %v1563_v32 = vadd.f32 %v1547_v31, %v1426_v55 }
 0x1c7   : > { %v1764_v44 = vpop.permute.xlu1 %1763  ;;  %v1760_v54 = vpop.permute.xlu0 %1759 }
 0x1cb   : > { %v1772_v27 = vpop.permute.xlu1 %1771  ;;  %v1768_v1 = vpop.permute.xlu0 %1767 }
 0x1cf   : > { %v1780_v51 = vpop.permute.xlu1 %1779  ;;  %v1776_v2 = vpop.permute.xlu0 %1775 }
 0x212   : > { %v1673_v47 = vpop.permute.xlu1 %1672  ;;  %v1671_v46 = vpop.permute.xlu0 %1670 }
 0x213   : > { %v1695_v45 = vadd.f32 %v1673_v47, %v1558_v33  ;;  %v1694_v48 = vadd.f32 %v1671_v46, %v1557_v3 }
 0x215   : > { %v1783_v57 = vadd.f32 %v1756_v43, %v1695_v45  ;;  %v1782_v58 = vadd.f32 %v1752_v53, %v1694_v48 }
 0x216   : > { %v1677_v11 = vpop.permute.xlu1 %1676  ;;  %v1675_v12 = vpop.permute.xlu0 %1674 }
 0x217   : > { %v1791_v13 = vpack.c.bf16 %v1783_v57, %v1783_v57  ;;  %v1790_v14 = vpack.c.bf16 %v1782_v58, %v1782_v58  ;;  %v1697_v17 = vadd.f32 %v1677_v11, %v1560_v19  ;;  %v1696_v18 = vadd.f32 %v1675_v12, %v1559_v39 }
 0x219   : > { %1800 = vst.msk [vmem:[%s2792_s19 + $0x2] sm:$0x3] %vm1798_vm0, %v1791_v13  ;;  %1799 = vst.msk [vmem:[%s2792_s19] sm:$0x3] %vm1798_vm0, %v1790_v14  ;;  %v1785_v35 = vadd.f32 %v1764_v44, %v1697_v17  ;;  %v1784_v49 = vadd.f32 %v1760_v54, %v1696_v18 }
 0x21a   : > { %v1681_v34 = vpop.permute.xlu1 %1680  ;;  %v1679_v50 = vpop.permute.xlu0 %1678 }
 0x21b   : > { %v1793_v21 = vpack.c.bf16 %v1785_v35, %v1785_v35  ;;  %v1792_v55 = vpack.c.bf16 %v1784_v49, %v1784_v49  ;;  %v1699_v22 = vadd.f32 %v1681_v34, %v1562_v38  ;;  %v1698_v59 = vadd.f32 %v1679_v50, %v1561_v16 }
 0x21d   : > { %1802 = vst.msk [vmem:[%s2792_s19 + $0x6] sm:$0x3] %vm1798_vm0, %v1793_v21  ;;  %1801 = vst.msk [vmem:[%s2792_s19 + $0x4] sm:$0x3] %vm1798_vm0, %v1792_v55  ;;  %v1787_v56 = vadd.f32 %v1772_v27, %v1699_v22  ;;  %v1786_v60 = vadd.f32 %v1768_v1, %v1698_v59 }
 0x21e   : > { %v1685_v52 = vpop.permute.xlu1 %1684  ;;  %v1683_v23 = vpop.permute.xlu0 %1682 }
 0x21f   : > { %v1795_v24 = vpack.c.bf16 %v1787_v56, %v1787_v56  ;;  %v1794_v29 = vpack.c.bf16 %v1786_v60, %v1786_v60  ;;  %v1701_v30 = vadd.f32 %v1685_v52, %v1564_v42  ;;  %v1700_v63 = vadd.f32 %v1683_v23, %v1563_v32 }
 0x220   : > { %v1832_v33 = vld [vmem:[%s2792_s19] sm:$0x3] (%p2284_p5)  ;;  %v1834_v3 = vld [vmem:[%s2792_s19 + $0x2] sm:$0x3] (%p2284_p5) }
 0x221   : > { %1804 = vst.msk [vmem:[%s2792_s19 + $0xa] sm:$0x3] %vm1798_vm0, %v1795_v24  ;;  %1803 = vst.msk [vmem:[%s2792_s19 + $0x8] sm:$0x3] %vm1798_vm0, %v1794_v29  ;;  %v1789_v0 = vadd.f32 %v1780_v51, %v1701_v30  ;;  %v1788_v7 = vadd.f32 %v1776_v2, %v1700_v63  ;;  %1813 = sbr.rel (!%p2284_p5) target bundleno = 558 (0x22e), region = 212 }
 0x222   : > { %1833 = vst [vmem:[%s1815_s15] sm:$0x3] (%p2284_p5), %v1832_v33  ;;  %1835 = vst [vmem:[%s1815_s15 + $0x4] sm:$0x3] (%p2284_p5), %v1834_v3 }
 0x223   : > { %v1797_v9 = vpack.c.bf16 %v1789_v0, %v1789_v0  ;;  %v1796_v10 = vpack.c.bf16 %v1788_v7, %v1788_v7 }
 0x224   : > { %v1836_v36 = vld [vmem:[%s2792_s19 + $0x4] sm:$0x3] (%p2284_p5)  ;;  %v1838_v4 = vld [vmem:[%s2792_s19 + $0x6] sm:$0x3] (%p2284_p5) }
 0x225   : > { %1806 = vst.msk [vmem:[%s2792_s19 + $0xe] sm:$0x3] %vm1798_vm0, %v1797_v9  ;;  %1805 = vst.msk [vmem:[%s2792_s19 + $0xc] sm:$0x3] %vm1798_vm0, %v1796_v10 }
 0x226   : > { %1837 = vst [vmem:[%s1815_s15 + $0x8] sm:$0x3] %v1836_v36  ;;  %1839 = vst [vmem:[%s1815_s15 + $0xc] sm:$0x3] %v1838_v4 }
 0x228   : > { %v1840_v8 = vld [vmem:[%s2792_s19 + $0x8] sm:$0x3]  ;;  %v1842_v61 = vld [vmem:[%s2792_s19 + $0xa] sm:$0x3] }
 0x229   : > { %1841 = vst [vmem:[%s1815_s15 + $0x10] sm:$0x3] %v1840_v8  ;;  %1843 = vst [vmem:[%s1815_s15 + $0x14] sm:$0x3] %v1842_v61 }
 0x22c   : > { %v1844_v62 = vld [vmem:[%s2792_s19 + $0xc] sm:$0x3]  ;;  %v1846_v28 = vld [vmem:[%s2792_s19 + $0xe] sm:$0x3] }
 0x22d   : > { %1845 = vst [vmem:[%s1815_s15 + $0x18] sm:$0x3] %v1844_v62  ;;  %1847 = vst [vmem:[%s1815_s15 + $0x1c] sm:$0x3] %v1846_v28 }
 0x22e PF: > { %p13_p10 = scmp.ge.s32.totalorder %s2267_s25, 4   ;;  %s2844_s21 = smov %s2207_s22 }
 0x22f   : > { %s2845_s22 = smov %s2278_s28  ;;  %s2846_s23 = smov %s2267_s25 }
 0x230   :  { %15 = sbr.rel (!%p13_p10) target bundleno = 2 (0x2), region = 316 }

// kernel: shufflenet_v2_forward.29
= control target key start
LH: loop header
LB: loop body
LE: loop exit
PB: predicated region body
PF: predicated region fallthrough
CT: control target
= control target key end

     0   :  { %v125_v0 = vmov 0.0   ;;  %vm126_vm0 = vmmov 0   ;;  %v127_v3 = vmov 0   ;;  %vm42_vm1 = vcmask 130048   ;;  %s166_s0 = inlined_call_operand.vmem [shape: bf16[16,8], index: 0, kind: input, shape index: {}]   ;;  %s167_s1 = inlined_call_operand.vmem [shape: bf16[16,16], index: 1, kind: input, shape index: {}]   ;;  %s168_s2 = inlined_call_operand.vmem [shape: f32[16,1], index: 2, kind: input, shape index: {}]   ;;  %s169_s3 = inlined_call_operand.vmem [shape: bf16[16,8], index: 3, kind: output, shape index: {}]  }
   0x1   :  { %113 = vmatprep.subr.bf16.mxu0 %v125_v0  ;;  %v123_v1 = vld [vmem:[%s166_s0] sm:$0xff]   ;;  %115 = vmatprep.mubr.msk.bf16.mxu0 %vm126_vm0, %v125_v0  ;;  %v20_v5 = vld [vmem:[%s168_s2 + $0x8] sm:$0xff]  ;;  %vm97_vm2 = vcmask 60416  }
   0x2   :  { %v124_v2 = vld [vmem:[%s167_s1] sm:$0xff]   ;;  %122 = vset.pattern.permute.xlu0 %v127_v3  ;;  %114 = vmatpush3.bf16.msra.mxu0 %v123_v1 }
   0x3   :  { %v19_v4 = vld [vmem:[%s168_s2] sm:$0xff] }
   0x4   :  { %23 = vperm.xlu0 %122, %v19_v4  }
   0x5   :  { %116 = vmatmul.mubr.msk.bf16.vlgmr.msra.gmra.mxu0 %vm42_vm1, %v124_v2 }
   0x8   :  { %28 = vperm.xlu0 %122, %v20_v5  }
  0x7f   :  { %v24_v6 = vpop.permute.xlu0 %23 }
  0x83   :  { %v29_v11 = vpop.permute.xlu0 %28 }
  0xc5   :  { %v80_v7 = vpop.f32.mrf.mxu0 }
  0xc6   :  { %v81_v8 = vadd.f32 %v80_v7, %v24_v6 }
  0xc7   :  { %v117_v9 = vpop.f32.mrf.mxu0 }
  0xc8   :  { %v87_v10 = vmax.f32 %v81_v8, 0.0 }
  0xc9   :  { %v83_v12 = vpop.f32.mrf.mxu0 }
  0xca   :  { %v109_v13 = vpack.c.bf16 %v87_v10, %v87_v10  ;;  %v84_v14 = vadd.f32 %v83_v12, %v29_v11 }
  0xcb   :  { %v118_v15 = vpop.f32.mrf.mxu0 }
  0xcc   :  { %98 = vst.msk [vmem:[%s169_s3] sm:$0xf] %vm97_vm2, %v109_v13  ;;  %v88_v16 = vmax.f32 %v84_v14, 0.0 }
  0xce   :  { %v110_v17 = vpack.c.bf16 %v88_v16, %v88_v16 }
  0xd0   :  { %99 = vst.msk [vmem:[%s169_s3 + $0x4] sm:$0xf] %vm97_vm2, %v110_v17 }

// kernel: shufflenet_v2_forward.26
= control target key start
LH: loop header
LB: loop body
LE: loop exit
PB: predicated region body
PF: predicated region fallthrough
CT: control target
= control target key end

     0   :  { %s1892_s12 = smov 0   ;;  %s1894_s13 = smov 0   ;;  %s2507_s0 = inlined_call_operand.vmem [shape: bf16[8,2,6,6], index: 0, kind: input, shape index: {}]   ;;  %s2508_s1 = inlined_call_operand.vmem [shape: f32[9,8,1,1], index: 1, kind: input, shape index: {}]   ;;  %s2509_s2 = inlined_call_operand.vmem [shape: f32[8,1,1], index: 2, kind: input, shape index: {}]   ;;  %s2510_s3 = inlined_call_operand.vmem [shape: bf16[8,2,4,4], index: 3, kind: output, shape index: {}]  }
   0x1   :  { %s1896_s14 = smov 0  }
   0x2 LB: > { %s1659_s15 = sadd.s32 4294967295, %s1867_s14   ;;  %s1909_s16 = sadd.s32 1, %s1867_s14   ;;  %s1867_s14 = sphi %s1896_s14, %s2514_s14   ;;  %s1863_s13 = sphi %s1894_s13, %s2513_s13   ;;  %s1859_s12 = sphi %s1892_s12, %s2512_s12  }
   0x3   : > { %s17_s17 = ssub.s32 %s1867_s14, %s1909_s16  ;;  %s20_s18 = sadd.s32 1, %s1863_s13 }
   0x4   : > { %p18_p0 = scmp.eq.s32.totalorder %s17_s17, 0  ;;  %p27_p1 = scmp.ne.s32.totalorder %s1863_s13, %s1859_s12 }
   0x5   : > { %p28_p2 = scmp.eq.s32.totalorder %s1867_s14, 0  ;;  %p99_p3 = scmp.eq.s32.totalorder %s1659_s15, 1 }
   0x6   : > { %s1920_s19 = scalar_select %p18_p0, %s1863_s13, %s20_s18  }
   0x7   : > { %p29_p4 = por %p28_p2, %p27_p1  ;;  %p1922_p5 = por %p99_p3, %p27_p1 }
   0x8   : > { %p1662_p6 = scmp.ge.s32.totalorder %s1867_s14, 2 }
   0xa   : > { %127 = sbr.rel (%p1662_p6) target bundleno = 24 (0x18), region = 24 }
   0xf   : > { %130 = sbr.rel (!%p29_p4) target bundleno = 24 (0x18), region = 28  ;;  %s132_s21 = sand.u32 (%p29_p4), 1, %s1863_s13  }
  0x10   : > { %s1664_s22 = sshll.u32 (%p29_p4), %s1867_s14, 2  ;;  %s1663_s23 = sshll.u32 (%p29_p4), %s132_s21, 5 }
  0x11   : > { %s136_s26 = scalar_lea.vmem (%p29_p4), %s2507_s0, %s1664_s22  ;;  %s134_s27 = scalar_lea.vmem (%p29_p4), [#allocation2], %s1663_s23 }
  0x12   : > { %v153_v0 = vld [vmem:[%s136_s26] sm:$0xf] (%p29_p4)  ;;  %v155_v1 = vld [vmem:[%s136_s26 + $0x8] sm:$0xf] (%p29_p4)  ;;  %v157_v2 = vld [vmem:[%s136_s26 + $0x10] sm:$0xf] (%p29_p4) }
  0x13   : > { %154 = vst [vmem:[%s134_s27] sm:$0xf] (%p29_p4), %v153_v0  ;;  %156 = vst [vmem:[%s134_s27 + $0x4] sm:$0xf] (%p29_p4), %v155_v1  ;;  %v159_v3 = vld [vmem:[%s136_s26 + $0x18] sm:$0xf] (%p29_p4) }
  0x14   : > { %v161_v4 = vld [vmem:[%s136_s26 + $0x20] sm:$0xf]  ;;  %158 = vst [vmem:[%s134_s27 + $0x8] sm:$0xf] %v157_v2  ;;  %160 = vst [vmem:[%s134_s27 + $0xc] sm:$0xf] %v159_v3 }
  0x15   : > { %162 = vst [vmem:[%s134_s27 + $0x10] sm:$0xf] %v161_v4  ;;  %v163_v5 = vld [vmem:[%s136_s26 + $0x28] sm:$0xf]  ;;  %v165_v6 = vld [vmem:[%s136_s26 + $0x30] sm:$0xf] }
  0x16   : > { %v167_v7 = vld [vmem:[%s136_s26 + $0x38] sm:$0xf]  ;;  %164 = vst [vmem:[%s134_s27 + $0x14] sm:$0xf] %v163_v5  ;;  %166 = vst [vmem:[%s134_s27 + $0x18] sm:$0xf] %v165_v6 }
  0x17   : > { %168 = vst [vmem:[%s134_s27 + $0x1c] sm:$0xf] %v167_v7 }
  0x18 PF: > { %p1665_p7 = scmp.ge.s32.totalorder %s1867_s14, 1  ;;  %p207_p8 = scmp.lt.s32.totalorder %s1867_s14, 3 }
  0x1a   : > { %p208_p9 = pnand %p1665_p7, %p207_p8 }
  0x1b   : > { %s214_s5 = sand.u32 (!%p208_p9), 1, %s1859_s12   ;;  %s1870_s8 = smov (!%p208_p9), 127  }
  0x1c   : > { %211 = sbr.rel (%p208_p9) target bundleno = 685 (0x2ad), region = 69  ;;  %s1666_s6 = sshll.u32 (!%p208_p9), %s214_s5, 5 }
  0x1d   : > { %s2075_s7 = scalar_lea.vmem (!%p208_p9), [#allocation2], %s1666_s6  ;;  %s1871_s9 = smov (!%p208_p9), 126  }
  0x21   : > { %v1670_v8 = vld [vmem:[%s2508_s1 + $0x2] ss:$0 sm:$0xff]  ;;  %v1668_v9 = vld [vmem:[%s2508_s1] ss:$0 sm:$0xff]  ;;  %v1869_v10 = vmov 0   ;;  %vm1516_vm0 = vcmask 25600  }
  0x22   : > { %1844 = vset.pattern.permute.xlu1 %v1869_v10  ;;  %1843 = vset.pattern.permute.xlu0 %v1869_v10  ;;  %v1671_v11 = vld [vmem:[%s2508_s1 + $0x3] ss:$0 sm:$0xff]  ;;  %v1669_v12 = vld [vmem:[%s2508_s1 + $0x1] ss:$0 sm:$0xff]  ;;  %v1673_v13 = vld [vmem:[%s2508_s1 + $0x5] ss:$0 sm:$0xff] }
  0x23   : > { %309 = vperm.xlu1 %1844, %v1670_v8   ;;  %301 = vperm.xlu0 %1843, %v1668_v9   ;;  %v1672_v14 = vld [vmem:[%s2508_s1 + $0x4] ss:$0 sm:$0xff]  ;;  %v1675_v15 = vld [vmem:[%s2508_s1 + $0x7] ss:$0 sm:$0xff]  ;;  %v1674_v16 = vld [vmem:[%s2508_s1 + $0x6] ss:$0 sm:$0xff] }
  0x24   : > { %v1685_v17 = vld [vmem:[%s2508_s1 + $0x9] ss:$0 sm:$0xff]  ;;  %v1684_v18 = vld [vmem:[%s2508_s1 + $0x8] ss:$0 sm:$0xff]  ;;  %v1687_v19 = vld [vmem:[%s2508_s1 + $0xb] ss:$0 sm:$0xff] }
  0x25   : > { %v1686_v20 = vld [vmem:[%s2508_s1 + $0xa] ss:$0 sm:$0xff]  ;;  %v1689_v21 = vld [vmem:[%s2508_s1 + $0xd] ss:$0 sm:$0xff]  ;;  %v1688_v22 = vld [vmem:[%s2508_s1 + $0xc] ss:$0 sm:$0xff] }
  0x26   : > { %v1691_v23 = vld [vmem:[%s2508_s1 + $0xf] ss:$0 sm:$0xff]  ;;  %v1690_v24 = vld [vmem:[%s2508_s1 + $0xe] ss:$0 sm:$0xff]  ;;  %v1701_v25 = vld [vmem:[%s2508_s1 + $0x11] ss:$0 sm:$0xff] }
  0x27   : > { %313 = vperm.xlu1 %1844, %v1671_v11   ;;  %305 = vperm.xlu0 %1843, %v1669_v12   ;;  %v1700_v26 = vld [vmem:[%s2508_s1 + $0x10] ss:$0 sm:$0xff]  ;;  %v1703_v27 = vld [vmem:[%s2508_s1 + $0x13] ss:$0 sm:$0xff]  ;;  %v1702_v28 = vld [vmem:[%s2508_s1 + $0x12] ss:$0 sm:$0xff] }
  0x28   : > { %v1705_v29 = vld [vmem:[%s2508_s1 + $0x15] ss:$0 sm:$0xff]  ;;  %v1704_v30 = vld [vmem:[%s2508_s1 + $0x14] ss:$0 sm:$0xff]  ;;  %v1707_v31 = vld [vmem:[%s2508_s1 + $0x17] ss:$0 sm:$0xff] }
  0x29   : > { %v1706_v32 = vld [vmem:[%s2508_s1 + $0x16] ss:$0 sm:$0xff]  ;;  %v1717_v33 = vld [vmem:[%s2508_s1 + $0x19] ss:$0 sm:$0xff]  ;;  %v1716_v34 = vld [vmem:[%s2508_s1 + $0x18] ss:$0 sm:$0xff] }
  0x2a   : > { %v1719_v35 = vld [vmem:[%s2508_s1 + $0x1b] ss:$0 sm:$0xff]  ;;  %v1718_v36 = vld [vmem:[%s2508_s1 + $0x1a] ss:$0 sm:$0xff]  ;;  %v1721_v37 = vld [vmem:[%s2508_s1 + $0x1d] ss:$0 sm:$0xff] }
  0x2b   : > { %321 = vperm.xlu1 %1844, %v1673_v13   ;;  %317 = vperm.xlu0 %1843, %v1672_v14   ;;  %v1720_v38 = vld [vmem:[%s2508_s1 + $0x1c] ss:$0 sm:$0xff]  ;;  %v1723_v39 = vld [vmem:[%s2508_s1 + $0x1f] ss:$0 sm:$0xff]  ;;  %v1722_v40 = vld [vmem:[%s2508_s1 + $0x1e] ss:$0 sm:$0xff] }
  0x2c   : > { %v1733_v41 = vld [vmem:[%s2508_s1 + $0x21] ss:$0 sm:$0xff]  ;;  %v1732_v42 = vld [vmem:[%s2508_s1 + $0x20] ss:$0 sm:$0xff]  ;;  %v1735_v43 = vld [vmem:[%s2508_s1 + $0x23] ss:$0 sm:$0xff] }
  0x2d   : > { %v1734_v44 = vld [vmem:[%s2508_s1 + $0x22] ss:$0 sm:$0xff]  ;;  %v1737_v45 = vld [vmem:[%s2508_s1 + $0x25] ss:$0 sm:$0xff]  ;;  %v1736_v46 = vld [vmem:[%s2508_s1 + $0x24] ss:$0 sm:$0xff] }
  0x2e   : > { %v1739_v47 = vld [vmem:[%s2508_s1 + $0x27] ss:$0 sm:$0xff]  ;;  %v1738_v48 = vld [vmem:[%s2508_s1 + $0x26] ss:$0 sm:$0xff]  ;;  %v1749_v49 = vld [vmem:[%s2508_s1 + $0x29] ss:$0 sm:$0xff] }
  0x2f   : > { %329 = vperm.xlu1 %1844, %v1675_v15   ;;  %325 = vperm.xlu0 %1843, %v1674_v16   ;;  %v1748_v50 = vld [vmem:[%s2508_s1 + $0x28] ss:$0 sm:$0xff]  ;;  %v236_v57 = vld [vmem:[%s2075_s7] sm:$0x3]  ;;  %v237_v58 = vld [vmem:[%s2075_s7 + $0x4] sm:$0x3] }
  0x30   : > { %v2083_v61 = vunpack.c.l.bf16 %v236_v57  ;;  %v2085_v62 = vunpack.c.l.bf16 %v237_v58  ;;  %v238_v63 = vld [vmem:[%s2075_s7 + $0x8] sm:$0x3]  ;;  %v239_v0 = vld [vmem:[%s2075_s7 + $0xc] sm:$0x3]  ;;  %v241_v7 = vld [vmem:[%s2075_s7 + $0x14] sm:$0x3] }
  0x31   : > { %v2091_v5 = vunpack.c.l.bf16 %v238_v63  ;;  %v2093_v6 = vunpack.c.l.bf16 %v239_v0  ;;  %v240_v8 = vld [vmem:[%s2075_s7 + $0x10] sm:$0x3]  ;;  %v2101_v13 = vunpack.c.l.bf16 %v241_v7  ;;  %v243_v15 = vld [vmem:[%s2075_s7 + $0x1c] sm:$0x3]  ;;  %v242_v16 = vld [vmem:[%s2075_s7 + $0x18] sm:$0x3] }
  0x32   : > { %v2103_v14 = vunpack.c.l.bf16 %v240_v8  ;;  %s1813_s12 = sshll.u32 (%p1922_p5), %s1659_s15, 1 }
  0x33   : > { %394 = vperm.xlu1 %1844, %v1685_v17   ;;  %390 = vperm.xlu0 %1843, %v1684_v18   ;;  %s1533_s29 = scalar_lea.vmem (%p1922_p5), %s2510_s3, %s1813_s12 }
  0x37   : > { %402 = vperm.xlu1 %1844, %v1687_v19   ;;  %398 = vperm.xlu0 %1843, %v1686_v20  }
  0x3b   : > { %410 = vperm.xlu1 %1844, %v1689_v21   ;;  %406 = vperm.xlu0 %1843, %v1688_v22   ;;  %v2111_v21 = vunpack.c.l.bf16 %v243_v15  ;;  %v2113_v22 = vunpack.c.l.bf16 %v242_v16  ;;  %v603_v15 = vld [vmem:[%s2075_s7 + $0x14] sm:$0x7]  ;;  %v602_v16 = vld [vmem:[%s2075_s7 + $0x10] sm:$0x7] }
  0x3f   : > { %418 = vperm.xlu1 %1844, %v1691_v23   ;;  %414 = vperm.xlu0 %1843, %v1690_v24  }
  0x43   : > { %523 = vperm.xlu1 %1844, %v1701_v25   ;;  %519 = vperm.xlu0 %1843, %v1700_v26  }
  0x47   : > { %531 = vperm.xlu1 %1844, %v1703_v27   ;;  %527 = vperm.xlu0 %1843, %v1702_v28  }
  0x4b   : > { %539 = vperm.xlu1 %1844, %v1705_v29   ;;  %535 = vperm.xlu0 %1843, %v1704_v30  }
  0x4f   : > { %547 = vperm.xlu1 %1844, %v1707_v31   ;;  %543 = vperm.xlu0 %1843, %v1706_v32  }
  0x53   : > { %668 = vperm.xlu1 %1844, %v1717_v33   ;;  %664 = vperm.xlu0 %1843, %v1716_v34  }
  0x57   : > { %676 = vperm.xlu1 %1844, %v1719_v35   ;;  %672 = vperm.xlu0 %1843, %v1718_v36  }
  0x5b   : > { %684 = vperm.xlu1 %1844, %v1721_v37   ;;  %680 = vperm.xlu0 %1843, %v1720_v38  }
  0x5f   : > { %692 = vperm.xlu1 %1844, %v1723_v39   ;;  %688 = vperm.xlu0 %1843, %v1722_v40  }
  0x63   : > { %789 = vperm.xlu1 %1844, %v1733_v41   ;;  %785 = vperm.xlu0 %1843, %v1732_v42  }
  0x67   : > { %797 = vperm.xlu1 %1844, %v1735_v43   ;;  %793 = vperm.xlu0 %1843, %v1734_v44  }
  0x6b   : > { %805 = vperm.xlu1 %1844, %v1737_v45   ;;  %801 = vperm.xlu0 %1843, %v1736_v46  }
  0x6f   : > { %813 = vperm.xlu1 %1844, %v1739_v47   ;;  %809 = vperm.xlu0 %1843, %v1738_v48  }
  0x73   : > { %926 = vperm.xlu1 %1844, %v1749_v49   ;;  %922 = vperm.xlu0 %1843, %v1748_v50   ;;  %v599_v49 = vld [vmem:[%s2075_s7 + $0x4] sm:$0x7]  ;;  %v598_v50 = vld [vmem:[%s2075_s7] sm:$0x7] }
  0x74   : > { %v2155_v63 = vunpack.c.l.bf16 %v599_v49  ;;  %v2157_v0 = vunpack.c.l.bf16 %v598_v50  ;;  %v1751_v49 = vld [vmem:[%s2508_s1 + $0x2b] ss:$0 sm:$0xff]  ;;  %v1750_v50 = vld [vmem:[%s2508_s1 + $0x2a] ss:$0 sm:$0xff] }
  0x9e   : > { %v2060_v51 = vpop.permute.xlu1 %309  ;;  %v2062_v52 = vpop.permute.xlu0 %301 }
  0xa2   : > { %v2065_v53 = vpop.permute.xlu1 %313  ;;  %v2067_v54 = vpop.permute.xlu0 %305 }
  0xa6   : > { %v2071_v55 = vpop.permute.xlu1 %321  ;;  %v2073_v56 = vpop.permute.xlu0 %317 }
  0xaa   : > { %v2079_v59 = vpop.permute.xlu1 %329  ;;  %v2081_v60 = vpop.permute.xlu0 %325 }
  0xae   : > { %v395_v1 = vpop.permute.xlu1 %394  ;;  %v391_v2 = vpop.permute.xlu0 %390 }
  0xaf   : > { %v422_v3 = vmul.f32 %v395_v1, %v2085_v62  ;;  %v421_v4 = vmul.f32 %v391_v2, %v2083_v61  ;;  %v601_v1 = vld [vmem:[%s2075_s7 + $0xc] sm:$0x7]  ;;  %v600_v2 = vld [vmem:[%s2075_s7 + $0x8] sm:$0x7] }
  0xb1   : > { %439 = vrot.lane.b32.xlu1 %v422_v3, %s1870_s8  ;;  %437 = vrot.lane.b32.xlu0 %v421_v4, %s1870_s8 }
  0xb2   : > { %v403_v9 = vpop.permute.xlu1 %402  ;;  %v399_v10 = vpop.permute.xlu0 %398 }
  0xb3   : > { %v424_v11 = vmul.f32 %v403_v9, %v2093_v6  ;;  %v423_v12 = vmul.f32 %v399_v10, %v2091_v5  ;;  %v2163_v9 = vunpack.c.l.bf16 %v601_v1  ;;  %v2165_v10 = vunpack.c.l.bf16 %v600_v2  ;;  %v1753_v1 = vld [vmem:[%s2508_s1 + $0x2d] ss:$0 sm:$0xff]  ;;  %v1752_v2 = vld [vmem:[%s2508_s1 + $0x2c] ss:$0 sm:$0xff] }
  0xb5   : > { %443 = vrot.lane.b32.xlu1 %v424_v11, %s1870_s8  ;;  %441 = vrot.lane.b32.xlu0 %v423_v12, %s1870_s8 }
  0xb6   : > { %v411_v17 = vpop.permute.xlu1 %410  ;;  %v407_v18 = vpop.permute.xlu0 %406 }
  0xb7   : > { %v426_v19 = vmul.f32 %v411_v17, %v2101_v13  ;;  %v425_v20 = vmul.f32 %v407_v18, %v2103_v14 }
  0xb9   : > { %447 = vrot.lane.b32.xlu1 %v426_v19, %s1870_s8  ;;  %445 = vrot.lane.b32.xlu0 %v425_v20, %s1870_s8 }
  0xba   : > { %v419_v23 = vpop.permute.xlu1 %418  ;;  %v415_v24 = vpop.permute.xlu0 %414 }
  0xbb   : > { %v428_v25 = vmul.f32 %v419_v23, %v2111_v21  ;;  %v427_v26 = vmul.f32 %v415_v24, %v2113_v22  ;;  %v2173_v23 = vunpack.c.l.bf16 %v603_v15  ;;  %v2175_v24 = vunpack.c.l.bf16 %v602_v16 }
  0xbd   : > { %451 = vrot.lane.b32.xlu1 %v428_v25, %s1870_s8  ;;  %449 = vrot.lane.b32.xlu0 %v427_v26, %s1870_s8 }
  0xbe   : > { %v524_v27 = vpop.permute.xlu1 %523  ;;  %v520_v28 = vpop.permute.xlu0 %519 }
  0xbf   : > { %v551_v29 = vmul.f32 %v524_v27, %v2085_v62  ;;  %v550_v30 = vmul.f32 %v520_v28, %v2083_v61  ;;  %v605_v27 = vld [vmem:[%s2075_s7 + $0x1c] sm:$0x7]  ;;  %v604_v28 = vld [vmem:[%s2075_s7 + $0x18] sm:$0x7] }
  0xc1   : > { %568 = vrot.lane.b32.xlu1 %v551_v29, %s1871_s9  ;;  %566 = vrot.lane.b32.xlu0 %v550_v30, %s1871_s9 }
  0xc2   : > { %v532_v31 = vpop.permute.xlu1 %531  ;;  %v528_v32 = vpop.permute.xlu0 %527 }
  0xc3   : > { %v553_v33 = vmul.f32 %v532_v31, %v2093_v6  ;;  %v552_v34 = vmul.f32 %v528_v32, %v2091_v5 }
  0xc5   : > { %572 = vrot.lane.b32.xlu1 %v553_v33, %s1871_s9  ;;  %570 = vrot.lane.b32.xlu0 %v552_v34, %s1871_s9  ;;  %v2183_v33 = vunpack.c.l.bf16 %v605_v27  ;;  %v2185_v34 = vunpack.c.l.bf16 %v604_v28  ;;  %v334_v27 = vmul.f32 %v2060_v51, %v2091_v5  ;;  %v335_v28 = vmul.f32 %v2065_v53, %v2093_v6 }
  0xc6   : > { %v540_v35 = vpop.permute.xlu1 %539  ;;  %v536_v36 = vpop.permute.xlu0 %535  ;;  %v339_v51 = vmul.f32 %v2079_v59, %v2111_v21  ;;  %v338_v53 = vmul.f32 %v2081_v60, %v2113_v22 }
  0xc7   : > { %v555_v37 = vmul.f32 %v540_v35, %v2101_v13  ;;  %v554_v38 = vmul.f32 %v536_v36, %v2103_v14 }
  0xc9   : > { %576 = vrot.lane.b32.xlu1 %v555_v37, %s1871_s9  ;;  %574 = vrot.lane.b32.xlu0 %v554_v38, %s1871_s9 }
  0xca   : > { %v548_v39 = vpop.permute.xlu1 %547  ;;  %v544_v40 = vpop.permute.xlu0 %543 }
  0xcb   : > { %v557_v41 = vmul.f32 %v548_v39, %v2111_v21  ;;  %v556_v42 = vmul.f32 %v544_v40, %v2113_v22 }
  0xcd   : > { %580 = vrot.lane.b32.xlu1 %v557_v41, %s1871_s9  ;;  %578 = vrot.lane.b32.xlu0 %v556_v42, %s1871_s9 }
  0xce   : > { %v2137_v43 = vpop.permute.xlu1 %668  ;;  %v2139_v44 = vpop.permute.xlu0 %664 }
  0xd2   : > { %v2141_v45 = vpop.permute.xlu1 %676  ;;  %v2143_v46 = vpop.permute.xlu0 %672 }
  0xd6   : > { %v2145_v47 = vpop.permute.xlu1 %684  ;;  %v2147_v48 = vpop.permute.xlu0 %680 }
  0xda   : > { %v2151_v57 = vpop.permute.xlu1 %692  ;;  %v2153_v58 = vpop.permute.xlu0 %688 }
  0xde   : > { %v790_v3 = vpop.permute.xlu1 %789  ;;  %v786_v4 = vpop.permute.xlu0 %785 }
  0xdf   : > { %v817_v7 = vmul.f32 %v790_v3, %v2155_v63  ;;  %v816_v8 = vmul.f32 %v786_v4, %v2157_v0 }
  0xe1   : > { %v833_v11 = vrot.slane %v817_v7, 1  ;;  %v832_v12 = vrot.slane %v816_v8, 1  ;;  %v1755_v7 = vld [vmem:[%s2508_s1 + $0x2f] ss:$0 sm:$0xff]  ;;  %v1754_v8 = vld [vmem:[%s2508_s1 + $0x2e] ss:$0 sm:$0xff] }
  0xe2   : > { %v798_v17 = vpop.permute.xlu1 %797  ;;  %v794_v18 = vpop.permute.xlu0 %793 }
  0xe3   : > { %v819_v19 = vmul.f32 %v798_v17, %v2163_v9  ;;  %v818_v20 = vmul.f32 %v794_v18, %v2165_v10  ;;  %842 = vrot.lane.b32.xlu1 %v833_v11, %s1870_s8  ;;  %840 = vrot.lane.b32.xlu0 %v832_v12, %s1870_s8  ;;  %v332_v17 = vmul.f32 %v2062_v52, %v2083_v61 }
  0xe4   : > { %v333_v18 = vmul.f32 %v2067_v54, %v2085_v62  ;;  %v337_v52 = vmul.f32 %v2071_v55, %v2101_v13  ;;  %v336_v54 = vmul.f32 %v2073_v56, %v2103_v14  ;;  %v695_v55 = vmul.f32 %v2139_v44, %v2157_v0 }
  0xe5   : > { %v835_v25 = vrot.slane %v819_v19, 1  ;;  %v834_v26 = vrot.slane %v818_v20, 1  ;;  %v701_v44 = vmul.f32 %v2153_v58, %v2185_v34 }
  0xe6   : > { %v806_v29 = vpop.permute.xlu1 %805  ;;  %v802_v30 = vpop.permute.xlu0 %801 }
  0xe7   : > { %v821_v31 = vmul.f32 %v806_v29, %v2173_v23  ;;  %v820_v32 = vmul.f32 %v802_v30, %v2175_v24  ;;  %846 = vrot.lane.b32.xlu1 %v835_v25, %s1870_s8  ;;  %844 = vrot.lane.b32.xlu0 %v834_v26, %s1870_s8 }
  0xe9   : > { %v837_v35 = vrot.slane %v821_v31, 1  ;;  %v836_v36 = vrot.slane %v820_v32, 1 }
  0xea   : > { %v814_v37 = vpop.permute.xlu1 %813  ;;  %v810_v38 = vpop.permute.xlu0 %809 }
  0xeb   : > { %v823_v39 = vmul.f32 %v814_v37, %v2183_v33  ;;  %v822_v40 = vmul.f32 %v810_v38, %v2185_v34  ;;  %850 = vrot.lane.b32.xlu1 %v837_v35, %s1870_s8  ;;  %848 = vrot.lane.b32.xlu0 %v836_v36, %s1870_s8  ;;  %v696_v37 = vmul.f32 %v2137_v43, %v2155_v63 }
  0xec   : > { %v702_v43 = vmul.f32 %v2151_v57, %v2183_v33 }
  0xed   : > { %v839_v41 = vrot.slane %v823_v39, 1  ;;  %v838_v42 = vrot.slane %v822_v40, 1  ;;  %v712_v39 = vrot.slane %v696_v37, 1  ;;  %v711_v40 = vrot.slane %v695_v55, 1 }
  0xee   : > { %v927_v3 = vpop.permute.xlu1 %926  ;;  %v923_v4 = vpop.permute.xlu0 %922 }
  0xef   : > { %854 = vrot.lane.b32.xlu1 %v839_v41, %s1870_s8  ;;  %852 = vrot.lane.b32.xlu0 %v838_v42, %s1870_s8  ;;  %v954_v11 = vmul.f32 %v927_v3, %v2155_v63  ;;  %v953_v12 = vmul.f32 %v923_v4, %v2157_v0 }
  0xf1   : > { %v970_v15 = vrot.slane %v954_v11, 1  ;;  %v969_v16 = vrot.slane %v953_v12, 1 }
  0xf3   : > { %934 = vperm.xlu1 %1844, %v1751_v49   ;;  %930 = vperm.xlu0 %1843, %v1750_v50  }
  0xf7   : > { %942 = vperm.xlu1 %1844, %v1753_v1   ;;  %938 = vperm.xlu0 %1843, %v1752_v2  }
  0xfb   : > { %950 = vperm.xlu1 %1844, %v1755_v7   ;;  %946 = vperm.xlu0 %1843, %v1754_v8   ;;  %v718_v7 = vrot.slane %v702_v43, 1  ;;  %v717_v8 = vrot.slane %v701_v44, 1  ;;  %v1780_v43 = vld [vmem:[%s2508_s1 + $0x38] ss:$0 sm:$0xff]  ;;  %v1770_v44 = vld [vmem:[%s2508_s1 + $0x36] ss:$0 sm:$0xff] }
  0xff   : > { %979 = vrot.lane.b32.xlu1 %v970_v15, %s1871_s9  ;;  %977 = vrot.lane.b32.xlu0 %v969_v16, %s1871_s9 }
 0x123   : > { %v440_v19 = vpop.permute.xlu1 %439  ;;  %v438_v20 = vpop.permute.xlu0 %437 }
 0x124   : > { %v462_v25 = vadd.f32 %v440_v19, %v333_v18  ;;  %v461_v26 = vadd.f32 %v438_v20, %v332_v17  ;;  %v698_v17 = vmul.f32 %v2141_v45, %v2163_v9  ;;  %v697_v18 = vmul.f32 %v2143_v46, %v2165_v10 }
 0x126   : > { %v714_v57 = vrot.slane %v698_v17, 1  ;;  %v713_v19 = vrot.slane %v697_v18, 1  ;;  %v1800_v17 = vld [vmem:[%s2508_s1 + $0x44] ss:$0 sm:$0xff]  ;;  %v1799_v18 = vld [vmem:[%s2508_s1 + $0x43] ss:$0 sm:$0xff] }
 0x127   : > { %v444_v29 = vpop.permute.xlu1 %443  ;;  %v442_v30 = vpop.permute.xlu0 %441 }
 0x128   : > { %v464_v31 = vadd.f32 %v444_v29, %v335_v28  ;;  %v463_v32 = vadd.f32 %v442_v30, %v334_v27 }
 0x12b   : > { %v448_v61 = vpop.permute.xlu1 %447  ;;  %v446_v62 = vpop.permute.xlu0 %445 }
 0x12c   : > { %v466_v35 = vadd.f32 %v448_v61, %v337_v52  ;;  %v465_v36 = vadd.f32 %v446_v62, %v336_v54 }
 0x12f   : > { %v452_v5 = vpop.permute.xlu1 %451  ;;  %v450_v6 = vpop.permute.xlu0 %449 }
 0x130   : > { %v468_v13 = vadd.f32 %v452_v5, %v339_v51  ;;  %v467_v56 = vadd.f32 %v450_v6, %v338_v53 }
 0x133   : > { %v569_v14 = vpop.permute.xlu1 %568  ;;  %v567_v38 = vpop.permute.xlu0 %566 }
 0x134   : > { %v591_v41 = vadd.f32 %v569_v14, %v462_v25  ;;  %v590_v42 = vadd.f32 %v567_v38, %v461_v26  ;;  %v700_v25 = vmul.f32 %v2145_v47, %v2173_v23  ;;  %v699_v26 = vmul.f32 %v2147_v48, %v2175_v24 }
 0x136   : > { %v728_v59 = vadd.f32 %v712_v39, %v591_v41  ;;  %v727_v21 = vadd.f32 %v711_v40, %v590_v42  ;;  %v715_v46 = vrot.slane %v699_v26, 1  ;;  %v1804_v26 = vld [vmem:[%s2509_s2] ss:$0 sm:$0xff] }
 0x137   : > { %v573_v49 = vpop.permute.xlu1 %572  ;;  %v571_v60 = vpop.permute.xlu0 %570 }
 0x138   : > { %v593_v22 = vadd.f32 %v573_v49, %v464_v31  ;;  %v592_v50 = vadd.f32 %v571_v60, %v463_v32  ;;  %v716_v32 = vrot.slane %v700_v25, 1  ;;  %v1805_v25 = vld [vmem:[%s2509_s2 + $0x1] ss:$0 sm:$0xff] }
 0x13a   : > { %v730_v29 = vadd.f32 %v714_v57, %v593_v22  ;;  %v729_v30 = vadd.f32 %v713_v19, %v592_v50  ;;  %v1766_v50 = vld [vmem:[%s2508_s1 + $0x32] ss:$0 sm:$0xff]  ;;  %v1802_v57 = vld [vmem:[%s2508_s1 + $0x46] ss:$0 sm:$0xff]  ;;  %v1801_v19 = vld [vmem:[%s2508_s1 + $0x45] ss:$0 sm:$0xff] }
 0x13b   : > { %v577_v1 = vpop.permute.xlu1 %576  ;;  %v575_v2 = vpop.permute.xlu0 %574 }
 0x13c   : > { %v595_v63 = vadd.f32 %v577_v1, %v466_v35  ;;  %v594_v0 = vadd.f32 %v575_v2, %v465_v36  ;;  %v1769_v1 = vld [vmem:[%s2508_s1 + $0x35] ss:$0 sm:$0xff]  ;;  %v1768_v2 = vld [vmem:[%s2508_s1 + $0x34] ss:$0 sm:$0xff] }
 0x13e   : > { %v732_v61 = vadd.f32 %v716_v32, %v595_v63  ;;  %v731_v62 = vadd.f32 %v715_v46, %v594_v0  ;;  %v1782_v63 = vld [vmem:[%s2508_s1 + $0x3a] ss:$0 sm:$0xff]  ;;  %v1781_v0 = vld [vmem:[%s2508_s1 + $0x39] ss:$0 sm:$0xff]  ;;  %v1811_v32 = vld [vmem:[%s2509_s2 + $0x7] ss:$0 sm:$0xff] }
 0x13f   : > { %v581_v3 = vpop.permute.xlu1 %580  ;;  %v579_v4 = vpop.permute.xlu0 %578  ;;  %v1810_v46 = vld [vmem:[%s2509_s2 + $0x6] ss:$0 sm:$0xff] }
 0x140   : > { %v597_v11 = vadd.f32 %v581_v3, %v468_v13  ;;  %v596_v12 = vadd.f32 %v579_v4, %v467_v56  ;;  %v1784_v3 = vld [vmem:[%s2508_s1 + $0x3c] ss:$0 sm:$0xff]  ;;  %v1783_v4 = vld [vmem:[%s2508_s1 + $0x3b] ss:$0 sm:$0xff] }
 0x142   : > { %v734_v15 = vadd.f32 %v718_v7, %v597_v11  ;;  %v733_v16 = vadd.f32 %v717_v8, %v596_v12  ;;  %v1786_v7 = vld [vmem:[%s2508_s1 + $0x3e] ss:$0 sm:$0xff]  ;;  %v1785_v8 = vld [vmem:[%s2508_s1 + $0x3d] ss:$0 sm:$0xff]  ;;  %v1796_v11 = vld [vmem:[%s2508_s1 + $0x40] ss:$0 sm:$0xff] }
 0x143   : > { %v1787_v12 = vld [vmem:[%s2508_s1 + $0x3f] ss:$0 sm:$0xff] }
 0x155   : > { %v843_v20 = vpop.permute.xlu1 %842  ;;  %v841_v58 = vpop.permute.xlu0 %840 }
 0x156   : > { %v2247_v27 = vadd.f32 %v843_v20, %v728_v59  ;;  %v2249_v28 = vadd.f32 %v841_v58, %v727_v21  ;;  %v1771_v20 = vld [vmem:[%s2508_s1 + $0x37] ss:$0 sm:$0xff]  ;;  %v1803_v58 = vld [vmem:[%s2508_s1 + $0x47] ss:$0 sm:$0xff] }
 0x159   : > { %v847_v45 = vpop.permute.xlu1 %846  ;;  %v845_v31 = vpop.permute.xlu0 %844 }
 0x15a   : > { %v2251_v52 = vadd.f32 %v847_v45, %v730_v29  ;;  %v2253_v54 = vadd.f32 %v845_v31, %v729_v30  ;;  %v1807_v29 = vld [vmem:[%s2509_s2 + $0x3] ss:$0 sm:$0xff]  ;;  %v1806_v30 = vld [vmem:[%s2509_s2 + $0x2] ss:$0 sm:$0xff]  ;;  %v1809_v45 = vld [vmem:[%s2509_s2 + $0x5] ss:$0 sm:$0xff] }
 0x15b   : > { %v1808_v31 = vld [vmem:[%s2509_s2 + $0x4] ss:$0 sm:$0xff] }
 0x15d   : > { %v851_v47 = vpop.permute.xlu1 %850  ;;  %v849_v35 = vpop.permute.xlu0 %848 }
 0x15e   : > { %v2255_v36 = vadd.f32 %v851_v47, %v732_v61  ;;  %v2257_v48 = vadd.f32 %v849_v35, %v731_v62 }
 0x161   : > { %v855_v51 = vpop.permute.xlu1 %854  ;;  %v853_v53 = vpop.permute.xlu0 %852 }
 0x162   : > { %v2259_v5 = vadd.f32 %v855_v51, %v734_v15  ;;  %v2261_v6 = vadd.f32 %v853_v53, %v733_v16  ;;  %v1798_v15 = vld [vmem:[%s2508_s1 + $0x42] ss:$0 sm:$0xff]  ;;  %v1797_v16 = vld [vmem:[%s2508_s1 + $0x41] ss:$0 sm:$0xff] }
 0x16e   : > { %v935_v37 = vpop.permute.xlu1 %934  ;;  %v931_v55 = vpop.permute.xlu0 %930 }
 0x16f   : > { %v956_v13 = vmul.f32 %v935_v37, %v2163_v9  ;;  %v955_v56 = vmul.f32 %v931_v55, %v2165_v10 }
 0x171   : > { %v972_v14 = vrot.slane %v956_v13, 1  ;;  %v971_v38 = vrot.slane %v955_v56, 1 }
 0x172   : > { %v943_v39 = vpop.permute.xlu1 %942  ;;  %v939_v40 = vpop.permute.xlu0 %938 }
 0x173   : > { %v958_v41 = vmul.f32 %v943_v39, %v2173_v23  ;;  %v957_v42 = vmul.f32 %v939_v40, %v2175_v24  ;;  %983 = vrot.lane.b32.xlu1 %v972_v14, %s1871_s9  ;;  %981 = vrot.lane.b32.xlu0 %v971_v38, %s1871_s9  ;;  %v1765_v24 = vld [vmem:[%s2508_s1 + $0x31] ss:$0 sm:$0xff] }
 0x175   : > { %v974_v59 = vrot.slane %v958_v41, 1  ;;  %v973_v21 = vrot.slane %v957_v42, 1  ;;  %v1010_v41 = vld [vmem:[%s2075_s7 + $0x4] sm:$0x6]  ;;  %v1009_v42 = vld [vmem:[%s2075_s7] sm:$0x6] }
 0x176   : > { %v951_v49 = vpop.permute.xlu1 %950  ;;  %v947_v60 = vpop.permute.xlu0 %946 }
 0x177   : > { %v960_v9 = vmul.f32 %v951_v49, %v2183_v33  ;;  %v959_v10 = vmul.f32 %v947_v60, %v2185_v34  ;;  %987 = vrot.lane.b32.xlu1 %v974_v59, %s1871_s9  ;;  %985 = vrot.lane.b32.xlu0 %v973_v21, %s1871_s9  ;;  %v1764_v33 = vld [vmem:[%s2508_s1 + $0x30] ss:$0 sm:$0xff]  ;;  %v1767_v34 = vld [vmem:[%s2508_s1 + $0x33] ss:$0 sm:$0xff] }
 0x178   : > { %v1012_v59 = vld [vmem:[%s2075_s7 + $0xc] sm:$0x6]  ;;  %v1011_v21 = vld [vmem:[%s2075_s7 + $0x8] sm:$0x6] }
 0x179   : > { %v976_v22 = vrot.slane %v960_v9, 1  ;;  %v975_v23 = vrot.slane %v959_v10, 1  ;;  %v2389_v9 = vunpack.c.l.bf16 %v1012_v59  ;;  %v1013_v10 = vld [vmem:[%s2075_s7 + $0x10] sm:$0x6] }
 0x17a   : > { %v980_v61 = vpop.permute.xlu1 %979  ;;  %v978_v62 = vpop.permute.xlu0 %977 }
 0x17b   : > { %991 = vrot.lane.b32.xlu1 %v976_v22, %s1871_s9  ;;  %989 = vrot.lane.b32.xlu0 %v975_v23, %s1871_s9  ;;  %v1002_v22 = vadd.f32 %v980_v61, %v2247_v27  ;;  %v1001_v23 = vadd.f32 %v978_v62, %v2249_v28 }
 0x17f   : > { %1079 = vperm.xlu1 %1844, %v1765_v24   ;;  %1075 = vperm.xlu0 %1843, %v1764_v33  }
 0x183   : > { %1087 = vperm.xlu1 %1844, %v1767_v34   ;;  %1083 = vperm.xlu0 %1843, %v1766_v50  }
 0x187   : > { %1095 = vperm.xlu1 %1844, %v1769_v1   ;;  %1091 = vperm.xlu0 %1843, %v1768_v2   ;;  %v2399_v2 = vunpack.c.l.bf16 %v1013_v10 }
 0x18b   : > { %1196 = vperm.xlu1 %1844, %v1780_v43   ;;  %1099 = vperm.xlu0 %1843, %v1770_v44  }
 0x18f   : > { %1204 = vperm.xlu1 %1844, %v1782_v63   ;;  %1200 = vperm.xlu0 %1843, %v1781_v0   ;;  %v1015_v63 = vld [vmem:[%s2075_s7 + $0x18] sm:$0x6] }
 0x193   : > { %1212 = vperm.xlu1 %1844, %v1784_v3   ;;  %1208 = vperm.xlu0 %1843, %v1783_v4  }
 0x197   : > { %1220 = vperm.xlu1 %1844, %v1786_v7   ;;  %1216 = vperm.xlu0 %1843, %v1785_v8   ;;  %v2408_v8 = vunpack.c.l.bf16 %v1015_v63 }
 0x19b   : > { %1333 = vperm.xlu1 %1844, %v1796_v11   ;;  %1224 = vperm.xlu0 %1843, %v1787_v12  }
 0x19f   : > { %1341 = vperm.xlu1 %1844, %v1798_v15   ;;  %1337 = vperm.xlu0 %1843, %v1797_v16  }
 0x1a3   : > { %1349 = vperm.xlu1 %1844, %v1800_v17   ;;  %1345 = vperm.xlu0 %1843, %v1799_v18  }
 0x1a7   : > { %1357 = vperm.xlu1 %1844, %v1802_v57   ;;  %1353 = vperm.xlu0 %1843, %v1801_v19  }
 0x1ab   : > { %1103 = vperm.xlu1 %1844, %v1771_v20   ;;  %1361 = vperm.xlu0 %1843, %v1803_v58  }
 0x1af   : > { %1473 = vperm.xlu1 %1844, %v1805_v25   ;;  %1469 = vperm.xlu0 %1843, %v1804_v26  }
 0x1b3   : > { %1481 = vperm.xlu1 %1844, %v1807_v29   ;;  %1477 = vperm.xlu0 %1843, %v1806_v30  }
 0x1b7   : > { %1489 = vperm.xlu1 %1844, %v1809_v45   ;;  %1485 = vperm.xlu0 %1843, %v1808_v31  }
 0x1bb   : > { %1497 = vperm.xlu1 %1844, %v1811_v32   ;;  %1493 = vperm.xlu0 %1843, %v1810_v46  }
 0x1e5   : > { %v984_v47 = vpop.permute.xlu1 %983  ;;  %v982_v35 = vpop.permute.xlu0 %981 }
 0x1e6   : > { %v1004_v51 = vadd.f32 %v984_v47, %v2251_v52  ;;  %v1003_v53 = vadd.f32 %v982_v35, %v2253_v54  ;;  %v2381_v52 = vunpack.c.l.bf16 %v1010_v41  ;;  %v2383_v54 = vunpack.c.l.bf16 %v1009_v42 }
 0x1e9   : > { %v988_v37 = vpop.permute.xlu1 %987  ;;  %v986_v55 = vpop.permute.xlu0 %985 }
 0x1ea   : > { %v1006_v13 = vadd.f32 %v988_v37, %v2255_v36  ;;  %v1005_v56 = vadd.f32 %v986_v55, %v2257_v48  ;;  %v1016_v55 = vld [vmem:[%s2075_s7 + $0x1c] sm:$0x6] }
 0x1eb   : > { %v1024_v42 = vunpack.c.l.bf16 %v1016_v55 }
 0x1ed   : > { %v992_v14 = vpop.permute.xlu1 %991  ;;  %v990_v38 = vpop.permute.xlu0 %989 }
 0x1ee   : > { %v2376_v39 = vadd.f32 %v992_v14, %v2259_v5  ;;  %v1007_v40 = vadd.f32 %v990_v38, %v2261_v6  ;;  %v2391_v5 = vunpack.c.l.bf16 %v1011_v21  ;;  %v1014_v6 = vld [vmem:[%s2075_s7 + $0x14] sm:$0x6]  ;;  %s1667_s7 = sshll.u32 %s214_s5, 4 }
 0x1ef   : > { %v2397_v1 = vunpack.c.l.bf16 %v1014_v6 }
 0x1fa   : > { %v1080_v36 = vpop.permute.xlu1 %1079  ;;  %v1076_v49 = vpop.permute.xlu0 %1075 }
 0x1fb   : > { %v1107_v48 = vmul.f32 %v1080_v36, %v2381_v52  ;;  %v1106_v60 = vmul.f32 %v1076_v49, %v2383_v54 }
 0x1fd   : > { %v1123_v24 = vrot.slane %v1107_v48, 2  ;;  %v1122_v33 = vrot.slane %v1106_v60, 2 }
 0x1fe   : > { %v1088_v34 = vpop.permute.xlu1 %1087  ;;  %v1084_v50 = vpop.permute.xlu0 %1083 }
 0x1ff   : > { %v1109_v43 = vmul.f32 %v1088_v34, %v2389_v9  ;;  %v1108_v44 = vmul.f32 %v1084_v50, %v2391_v5  ;;  %v2404_v0 = vadd.f32 %v1122_v33, %v1001_v23  ;;  %v2406_v3 = vadd.f32 %v1123_v24, %v1002_v22 }
 0x201   : > { %v1125_v27 = vrot.slane %v1109_v43, 2  ;;  %v1124_v4 = vrot.slane %v1108_v44, 2 }
 0x202   : > { %v1096_v28 = vpop.permute.xlu1 %1095  ;;  %v1092_v7 = vpop.permute.xlu0 %1091 }
 0x203   : > { %v1111_v11 = vmul.f32 %v1096_v28, %v2397_v1  ;;  %v1110_v12 = vmul.f32 %v1092_v7, %v2399_v2  ;;  %v2412_v15 = vadd.f32 %v1124_v4, %v1003_v53  ;;  %v2414_v16 = vadd.f32 %v1125_v27, %v1004_v51 }
 0x205   : > { %v1127_v17 = vrot.slane %v1111_v11, 2  ;;  %v1126_v18 = vrot.slane %v1110_v12, 2 }
 0x206   : > { %v1197_v57 = vpop.permute.xlu1 %1196  ;;  %v1100_v19 = vpop.permute.xlu0 %1099 }
 0x207   : > { %v1227_v20 = vmul.f32 %v1197_v57, %v2383_v54  ;;  %v1112_v58 = vmul.f32 %v1100_v19, %v2408_v8  ;;  %v2418_v25 = vadd.f32 %v1126_v18, %v1005_v56  ;;  %v2420_v26 = vadd.f32 %v1127_v17, %v1006_v13 }
 0x209   : > { %v1243_v29 = vrot.slane %v1227_v20, 2  ;;  %v1128_v30 = vrot.slane %v1112_v58, 2 }
 0x20a   : > { %v1205_v45 = vpop.permute.xlu1 %1204  ;;  %v1201_v31 = vpop.permute.xlu0 %1200 }
 0x20b   : > { %v1229_v32 = vmul.f32 %v1205_v45, %v2391_v5  ;;  %v1228_v46 = vmul.f32 %v1201_v31, %v2381_v52  ;;  %1251 = vrot.lane.b32.xlu0 %v1243_v29, %s1870_s8  ;;  %v2425_v61 = vadd.f32 %v1128_v30, %v1007_v40 }
 0x20d   : > { %v1245_v62 = vrot.slane %v1229_v32, 2  ;;  %v1244_v47 = vrot.slane %v1228_v46, 2 }
 0x20e   : > { %v1213_v35 = vpop.permute.xlu1 %1212  ;;  %v1209_v51 = vpop.permute.xlu0 %1208 }
 0x20f   : > { %v1231_v53 = vmul.f32 %v1213_v35, %v2399_v2  ;;  %v1230_v37 = vmul.f32 %v1209_v51, %v2389_v9  ;;  %1255 = vrot.lane.b32.xlu0 %v1245_v62, %s1870_s8  ;;  %1253 = vrot.lane.b32.xlu1 %v1244_v47, %s1870_s8 }
 0x211   : > { %v1247_v13 = vrot.slane %v1231_v53, 2  ;;  %v1246_v56 = vrot.slane %v1230_v37, 2 }
 0x212   : > { %v1221_v14 = vpop.permute.xlu1 %1220  ;;  %v1217_v38 = vpop.permute.xlu0 %1216 }
 0x213   : > { %v1233_v40 = vmul.f32 %v1221_v14, %v2408_v8  ;;  %v1232_v41 = vmul.f32 %v1217_v38, %v2397_v1  ;;  %1259 = vrot.lane.b32.xlu0 %v1247_v13, %s1870_s8  ;;  %1257 = vrot.lane.b32.xlu1 %v1246_v56, %s1870_s8 }
 0x215   : > { %v1249_v59 = vrot.slane %v1233_v40, 2  ;;  %v1248_v21 = vrot.slane %v1232_v41, 2 }
 0x216   : > { %v1334_v36 = vpop.permute.xlu1 %1333  ;;  %v1225_v49 = vpop.permute.xlu0 %1224 }
 0x217   : > { %v1364_v48 = vmul.f32 %v1334_v36, %v2383_v54  ;;  %v1234_v60 = vmul.f32 %v1225_v49, %v1024_v42  ;;  %1263 = vrot.lane.b32.xlu0 %v1249_v59, %s1870_s8  ;;  %1261 = vrot.lane.b32.xlu1 %v1248_v21, %s1870_s8 }
 0x219   : > { %v1380_v6 = vrot.slane %v1364_v48, 2  ;;  %v1250_v10 = vrot.slane %v1234_v60, 2 }
 0x21a   : > { %v1342_v22 = vpop.permute.xlu1 %1341  ;;  %v1338_v23 = vpop.permute.xlu0 %1337 }
 0x21b   : > { %v1366_v24 = vmul.f32 %v1342_v22, %v2391_v5  ;;  %v1365_v33 = vmul.f32 %v1338_v23, %v2381_v52  ;;  %1388 = vrot.lane.b32.xlu0 %v1380_v6, %s1871_s9  ;;  %1265 = vrot.lane.b32.xlu1 %v1250_v10, %s1870_s8  ;;  %s2462_s8 = scalar_lea.vmem [#allocation3], %s1667_s7 }
 0x21d   : > { %v1382_v34 = vrot.slane %v1366_v24, 2  ;;  %v1381_v50 = vrot.slane %v1365_v33, 2 }
 0x21e   : > { %v1350_v54 = vpop.permute.xlu1 %1349  ;;  %v1346_v43 = vpop.permute.xlu0 %1345 }
 0x21f   : > { %v1368_v44 = vmul.f32 %v1350_v54, %v2399_v2  ;;  %v1367_v63 = vmul.f32 %v1346_v43, %v2389_v9  ;;  %1392 = vrot.lane.b32.xlu0 %v1382_v34, %s1871_s9  ;;  %1390 = vrot.lane.b32.xlu1 %v1381_v50, %s1871_s9 }
 0x221   : > { %v1384_v27 = vrot.slane %v1368_v44, 2  ;;  %v1383_v5 = vrot.slane %v1367_v63, 2 }
 0x222   : > { %v1358_v4 = vpop.permute.xlu1 %1357  ;;  %v1354_v52 = vpop.permute.xlu0 %1353 }
 0x223   : > { %v1370_v28 = vmul.f32 %v1358_v4, %v2408_v8  ;;  %v1369_v7 = vmul.f32 %v1354_v52, %v2397_v1  ;;  %1396 = vrot.lane.b32.xlu0 %v1384_v27, %s1871_s9  ;;  %1394 = vrot.lane.b32.xlu1 %v1383_v5, %s1871_s9 }
 0x225   : > { %v1386_v11 = vrot.slane %v1370_v28, 2  ;;  %v1385_v2 = vrot.slane %v1369_v7, 2 }
 0x226   : > { %v1104_v12 = vpop.permute.xlu1 %1103  ;;  %v1362_v9 = vpop.permute.xlu0 %1361 }
 0x227   : > { %v1113_v17 = vmul.f32 %v1104_v12, %v1024_v42  ;;  %v1371_v18 = vmul.f32 %v1362_v9, %v1024_v42  ;;  %1400 = vrot.lane.b32.xlu0 %v1386_v11, %s1871_s9  ;;  %1398 = vrot.lane.b32.xlu1 %v1385_v2, %s1871_s9 }
 0x229   : > { %v1129_v57 = vrot.slane %v1113_v17, 2  ;;  %v1387_v19 = vrot.slane %v1371_v18, 2 }
 0x22a   : > { %v1470_v8 = vpop.permute.xlu0 %1469  ;;  %v1474_v20 = vpop.permute.xlu1 %1473 }
 0x22b   : > { %1402 = vrot.lane.b32.xlu1 %v1387_v19, %s1871_s9  ;;  %v1145_v1 = vadd.f32 %v1129_v57, %v2376_v39 }
 0x22e   : > { %v1478_v58 = vpop.permute.xlu0 %1477  ;;  %v1482_v29 = vpop.permute.xlu1 %1481 }
 0x232   : > { %v1486_v30 = vpop.permute.xlu0 %1485  ;;  %v1490_v45 = vpop.permute.xlu1 %1489 }
 0x236   : > { %v1494_v31 = vpop.permute.xlu0 %1493  ;;  %v1498_v32 = vpop.permute.xlu1 %1497 }
 0x27d   : > { %v1252_v46 = vpop.permute.xlu0 %1251 }
 0x27e   : > { %v1275_v55 = vadd.f32 %v1252_v46, %v2404_v0 }
 0x281   : > { %v1254_v62 = vpop.permute.xlu1 %1253  ;;  %v1256_v47 = vpop.permute.xlu0 %1255 }
 0x282   : > { %v1276_v14 = vadd.f32 %v1254_v62, %v2406_v3  ;;  %v1277_v38 = vadd.f32 %v1256_v47, %v2412_v15 }
 0x285   : > { %v1258_v35 = vpop.permute.xlu1 %1257  ;;  %v1260_v51 = vpop.permute.xlu0 %1259 }
 0x286   : > { %v1278_v49 = vadd.f32 %v1258_v35, %v2414_v16  ;;  %v1279_v0 = vadd.f32 %v1260_v51, %v2418_v25 }
 0x289   : > { %v1262_v53 = vpop.permute.xlu1 %1261  ;;  %v1264_v37 = vpop.permute.xlu0 %1263 }
 0x28a   : > { %v1280_v16 = vadd.f32 %v1262_v53, %v2420_v26  ;;  %v1281_v25 = vadd.f32 %v1264_v37, %v2425_v61 }
 0x28d   : > { %v1266_v13 = vpop.permute.xlu1 %1265  ;;  %v1389_v39 = vpop.permute.xlu0 %1388 }
 0x28e   : > { %v1412_v56 = vadd.f32 %v1389_v39, %v1275_v55  ;;  %v1282_v27 = vadd.f32 %v1266_v13, %v1145_v1 }
 0x290   : > { %v1500_v40 = vadd.f32 %v1470_v8, %v1412_v56 }
 0x291   : > { %v1391_v41 = vpop.permute.xlu1 %1390  ;;  %v1393_v42 = vpop.permute.xlu0 %1392 }
 0x292   : > { %v1508_v59 = vpack.c.bf16 %v1500_v40, %v1500_v40  ;;  %v1413_v21 = vadd.f32 %v1391_v41, %v1276_v14  ;;  %v1414_v36 = vadd.f32 %v1393_v42, %v1277_v38 }
 0x294   : > { %1517 = vst.msk [vmem:[%s2462_s8] sm:$0x3] %vm1516_vm0, %v1508_v59  ;;  %v1501_v3 = vadd.f32 %v1474_v20, %v1413_v21  ;;  %v1502_v15 = vadd.f32 %v1478_v58, %v1414_v36 }
 0x295   : > { %v1395_v48 = vpop.permute.xlu1 %1394  ;;  %v1397_v60 = vpop.permute.xlu0 %1396 }
 0x296   : > { %v1509_v6 = vpack.c.bf16 %v1501_v3, %v1501_v3  ;;  %v1510_v10 = vpack.c.bf16 %v1502_v15, %v1502_v15  ;;  %v1415_v22 = vadd.f32 %v1395_v48, %v1278_v49  ;;  %v1416_v23 = vadd.f32 %v1397_v60, %v1279_v0 }
 0x298   : > { %1518 = vst.msk [vmem:[%s2462_s8 + $0x2] sm:$0x3] %vm1516_vm0, %v1509_v6  ;;  %1519 = vst.msk [vmem:[%s2462_s8 + $0x4] sm:$0x3] %vm1516_vm0, %v1510_v10  ;;  %v1503_v24 = vadd.f32 %v1482_v29, %v1415_v22  ;;  %v1504_v33 = vadd.f32 %v1486_v30, %v1416_v23 }
 0x299   : > { %v1399_v34 = vpop.permute.xlu1 %1398  ;;  %v1401_v50 = vpop.permute.xlu0 %1400 }
 0x29a   : > { %v1511_v54 = vpack.c.bf16 %v1503_v24, %v1503_v24  ;;  %v1512_v43 = vpack.c.bf16 %v1504_v33, %v1504_v33  ;;  %v1417_v44 = vadd.f32 %v1399_v34, %v1280_v16  ;;  %v1418_v63 = vadd.f32 %v1401_v50, %v1281_v25 }
 0x29b   : > { %v1550_v2 = vld [vmem:[%s2462_s8] sm:$0x3] (%p1922_p5) }
 0x29c   : > { %1520 = vst.msk [vmem:[%s2462_s8 + $0x6] sm:$0x3] %vm1516_vm0, %v1511_v54  ;;  %1521 = vst.msk [vmem:[%s2462_s8 + $0x8] sm:$0x3] %vm1516_vm0, %v1512_v43  ;;  %v1505_v26 = vadd.f32 %v1490_v45, %v1417_v44  ;;  %v1506_v61 = vadd.f32 %v1494_v31, %v1418_v63 }
 0x29d   : > { %v1403_v5 = vpop.permute.xlu1 %1402  ;;  %1551 = vst [vmem:[%s1533_s29] sm:$0x3] (%p1922_p5), %v1550_v2 }
 0x29e   : > { %v1513_v4 = vpack.c.bf16 %v1505_v26, %v1505_v26  ;;  %v1514_v52 = vpack.c.bf16 %v1506_v61, %v1506_v61  ;;  %v1419_v28 = vadd.f32 %v1403_v5, %v1282_v27 }
 0x29f   : > { %v1552_v12 = vld [vmem:[%s2462_s8 + $0x2] sm:$0x3] (%p1922_p5)  ;;  %v1554_v9 = vld [vmem:[%s2462_s8 + $0x4] sm:$0x3] (%p1922_p5) }
 0x2a0   : > { %1522 = vst.msk [vmem:[%s2462_s8 + $0xa] sm:$0x3] %vm1516_vm0, %v1513_v4  ;;  %1523 = vst.msk [vmem:[%s2462_s8 + $0xc] sm:$0x3] %vm1516_vm0, %v1514_v52  ;;  %v1507_v7 = vadd.f32 %v1498_v32, %v1419_v28  ;;  %1531 = sbr.rel (!%p1922_p5) target bundleno = 685 (0x2ad), region = 77 }
 0x2a1   : > { %1553 = vst [vmem:[%s1533_s29 + $0x4] sm:$0x3] (%p1922_p5), %v1552_v12  ;;  %1555 = vst [vmem:[%s1533_s29 + $0x8] sm:$0x3] (%p1922_p5), %v1554_v9 }
 0x2a2   : > { %v1515_v11 = vpack.c.bf16 %v1507_v7, %v1507_v7 }
 0x2a3   : > { %v1556_v17 = vld [vmem:[%s2462_s8 + $0x6] sm:$0x3] (%p1922_p5)  ;;  %v1558_v18 = vld [vmem:[%s2462_s8 + $0x8] sm:$0x3] (%p1922_p5) }
 0x2a4   : > { %1524 = vst.msk [vmem:[%s2462_s8 + $0xe] sm:$0x3] %vm1516_vm0, %v1515_v11  ;;  %1557 = vst [vmem:[%s1533_s29 + $0xc] sm:$0x3] (%p1922_p5), %v1556_v17 }
 0x2a5   : > { %1559 = vst [vmem:[%s1533_s29 + $0x10] sm:$0x3] %v1558_v18 }
 0x2a7   : > { %v1560_v57 = vld [vmem:[%s2462_s8 + $0xa] sm:$0x3]  ;;  %v1562_v19 = vld [vmem:[%s2462_s8 + $0xc] sm:$0x3] }
 0x2a8   : > { %1561 = vst [vmem:[%s1533_s29 + $0x14] sm:$0x3] %v1560_v57  ;;  %1563 = vst [vmem:[%s1533_s29 + $0x18] sm:$0x3] %v1562_v19 }
 0x2ab   : > { %v1564_v1 = vld [vmem:[%s2462_s8 + $0xe] sm:$0x3] }
 0x2ac   : > { %1565 = vst [vmem:[%s1533_s29 + $0x1c] sm:$0x3] %v1564_v1 }
 0x2ad PF: > { %p10_p10 = scmp.ge.s32.totalorder %s1909_s16, 4   ;;  %s2512_s12 = smov %s1863_s13 }
 0x2ae   : > { %s2513_s13 = smov %s1920_s19  ;;  %s2514_s14 = smov %s1909_s16 }
 0x2af   :  { %12 = sbr.rel (!%p10_p10) target bundleno = 2 (0x2), region = 157 }

// kernel: shufflenet_v2_forward.30
= control target key start
LH: loop header
LB: loop body
LE: loop exit
PB: predicated region body
PF: predicated region fallthrough
CT: control target
= control target key end

     0   :  { %v125_v0 = vmov 0.0   ;;  %vm126_vm0 = vmmov 0   ;;  %v127_v3 = vmov 0   ;;  %vm42_vm1 = vcmask 130048   ;;  %s166_s0 = inlined_call_operand.vmem [shape: bf16[16,32], index: 0, kind: input, shape index: {}]   ;;  %s167_s1 = inlined_call_operand.vmem [shape: bf16[16,16], index: 1, kind: input, shape index: {}]   ;;  %s168_s2 = inlined_call_operand.vmem [shape: f32[16,1], index: 2, kind: input, shape index: {}]   ;;  %s169_s3 = inlined_call_operand.vmem [shape: bf16[16,32], index: 3, kind: output, shape index: {}]  }
   0x1   :  { %113 = vmatprep.subr.bf16.mxu0 %v125_v0  ;;  %v123_v1 = vld [vmem:[%s166_s0] sm:$0xff]   ;;  %115 = vmatprep.mubr.msk.bf16.mxu0 %vm126_vm0, %v125_v0  ;;  %v20_v5 = vld [vmem:[%s168_s2 + $0x8] sm:$0xff]  ;;  %vm97_vm2 = vcmask 257024  }
   0x2   :  { %v124_v2 = vld [vmem:[%s167_s1] sm:$0xff]   ;;  %122 = vset.pattern.permute.xlu0 %v127_v3  ;;  %114 = vmatpush3.bf16.msra.mxu0 %v123_v1 }
   0x3   :  { %v19_v4 = vld [vmem:[%s168_s2] sm:$0xff] }
   0x4   :  { %23 = vperm.xlu0 %122, %v19_v4  }
   0x5   :  { %116 = vmatmul.mubr.msk.bf16.vlgmr.msra.gmra.mxu0 %vm42_vm1, %v124_v2 }
   0x8   :  { %28 = vperm.xlu0 %122, %v20_v5  }
  0x7f   :  { %v24_v6 = vpop.permute.xlu0 %23 }
  0x83   :  { %v29_v11 = vpop.permute.xlu0 %28 }
  0xc5   :  { %v80_v7 = vpop.f32.mrf.mxu0 }
  0xc6   :  { %v81_v8 = vadd.f32 %v80_v7, %v24_v6 }
  0xc7   :  { %v117_v9 = vpop.f32.mrf.mxu0 }
  0xc8   :  { %v87_v10 = vmax.f32 %v81_v8, 0.0 }
  0xc9   :  { %v83_v12 = vpop.f32.mrf.mxu0 }
  0xca   :  { %v109_v13 = vpack.c.bf16 %v87_v10, %v87_v10  ;;  %v84_v14 = vadd.f32 %v83_v12, %v29_v11 }
  0xcb   :  { %v118_v15 = vpop.f32.mrf.mxu0 }
  0xcc   :  { %98 = vst.msk [vmem:[%s169_s3] sm:$0xf] %vm97_vm2, %v109_v13  ;;  %v88_v16 = vmax.f32 %v84_v14, 0.0 }
  0xce   :  { %v110_v17 = vpack.c.bf16 %v88_v16, %v88_v16 }
  0xd0   :  { %99 = vst.msk [vmem:[%s169_s3 + $0x4] sm:$0xf] %vm97_vm2, %v110_v17 }

// kernel: shufflenet_v2_forward.28
= control target key start
LH: loop header
LB: loop body
LE: loop exit
PB: predicated region body
PF: predicated region fallthrough
CT: control target
= control target key end

     0   :  { %s3855_s21 = smov 0   ;;  %s3857_s22 = smov 0   ;;  %s5441_s0 = inlined_call_operand.vmem [shape: bf16[16,2,3,3], index: 0, kind: input, shape index: {}]   ;;  %s5442_s1 = inlined_call_operand.vmem [shape: bf16[16,2,3,3], index: 1, kind: input, shape index: {}]   ;;  %s5443_s2 = inlined_call_operand.vmem [shape: bf16[16,2,3,3], index: 2, kind: input, shape index: {}]   ;;  %s5444_s3 = inlined_call_operand.vmem [shape: bf16[16,2,3,3], index: 3, kind: input, shape index: {}]   ;;  %s5445_s4 = inlined_call_operand.vmem [shape: f32[9,16,1,1], index: 4, kind: input, shape index: {}]   ;;  %s5446_s5 = inlined_call_operand.vmem [shape: f32[16,1,1], index: 5, kind: input, shape index: {}]   ;;  %s5447_s6 = inlined_call_operand.vmem [shape: bf16[16,2,2,2], index: 6, kind: output, shape index: {}]  }
   0x1   :  { %s3859_s23 = smov 0  }
   0x2 LB: > { %s3409_s24 = sadd.s32 4294967295, %s3816_s23   ;;  %s3872_s25 = sadd.s32 1, %s3816_s23   ;;  %s3816_s23 = sphi %s3859_s23, %s5562_s23   ;;  %s3812_s22 = sphi %s3857_s22, %s5561_s22   ;;  %s3808_s21 = sphi %s3855_s21, %s5560_s21  }
   0x3   : > { %s20_s26 = ssub.s32 %s3816_s23, %s3872_s25  ;;  %s23_s27 = sadd.s32 1, %s3812_s22 }
   0x4   : > { %p21_p0 = scmp.eq.s32.totalorder %s20_s26, 0  ;;  %p30_p1 = scmp.ne.s32.totalorder %s3812_s22, %s3808_s21 }
   0x5   : > { %p31_p2 = scmp.eq.s32.totalorder %s3816_s23, 0  ;;  %p180_p3 = scmp.eq.s32.totalorder %s3409_s24, 1 }
   0x6   : > { %s3883_s28 = scalar_select %p21_p0, %s3812_s22, %s23_s27  }
   0x7   : > { %p3885_p4 = por %p31_p2, %p30_p1  ;;  %p3889_p5 = por %p180_p3, %p30_p1 }
   0x8   : > { %p3412_p6 = scmp.ge.s32.totalorder %s3816_s23, 2 }
   0xa   : > { %208 = sbr.rel (%p3412_p6) target bundleno = 71 (0x47), region = 24 }
   0xf   : > { %211 = sbr.rel (!%p3885_p4) target bundleno = 29 (0x1d), region = 28  ;;  %s213_s7 = sand.u32 (%p3885_p4), 1, %s3812_s22  }
  0x10   : > { %s3414_s8 = sshll.u32 (%p3885_p4), %s3816_s23, 1  ;;  %s3413_s9 = sshll.u32 (%p3885_p4), %s213_s7, 5 }
  0x11   : > { %s3901_s12 = scalar_lea.vmem (%p3885_p4), %s5441_s0, %s3414_s8  ;;  %s215_s13 = scalar_lea.vmem (%p3885_p4), [#allocation2], %s3413_s9 }
  0x12   : > { %v234_v0 = vld [vmem:[%s3901_s12] sm:$0x3] (%p3885_p4)  ;;  %v236_v1 = vld [vmem:[%s3901_s12 + $0x4] sm:$0x3] (%p3885_p4)  ;;  %v238_v2 = vld [vmem:[%s3901_s12 + $0x8] sm:$0x3] (%p3885_p4) }
  0x13   : > { %235 = vst [vmem:[%s215_s13] sm:$0x3] (%p3885_p4), %v234_v0  ;;  %237 = vst [vmem:[%s215_s13 + $0x2] sm:$0x3] (%p3885_p4), %v236_v1  ;;  %v240_v3 = vld [vmem:[%s3901_s12 + $0xc] sm:$0x3] (%p3885_p4) }
  0x14   : > { %v242_v4 = vld [vmem:[%s3901_s12 + $0x10] sm:$0x3]  ;;  %239 = vst [vmem:[%s215_s13 + $0x4] sm:$0x3] %v238_v2  ;;  %241 = vst [vmem:[%s215_s13 + $0x6] sm:$0x3] %v240_v3 }
  0x15   : > { %243 = vst [vmem:[%s215_s13 + $0x8] sm:$0x3] %v242_v4  ;;  %v244_v5 = vld [vmem:[%s3901_s12 + $0x14] sm:$0x3]  ;;  %v246_v6 = vld [vmem:[%s3901_s12 + $0x18] sm:$0x3] }
  0x16   : > { %v248_v7 = vld [vmem:[%s3901_s12 + $0x1c] sm:$0x3]  ;;  %245 = vst [vmem:[%s215_s13 + $0xa] sm:$0x3] %v244_v5  ;;  %247 = vst [vmem:[%s215_s13 + $0xc] sm:$0x3] %v246_v6 }
  0x17   : > { %249 = vst [vmem:[%s215_s13 + $0xe] sm:$0x3] %v248_v7  ;;  %v250_v8 = vld [vmem:[%s3901_s12 + $0x20] sm:$0x3]  ;;  %v252_v9 = vld [vmem:[%s3901_s12 + $0x24] sm:$0x3] }
  0x18   : > { %v254_v10 = vld [vmem:[%s3901_s12 + $0x28] sm:$0x3]  ;;  %251 = vst [vmem:[%s215_s13 + $0x10] sm:$0x3] %v250_v8  ;;  %253 = vst [vmem:[%s215_s13 + $0x12] sm:$0x3] %v252_v9 }
  0x19   : > { %255 = vst [vmem:[%s215_s13 + $0x14] sm:$0x3] %v254_v10  ;;  %v256_v11 = vld [vmem:[%s3901_s12 + $0x2c] sm:$0x3]  ;;  %v258_v12 = vld [vmem:[%s3901_s12 + $0x30] sm:$0x3] }
  0x1a   : > { %v260_v13 = vld [vmem:[%s3901_s12 + $0x34] sm:$0x3]  ;;  %257 = vst [vmem:[%s215_s13 + $0x16] sm:$0x3] %v256_v11  ;;  %259 = vst [vmem:[%s215_s13 + $0x18] sm:$0x3] %v258_v12 }
  0x1b   : > { %261 = vst [vmem:[%s215_s13 + $0x1a] sm:$0x3] %v260_v13  ;;  %v262_v14 = vld [vmem:[%s3901_s12 + $0x38] sm:$0x3]  ;;  %v264_v15 = vld [vmem:[%s3901_s12 + $0x3c] sm:$0x3] }
  0x1c   : > { %263 = vst [vmem:[%s215_s13 + $0x1c] sm:$0x3] %v262_v14  ;;  %265 = vst [vmem:[%s215_s13 + $0x1e] sm:$0x3] %v264_v15 }
  0x1d PF: > { %321 = sbr.rel (!%p3885_p4) target bundleno = 43 (0x2b), region = 69  ;;  %s323_s14 = sand.u32 (%p3885_p4), 1, %s3812_s22  }
  0x1e   : > { %s3416_s15 = sshll.u32 (%p3885_p4), %s3816_s23, 1  ;;  %s3415_s16 = sshll.u32 (%p3885_p4), %s323_s14, 5 }
  0x1f   : > { %s3926_s19 = scalar_lea.vmem (%p3885_p4), %s5442_s1, %s3416_s15  ;;  %s325_s20 = scalar_lea.vmem (%p3885_p4), [#allocation3], %s3415_s16 }
  0x20   : > { %v344_v16 = vld [vmem:[%s3926_s19] sm:$0x3] (%p3885_p4)  ;;  %v346_v17 = vld [vmem:[%s3926_s19 + $0x4] sm:$0x3] (%p3885_p4)  ;;  %v348_v18 = vld [vmem:[%s3926_s19 + $0x8] sm:$0x3] (%p3885_p4) }
  0x21   : > { %345 = vst [vmem:[%s325_s20] sm:$0x3] (%p3885_p4), %v344_v16  ;;  %347 = vst [vmem:[%s325_s20 + $0x2] sm:$0x3] (%p3885_p4), %v346_v17  ;;  %v350_v19 = vld [vmem:[%s3926_s19 + $0xc] sm:$0x3] (%p3885_p4) }
  0x22   : > { %v352_v20 = vld [vmem:[%s3926_s19 + $0x10] sm:$0x3]  ;;  %349 = vst [vmem:[%s325_s20 + $0x4] sm:$0x3] %v348_v18  ;;  %351 = vst [vmem:[%s325_s20 + $0x6] sm:$0x3] %v350_v19 }
  0x23   : > { %353 = vst [vmem:[%s325_s20 + $0x8] sm:$0x3] %v352_v20  ;;  %v354_v21 = vld [vmem:[%s3926_s19 + $0x14] sm:$0x3]  ;;  %v356_v22 = vld [vmem:[%s3926_s19 + $0x18] sm:$0x3] }
  0x24   : > { %v358_v23 = vld [vmem:[%s3926_s19 + $0x1c] sm:$0x3]  ;;  %355 = vst [vmem:[%s325_s20 + $0xa] sm:$0x3] %v354_v21  ;;  %357 = vst [vmem:[%s325_s20 + $0xc] sm:$0x3] %v356_v22 }
  0x25   : > { %359 = vst [vmem:[%s325_s20 + $0xe] sm:$0x3] %v358_v23  ;;  %v360_v24 = vld [vmem:[%s3926_s19 + $0x20] sm:$0x3]  ;;  %v362_v25 = vld [vmem:[%s3926_s19 + $0x24] sm:$0x3] }
  0x26   : > { %v364_v26 = vld [vmem:[%s3926_s19 + $0x28] sm:$0x3]  ;;  %361 = vst [vmem:[%s325_s20 + $0x10] sm:$0x3] %v360_v24  ;;  %363 = vst [vmem:[%s325_s20 + $0x12] sm:$0x3] %v362_v25 }
  0x27   : > { %365 = vst [vmem:[%s325_s20 + $0x14] sm:$0x3] %v364_v26  ;;  %v366_v27 = vld [vmem:[%s3926_s19 + $0x2c] sm:$0x3]  ;;  %v368_v28 = vld [vmem:[%s3926_s19 + $0x30] sm:$0x3] }
  0x28   : > { %v370_v29 = vld [vmem:[%s3926_s19 + $0x34] sm:$0x3]  ;;  %367 = vst [vmem:[%s325_s20 + $0x16] sm:$0x3] %v366_v27  ;;  %369 = vst [vmem:[%s325_s20 + $0x18] sm:$0x3] %v368_v28 }
  0x29   : > { %371 = vst [vmem:[%s325_s20 + $0x1a] sm:$0x3] %v370_v29  ;;  %v372_v30 = vld [vmem:[%s3926_s19 + $0x38] sm:$0x3]  ;;  %v374_v31 = vld [vmem:[%s3926_s19 + $0x3c] sm:$0x3] }
  0x2a   : > { %373 = vst [vmem:[%s325_s20 + $0x1c] sm:$0x3] %v372_v30  ;;  %375 = vst [vmem:[%s325_s20 + $0x1e] sm:$0x3] %v374_v31 }
  0x2b PF: > { %431 = sbr.rel (!%p3885_p4) target bundleno = 57 (0x39), region = 110  ;;  %s433_s26 = sand.u32 (%p3885_p4), 1, %s3812_s22  }
  0x2c   : > { %s3418_s27 = sshll.u32 (%p3885_p4), %s3816_s23, 1  ;;  %s3417_s7 = sshll.u32 (%p3885_p4), %s433_s26, 5 }
  0x2d   : > { %s3951_s10 = scalar_lea.vmem (%p3885_p4), %s5443_s2, %s3418_s27  ;;  %s435_s11 = scalar_lea.vmem (%p3885_p4), [#allocation4], %s3417_s7 }
  0x2e   : > { %v454_v32 = vld [vmem:[%s3951_s10] sm:$0x3] (%p3885_p4)  ;;  %v456_v33 = vld [vmem:[%s3951_s10 + $0x4] sm:$0x3] (%p3885_p4)  ;;  %v458_v34 = vld [vmem:[%s3951_s10 + $0x8] sm:$0x3] (%p3885_p4) }
  0x2f   : > { %455 = vst [vmem:[%s435_s11] sm:$0x3] (%p3885_p4), %v454_v32  ;;  %457 = vst [vmem:[%s435_s11 + $0x2] sm:$0x3] (%p3885_p4), %v456_v33  ;;  %v460_v35 = vld [vmem:[%s3951_s10 + $0xc] sm:$0x3] (%p3885_p4) }
  0x30   : > { %v462_v36 = vld [vmem:[%s3951_s10 + $0x10] sm:$0x3]  ;;  %459 = vst [vmem:[%s435_s11 + $0x4] sm:$0x3] %v458_v34  ;;  %461 = vst [vmem:[%s435_s11 + $0x6] sm:$0x3] %v460_v35 }
  0x31   : > { %463 = vst [vmem:[%s435_s11 + $0x8] sm:$0x3] %v462_v36  ;;  %v464_v37 = vld [vmem:[%s3951_s10 + $0x14] sm:$0x3]  ;;  %v466_v38 = vld [vmem:[%s3951_s10 + $0x18] sm:$0x3] }
  0x32   : > { %v468_v39 = vld [vmem:[%s3951_s10 + $0x1c] sm:$0x3]  ;;  %465 = vst [vmem:[%s435_s11 + $0xa] sm:$0x3] %v464_v37  ;;  %467 = vst [vmem:[%s435_s11 + $0xc] sm:$0x3] %v466_v38 }
  0x33   : > { %469 = vst [vmem:[%s435_s11 + $0xe] sm:$0x3] %v468_v39  ;;  %v470_v40 = vld [vmem:[%s3951_s10 + $0x20] sm:$0x3]  ;;  %v472_v41 = vld [vmem:[%s3951_s10 + $0x24] sm:$0x3] }
  0x34   : > { %v474_v42 = vld [vmem:[%s3951_s10 + $0x28] sm:$0x3]  ;;  %471 = vst [vmem:[%s435_s11 + $0x10] sm:$0x3] %v470_v40  ;;  %473 = vst [vmem:[%s435_s11 + $0x12] sm:$0x3] %v472_v41 }
  0x35   : > { %475 = vst [vmem:[%s435_s11 + $0x14] sm:$0x3] %v474_v42  ;;  %v476_v43 = vld [vmem:[%s3951_s10 + $0x2c] sm:$0x3]  ;;  %v478_v44 = vld [vmem:[%s3951_s10 + $0x30] sm:$0x3] }
  0x36   : > { %v480_v45 = vld [vmem:[%s3951_s10 + $0x34] sm:$0x3]  ;;  %477 = vst [vmem:[%s435_s11 + $0x16] sm:$0x3] %v476_v43  ;;  %479 = vst [vmem:[%s435_s11 + $0x18] sm:$0x3] %v478_v44 }
  0x37   : > { %481 = vst [vmem:[%s435_s11 + $0x1a] sm:$0x3] %v480_v45  ;;  %v482_v46 = vld [vmem:[%s3951_s10 + $0x38] sm:$0x3]  ;;  %v484_v47 = vld [vmem:[%s3951_s10 + $0x3c] sm:$0x3] }
  0x38   : > { %483 = vst [vmem:[%s435_s11 + $0x1c] sm:$0x3] %v482_v46  ;;  %485 = vst [vmem:[%s435_s11 + $0x1e] sm:$0x3] %v484_v47 }
  0x39 PF: > { %541 = sbr.rel (!%p3885_p4) target bundleno = 71 (0x47), region = 151  ;;  %s543_s12 = sand.u32 (%p3885_p4), 1, %s3812_s22  }
  0x3a   : > { %s3420_s13 = sshll.u32 (%p3885_p4), %s3816_s23, 1  ;;  %s3419_s14 = sshll.u32 (%p3885_p4), %s543_s12, 5 }
  0x3b   : > { %s3976_s17 = scalar_lea.vmem (%p3885_p4), %s5444_s3, %s3420_s13  ;;  %s545_s29 = scalar_lea.vmem (%p3885_p4), [#allocation5], %s3419_s14 }
  0x3c   : > { %v564_v48 = vld [vmem:[%s3976_s17] sm:$0x3] (%p3885_p4)  ;;  %v566_v49 = vld [vmem:[%s3976_s17 + $0x4] sm:$0x3] (%p3885_p4)  ;;  %v568_v50 = vld [vmem:[%s3976_s17 + $0x8] sm:$0x3] (%p3885_p4) }
  0x3d   : > { %565 = vst [vmem:[%s545_s29] sm:$0x3] (%p3885_p4), %v564_v48  ;;  %567 = vst [vmem:[%s545_s29 + $0x2] sm:$0x3] (%p3885_p4), %v566_v49  ;;  %v570_v51 = vld [vmem:[%s3976_s17 + $0xc] sm:$0x3] (%p3885_p4) }
  0x3e   : > { %v572_v52 = vld [vmem:[%s3976_s17 + $0x10] sm:$0x3]  ;;  %569 = vst [vmem:[%s545_s29 + $0x4] sm:$0x3] %v568_v50  ;;  %571 = vst [vmem:[%s545_s29 + $0x6] sm:$0x3] %v570_v51 }
  0x3f   : > { %573 = vst [vmem:[%s545_s29 + $0x8] sm:$0x3] %v572_v52  ;;  %v574_v53 = vld [vmem:[%s3976_s17 + $0x14] sm:$0x3]  ;;  %v576_v54 = vld [vmem:[%s3976_s17 + $0x18] sm:$0x3] }
  0x40   : > { %v578_v55 = vld [vmem:[%s3976_s17 + $0x1c] sm:$0x3]  ;;  %575 = vst [vmem:[%s545_s29 + $0xa] sm:$0x3] %v574_v53  ;;  %577 = vst [vmem:[%s545_s29 + $0xc] sm:$0x3] %v576_v54 }
  0x41   : > { %579 = vst [vmem:[%s545_s29 + $0xe] sm:$0x3] %v578_v55  ;;  %v580_v56 = vld [vmem:[%s3976_s17 + $0x20] sm:$0x3]  ;;  %v582_v57 = vld [vmem:[%s3976_s17 + $0x24] sm:$0x3] }
  0x42   : > { %v584_v58 = vld [vmem:[%s3976_s17 + $0x28] sm:$0x3]  ;;  %581 = vst [vmem:[%s545_s29 + $0x10] sm:$0x3] %v580_v56  ;;  %583 = vst [vmem:[%s545_s29 + $0x12] sm:$0x3] %v582_v57 }
  0x43   : > { %585 = vst [vmem:[%s545_s29 + $0x14] sm:$0x3] %v584_v58  ;;  %v586_v59 = vld [vmem:[%s3976_s17 + $0x2c] sm:$0x3]  ;;  %v588_v60 = vld [vmem:[%s3976_s17 + $0x30] sm:$0x3] }
  0x44   : > { %v590_v61 = vld [vmem:[%s3976_s17 + $0x34] sm:$0x3]  ;;  %587 = vst [vmem:[%s545_s29 + $0x16] sm:$0x3] %v586_v59  ;;  %589 = vst [vmem:[%s545_s29 + $0x18] sm:$0x3] %v588_v60 }
  0x45   : > { %591 = vst [vmem:[%s545_s29 + $0x1a] sm:$0x3] %v590_v61  ;;  %v592_v62 = vld [vmem:[%s3976_s17 + $0x38] sm:$0x3]  ;;  %v594_v63 = vld [vmem:[%s3976_s17 + $0x3c] sm:$0x3] }
  0x46   : > { %593 = vst [vmem:[%s545_s29 + $0x1c] sm:$0x3] %v592_v62  ;;  %595 = vst [vmem:[%s545_s29 + $0x1e] sm:$0x3] %v594_v63 }
  0x47 PF: > { %p3421_p7 = scmp.ge.s32.totalorder %s3816_s23, 1  ;;  %p650_p8 = scmp.lt.s32.totalorder %s3816_s23, 3 }
  0x49   : > { %p651_p9 = pnand %p3421_p7, %p650_p8 }
  0x4b   : > { %654 = sbr.rel (%p651_p9) target bundleno = 913 (0x391), region = 192 }
  0x50   : > { %v3429_v0 = vld [vmem:[%s5445_s4 + $0x2] ss:$0 sm:$0xff]  ;;  %v3427_v1 = vld [vmem:[%s5445_s4] ss:$0 sm:$0xff]  ;;  %v3818_v2 = vmov 0   ;;  %s657_s17 = sand.u32 1, %s3808_s21   ;;  %s5397_s7 = scalar_lea.vmem (%p3889_p5), %s5447_s6, %s3409_s24 }
  0x51   : > { %3793 = vset.pattern.permute.xlu1 %v3818_v2  ;;  %3792 = vset.pattern.permute.xlu0 %v3818_v2  ;;  %v3430_v3 = vld [vmem:[%s5445_s4 + $0x3] ss:$0 sm:$0xff]  ;;  %v3428_v4 = vld [vmem:[%s5445_s4 + $0x1] ss:$0 sm:$0xff]  ;;  %v3432_v5 = vld [vmem:[%s5445_s4 + $0x5] ss:$0 sm:$0xff] }
  0x52   : > { %855 = vperm.xlu1 %3793, %v3429_v0   ;;  %847 = vperm.xlu0 %3792, %v3427_v1   ;;  %v3431_v6 = vld [vmem:[%s5445_s4 + $0x4] ss:$0 sm:$0xff]  ;;  %v3434_v7 = vld [vmem:[%s5445_s4 + $0x7] ss:$0 sm:$0xff]  ;;  %v3433_v8 = vld [vmem:[%s5445_s4 + $0x6] ss:$0 sm:$0xff] }
  0x53   : > { %v3436_v9 = vld [vmem:[%s5445_s4 + $0x9] ss:$0 sm:$0xff]  ;;  %v3435_v10 = vld [vmem:[%s5445_s4 + $0x8] ss:$0 sm:$0xff]  ;;  %v3438_v11 = vld [vmem:[%s5445_s4 + $0xb] ss:$0 sm:$0xff] }
  0x54   : > { %v3437_v12 = vld [vmem:[%s5445_s4 + $0xa] ss:$0 sm:$0xff]  ;;  %v3440_v13 = vld [vmem:[%s5445_s4 + $0xd] ss:$0 sm:$0xff]  ;;  %v3439_v14 = vld [vmem:[%s5445_s4 + $0xc] ss:$0 sm:$0xff] }
  0x55   : > { %v3442_v15 = vld [vmem:[%s5445_s4 + $0xf] ss:$0 sm:$0xff]  ;;  %v3441_v16 = vld [vmem:[%s5445_s4 + $0xe] ss:$0 sm:$0xff]  ;;  %v3460_v17 = vld [vmem:[%s5445_s4 + $0x11] ss:$0 sm:$0xff] }
  0x56   : > { %859 = vperm.xlu1 %3793, %v3430_v3   ;;  %851 = vperm.xlu0 %3792, %v3428_v4   ;;  %v3459_v18 = vld [vmem:[%s5445_s4 + $0x10] ss:$0 sm:$0xff]  ;;  %v3462_v19 = vld [vmem:[%s5445_s4 + $0x13] ss:$0 sm:$0xff]  ;;  %v3461_v20 = vld [vmem:[%s5445_s4 + $0x12] ss:$0 sm:$0xff] }
  0x57   : > { %v3464_v21 = vld [vmem:[%s5445_s4 + $0x15] ss:$0 sm:$0xff]  ;;  %v3463_v22 = vld [vmem:[%s5445_s4 + $0x14] ss:$0 sm:$0xff]  ;;  %v3466_v23 = vld [vmem:[%s5445_s4 + $0x17] ss:$0 sm:$0xff] }
  0x58   : > { %v3465_v24 = vld [vmem:[%s5445_s4 + $0x16] ss:$0 sm:$0xff]  ;;  %v3468_v25 = vld [vmem:[%s5445_s4 + $0x19] ss:$0 sm:$0xff]  ;;  %v3467_v26 = vld [vmem:[%s5445_s4 + $0x18] ss:$0 sm:$0xff] }
  0x59   : > { %v3470_v27 = vld [vmem:[%s5445_s4 + $0x1b] ss:$0 sm:$0xff]  ;;  %v3469_v28 = vld [vmem:[%s5445_s4 + $0x1a] ss:$0 sm:$0xff]  ;;  %v3472_v29 = vld [vmem:[%s5445_s4 + $0x1d] ss:$0 sm:$0xff] }
  0x5a   : > { %867 = vperm.xlu1 %3793, %v3432_v5   ;;  %863 = vperm.xlu0 %3792, %v3431_v6   ;;  %v3471_v30 = vld [vmem:[%s5445_s4 + $0x1c] ss:$0 sm:$0xff]  ;;  %v3474_v31 = vld [vmem:[%s5445_s4 + $0x1f] ss:$0 sm:$0xff]  ;;  %v3473_v32 = vld [vmem:[%s5445_s4 + $0x1e] ss:$0 sm:$0xff] }
  0x5b   : > { %v3492_v33 = vld [vmem:[%s5445_s4 + $0x21] ss:$0 sm:$0xff]  ;;  %v3491_v34 = vld [vmem:[%s5445_s4 + $0x20] ss:$0 sm:$0xff]  ;;  %v3494_v35 = vld [vmem:[%s5445_s4 + $0x23] ss:$0 sm:$0xff] }
  0x5c   : > { %v3493_v36 = vld [vmem:[%s5445_s4 + $0x22] ss:$0 sm:$0xff]  ;;  %v3496_v37 = vld [vmem:[%s5445_s4 + $0x25] ss:$0 sm:$0xff]  ;;  %v3495_v38 = vld [vmem:[%s5445_s4 + $0x24] ss:$0 sm:$0xff] }
  0x5d   : > { %v3498_v39 = vld [vmem:[%s5445_s4 + $0x27] ss:$0 sm:$0xff]  ;;  %v3497_v40 = vld [vmem:[%s5445_s4 + $0x26] ss:$0 sm:$0xff]  ;;  %v3500_v41 = vld [vmem:[%s5445_s4 + $0x29] ss:$0 sm:$0xff] }
  0x5e   : > { %875 = vperm.xlu1 %3793, %v3434_v7   ;;  %871 = vperm.xlu0 %3792, %v3433_v8   ;;  %v3499_v42 = vld [vmem:[%s5445_s4 + $0x28] ss:$0 sm:$0xff]  ;;  %v3502_v43 = vld [vmem:[%s5445_s4 + $0x2b] ss:$0 sm:$0xff]  ;;  %v3501_v44 = vld [vmem:[%s5445_s4 + $0x2a] ss:$0 sm:$0xff] }
  0x5f   : > { %v3504_v45 = vld [vmem:[%s5445_s4 + $0x2d] ss:$0 sm:$0xff]  ;;  %v3503_v46 = vld [vmem:[%s5445_s4 + $0x2c] ss:$0 sm:$0xff]  ;;  %v3506_v47 = vld [vmem:[%s5445_s4 + $0x2f] ss:$0 sm:$0xff] }
  0x60   : > { %v3505_v48 = vld [vmem:[%s5445_s4 + $0x2e] ss:$0 sm:$0xff]  ;;  %v3524_v49 = vld [vmem:[%s5445_s4 + $0x31] ss:$0 sm:$0xff]  ;;  %v3523_v50 = vld [vmem:[%s5445_s4 + $0x30] ss:$0 sm:$0xff] }
  0x61   : > { %s4205_s29 = sshll.u32 %s657_s17, 5  ;;  %s3819_s19 = smov 127   ;;  %vm3174_vm0 = vcmask 8192  }
  0x62   : > { %883 = vperm.xlu1 %3793, %v3436_v9   ;;  %879 = vperm.xlu0 %3792, %v3435_v10   ;;  %s4212_s18 = scalar_lea.vmem [#allocation2], %s4205_s29  ;;  %s4491_s26 = scalar_lea.vmem [#allocation3], %s4205_s29 }
  0x63   : > { %s4501_s27 = scalar_lea.vmem [#allocation4], %s4205_s29  ;;  %s4897_s11 = scalar_lea.vmem [#allocation5], %s4205_s29 }
  0x66   : > { %891 = vperm.xlu1 %3793, %v3438_v11   ;;  %887 = vperm.xlu0 %3792, %v3437_v12  }
  0x6a   : > { %899 = vperm.xlu1 %3793, %v3440_v13   ;;  %895 = vperm.xlu0 %3792, %v3439_v14  }
  0x6e   : > { %907 = vperm.xlu1 %3793, %v3442_v15   ;;  %903 = vperm.xlu0 %3792, %v3441_v16  }
  0x72   : > { %1060 = vperm.xlu1 %3793, %v3460_v17   ;;  %1056 = vperm.xlu0 %3792, %v3459_v18   ;;  %v4215_v17 = vld [vmem:[%s4212_s18] sm:$0x1]  ;;  %v4218_v18 = vld [vmem:[%s4212_s18 + $0x2] sm:$0x1] }
  0x73   : > { %5491 = vst [vmem:[#allocation14_spill] sm:$0xff] %v4215_v17  ;;  %5492 = vst [vmem:[#allocation15_spill] sm:$0xff] %v4218_v18 }
  0x76   : > { %1068 = vperm.xlu1 %3793, %v3462_v19   ;;  %1064 = vperm.xlu0 %3792, %v3461_v20  }
  0x7a   : > { %1076 = vperm.xlu1 %3793, %v3464_v21   ;;  %1072 = vperm.xlu0 %3792, %v3463_v22   ;;  %v5450_v21 = vunpack.c.l.bf16 %v4215_v17  ;;  %v5449_v22 = vunpack.c.l.bf16 %v4218_v18  ;;  %v932_v18 = vld [vmem:[%s4491_s26 + $0xc] sm:$0x1] }
  0x7e   : > { %1084 = vperm.xlu1 %3793, %v3466_v23   ;;  %1080 = vperm.xlu0 %3792, %v3465_v24   ;;  %v4227_v23 = vld [vmem:[%s4212_s18 + $0x4] sm:$0x1]  ;;  %v4230_v24 = vld [vmem:[%s4212_s18 + $0x6] sm:$0x1] }
  0x7f   : > { %5493 = vst [vmem:[#allocation16_spill] sm:$0xff] %v4227_v23 }
  0x82   : > { %1092 = vperm.xlu1 %3793, %v3468_v25   ;;  %1088 = vperm.xlu0 %3792, %v3467_v26  }
  0x86   : > { %1100 = vperm.xlu1 %3793, %v3470_v27   ;;  %1096 = vperm.xlu0 %3792, %v3469_v28  }
  0x8a   : > { %1108 = vperm.xlu1 %3793, %v3472_v29   ;;  %1104 = vperm.xlu0 %3792, %v3471_v30   ;;  %v5448_v29 = vunpack.c.l.bf16 %v4227_v23  ;;  %v5463_v30 = vunpack.c.l.bf16 %v4230_v24 }
  0x8e   : > { %1116 = vperm.xlu1 %3793, %v3474_v31   ;;  %1112 = vperm.xlu0 %3792, %v3473_v32   ;;  %v4241_v31 = vld [vmem:[%s4212_s18 + $0xa] sm:$0x1]  ;;  %v4244_v32 = vld [vmem:[%s4212_s18 + $0x8] sm:$0x1] }
  0x92   : > { %1253 = vperm.xlu1 %3793, %v3492_v33   ;;  %1249 = vperm.xlu0 %3792, %v3491_v34  }
  0x96   : > { %1261 = vperm.xlu1 %3793, %v3494_v35   ;;  %1257 = vperm.xlu0 %3792, %v3493_v36  }
  0x9a   : > { %1269 = vperm.xlu1 %3793, %v3496_v37   ;;  %1265 = vperm.xlu0 %3792, %v3495_v38   ;;  %v5462_v37 = vunpack.c.l.bf16 %v4241_v31  ;;  %v5461_v38 = vunpack.c.l.bf16 %v4244_v32 }
  0x9e   : > { %1277 = vperm.xlu1 %3793, %v3498_v39   ;;  %1273 = vperm.xlu0 %3792, %v3497_v40   ;;  %v4255_v39 = vld [vmem:[%s4212_s18 + $0xe] sm:$0x1]  ;;  %v4258_v40 = vld [vmem:[%s4212_s18 + $0xc] sm:$0x1] }
  0xa2   : > { %1285 = vperm.xlu1 %3793, %v3500_v41   ;;  %1281 = vperm.xlu0 %3792, %v3499_v42  }
  0xa6   : > { %1293 = vperm.xlu1 %3793, %v3502_v43   ;;  %1289 = vperm.xlu0 %3792, %v3501_v44  }
  0xaa   : > { %1301 = vperm.xlu1 %3793, %v3504_v45   ;;  %1297 = vperm.xlu0 %3792, %v3503_v46   ;;  %v5460_v45 = vunpack.c.l.bf16 %v4255_v39  ;;  %v5455_v46 = vunpack.c.l.bf16 %v4258_v40 }
  0xae   : > { %1309 = vperm.xlu1 %3793, %v3506_v47   ;;  %1305 = vperm.xlu0 %3792, %v3505_v48   ;;  %v4269_v47 = vld [vmem:[%s4212_s18 + $0x12] sm:$0x1]  ;;  %v4272_v48 = vld [vmem:[%s4212_s18 + $0x10] sm:$0x1] }
  0xb2   : > { %1542 = vperm.xlu1 %3793, %v3524_v49   ;;  %1538 = vperm.xlu0 %3792, %v3523_v50  }
  0xcd   : > { %v4146_v51 = vpop.permute.xlu1 %855  ;;  %v4148_v52 = vpop.permute.xlu0 %847 }
  0xce   : > { %5484 = vst [vmem:[#allocation7_spill] sm:$0xff] %v4146_v51  ;;  %5485 = vst [vmem:[#allocation8_spill] sm:$0xff] %v4148_v52  ;;  %v930_v51 = vld [vmem:[%s4491_s26 + $0x8] sm:$0x1] }
  0xd1   : > { %v4150_v53 = vpop.permute.xlu1 %859  ;;  %v4152_v54 = vpop.permute.xlu0 %851 }
  0xd2   : > { %5486 = vst [vmem:[#allocation9_spill] sm:$0xff] %v4152_v54  ;;  %v933_v54 = vld [vmem:[%s4491_s26 + $0xe] sm:$0x1] }
  0xd5   : > { %v4154_v55 = vpop.permute.xlu1 %867  ;;  %v4156_v56 = vpop.permute.xlu0 %863 }
  0xd9   : > { %v4158_v57 = vpop.permute.xlu1 %875  ;;  %v4160_v58 = vpop.permute.xlu0 %871 }
  0xdd   : > { %v4162_v59 = vpop.permute.xlu1 %883  ;;  %v4164_v60 = vpop.permute.xlu0 %879 }
  0xe1   : > { %v4166_v61 = vpop.permute.xlu1 %891  ;;  %v4168_v62 = vpop.permute.xlu0 %887 }
  0xe5   : > { %v4170_v63 = vpop.permute.xlu1 %899  ;;  %v4172_v0 = vpop.permute.xlu0 %895 }
  0xe9   : > { %v4174_v1 = vpop.permute.xlu1 %907  ;;  %v4176_v2 = vpop.permute.xlu0 %903 }
  0xea   : > { %5487 = vst [vmem:[#allocation10_spill] sm:$0xff] %v4176_v2 }
  0xed   : > { %v4178_v3 = vpop.permute.xlu1 %1060  ;;  %v4180_v4 = vpop.permute.xlu0 %1056 }
  0xee   : > { %5488 = vst [vmem:[#allocation11_spill] sm:$0xff] %v4178_v3  ;;  %5489 = vst [vmem:[#allocation12_spill] sm:$0xff] %v4180_v4 }
  0xf1   : > { %v4182_v5 = vpop.permute.xlu1 %1068  ;;  %v4184_v6 = vpop.permute.xlu0 %1064 }
  0xf2   : > { %5490 = vst [vmem:[#allocation13_spill] sm:$0xff] %v4184_v6  ;;  %v946_v6 = vunpack.c.l.bf16 %v930_v51 }
  0xf5   : > { %v4186_v7 = vpop.permute.xlu1 %1076  ;;  %v4188_v8 = vpop.permute.xlu0 %1072 }
  0xf6   : > { %v1123_v51 = vmul.f32 %v4188_v8, %v946_v6  ;;  %v5509_v8 = vunpack.c.l.bf16 %v4258_v40  ;;  %v4567_v40 = vld [vmem:[%s4501_s27 + $0x10] sm:$0x1] }
  0xf9   : > { %v4190_v9 = vpop.permute.xlu1 %1084  ;;  %v4192_v10 = vpop.permute.xlu0 %1080 }
  0xfd   : > { %v4194_v11 = vpop.permute.xlu1 %1092  ;;  %v4196_v12 = vpop.permute.xlu0 %1088 }
 0x101   : > { %v4198_v13 = vpop.permute.xlu1 %1100  ;;  %v4200_v14 = vpop.permute.xlu0 %1096 }
 0x105   : > { %v4207_v15 = vpop.permute.xlu1 %1108  ;;  %v4209_v16 = vpop.permute.xlu0 %1104 }
 0x109   : > { %v4220_v19 = vpop.permute.xlu1 %1116  ;;  %v4222_v20 = vpop.permute.xlu0 %1112 }
 0x10d   : > { %v1254_v25 = vpop.permute.xlu1 %1253  ;;  %v1250_v26 = vpop.permute.xlu0 %1249 }
 0x10e   : > { %v1313_v27 = vmul.f32 %v1254_v25, %v5449_v22  ;;  %v1312_v28 = vmul.f32 %v1250_v26, %v5450_v21 }
 0x110   : > { %1346 = vrot.lane.b32.xlu1 %v1313_v27, %s3819_s19  ;;  %1344 = vrot.lane.b32.xlu0 %v1312_v28, %s3819_s19  ;;  %v5454_v27 = vunpack.c.l.bf16 %v4269_v47  ;;  %v5451_v28 = vunpack.c.l.bf16 %v4272_v48 }
 0x111   : > { %v1262_v33 = vpop.permute.xlu1 %1261  ;;  %v1258_v34 = vpop.permute.xlu0 %1257 }
 0x112   : > { %v1315_v35 = vmul.f32 %v1262_v33, %v5463_v30  ;;  %v1314_v36 = vmul.f32 %v1258_v34, %v5448_v29  ;;  %v4283_v33 = vld [vmem:[%s4212_s18 + $0x16] sm:$0x1]  ;;  %v4286_v34 = vld [vmem:[%s4212_s18 + $0x14] sm:$0x1] }
 0x114   : > { %1350 = vrot.lane.b32.xlu1 %v1315_v35, %s3819_s19  ;;  %1348 = vrot.lane.b32.xlu0 %v1314_v36, %s3819_s19 }
 0x115   : > { %v1270_v41 = vpop.permute.xlu1 %1269  ;;  %v1266_v42 = vpop.permute.xlu0 %1265 }
 0x116   : > { %v1317_v43 = vmul.f32 %v1270_v41, %v5462_v37  ;;  %v1316_v44 = vmul.f32 %v1266_v42, %v5461_v38 }
 0x118   : > { %1354 = vrot.lane.b32.xlu1 %v1317_v43, %s3819_s19  ;;  %1352 = vrot.lane.b32.xlu0 %v1316_v44, %s3819_s19  ;;  %v5453_v43 = vunpack.c.l.bf16 %v4283_v33  ;;  %v5452_v44 = vunpack.c.l.bf16 %v4286_v34 }
 0x119   : > { %v1278_v49 = vpop.permute.xlu1 %1277  ;;  %v1274_v50 = vpop.permute.xlu0 %1273 }
 0x11a   : > { %v1319_v25 = vmul.f32 %v1278_v49, %v5460_v45  ;;  %v1318_v26 = vmul.f32 %v1274_v50, %v5455_v46  ;;  %v4297_v49 = vld [vmem:[%s4212_s18 + $0x1a] sm:$0x1]  ;;  %v4300_v50 = vld [vmem:[%s4212_s18 + $0x18] sm:$0x1] }
 0x11b   : > { %v5459_v29 = vunpack.c.l.bf16 %v4297_v49  ;;  %v5458_v22 = vunpack.c.l.bf16 %v4300_v50 }
 0x11c   : > { %1358 = vrot.lane.b32.xlu1 %v1319_v25, %s3819_s19  ;;  %1356 = vrot.lane.b32.xlu0 %v1318_v26, %s3819_s19 }
 0x11d   : > { %v1286_v35 = vpop.permute.xlu1 %1285  ;;  %v1282_v36 = vpop.permute.xlu0 %1281 }
 0x11e   : > { %v1321_v41 = vmul.f32 %v1286_v35, %v5454_v27  ;;  %v1320_v42 = vmul.f32 %v1282_v36, %v5451_v28 }
 0x120   : > { %1362 = vrot.lane.b32.xlu1 %v1321_v41, %s3819_s19  ;;  %1360 = vrot.lane.b32.xlu0 %v1320_v42, %s3819_s19  ;;  %v4311_v41 = vld [vmem:[%s4212_s18 + $0x1e] sm:$0x1]  ;;  %v4314_v42 = vld [vmem:[%s4212_s18 + $0x1c] sm:$0x1] }
 0x121   : > { %v1294_v25 = vpop.permute.xlu1 %1293  ;;  %v1290_v26 = vpop.permute.xlu0 %1289  ;;  %5494 = vst [vmem:[#allocation17_spill] sm:$0xff] %v4314_v42 }
 0x122   : > { %v1323_v35 = vmul.f32 %v1294_v25, %v5453_v43  ;;  %v1322_v36 = vmul.f32 %v1290_v26, %v5452_v44  ;;  %v5457_v44 = vunpack.c.l.bf16 %v4311_v41  ;;  %v5456_v43 = vunpack.c.l.bf16 %v4314_v42 }
 0x124   : > { %1366 = vrot.lane.b32.xlu1 %v1323_v35, %s3819_s19  ;;  %1364 = vrot.lane.b32.xlu0 %v1322_v36, %s3819_s19 }
 0x125   : > { %v1302_v21 = vpop.permute.xlu1 %1301  ;;  %v1298_v28 = vpop.permute.xlu0 %1297 }
 0x126   : > { %v1325_v25 = vmul.f32 %v1302_v21, %v5459_v29  ;;  %v1324_v26 = vmul.f32 %v1298_v28, %v5458_v22  ;;  %v3526_v21 = vld [vmem:[%s5445_s4 + $0x33] ss:$0 sm:$0xff]  ;;  %v3525_v28 = vld [vmem:[%s5445_s4 + $0x32] ss:$0 sm:$0xff] }
 0x128   : > { %1370 = vrot.lane.b32.xlu1 %v1325_v25, %s3819_s19  ;;  %1368 = vrot.lane.b32.xlu0 %v1324_v26, %s3819_s19  ;;  %v3528_v25 = vld [vmem:[%s5445_s4 + $0x35] ss:$0 sm:$0xff]  ;;  %v3529_v26 = vld [vmem:[%s5445_s4 + $0x36] ss:$0 sm:$0xff] }
 0x129   : > { %v1310_v35 = vpop.permute.xlu1 %1309  ;;  %v1306_v36 = vpop.permute.xlu0 %1305 }
 0x12a   : > { %v1327_v27 = vmul.f32 %v1310_v35, %v5457_v44  ;;  %v1326_v46 = vmul.f32 %v1306_v36, %v5456_v43  ;;  %v3532_v35 = vld [vmem:[%s5445_s4 + $0x39] ss:$0 sm:$0xff]  ;;  %v3531_v36 = vld [vmem:[%s5445_s4 + $0x38] ss:$0 sm:$0xff] }
 0x12c   : > { %1374 = vrot.lane.b32.xlu1 %v1327_v27, %s3819_s19  ;;  %1372 = vrot.lane.b32.xlu0 %v1326_v46, %s3819_s19  ;;  %v3527_v27 = vld [vmem:[%s5445_s4 + $0x34] ss:$0 sm:$0xff]  ;;  %v3530_v46 = vld [vmem:[%s5445_s4 + $0x37] ss:$0 sm:$0xff] }
 0x130   : > { %1550 = vperm.xlu1 %3793, %v3526_v21   ;;  %1546 = vperm.xlu0 %3792, %v3525_v28   ;;  %v3534_v21 = vld [vmem:[%s5445_s4 + $0x3b] ss:$0 sm:$0xff]  ;;  %v3533_v28 = vld [vmem:[%s5445_s4 + $0x3a] ss:$0 sm:$0xff] }
 0x134   : > { %1558 = vperm.xlu1 %3793, %v3528_v25   ;;  %1554 = vperm.xlu0 %3792, %v3527_v27   ;;  %v3536_v25 = vld [vmem:[%s5445_s4 + $0x3d] ss:$0 sm:$0xff]  ;;  %v3535_v27 = vld [vmem:[%s5445_s4 + $0x3c] ss:$0 sm:$0xff] }
 0x138   : > { %1566 = vperm.xlu1 %3793, %v3530_v46   ;;  %1562 = vperm.xlu0 %3792, %v3529_v26   ;;  %v3538_v46 = vld [vmem:[%s5445_s4 + $0x3f] ss:$0 sm:$0xff]  ;;  %v3537_v26 = vld [vmem:[%s5445_s4 + $0x3e] ss:$0 sm:$0xff] }
 0x13c   : > { %1574 = vperm.xlu1 %3793, %v3532_v35   ;;  %1570 = vperm.xlu0 %3792, %v3531_v36   ;;  %v3556_v35 = vld [vmem:[%s5445_s4 + $0x41] ss:$0 sm:$0xff]  ;;  %v3555_v36 = vld [vmem:[%s5445_s4 + $0x40] ss:$0 sm:$0xff] }
 0x140   : > { %1582 = vperm.xlu1 %3793, %v3534_v21   ;;  %1578 = vperm.xlu0 %3792, %v3533_v28   ;;  %v3558_v21 = vld [vmem:[%s5445_s4 + $0x43] ss:$0 sm:$0xff]  ;;  %v3557_v28 = vld [vmem:[%s5445_s4 + $0x42] ss:$0 sm:$0xff] }
 0x144   : > { %1590 = vperm.xlu1 %3793, %v3536_v25   ;;  %1586 = vperm.xlu0 %3792, %v3535_v27   ;;  %v3560_v25 = vld [vmem:[%s5445_s4 + $0x45] ss:$0 sm:$0xff]  ;;  %v3559_v27 = vld [vmem:[%s5445_s4 + $0x44] ss:$0 sm:$0xff] }
 0x148   : > { %1598 = vperm.xlu1 %3793, %v3538_v46   ;;  %1594 = vperm.xlu0 %3792, %v3537_v26   ;;  %v3562_v46 = vld [vmem:[%s5445_s4 + $0x47] ss:$0 sm:$0xff]  ;;  %v3561_v26 = vld [vmem:[%s5445_s4 + $0x46] ss:$0 sm:$0xff] }
 0x14c   : > { %1767 = vperm.xlu1 %3793, %v3556_v35   ;;  %1763 = vperm.xlu0 %3792, %v3555_v36   ;;  %v3564_v35 = vld [vmem:[%s5445_s4 + $0x49] ss:$0 sm:$0xff]  ;;  %v3563_v36 = vld [vmem:[%s5445_s4 + $0x48] ss:$0 sm:$0xff] }
 0x150   : > { %1775 = vperm.xlu1 %3793, %v3558_v21   ;;  %1771 = vperm.xlu0 %3792, %v3557_v28   ;;  %v3566_v21 = vld [vmem:[%s5445_s4 + $0x4b] ss:$0 sm:$0xff]  ;;  %v3565_v28 = vld [vmem:[%s5445_s4 + $0x4a] ss:$0 sm:$0xff] }
 0x154   : > { %1783 = vperm.xlu1 %3793, %v3560_v25   ;;  %1779 = vperm.xlu0 %3792, %v3559_v27   ;;  %v3568_v25 = vld [vmem:[%s5445_s4 + $0x4d] ss:$0 sm:$0xff]  ;;  %v3567_v27 = vld [vmem:[%s5445_s4 + $0x4c] ss:$0 sm:$0xff] }
 0x158   : > { %1791 = vperm.xlu1 %3793, %v3562_v46   ;;  %1787 = vperm.xlu0 %3792, %v3561_v26   ;;  %v3570_v46 = vld [vmem:[%s5445_s4 + $0x4f] ss:$0 sm:$0xff]  ;;  %v3569_v26 = vld [vmem:[%s5445_s4 + $0x4e] ss:$0 sm:$0xff] }
 0x15c   : > { %1799 = vperm.xlu1 %3793, %v3564_v35   ;;  %1795 = vperm.xlu0 %3792, %v3563_v36   ;;  %v3588_v35 = vld [vmem:[%s5445_s4 + $0x51] ss:$0 sm:$0xff]  ;;  %v3587_v36 = vld [vmem:[%s5445_s4 + $0x50] ss:$0 sm:$0xff] }
 0x160   : > { %1807 = vperm.xlu1 %3793, %v3566_v21   ;;  %1803 = vperm.xlu0 %3792, %v3565_v28   ;;  %v3590_v21 = vld [vmem:[%s5445_s4 + $0x53] ss:$0 sm:$0xff]  ;;  %v3589_v28 = vld [vmem:[%s5445_s4 + $0x52] ss:$0 sm:$0xff] }
 0x164   : > { %1815 = vperm.xlu1 %3793, %v3568_v25   ;;  %1811 = vperm.xlu0 %3792, %v3567_v27   ;;  %v3592_v25 = vld [vmem:[%s5445_s4 + $0x55] ss:$0 sm:$0xff]  ;;  %v3591_v27 = vld [vmem:[%s5445_s4 + $0x54] ss:$0 sm:$0xff] }
 0x168   : > { %1823 = vperm.xlu1 %3793, %v3570_v46   ;;  %1819 = vperm.xlu0 %3792, %v3569_v26   ;;  %v3594_v46 = vld [vmem:[%s5445_s4 + $0x57] ss:$0 sm:$0xff]  ;;  %v3593_v26 = vld [vmem:[%s5445_s4 + $0x56] ss:$0 sm:$0xff] }
 0x16c   : > { %1960 = vperm.xlu1 %3793, %v3588_v35   ;;  %1956 = vperm.xlu0 %3792, %v3587_v36   ;;  %v3596_v35 = vld [vmem:[%s5445_s4 + $0x59] ss:$0 sm:$0xff]  ;;  %v3595_v36 = vld [vmem:[%s5445_s4 + $0x58] ss:$0 sm:$0xff] }
 0x170   : > { %1968 = vperm.xlu1 %3793, %v3590_v21   ;;  %1964 = vperm.xlu0 %3792, %v3589_v28   ;;  %v3598_v21 = vld [vmem:[%s5445_s4 + $0x5b] ss:$0 sm:$0xff]  ;;  %v3597_v28 = vld [vmem:[%s5445_s4 + $0x5a] ss:$0 sm:$0xff] }
 0x174   : > { %1976 = vperm.xlu1 %3793, %v3592_v25   ;;  %1972 = vperm.xlu0 %3792, %v3591_v27   ;;  %v4456_v25 = vpop.permute.xlu1 %1542  ;;  %v4458_v27 = vpop.permute.xlu0 %1538 }
 0x175   : > { %5495 = vst [vmem:[#allocation18_spill] sm:$0xff] %v4456_v25  ;;  %5496 = vst [vmem:[#allocation19_spill] sm:$0xff] %v4458_v27  ;;  %v931_v25 = vld [vmem:[%s4491_s26 + $0xa] sm:$0x1] }
 0x176   : > { %v947_v23 = vunpack.c.l.bf16 %v931_v25  ;;  %v5504_v25 = vunpack.c.l.bf16 %v4230_v24  ;;  %v5505_v24 = vunpack.c.l.bf16 %v4241_v31  ;;  %v4543_v31 = vld [vmem:[%s4501_s27 + $0xc] sm:$0x1] }
 0x178   : > { %1984 = vperm.xlu1 %3793, %v3594_v46   ;;  %1980 = vperm.xlu0 %3792, %v3593_v26   ;;  %v3600_v46 = vld [vmem:[%s5445_s4 + $0x5d] ss:$0 sm:$0xff]  ;;  %v3599_v26 = vld [vmem:[%s5445_s4 + $0x5c] ss:$0 sm:$0xff]  ;;  %v913_v17 = vmul.f32 %v4150_v53, %v5504_v25  ;;  %v1124_v3 = vmul.f32 %v4186_v7, %v947_v23  ;;  %v915_v53 = vmul.f32 %v4154_v55, %v5505_v24  ;;  %v5506_v7 = vunpack.c.l.bf16 %v4244_v32 }
 0x17a   : > { %v914_v23 = vmul.f32 %v4156_v56, %v5506_v7 }
 0x17c   : > { %1992 = vperm.xlu1 %3793, %v3596_v35   ;;  %1988 = vperm.xlu0 %3792, %v3595_v36   ;;  %v1139_v7 = vadd.f32 %v1123_v51, %v914_v23 }
 0x180   : > { %2000 = vperm.xlu1 %3793, %v3598_v21   ;;  %1996 = vperm.xlu0 %3792, %v3597_v28   ;;  %v3602_v21 = vld [vmem:[%s5445_s4 + $0x5f] ss:$0 sm:$0xff]  ;;  %v3601_v28 = vld [vmem:[%s5445_s4 + $0x5e] ss:$0 sm:$0xff] }
 0x182   : > { %v4466_v35 = vpop.permute.xlu1 %1346  ;;  %v4468_v36 = vpop.permute.xlu0 %1344 }
 0x183   : > { %5497 = vst [vmem:[#allocation20_spill] sm:$0xff] %v4466_v35  ;;  %5498 = vst [vmem:[#allocation21_spill] sm:$0xff] %v4468_v36  ;;  %v4504_v36 = vld [vmem:[%s4501_s27 + $0x6] sm:$0x1] }
 0x184   : > { %2008 = vperm.xlu1 %3793, %v3600_v46   ;;  %2004 = vperm.xlu0 %3792, %v3599_v26  }
 0x186   : > { %v1351_v43 = vpop.permute.xlu1 %1350  ;;  %v4476_v44 = vpop.permute.xlu0 %1348 }
 0x187   : > { %5499 = vst [vmem:[#allocation22_spill] sm:$0xff] %v4476_v44 }
 0x188   : > { %2016 = vperm.xlu1 %3793, %v3602_v21   ;;  %2012 = vperm.xlu0 %3792, %v3601_v28   ;;  %v929_v21 = vld [vmem:[%s4491_s26 + $0x6] sm:$0x1] }
 0x189   : > { %v945_v27 = vunpack.c.l.bf16 %v929_v21 }
 0x18a   : > { %v1355_v22 = vpop.permute.xlu1 %1354  ;;  %v1353_v29 = vpop.permute.xlu0 %1352 }
 0x18b   : > { %v1122_v35 = vmul.f32 %v4182_v5, %v945_v27  ;;  %v949_v5 = vunpack.c.l.bf16 %v933_v54  ;;  %v948_v27 = vunpack.c.l.bf16 %v932_v18  ;;  %v5507_v54 = vunpack.c.l.bf16 %v4504_v36  ;;  %v4540_v18 = vld [vmem:[%s4501_s27 + $0xe] sm:$0x1] }
 0x18c   : > { %v1396_v51 = vadd.f32 %v1353_v29, %v1139_v7 }
 0x18d   : > { %v1138_v2 = vadd.f32 %v1122_v35, %v913_v17  ;;  %v1140_v35 = vadd.f32 %v1124_v3, %v915_v53  ;;  %v1126_v56 = vmul.f32 %v4190_v9, %v949_v5  ;;  %v1125_v24 = vmul.f32 %v4192_v10, %v948_v27  ;;  %v4564_v53 = vld [vmem:[%s4501_s27 + $0x12] sm:$0x1] }
 0x18e   : > { %v4478_v45 = vpop.permute.xlu1 %1358  ;;  %v4480_v46 = vpop.permute.xlu0 %1356  ;;  %v1431_v10 = vunpack.c.l.bf16 %v4540_v18 }
 0x18f   : > { %v1395_v42 = vadd.f32 %v1351_v43, %v1138_v2  ;;  %v937_v2 = vld [vmem:[%s4491_s26 + $0x16] sm:$0x1]  ;;  %v936_v43 = vld [vmem:[%s4491_s26 + $0x14] sm:$0x1]  ;;  %v1397_v5 = vadd.f32 %v1355_v22, %v1140_v35  ;;  %v938_v22 = vld [vmem:[%s4491_s26 + $0x18] sm:$0x1] }
 0x192   : > { %v4482_v26 = vpop.permute.xlu1 %1362  ;;  %v4484_v38 = vpop.permute.xlu0 %1360 }
 0x196   : > { %v4486_v37 = vpop.permute.xlu1 %1366  ;;  %v4488_v30 = vpop.permute.xlu0 %1364 }
 0x19a   : > { %v4494_v28 = vpop.permute.xlu1 %1370  ;;  %v4496_v44 = vpop.permute.xlu0 %1368 }
 0x19b   : > { %5500 = vst [vmem:[#allocation23_spill] sm:$0xff] %v4494_v28  ;;  %5501 = vst [vmem:[#allocation24_spill] sm:$0xff] %v4496_v44  ;;  %v4519_v44 = vld [vmem:[%s4501_s27 + $0xa] sm:$0x1]  ;;  %v4522_v28 = vld [vmem:[%s4501_s27 + $0x8] sm:$0x1] }
 0x19e   : > { %v4509_v52 = vpop.permute.xlu1 %1374  ;;  %v4511_v21 = vpop.permute.xlu0 %1372 }
 0x19f   : > { %5502 = vst [vmem:[#allocation25_spill] sm:$0xff] %v4509_v52  ;;  %5503 = vst [vmem:[#allocation26_spill] sm:$0xff] %v4511_v21  ;;  %v935_v52 = vld [vmem:[%s4491_s26 + $0x12] sm:$0x1]  ;;  %v934_v21 = vld [vmem:[%s4491_s26 + $0x10] sm:$0x1] }
 0x1a0   : > { %v951_v55 = vunpack.c.l.bf16 %v935_v52  ;;  %v950_v32 = vunpack.c.l.bf16 %v934_v21  ;;  %v916_v52 = vmul.f32 %v4160_v58, %v5509_v8  ;;  %v1430_v21 = vunpack.c.l.bf16 %v4543_v31 }
 0x1a1   : > { %v952_v8 = vunpack.c.l.bf16 %v936_v43 }
 0x1a2   : > { %v1128_v58 = vmul.f32 %v4194_v11, %v951_v55  ;;  %v1127_v23 = vmul.f32 %v4196_v12, %v950_v32  ;;  %v1141_v35 = vadd.f32 %v1125_v24, %v916_v52  ;;  %v5513_v11 = vunpack.c.l.bf16 %v4272_v48  ;;  %v4592_v48 = vld [vmem:[%s4501_s27 + $0x16] sm:$0x1] }
 0x1a3   : > { %v954_v52 = vunpack.c.l.bf16 %v938_v22 }
 0x1a4   : > { %v918_v12 = vmul.f32 %v4164_v60, %v5513_v11  ;;  %v1398_v24 = vadd.f32 %v4480_v46, %v1141_v35  ;;  %v4595_v60 = vld [vmem:[%s4501_s27 + $0x14] sm:$0x1]  ;;  %v941_v46 = vld [vmem:[%s4491_s26 + $0x1e] sm:$0x1]  ;;  %v5514_v35 = vunpack.c.l.bf16 %v4283_v33  ;;  %v4620_v33 = vld [vmem:[%s4501_s27 + $0x1a] sm:$0x1] }
 0x1a5   : > { %v1131_v11 = vmul.f32 %v4209_v16, %v954_v52  ;;  %v5471_v52 = vunpack.c.l.bf16 %v4620_v33 }
 0x1ab   : > { %v1551_v25 = vpop.permute.xlu1 %1550  ;;  %v4533_v4 = vpop.permute.xlu0 %1546 }
 0x1ac   : > { %v1604_v6 = vmul.f32 %v1551_v25, %v5507_v54  ;;  %v5508_v54 = vunpack.c.l.bf16 %v4255_v39  ;;  %v5511_v39 = vunpack.c.l.bf16 %v4522_v28 }
 0x1ae   : > { %v4549_v25 = vadd.f32 %v1604_v6, %v1395_v42  ;;  %v917_v17 = vmul.f32 %v4158_v57, %v5508_v54  ;;  %v5510_v42 = vunpack.c.l.bf16 %v4519_v44  ;;  %v953_v6 = vunpack.c.l.bf16 %v937_v2  ;;  %v939_v54 = vld [vmem:[%s4491_s26 + $0x1a] sm:$0x1] }
 0x1af   : > { %v1559_v3 = vpop.permute.xlu1 %1558  ;;  %v1555_v9 = vpop.permute.xlu0 %1554  ;;  %v1433_v2 = vunpack.c.l.bf16 %v4564_v53  ;;  %v955_v43 = vunpack.c.l.bf16 %v939_v54  ;;  %v5515_v54 = vunpack.c.l.bf16 %v4286_v34  ;;  %v4623_v34 = vld [vmem:[%s4501_s27 + $0x18] sm:$0x1] }
 0x1b0   : > { %v1606_v27 = vmul.f32 %v1559_v3, %v5510_v42  ;;  %v1605_v57 = vmul.f32 %v1555_v9, %v5511_v39  ;;  %v1142_v29 = vadd.f32 %v1126_v56, %v917_v17  ;;  %v5512_v9 = vunpack.c.l.bf16 %v4269_v47  ;;  %v940_v39 = vld [vmem:[%s4491_s26 + $0x1c] sm:$0x1] }
 0x1b1   : > { %v1432_v17 = vunpack.c.l.bf16 %v4567_v40  ;;  %v5529_v40 = vunpack.c.l.bf16 %v4620_v33  ;;  %v3620_v33 = vld [vmem:[%s5445_s4 + $0x61] ss:$0 sm:$0xff] }
 0x1b2   : > { %v4573_v7 = vadd.f32 %v1606_v27, %v1397_v5  ;;  %v4575_v3 = vadd.f32 %v1605_v57, %v1396_v51  ;;  %v919_v42 = vmul.f32 %v4162_v59, %v5512_v9  ;;  %v1399_v56 = vadd.f32 %v4478_v45, %v1142_v29 }
 0x1b3   : > { %v1567_v55 = vpop.permute.xlu1 %1566  ;;  %v1563_v32 = vpop.permute.xlu0 %1562  ;;  %v1143_v51 = vadd.f32 %v1127_v23, %v918_v12  ;;  %v1130_v27 = vmul.f32 %v4198_v13, %v953_v6  ;;  %v1129_v45 = vmul.f32 %v4200_v14, %v952_v8  ;;  %v921_v9 = vmul.f32 %v4166_v61, %v5514_v35 }
 0x1b4   : > { %v1608_v47 = vmul.f32 %v1567_v55, %v1431_v10  ;;  %v1607_v59 = vmul.f32 %v1563_v32, %v1430_v21  ;;  %v1144_v5 = vadd.f32 %v1128_v58, %v919_v42  ;;  %v920_v58 = vmul.f32 %v4168_v62, %v5515_v54 }
 0x1b5   : > { %v1435_v6 = vunpack.c.l.bf16 %v4592_v48  ;;  %v1434_v14 = vunpack.c.l.bf16 %v4595_v60  ;;  %v1400_v22 = vadd.f32 %v4484_v38, %v1143_v51  ;;  %v1132_v62 = vmul.f32 %v4207_v15, %v955_v43 }
 0x1b6   : > { %v4601_v57 = vadd.f32 %v1608_v47, %v1399_v56  ;;  %v4603_v29 = vadd.f32 %v1607_v59, %v1398_v24  ;;  %v1401_v8 = vadd.f32 %v4482_v26, %v1144_v5  ;;  %v957_v12 = vunpack.c.l.bf16 %v941_v46 }
 0x1b7   : > { %v1575_v23 = vpop.permute.xlu1 %1574  ;;  %v1571_v13 = vpop.permute.xlu0 %1570  ;;  %v956_v55 = vunpack.c.l.bf16 %v940_v39  ;;  %v1146_v26 = vadd.f32 %v1130_v27, %v921_v9  ;;  %v1145_v38 = vadd.f32 %v1129_v45, %v920_v58  ;;  %v5516_v24 = vunpack.c.l.bf16 %v4297_v49  ;;  %v4646_v49 = vld [vmem:[%s4501_s27 + $0x1e] sm:$0x1]  ;;  %v5519_v58 = vld [vmem:[#allocation17_spill] sm:$0xff] }
 0x1b8   : > { %v1610_v42 = vmul.f32 %v1575_v23, %v1433_v2  ;;  %v1609_v61 = vmul.f32 %v1571_v13, %v1432_v17  ;;  %v5517_v59 = vunpack.c.l.bf16 %v4300_v50  ;;  %v5470_v5 = vunpack.c.l.bf16 %v4623_v34  ;;  %v4649_v50 = vld [vmem:[%s4501_s27 + $0x1c] sm:$0x1] }
 0x1b9   : > { %v923_v47 = vmul.f32 %v4170_v63, %v5516_v24  ;;  %v1403_v51 = vadd.f32 %v4486_v37, %v1146_v26  ;;  %v1402_v27 = vadd.f32 %v4488_v30, %v1145_v38  ;;  %v1134_v39 = vmul.f32 %v4220_v19, %v957_v12  ;;  %v5521_v13 = vld [vmem:[#allocation10_spill] sm:$0xff] }
 0x1ba   : > { %v4627_v32 = vadd.f32 %v1610_v42, %v1401_v8  ;;  %v4629_v56 = vadd.f32 %v1609_v61, %v1400_v22  ;;  %v922_v15 = vmul.f32 %v4172_v0, %v5517_v59  ;;  %v1133_v35 = vmul.f32 %v4222_v20, %v956_v55 }
 0x1bb   : > { %v1583_v43 = vpop.permute.xlu1 %1582  ;;  %v1579_v16 = vpop.permute.xlu0 %1578  ;;  %v1148_v0 = vadd.f32 %v1132_v62, %v923_v47  ;;  %v5518_v30 = vunpack.c.l.bf16 %v4311_v41  ;;  %v5520_v23 = vunpack.c.l.bf16 %v5519_v58  ;;  %v5469_v61 = vunpack.c.l.bf16 %v4646_v49  ;;  %v5522_v62 = vld [vmem:[#allocation23_spill] sm:$0xff] }
 0x1bc   : > { %v1612_v45 = vmul.f32 %v1583_v43, %v1435_v6  ;;  %v1611_v63 = vmul.f32 %v1579_v16, %v1434_v14  ;;  %v1147_v46 = vadd.f32 %v1131_v11, %v922_v15  ;;  %v5468_v19 = vunpack.c.l.bf16 %v4649_v50  ;;  %v5523_v11 = vld [vmem:[#allocation24_spill] sm:$0xff]  ;;  %v5524_v15 = vld [vmem:[#allocation25_spill] sm:$0xff]  ;;  %v5525_v16 = vld [vmem:[#allocation26_spill] sm:$0xff] }
 0x1bd   : > { %v925_v54 = vmul.f32 %v4174_v1, %v5518_v30  ;;  %v924_v8 = vmul.f32 %v5521_v13, %v5520_v23  ;;  %v1405_v20 = vadd.f32 %v5522_v62, %v1148_v0  ;;  %v5531_v60 = vunpack.c.l.bf16 %v4646_v49  ;;  %v3622_v49 = vld [vmem:[%s5445_s4 + $0x63] ss:$0 sm:$0xff] }
 0x1be   : > { %v4653_v9 = vadd.f32 %v1612_v45, %v1403_v51  ;;  %v4655_v37 = vadd.f32 %v1611_v63, %v1402_v27  ;;  %v1404_v12 = vadd.f32 %v5523_v11, %v1147_v46 }
 0x1bf   : > { %v1591_v22 = vpop.permute.xlu1 %1590  ;;  %v1587_v42 = vpop.permute.xlu0 %1586  ;;  %v1150_v41 = vadd.f32 %v1134_v39, %v925_v54  ;;  %v1149_v26 = vadd.f32 %v1133_v35, %v924_v8 }
 0x1c0   : > { %v1614_v55 = vmul.f32 %v1591_v22, %v5471_v52  ;;  %v1613_v1 = vmul.f32 %v1587_v42, %v5470_v5 }
 0x1c1   : > { %v1407_v43 = vadd.f32 %v5524_v15, %v1150_v41  ;;  %v1406_v51 = vadd.f32 %v5525_v16, %v1149_v26 }
 0x1c2   : > { %v4671_v38 = vadd.f32 %v1614_v55, %v1405_v20  ;;  %v4673_v24 = vadd.f32 %v1613_v1, %v1404_v12  ;;  %v4714_v12 = vld [vmem:[%s4501_s27 + $0x2] sm:$0x1]  ;;  %v4717_v55 = vld [vmem:[%s4501_s27] sm:$0x1] }
 0x1c3   : > { %v1599_v47 = vpop.permute.xlu1 %1598  ;;  %v1595_v59 = vpop.permute.xlu0 %1594  ;;  %v5473_v26 = vunpack.c.l.bf16 %v4714_v12 }
 0x1c4   : > { %v1616_v27 = vmul.f32 %v1599_v47, %v5469_v61  ;;  %v1615_v45 = vmul.f32 %v1595_v59, %v5468_v19  ;;  %v5472_v47 = vunpack.c.l.bf16 %v4717_v55  ;;  %v4726_v59 = vld [vmem:[%s4501_s27 + $0x4] sm:$0x1]  ;;  %v5526_v61 = vunpack.c.l.bf16 %v4504_v36 }
 0x1c6   : > { %v4681_v63 = vadd.f32 %v1616_v27, %v1407_v43  ;;  %v4683_v0 = vadd.f32 %v1615_v45, %v1406_v51  ;;  %v1426_v27 = vunpack.c.l.bf16 %v4726_v59  ;;  %v3725_v59 = vld [vmem:[%s5445_s4 + $0x8a] ss:$0 sm:$0xff] }
 0x1c7   : > { %v4685_v46 = vpop.permute.xlu1 %1767  ;;  %v4687_v39 = vpop.permute.xlu0 %1763 }
 0x1cb   : > { %v4689_v35 = vpop.permute.xlu1 %1775  ;;  %v4691_v30 = vpop.permute.xlu0 %1771 }
 0x1cf   : > { %v4693_v54 = vpop.permute.xlu1 %1783  ;;  %v4695_v58 = vpop.permute.xlu0 %1779 }
 0x1d3   : > { %v4697_v23 = vpop.permute.xlu1 %1791  ;;  %v4699_v13 = vpop.permute.xlu0 %1787 }
 0x1d7   : > { %v4701_v8 = vpop.permute.xlu1 %1799  ;;  %v4703_v22 = vpop.permute.xlu0 %1795 }
 0x1db   : > { %v4705_v42 = vpop.permute.xlu1 %1807  ;;  %v4707_v62 = vpop.permute.xlu0 %1803 }
 0x1df   : > { %v4709_v20 = vpop.permute.xlu1 %1815  ;;  %v4711_v11 = vpop.permute.xlu0 %1811 }
 0x1e3   : > { %v4719_v1 = vpop.permute.xlu1 %1823  ;;  %v4721_v41 = vpop.permute.xlu0 %1819 }
 0x1e7   : > { %v1961_v15 = vpop.permute.xlu1 %1960  ;;  %v1957_v43 = vpop.permute.xlu0 %1956 }
 0x1e8   : > { %v2020_v16 = vmul.f32 %v1961_v15, %v5473_v26  ;;  %v2019_v51 = vmul.f32 %v1957_v43, %v5472_v47  ;;  %v5527_v47 = vunpack.c.l.bf16 %v4519_v44 }
 0x1ea   : > { %2053 = vrot.lane.b32.xlu1 %v2020_v16, %s3819_s19  ;;  %2051 = vrot.lane.b32.xlu0 %v2019_v51, %s3819_s19  ;;  %v5528_v16 = vunpack.c.l.bf16 %v4522_v28 }
 0x1eb   : > { %v1969_v45 = vpop.permute.xlu1 %1968  ;;  %v1965_v19 = vpop.permute.xlu0 %1964 }
 0x1ec   : > { %v2022_v5 = vmul.f32 %v1969_v45, %v5526_v61  ;;  %v2021_v52 = vmul.f32 %v1965_v19, %v1426_v27 }
 0x1ee   : > { %2057 = vrot.lane.b32.xlu1 %v2022_v5, %s3819_s19  ;;  %2055 = vrot.lane.b32.xlu0 %v2021_v52, %s3819_s19 }
 0x1ef   : > { %v1977_v15 = vpop.permute.xlu1 %1976  ;;  %v1973_v43 = vpop.permute.xlu0 %1972 }
 0x1f0   : > { %v2024_v26 = vmul.f32 %v1977_v15, %v5527_v47  ;;  %v2023_v51 = vmul.f32 %v1973_v43, %v5528_v16  ;;  %v5530_v47 = vunpack.c.l.bf16 %v4623_v34  ;;  %v5532_v15 = vunpack.c.l.bf16 %v4649_v50  ;;  %v3619_v34 = vld [vmem:[%s5445_s4 + $0x60] ss:$0 sm:$0xff]  ;;  %v3621_v50 = vld [vmem:[%s5445_s4 + $0x62] ss:$0 sm:$0xff]  ;;  %v3624_v16 = vld [vmem:[%s5445_s4 + $0x65] ss:$0 sm:$0xff] }
 0x1f2   : > { %2061 = vrot.lane.b32.xlu1 %v2024_v26, %s3819_s19  ;;  %2059 = vrot.lane.b32.xlu0 %v2023_v51, %s3819_s19  ;;  %v3623_v51 = vld [vmem:[%s5445_s4 + $0x64] ss:$0 sm:$0xff] }
 0x1f3   : > { %v1985_v36 = vpop.permute.xlu1 %1984  ;;  %v1981_v61 = vpop.permute.xlu0 %1980 }
 0x1f4   : > { %v2026_v19 = vmul.f32 %v1985_v36, %v1431_v10  ;;  %v2025_v52 = vmul.f32 %v1981_v61, %v1430_v21  ;;  %v3626_v36 = vld [vmem:[%s5445_s4 + $0x67] ss:$0 sm:$0xff]  ;;  %v3625_v61 = vld [vmem:[%s5445_s4 + $0x66] ss:$0 sm:$0xff] }
 0x1f6   : > { %2065 = vrot.lane.b32.xlu1 %v2026_v19, %s3819_s19  ;;  %2063 = vrot.lane.b32.xlu0 %v2025_v52, %s3819_s19  ;;  %v3628_v19 = vld [vmem:[%s5445_s4 + $0x69] ss:$0 sm:$0xff]  ;;  %v3627_v52 = vld [vmem:[%s5445_s4 + $0x68] ss:$0 sm:$0xff] }
 0x1f7   : > { %v1993_v44 = vpop.permute.xlu1 %1992  ;;  %v1989_v5 = vpop.permute.xlu0 %1988 }
 0x1f8   : > { %v2028_v28 = vmul.f32 %v1993_v44, %v1433_v2  ;;  %v2027_v26 = vmul.f32 %v1989_v5, %v1432_v17  ;;  %v3630_v44 = vld [vmem:[%s5445_s4 + $0x6b] ss:$0 sm:$0xff]  ;;  %v3629_v5 = vld [vmem:[%s5445_s4 + $0x6a] ss:$0 sm:$0xff] }
 0x1fa   : > { %2069 = vrot.lane.b32.xlu1 %v2028_v28, %s3819_s19  ;;  %2067 = vrot.lane.b32.xlu0 %v2027_v26, %s3819_s19  ;;  %v3632_v28 = vld [vmem:[%s5445_s4 + $0x6d] ss:$0 sm:$0xff]  ;;  %v3631_v26 = vld [vmem:[%s5445_s4 + $0x6c] ss:$0 sm:$0xff] }
 0x1fb   : > { %v2001_v18 = vpop.permute.xlu1 %2000  ;;  %v1997_v10 = vpop.permute.xlu0 %1996 }
 0x1fc   : > { %v2030_v31 = vmul.f32 %v2001_v18, %v1435_v6  ;;  %v2029_v21 = vmul.f32 %v1997_v10, %v1434_v14  ;;  %v3634_v18 = vld [vmem:[%s5445_s4 + $0x6f] ss:$0 sm:$0xff]  ;;  %v3633_v10 = vld [vmem:[%s5445_s4 + $0x6e] ss:$0 sm:$0xff] }
 0x1fe   : > { %2073 = vrot.lane.b32.xlu1 %v2030_v31, %s3819_s19  ;;  %2071 = vrot.lane.b32.xlu0 %v2029_v21, %s3819_s19  ;;  %v3668_v31 = vld [vmem:[%s5445_s4 + $0x71] ss:$0 sm:$0xff]  ;;  %v3667_v21 = vld [vmem:[%s5445_s4 + $0x70] ss:$0 sm:$0xff] }
 0x1ff   : > { %v2009_v53 = vpop.permute.xlu1 %2008  ;;  %v2005_v2 = vpop.permute.xlu0 %2004 }
 0x200   : > { %v2032_v17 = vmul.f32 %v2009_v53, %v5529_v40  ;;  %v2031_v45 = vmul.f32 %v2005_v2, %v5530_v47  ;;  %v3670_v53 = vld [vmem:[%s5445_s4 + $0x73] ss:$0 sm:$0xff]  ;;  %v3669_v2 = vld [vmem:[%s5445_s4 + $0x72] ss:$0 sm:$0xff]  ;;  %v3672_v40 = vld [vmem:[%s5445_s4 + $0x75] ss:$0 sm:$0xff] }
 0x201   : > { %v3674_v47 = vld [vmem:[%s5445_s4 + $0x77] ss:$0 sm:$0xff] }
 0x202   : > { %2077 = vrot.lane.b32.xlu1 %v2032_v17, %s3819_s19  ;;  %2075 = vrot.lane.b32.xlu0 %v2031_v45, %s3819_s19  ;;  %v3671_v17 = vld [vmem:[%s5445_s4 + $0x74] ss:$0 sm:$0xff]  ;;  %v3673_v45 = vld [vmem:[%s5445_s4 + $0x76] ss:$0 sm:$0xff] }
 0x203   : > { %v2017_v48 = vpop.permute.xlu1 %2016  ;;  %v2013_v6 = vpop.permute.xlu0 %2012 }
 0x204   : > { %v2034_v14 = vmul.f32 %v2017_v48, %v5531_v60  ;;  %v2033_v43 = vmul.f32 %v2013_v6, %v5532_v15  ;;  %v3676_v48 = vld [vmem:[%s5445_s4 + $0x79] ss:$0 sm:$0xff]  ;;  %v3675_v6 = vld [vmem:[%s5445_s4 + $0x78] ss:$0 sm:$0xff]  ;;  %v3678_v60 = vld [vmem:[%s5445_s4 + $0x7b] ss:$0 sm:$0xff] }
 0x205   : > { %v3680_v15 = vld [vmem:[%s5445_s4 + $0x7d] ss:$0 sm:$0xff] }
 0x206   : > { %2081 = vrot.lane.b32.xlu1 %v2034_v14, %s3819_s19  ;;  %2079 = vrot.lane.b32.xlu0 %v2033_v43, %s3819_s19  ;;  %v3677_v14 = vld [vmem:[%s5445_s4 + $0x7a] ss:$0 sm:$0xff]  ;;  %v3679_v43 = vld [vmem:[%s5445_s4 + $0x7c] ss:$0 sm:$0xff] }
 0x20a   : > { %2249 = vperm.xlu1 %3793, %v3620_v33   ;;  %2245 = vperm.xlu0 %3792, %v3619_v34   ;;  %v3682_v33 = vld [vmem:[%s5445_s4 + $0x7f] ss:$0 sm:$0xff]  ;;  %v3681_v34 = vld [vmem:[%s5445_s4 + $0x7e] ss:$0 sm:$0xff] }
 0x20e   : > { %2257 = vperm.xlu1 %3793, %v3622_v49   ;;  %2253 = vperm.xlu0 %3792, %v3621_v50   ;;  %v3716_v49 = vld [vmem:[%s5445_s4 + $0x81] ss:$0 sm:$0xff]  ;;  %v3715_v50 = vld [vmem:[%s5445_s4 + $0x80] ss:$0 sm:$0xff] }
 0x212   : > { %2265 = vperm.xlu1 %3793, %v3624_v16   ;;  %2261 = vperm.xlu0 %3792, %v3623_v51   ;;  %v927_v16 = vld [vmem:[%s4491_s26 + $0x2] sm:$0x1]  ;;  %v926_v51 = vld [vmem:[%s4491_s26] sm:$0x1] }
 0x216   : > { %2273 = vperm.xlu1 %3793, %v3626_v36   ;;  %2269 = vperm.xlu0 %3792, %v3625_v61   ;;  %v943_v36 = vunpack.c.l.bf16 %v927_v16  ;;  %v942_v61 = vunpack.c.l.bf16 %v926_v51  ;;  %v5541_v16 = vld [vmem:[#allocation13_spill] sm:$0xff] }
 0x21a   : > { %2281 = vperm.xlu1 %3793, %v3628_v19   ;;  %2277 = vperm.xlu0 %3792, %v3627_v52   ;;  %v3718_v19 = vld [vmem:[%s5445_s4 + $0x83] ss:$0 sm:$0xff]  ;;  %v3717_v52 = vld [vmem:[%s5445_s4 + $0x82] ss:$0 sm:$0xff] }
 0x21e   : > { %2289 = vperm.xlu1 %3793, %v3630_v44   ;;  %2285 = vperm.xlu0 %3792, %v3629_v5   ;;  %v928_v44 = vld [vmem:[%s4491_s26 + $0x4] sm:$0x1] }
 0x21f   : > { %v5533_v5 = vld [vmem:[#allocation11_spill] sm:$0xff] }
 0x222   : > { %2297 = vperm.xlu1 %3793, %v3632_v28   ;;  %2293 = vperm.xlu0 %3792, %v3631_v26   ;;  %v1120_v28 = vmul.f32 %v5533_v5, %v943_v36  ;;  %v5534_v26 = vld [vmem:[#allocation12_spill] sm:$0xff]  ;;  %v1636_v36 = vld [vmem:[%s4897_s11 + $0x6] sm:$0x1] }
 0x226   : > { %2305 = vperm.xlu1 %3793, %v3634_v18   ;;  %2301 = vperm.xlu0 %3792, %v3633_v10   ;;  %v1119_v18 = vmul.f32 %v5534_v26, %v942_v61  ;;  %v3720_v10 = vld [vmem:[%s5445_s4 + $0x85] ss:$0 sm:$0xff]  ;;  %v1635_v61 = vld [vmem:[%s4897_s11 + $0x4] sm:$0x1] }
 0x22a   : > { %2538 = vperm.xlu1 %3793, %v3668_v31   ;;  %2534 = vperm.xlu0 %3792, %v3667_v21   ;;  %v3719_v31 = vld [vmem:[%s5445_s4 + $0x84] ss:$0 sm:$0xff]  ;;  %v944_v21 = vunpack.c.l.bf16 %v928_v44  ;;  %v5543_v44 = vld [vmem:[#allocation21_spill] sm:$0xff] }
 0x22c   : > { %v1121_v51 = vmul.f32 %v5541_v16, %v944_v21  ;;  %v1640_v16 = vld [vmem:[%s4897_s11 + $0xe] sm:$0x1] }
 0x22e   : > { %2546 = vperm.xlu1 %3793, %v3670_v53   ;;  %2542 = vperm.xlu0 %3792, %v3669_v2   ;;  %v1634_v53 = vld [vmem:[%s4897_s11 + $0x2] sm:$0x1]  ;;  %v1633_v2 = vld [vmem:[%s4897_s11] sm:$0x1] }
 0x232   : > { %2554 = vperm.xlu1 %3793, %v3672_v40   ;;  %2550 = vperm.xlu0 %3792, %v3671_v17   ;;  %v5535_v40 = vld [vmem:[#allocation14_spill] sm:$0xff] }
 0x233   : > { %v5536_v17 = vunpack.c.l.bf16 %v5535_v40  ;;  %v5549_v40 = vunpack.c.l.bf16 %v4717_v55  ;;  %v3723_v55 = vld [vmem:[%s5445_s4 + $0x88] ss:$0 sm:$0xff] }
 0x236   : > { %2562 = vperm.xlu1 %3793, %v3674_v47   ;;  %2558 = vperm.xlu0 %3792, %v3673_v45   ;;  %v5537_v47 = vld [vmem:[#allocation8_spill] sm:$0xff] }
 0x237   : > { %v910_v45 = vmul.f32 %v5537_v47, %v5536_v17  ;;  %v5550_v17 = vld [vmem:[#allocation19_spill] sm:$0xff] }
 0x238   : > { %v1601_v47 = vmul.f32 %v5550_v17, %v5549_v40  ;;  %v3728_v17 = vld [vmem:[%s5445_s4 + $0x8d] ss:$0 sm:$0xff] }
 0x23a   : > { %2570 = vperm.xlu1 %3793, %v3676_v48   ;;  %2566 = vperm.xlu0 %3792, %v3675_v6   ;;  %v5538_v48 = vld [vmem:[#allocation15_spill] sm:$0xff] }
 0x23b   : > { %v5539_v6 = vunpack.c.l.bf16 %v5538_v48 }
 0x23e   : > { %2578 = vperm.xlu1 %3793, %v3678_v60   ;;  %2574 = vperm.xlu0 %3792, %v3677_v14   ;;  %v5540_v60 = vld [vmem:[#allocation9_spill] sm:$0xff] }
 0x23f   : > { %v911_v14 = vmul.f32 %v5540_v60, %v5539_v6  ;;  %v1652_v6 = vunpack.c.l.bf16 %v1636_v36  ;;  %v1651_v60 = vunpack.c.l.bf16 %v1635_v61 }
 0x241   : > { %v1829_v36 = vmul.f32 %v4689_v35, %v1652_v6  ;;  %v1828_v61 = vmul.f32 %v4691_v30, %v1651_v60  ;;  %v1656_v30 = vunpack.c.l.bf16 %v1640_v16  ;;  %v1644_v60 = vld [vmem:[%s4897_s11 + $0x16] sm:$0x1]  ;;  %v1645_v16 = vld [vmem:[%s4897_s11 + $0x18] sm:$0x1] }
 0x242   : > { %2586 = vperm.xlu1 %3793, %v3680_v15   ;;  %2582 = vperm.xlu0 %3792, %v3679_v43   ;;  %v1136_v15 = vadd.f32 %v1120_v28, %v911_v14  ;;  %v1135_v43 = vadd.f32 %v1119_v18, %v910_v45  ;;  %v5544_v28 = vld [vmem:[#allocation16_spill] sm:$0xff]  ;;  %v5546_v18 = vld [vmem:[#allocation7_spill] sm:$0xff] }
 0x243   : > { %v5545_v26 = vunpack.c.l.bf16 %v5544_v28  ;;  %v1638_v45 = vld [vmem:[%s4897_s11 + $0xa] sm:$0x1]  ;;  %v1637_v14 = vld [vmem:[%s4897_s11 + $0x8] sm:$0x1] }
 0x244   : > { %v1392_v5 = vadd.f32 %v5543_v44, %v1135_v43 }
 0x246   : > { %2594 = vperm.xlu1 %3793, %v3682_v33   ;;  %2590 = vperm.xlu0 %3792, %v3681_v34   ;;  %v1650_v33 = vunpack.c.l.bf16 %v1634_v53  ;;  %v1649_v34 = vunpack.c.l.bf16 %v1633_v2  ;;  %v5548_v53 = vld [vmem:[#allocation18_spill] sm:$0xff] }
 0x248   : > { %v1827_v21 = vmul.f32 %v4685_v46, %v1650_v33  ;;  %v1826_v48 = vmul.f32 %v4687_v39, %v1649_v34  ;;  %v1603_v46 = vmul.f32 %v4533_v4, %v1426_v27  ;;  %v5551_v39 = vld [vmem:[#allocation22_spill] sm:$0xff]  ;;  %v1654_v34 = vunpack.c.l.bf16 %v1638_v45  ;;  %v3726_v4 = vld [vmem:[%s5445_s4 + $0x8b] ss:$0 sm:$0xff] }
 0x24a   : > { %2795 = vperm.xlu1 %3793, %v3716_v49   ;;  %2791 = vperm.xlu0 %3792, %v3715_v50   ;;  %v3722_v49 = vld [vmem:[%s5445_s4 + $0x87] ss:$0 sm:$0xff]  ;;  %v3721_v50 = vld [vmem:[%s5445_s4 + $0x86] ss:$0 sm:$0xff] }
 0x24e   : > { %2803 = vperm.xlu1 %3793, %v3718_v19   ;;  %2799 = vperm.xlu0 %3792, %v3717_v52   ;;  %v5542_v19 = vld [vmem:[#allocation20_spill] sm:$0xff] }
 0x24f   : > { %v1393_v52 = vadd.f32 %v5542_v19, %v1136_v15  ;;  %v1639_v19 = vld [vmem:[%s4897_s11 + $0xc] sm:$0x1] }
 0x252   : > { %2811 = vperm.xlu1 %3793, %v3720_v10   ;;  %2807 = vperm.xlu0 %3792, %v3719_v31   ;;  %v912_v10 = vmul.f32 %v5546_v18, %v5545_v26  ;;  %v5547_v31 = vunpack.c.l.bf16 %v4714_v12  ;;  %v3724_v12 = vld [vmem:[%s5445_s4 + $0x89] ss:$0 sm:$0xff]  ;;  %v1655_v26 = vunpack.c.l.bf16 %v1639_v19  ;;  %v1642_v18 = vld [vmem:[%s4897_s11 + $0x12] sm:$0x1] }
 0x254   : > { %v1602_v2 = vmul.f32 %v5548_v53, %v5547_v31  ;;  %v1137_v15 = vadd.f32 %v1121_v51, %v912_v10  ;;  %v1831_v10 = vmul.f32 %v4693_v54, %v1654_v34  ;;  %v1641_v53 = vld [vmem:[%s4897_s11 + $0x10] sm:$0x1] }
 0x255   : > { %v1657_v6 = vunpack.c.l.bf16 %v1641_v53 }
 0x256   : > { %2819 = vperm.xlu1 %3793, %v3722_v49   ;;  %2815 = vperm.xlu0 %3792, %v3721_v50   ;;  %v1618_v43 = vadd.f32 %v1602_v2, %v1393_v52  ;;  %v1617_v49 = vadd.f32 %v1601_v47, %v1392_v5  ;;  %v1394_v33 = vadd.f32 %v5551_v39, %v1137_v15  ;;  %v1653_v50 = vunpack.c.l.bf16 %v1637_v14  ;;  %v3727_v47 = vld [vmem:[%s5445_s4 + $0x8c] ss:$0 sm:$0xff] }
 0x257   : > { %v1845_v2 = vadd.f32 %v1829_v36, %v4549_v25  ;;  %v1833_v25 = vmul.f32 %v4697_v23, %v1656_v30  ;;  %v1832_v14 = vmul.f32 %v4699_v13, %v1655_v26 }
 0x258   : > { %v1843_v51 = vadd.f32 %v1827_v21, %v1618_v43  ;;  %v1842_v52 = vadd.f32 %v1826_v48, %v1617_v49  ;;  %v1619_v5 = vadd.f32 %v1603_v46, %v1394_v33  ;;  %v1830_v31 = vmul.f32 %v4695_v58, %v1653_v50  ;;  %v3730_v43 = vld [vmem:[%s5445_s4 + $0x8f] ss:$0 sm:$0xff]  ;;  %v3729_v49 = vld [vmem:[%s5445_s4 + $0x8e] ss:$0 sm:$0xff]  ;;  %v1646_v50 = vld [vmem:[%s4897_s11 + $0x1a] sm:$0x1] }
 0x259   : > { %v1658_v58 = vunpack.c.l.bf16 %v1642_v18  ;;  %v1660_v33 = vunpack.c.l.bf16 %v1644_v60  ;;  %v1849_v36 = vadd.f32 %v1833_v25, %v4601_v57 }
 0x25a   : > { %2827 = vperm.xlu1 %3793, %v3724_v12   ;;  %2823 = vperm.xlu0 %3792, %v3723_v55   ;;  %v1844_v40 = vadd.f32 %v1828_v61, %v1619_v5  ;;  %v1643_v12 = vld [vmem:[%s4897_s11 + $0x14] sm:$0x1]  ;;  %v1847_v55 = vadd.f32 %v1831_v10, %v4573_v7  ;;  %v1846_v15 = vadd.f32 %v1830_v31, %v4575_v3  ;;  %v1648_v5 = vld [vmem:[%s4897_s11 + $0x1e] sm:$0x1] }
 0x25b   : > { %v1659_v34 = vunpack.c.l.bf16 %v1643_v12  ;;  %v1835_v7 = vmul.f32 %v4701_v8, %v1658_v58  ;;  %v1834_v3 = vmul.f32 %v4703_v22, %v1657_v6  ;;  %v1848_v61 = vadd.f32 %v1832_v14, %v4603_v29  ;;  %v1647_v22 = vld [vmem:[%s4897_s11 + $0x1c] sm:$0x1]  ;;  %v5032_v12 = vld [vmem:[%s4212_s18] sm:$0x3] }
 0x25c   : > { %v2054_v27 = vpop.permute.xlu1 %2053  ;;  %v2052_v44 = vpop.permute.xlu0 %2051  ;;  %v1664_v31 = vunpack.c.l.bf16 %v1648_v5  ;;  %v1663_v53 = vunpack.c.l.bf16 %v1647_v22  ;;  %v5067_v5 = vld [vmem:[%s4212_s18 + $0xe] sm:$0x3]  ;;  %v5070_v22 = vld [vmem:[%s4212_s18 + $0xc] sm:$0x3] }
 0x25d   : > { %v4951_v28 = vadd.f32 %v2054_v27, %v1843_v51  ;;  %v4953_v35 = vadd.f32 %v2052_v44, %v1842_v52  ;;  %v1661_v27 = vunpack.c.l.bf16 %v1645_v16  ;;  %v1837_v44 = vmul.f32 %v4705_v42, %v1660_v33 }
 0x25e   : > { %2835 = vperm.xlu1 %3793, %v3726_v4   ;;  %2831 = vperm.xlu0 %3792, %v3725_v59   ;;  %v1662_v59 = vunpack.c.l.bf16 %v1646_v50  ;;  %v1836_v8 = vmul.f32 %v4707_v62, %v1659_v34  ;;  %v1851_v30 = vadd.f32 %v1835_v7, %v4627_v32  ;;  %v1850_v57 = vadd.f32 %v1834_v3, %v4629_v56  ;;  %v5049_v7 = vld [vmem:[%s4212_s18 + $0xa] sm:$0x3]  ;;  %v5052_v3 = vld [vmem:[%s4212_s18 + $0x8] sm:$0x3] }
 0x25f   : > { %v1838_v42 = vmul.f32 %v4711_v11, %v1661_v27  ;;  %v1853_v62 = vadd.f32 %v1837_v44, %v4653_v9 }
 0x260   : > { %v2058_v45 = vpop.permute.xlu1 %2057  ;;  %v2056_v21 = vpop.permute.xlu0 %2055 }
 0x261   : > { %v4966_v48 = vadd.f32 %v2058_v45, %v1845_v2  ;;  %v4968_v54 = vadd.f32 %v2056_v21, %v1844_v40  ;;  %v1839_v2 = vmul.f32 %v4709_v20, %v1662_v59  ;;  %v1852_v40 = vadd.f32 %v1836_v8, %v4655_v37 }
 0x262   : > { %2843 = vperm.xlu1 %3793, %v3728_v17   ;;  %2839 = vperm.xlu0 %3792, %v3727_v47   ;;  %v1841_v45 = vmul.f32 %v4719_v1, %v1664_v31  ;;  %v1840_v21 = vmul.f32 %v4721_v41, %v1663_v53  ;;  %v1854_v11 = vadd.f32 %v1838_v42, %v4673_v24  ;;  %v5029_v24 = vld [vmem:[%s4212_s18 + $0x2] sm:$0x3] }
 0x263   : > { %v1855_v20 = vadd.f32 %v1839_v2, %v4671_v38 }
 0x264   : > { %v2062_v46 = vpop.permute.xlu1 %2061  ;;  %v2060_v39 = vpop.permute.xlu0 %2059  ;;  %v1857_v60 = vadd.f32 %v1841_v45, %v4681_v63  ;;  %v1856_v25 = vadd.f32 %v1840_v21, %v4683_v0  ;;  %v5040_v63 = vld [vmem:[%s4212_s18 + $0x4] sm:$0x3] }
 0x265   : > { %v4982_v23 = vadd.f32 %v2062_v46, %v1847_v55  ;;  %v4984_v13 = vadd.f32 %v2060_v39, %v1846_v15  ;;  %v2132_v55 = vunpack.c.l.bf16 %v5029_v24  ;;  %v2131_v15 = vunpack.c.l.bf16 %v5032_v12 }
 0x266   : > { %2851 = vperm.xlu1 %3793, %v3730_v43   ;;  %2847 = vperm.xlu0 %3792, %v3729_v49   ;;  %v5037_v43 = vld [vmem:[%s4212_s18 + $0x6] sm:$0x3]  ;;  %v2133_v34 = vunpack.c.l.bf16 %v5040_v63 }
 0x267   : > { %v2134_v33 = vunpack.c.l.bf16 %v5037_v43 }
 0x268   : > { %v2066_v19 = vpop.permute.xlu1 %2065  ;;  %v2064_v51 = vpop.permute.xlu0 %2063 }
 0x269   : > { %v4992_v52 = vadd.f32 %v2066_v19, %v1849_v36  ;;  %v4994_v4 = vadd.f32 %v2064_v51, %v1848_v61  ;;  %v2136_v19 = vunpack.c.l.bf16 %v5049_v7  ;;  %v2135_v51 = vunpack.c.l.bf16 %v5052_v3 }
 0x26c   : > { %v2070_v26 = vpop.permute.xlu1 %2069  ;;  %v2068_v29 = vpop.permute.xlu0 %2067 }
 0x26d   : > { %v5002_v18 = vadd.f32 %v2070_v26, %v1851_v30  ;;  %v5004_v10 = vadd.f32 %v2068_v29, %v1850_v57  ;;  %v2138_v29 = vunpack.c.l.bf16 %v5067_v5 }
 0x270   : > { %v2074_v17 = vpop.permute.xlu1 %2073  ;;  %v2072_v32 = vpop.permute.xlu0 %2071 }
 0x271   : > { %v5010_v47 = vadd.f32 %v2074_v17, %v1853_v62  ;;  %v5012_v56 = vadd.f32 %v2072_v32, %v1852_v40  ;;  %v5085_v62 = vld [vmem:[%s4212_s18 + $0x12] sm:$0x3]  ;;  %v5088_v40 = vld [vmem:[%s4212_s18 + $0x10] sm:$0x3] }
 0x272   : > { %v5481_v21 = vunpack.c.l.bf16 %v5085_v62 }
 0x274   : > { %v2078_v9 = vpop.permute.xlu1 %2077  ;;  %v2076_v37 = vpop.permute.xlu0 %2075 }
 0x275   : > { %v5018_v58 = vadd.f32 %v2078_v9, %v1855_v20  ;;  %v5020_v6 = vadd.f32 %v2076_v37, %v1854_v11 }
 0x278   : > { %v2082_v14 = vpop.permute.xlu1 %2081  ;;  %v2080_v1 = vpop.permute.xlu0 %2079 }
 0x279   : > { %v5024_v41 = vadd.f32 %v2082_v14, %v1857_v60  ;;  %v5026_v38 = vadd.f32 %v2080_v1, %v1856_v25  ;;  %v5103_v60 = vld [vmem:[%s4212_s18 + $0x16] sm:$0x3]  ;;  %v5106_v25 = vld [vmem:[%s4212_s18 + $0x14] sm:$0x3] }
 0x285   : > { %v2250_v0 = vpop.permute.xlu1 %2249  ;;  %v2246_v49 = vpop.permute.xlu0 %2245 }
 0x286   : > { %v2309_v46 = vmul.f32 %v2250_v0, %v2132_v55  ;;  %v2308_v39 = vmul.f32 %v2246_v49, %v2131_v15  ;;  %v5479_v49 = vunpack.c.l.bf16 %v5103_v60 }
 0x288   : > { %v3636_v50 = vrot.slane %v2309_v46, 9  ;;  %v3635_v16 = vrot.slane %v2308_v39, 9 }
 0x289   : > { %v2258_v36 = vpop.permute.xlu1 %2257  ;;  %v2254_v61 = vpop.permute.xlu0 %2253 }
 0x28a   : > { %v5057_v59 = vadd.f32 %v3636_v50, %v4951_v28  ;;  %v5060_v27 = vadd.f32 %v3635_v16, %v4953_v35  ;;  %v2311_v44 = vmul.f32 %v2258_v36, %v2134_v33  ;;  %v2310_v8 = vmul.f32 %v2254_v61, %v2133_v34  ;;  %v5121_v36 = vld [vmem:[%s4212_s18 + $0x1a] sm:$0x3]  ;;  %v5124_v61 = vld [vmem:[%s4212_s18 + $0x18] sm:$0x3] }
 0x28b   : > { %v2137_v35 = vunpack.c.l.bf16 %v5070_v22 }
 0x28c   : > { %v3638_v30 = vrot.slane %v2311_v44, 9  ;;  %v3637_v57 = vrot.slane %v2310_v8, 9 }
 0x28d   : > { %v2266_v26 = vpop.permute.xlu1 %2265  ;;  %v2262_v28 = vpop.permute.xlu0 %2261 }
 0x28e   : > { %v5075_v31 = vadd.f32 %v3638_v30, %v4966_v48  ;;  %v5078_v53 = vadd.f32 %v3637_v57, %v4968_v54  ;;  %v2313_v2 = vmul.f32 %v2266_v26, %v2136_v19  ;;  %v2312_v42 = vmul.f32 %v2262_v28, %v2135_v51 }
 0x28f   : > { %v5480_v54 = vunpack.c.l.bf16 %v5088_v40  ;;  %v5477_v57 = vunpack.c.l.bf16 %v5121_v36 }
 0x290   : > { %v3640_v17 = vrot.slane %v2313_v2, 9  ;;  %v3639_v32 = vrot.slane %v2312_v42, 9 }
 0x291   : > { %v2274_v45 = vpop.permute.xlu1 %2273  ;;  %v2270_v48 = vpop.permute.xlu0 %2269 }
 0x292   : > { %v5093_v20 = vadd.f32 %v3640_v17, %v4982_v23  ;;  %v5096_v11 = vadd.f32 %v3639_v32, %v4984_v13  ;;  %v2315_v9 = vmul.f32 %v2274_v45, %v2138_v29  ;;  %v2314_v37 = vmul.f32 %v2270_v48, %v2137_v35  ;;  %v5139_v17 = vld [vmem:[%s4212_s18 + $0x1e] sm:$0x3]  ;;  %v5142_v32 = vld [vmem:[%s4212_s18 + $0x1c] sm:$0x3] }
 0x293   : > { %v5478_v13 = vunpack.c.l.bf16 %v5106_v25 }
 0x294   : > { %v3642_v14 = vrot.slane %v2315_v9, 9  ;;  %v3641_v1 = vrot.slane %v2314_v37, 9  ;;  %v5475_v37 = vunpack.c.l.bf16 %v5139_v17 }
 0x295   : > { %v2282_v0 = vpop.permute.xlu1 %2281  ;;  %v2278_v23 = vpop.permute.xlu0 %2277 }
 0x296   : > { %v5111_v46 = vadd.f32 %v3642_v14, %v4992_v52  ;;  %v5114_v39 = vadd.f32 %v3641_v1, %v4994_v4  ;;  %v2317_v50 = vmul.f32 %v2282_v0, %v5481_v21  ;;  %v2316_v16 = vmul.f32 %v2278_v23, %v5480_v54  ;;  %v2411_v54 = vld [vmem:[%s4491_s26 + $0xe] sm:$0x3]  ;;  %v2418_v21 = vld [vmem:[%s4491_s26 + $0x1c] sm:$0x3] }
 0x297   : > { %v5474_v4 = vunpack.c.l.bf16 %v5124_v61 }
 0x298   : > { %v3644_v44 = vrot.slane %v2317_v50, 9  ;;  %v3643_v8 = vrot.slane %v2316_v16, 9  ;;  %v2405_v50 = vld [vmem:[%s4491_s26 + $0x2] sm:$0x3]  ;;  %v2404_v16 = vld [vmem:[%s4491_s26] sm:$0x3] }
 0x299   : > { %v2290_v30 = vpop.permute.xlu1 %2289  ;;  %v2286_v52 = vpop.permute.xlu0 %2285 }
 0x29a   : > { %v5129_v26 = vadd.f32 %v3644_v44, %v5002_v18  ;;  %v5132_v28 = vadd.f32 %v3643_v8, %v5004_v10  ;;  %v2319_v2 = vmul.f32 %v2290_v30, %v5479_v49  ;;  %v2318_v42 = vmul.f32 %v2286_v52, %v5478_v13 }
 0x29b   : > { %v5476_v10 = vunpack.c.l.bf16 %v5142_v32 }
 0x29c   : > { %v3646_v45 = vrot.slane %v2319_v2, 9  ;;  %v3645_v48 = vrot.slane %v2318_v42, 9  ;;  %v2421_v2 = vunpack.c.l.bf16 %v2405_v50 }
 0x29d   : > { %v2298_v9 = vpop.permute.xlu1 %2297  ;;  %v2294_v18 = vpop.permute.xlu0 %2293 }
 0x29e   : > { %v5147_v14 = vadd.f32 %v3646_v45, %v5010_v47  ;;  %v5150_v1 = vadd.f32 %v3645_v48, %v5012_v56  ;;  %v2321_v0 = vmul.f32 %v2298_v9, %v5477_v57  ;;  %v2320_v23 = vmul.f32 %v2294_v18, %v5474_v4  ;;  %v2407_v9 = vld [vmem:[%s4491_s26 + $0x6] sm:$0x3]  ;;  %v2406_v18 = vld [vmem:[%s4491_s26 + $0x4] sm:$0x3] }
 0x29f   : > { %v2420_v47 = vunpack.c.l.bf16 %v2404_v16  ;;  %v2423_v4 = vunpack.c.l.bf16 %v2407_v9 }
 0x2a0   : > { %v3648_v44 = vrot.slane %v2321_v0, 9  ;;  %v3647_v8 = vrot.slane %v2320_v23, 9 }
 0x2a1   : > { %v2306_v30 = vpop.permute.xlu1 %2305  ;;  %v2302_v52 = vpop.permute.xlu0 %2301 }
 0x2a2   : > { %v5159_v42 = vadd.f32 %v3648_v44, %v5018_v58  ;;  %v5162_v56 = vadd.f32 %v3647_v8, %v5020_v6  ;;  %v2323_v45 = vmul.f32 %v2306_v30, %v5475_v37  ;;  %v2322_v48 = vmul.f32 %v2302_v52, %v5476_v10  ;;  %v2409_v37 = vld [vmem:[%s4491_s26 + $0xa] sm:$0x3]  ;;  %v2408_v52 = vld [vmem:[%s4491_s26 + $0x8] sm:$0x3] }
 0x2a3   : > { %v2422_v58 = vunpack.c.l.bf16 %v2406_v18  ;;  %v2425_v13 = vunpack.c.l.bf16 %v2409_v37  ;;  %v2424_v9 = vunpack.c.l.bf16 %v2408_v52 }
 0x2a4   : > { %v3650_v0 = vrot.slane %v2323_v45, 9  ;;  %v3649_v23 = vrot.slane %v2322_v48, 9 }
 0x2a5   : > { %v2539_v50 = vpop.permute.xlu1 %2538  ;;  %v2535_v16 = vpop.permute.xlu0 %2534 }
 0x2a6   : > { %v5171_v6 = vadd.f32 %v3650_v0, %v5024_v41  ;;  %v5174_v44 = vadd.f32 %v3649_v23, %v5026_v38  ;;  %v2598_v8 = vmul.f32 %v2539_v50, %v2421_v2  ;;  %v2597_v30 = vmul.f32 %v2535_v16, %v2420_v47  ;;  %v2410_v41 = vld [vmem:[%s4491_s26 + $0xc] sm:$0x3] }
 0x2a7   : > { %v2427_v16 = vunpack.c.l.bf16 %v2411_v54  ;;  %v2426_v37 = vunpack.c.l.bf16 %v2410_v41 }
 0x2a8   : > { %v3684_v10 = vrot.slane %v2598_v8, 9  ;;  %v3683_v57 = vrot.slane %v2597_v30, 9 }
 0x2a9   : > { %v2547_v45 = vpop.permute.xlu1 %2546  ;;  %v2543_v48 = vpop.permute.xlu0 %2542 }
 0x2aa   : > { %v2600_v18 = vmul.f32 %v2547_v45, %v2423_v4  ;;  %v2599_v49 = vmul.f32 %v2543_v48, %v2422_v58  ;;  %v5181_v0 = vadd.f32 %v3684_v10, %v5057_v59  ;;  %v5184_v38 = vadd.f32 %v3683_v57, %v5060_v27  ;;  %v2413_v4 = vld [vmem:[%s4491_s26 + $0x12] sm:$0x3]  ;;  %v2412_v58 = vld [vmem:[%s4491_s26 + $0x10] sm:$0x3] }
 0x2ab   : > { %v2429_v45 = vunpack.c.l.bf16 %v2413_v4  ;;  %v2428_v54 = vunpack.c.l.bf16 %v2412_v58 }
 0x2ac   : > { %v3686_v2 = vrot.slane %v2600_v18, 9  ;;  %v3685_v47 = vrot.slane %v2599_v49, 9 }
 0x2ad   : > { %v2555_v23 = vpop.permute.xlu1 %2554  ;;  %v2551_v50 = vpop.permute.xlu0 %2550 }
 0x2ae   : > { %v2602_v8 = vmul.f32 %v2555_v23, %v2425_v13  ;;  %v2601_v30 = vmul.f32 %v2551_v50, %v2424_v9  ;;  %v5189_v52 = vadd.f32 %v3686_v2, %v5075_v31  ;;  %v5192_v59 = vadd.f32 %v3685_v47, %v5078_v53  ;;  %v2415_v13 = vld [vmem:[%s4491_s26 + $0x16] sm:$0x3]  ;;  %v2414_v9 = vld [vmem:[%s4491_s26 + $0x14] sm:$0x3] }
 0x2af   : > { %v2431_v50 = vunpack.c.l.bf16 %v2415_v13 }
 0x2b0   : > { %v3688_v27 = vrot.slane %v2602_v8, 9  ;;  %v3687_v57 = vrot.slane %v2601_v30, 9  ;;  %v2430_v8 = vunpack.c.l.bf16 %v2414_v9  ;;  %v2419_v9 = vld [vmem:[%s4491_s26 + $0x1e] sm:$0x3] }
 0x2b1   : > { %v2563_v10 = vpop.permute.xlu1 %2562  ;;  %v2559_v49 = vpop.permute.xlu0 %2558 }
 0x2b2   : > { %v2604_v48 = vmul.f32 %v2563_v10, %v2427_v16  ;;  %v2603_v18 = vmul.f32 %v2559_v49, %v2426_v37  ;;  %v5197_v41 = vadd.f32 %v3688_v27, %v5093_v20  ;;  %v5200_v31 = vadd.f32 %v3687_v57, %v5096_v11  ;;  %v2417_v16 = vld [vmem:[%s4491_s26 + $0x1a] sm:$0x3]  ;;  %v2416_v37 = vld [vmem:[%s4491_s26 + $0x18] sm:$0x3] }
 0x2b3   : > { %v2433_v49 = vunpack.c.l.bf16 %v2417_v16 }
 0x2b4   : > { %v3690_v53 = vrot.slane %v2604_v48, 9  ;;  %v3689_v2 = vrot.slane %v2603_v18, 9  ;;  %v2432_v48 = vunpack.c.l.bf16 %v2416_v37 }
 0x2b5   : > { %v2571_v47 = vpop.permute.xlu1 %2570  ;;  %v2567_v23 = vpop.permute.xlu0 %2566 }
 0x2b6   : > { %v2606_v30 = vmul.f32 %v2571_v47, %v2429_v45  ;;  %v2605_v4 = vmul.f32 %v2567_v23, %v2428_v54  ;;  %v5205_v58 = vadd.f32 %v3690_v53, %v5111_v46  ;;  %v5208_v20 = vadd.f32 %v3689_v2, %v5114_v39 }
 0x2b7   : > { %v2435_v47 = vunpack.c.l.bf16 %v2419_v9  ;;  %v2434_v23 = vunpack.c.l.bf16 %v2418_v21 }
 0x2b8   : > { %v3692_v11 = vrot.slane %v2606_v30, 9  ;;  %v3691_v27 = vrot.slane %v2605_v4, 9 }
 0x2b9   : > { %v2579_v57 = vpop.permute.xlu1 %2578  ;;  %v2575_v10 = vpop.permute.xlu0 %2574 }
 0x2ba   : > { %v2608_v18 = vmul.f32 %v2579_v57, %v2431_v50  ;;  %v2607_v13 = vmul.f32 %v2575_v10, %v2430_v8  ;;  %v5213_v45 = vadd.f32 %v3692_v11, %v5129_v26  ;;  %v5216_v54 = vadd.f32 %v3691_v27, %v5132_v28 }
 0x2bc   : > { %v3694_v46 = vrot.slane %v2608_v18, 9  ;;  %v3693_v53 = vrot.slane %v2607_v13, 9 }
 0x2bd   : > { %v2587_v39 = vpop.permute.xlu1 %2586  ;;  %v2583_v2 = vpop.permute.xlu0 %2582 }
 0x2be   : > { %v2610_v30 = vmul.f32 %v2587_v39, %v2433_v49  ;;  %v2609_v4 = vmul.f32 %v2583_v2, %v2432_v48  ;;  %v5219_v16 = vadd.f32 %v3694_v46, %v5147_v14  ;;  %v5222_v50 = vadd.f32 %v3693_v53, %v5150_v1 }
 0x2c0   : > { %v3696_v8 = vrot.slane %v2610_v30, 9  ;;  %v3695_v26 = vrot.slane %v2609_v4, 9  ;;  %v5552_v30 = vunpack.c.l.bf16 %v5085_v62 }
 0x2c1   : > { %v2595_v37 = vpop.permute.xlu1 %2594  ;;  %v2591_v11 = vpop.permute.xlu0 %2590 }
 0x2c2   : > { %v2612_v28 = vmul.f32 %v2595_v37, %v2435_v47  ;;  %v2611_v27 = vmul.f32 %v2591_v11, %v2434_v23  ;;  %v5225_v57 = vadd.f32 %v3696_v8, %v5159_v42  ;;  %v5228_v10 = vadd.f32 %v3695_v26, %v5162_v56 }
 0x2c3   : > { %v5553_v8 = vunpack.c.l.bf16 %v5088_v40  ;;  %v5554_v37 = vunpack.c.l.bf16 %v5103_v60 }
 0x2c4   : > { %v3698_v21 = vrot.slane %v2612_v28, 9  ;;  %v3697_v49 = vrot.slane %v2611_v27, 9  ;;  %v5555_v28 = vunpack.c.l.bf16 %v5106_v25 }
 0x2c5   : > { %v2796_v48 = vpop.permute.xlu1 %2795  ;;  %v2792_v14 = vpop.permute.xlu0 %2791 }
 0x2c6   : > { %v2855_v1 = vmul.f32 %v2796_v48, %v2132_v55  ;;  %v2854_v18 = vmul.f32 %v2792_v14, %v2131_v15  ;;  %v5235_v13 = vadd.f32 %v3697_v49, %v5174_v44  ;;  %v5238_v9 = vadd.f32 %v3698_v21, %v5171_v6 }
 0x2c7   : > { %v5556_v48 = vunpack.c.l.bf16 %v5121_v36  ;;  %v3747_v36 = vld [vmem:[%s5446_s5] ss:$0 sm:$0xff] }
 0x2c8   : > { %v3732_v42 = vrot.slane %v2855_v1, 9  ;;  %v3731_v46 = vrot.slane %v2854_v18, 9  ;;  %v5557_v1 = vunpack.c.l.bf16 %v5124_v61 }
 0x2c9   : > { %v2804_v56 = vpop.permute.xlu1 %2803  ;;  %v2800_v53 = vpop.permute.xlu0 %2799 }
 0x2ca   : > { %v2857_v39 = vmul.f32 %v2804_v56, %v2134_v33  ;;  %v2856_v24 = vmul.f32 %v2800_v53, %v2133_v34  ;;  %2920 = vrot.lane.b32.xlu1 %v3732_v42, %s3819_s19  ;;  %2918 = vrot.lane.b32.xlu0 %v3731_v46, %s3819_s19  ;;  %v5558_v46 = vunpack.c.l.bf16 %v5142_v32  ;;  %v3749_v53 = vld [vmem:[%s5446_s5 + $0x2] ss:$0 sm:$0xff]  ;;  %v3748_v32 = vld [vmem:[%s5446_s5 + $0x1] ss:$0 sm:$0xff] }
 0x2cc   : > { %v3734_v12 = vrot.slane %v2857_v39, 9  ;;  %v3733_v55 = vrot.slane %v2856_v24, 9  ;;  %v3751_v39 = vld [vmem:[%s5446_s5 + $0x4] ss:$0 sm:$0xff]  ;;  %v3750_v24 = vld [vmem:[%s5446_s5 + $0x3] ss:$0 sm:$0xff] }
 0x2cd   : > { %v2812_v15 = vpop.permute.xlu1 %2811  ;;  %v2808_v44 = vpop.permute.xlu0 %2807 }
 0x2ce   : > { %v2859_v6 = vmul.f32 %v2812_v15, %v2136_v19  ;;  %v2858_v2 = vmul.f32 %v2808_v44, %v2135_v51  ;;  %2924 = vrot.lane.b32.xlu1 %v3734_v12, %s3819_s19  ;;  %2922 = vrot.lane.b32.xlu0 %v3733_v55, %s3819_s19  ;;  %v3753_v12 = vld [vmem:[%s5446_s5 + $0x6] ss:$0 sm:$0xff]  ;;  %v3752_v55 = vld [vmem:[%s5446_s5 + $0x5] ss:$0 sm:$0xff] }
 0x2cf   : > { %v3755_v15 = vld [vmem:[%s5446_s5 + $0x8] ss:$0 sm:$0xff]  ;;  %v3754_v44 = vld [vmem:[%s5446_s5 + $0x7] ss:$0 sm:$0xff] }
 0x2d0   : > { %v3736_v43 = vrot.slane %v2859_v6, 9  ;;  %v3735_v63 = vrot.slane %v2858_v2, 9  ;;  %v3757_v6 = vld [vmem:[%s5446_s5 + $0xa] ss:$0 sm:$0xff]  ;;  %v3756_v2 = vld [vmem:[%s5446_s5 + $0x9] ss:$0 sm:$0xff] }
 0x2d1   : > { %v2820_v33 = vpop.permute.xlu1 %2819  ;;  %v2816_v34 = vpop.permute.xlu0 %2815 }
 0x2d2   : > { %v2861_v47 = vmul.f32 %v2820_v33, %v2138_v29  ;;  %v2860_v23 = vmul.f32 %v2816_v34, %v2137_v35  ;;  %2928 = vrot.lane.b32.xlu1 %v3736_v43, %s3819_s19  ;;  %2926 = vrot.lane.b32.xlu0 %v3735_v63, %s3819_s19  ;;  %v3759_v43 = vld [vmem:[%s5446_s5 + $0xc] ss:$0 sm:$0xff]  ;;  %v3758_v63 = vld [vmem:[%s5446_s5 + $0xb] ss:$0 sm:$0xff] }
 0x2d3   : > { %v3761_v34 = vld [vmem:[%s5446_s5 + $0xe] ss:$0 sm:$0xff] }
 0x2d4   : > { %v3738_v7 = vrot.slane %v2861_v47, 9  ;;  %v3737_v3 = vrot.slane %v2860_v23, 9  ;;  %v3760_v47 = vld [vmem:[%s5446_s5 + $0xd] ss:$0 sm:$0xff]  ;;  %v5559_v23 = vunpack.c.l.bf16 %v5139_v17 }
 0x2d5   : > { %v2828_v19 = vpop.permute.xlu1 %2827  ;;  %v2824_v51 = vpop.permute.xlu0 %2823 }
 0x2d6   : > { %v2863_v4 = vmul.f32 %v2828_v19, %v5552_v30  ;;  %v2862_v26 = vmul.f32 %v2824_v51, %v5553_v8  ;;  %2932 = vrot.lane.b32.xlu1 %v3738_v7, %s3819_s19  ;;  %2930 = vrot.lane.b32.xlu0 %v3737_v3, %s3819_s19  ;;  %v3762_v3 = vld [vmem:[%s5446_s5 + $0xf] ss:$0 sm:$0xff] }
 0x2d8   : > { %v3740_v5 = vrot.slane %v2863_v4, 9  ;;  %v3739_v22 = vrot.slane %v2862_v26, 9 }
 0x2d9   : > { %v2836_v29 = vpop.permute.xlu1 %2835  ;;  %v2832_v35 = vpop.permute.xlu0 %2831 }
 0x2da   : > { %v2865_v11 = vmul.f32 %v2836_v29, %v5554_v37  ;;  %v2864_v27 = vmul.f32 %v2832_v35, %v5555_v28  ;;  %2936 = vrot.lane.b32.xlu1 %v3740_v5, %s3819_s19  ;;  %2934 = vrot.lane.b32.xlu0 %v3739_v22, %s3819_s19 }
 0x2dc   : > { %v3742_v62 = vrot.slane %v2865_v11, 9  ;;  %v3741_v40 = vrot.slane %v2864_v27, 9 }
 0x2dd   : > { %v2844_v21 = vpop.permute.xlu1 %2843  ;;  %v2840_v49 = vpop.permute.xlu0 %2839 }
 0x2de   : > { %v2867_v14 = vmul.f32 %v2844_v21, %v5556_v48  ;;  %v2866_v18 = vmul.f32 %v2840_v49, %v5557_v1  ;;  %2940 = vrot.lane.b32.xlu1 %v3742_v62, %s3819_s19  ;;  %2938 = vrot.lane.b32.xlu0 %v3741_v40, %s3819_s19 }
 0x2e0   : > { %v3744_v60 = vrot.slane %v2867_v14, 9  ;;  %v3743_v25 = vrot.slane %v2866_v18, 9 }
 0x2e1   : > { %v2848_v42 = vpop.permute.xlu0 %2847  ;;  %v2852_v33 = vpop.permute.xlu1 %2851 }
 0x2e2   : > { %v2868_v56 = vmul.f32 %v2848_v42, %v5558_v46  ;;  %2944 = vrot.lane.b32.xlu1 %v3744_v60, %s3819_s19  ;;  %2942 = vrot.lane.b32.xlu0 %v3743_v25, %s3819_s19  ;;  %v2869_v7 = vmul.f32 %v2852_v33, %v5559_v23 }
 0x2e4   : > { %v3745_v61 = vrot.slane %v2868_v56, 9  ;;  %v3746_v19 = vrot.slane %v2869_v7, 9 }
 0x2e6   : > { %3079 = vperm.xlu1 %3793, %v3747_v36   ;;  %2946 = vrot.lane.b32.xlu0 %v3745_v61, %s3819_s19 }
 0x2ea   : > { %3087 = vperm.xlu1 %3793, %v3749_v53   ;;  %3083 = vperm.xlu0 %3792, %v3748_v32  }
 0x2ee   : > { %3095 = vperm.xlu1 %3793, %v3751_v39   ;;  %3091 = vperm.xlu0 %3792, %v3750_v24  }
 0x2f2   : > { %3103 = vperm.xlu1 %3793, %v3753_v12   ;;  %3099 = vperm.xlu0 %3792, %v3752_v55  }
 0x2f6   : > { %3111 = vperm.xlu1 %3793, %v3755_v15   ;;  %3107 = vperm.xlu0 %3792, %v3754_v44  }
 0x2fa   : > { %3119 = vperm.xlu1 %3793, %v3757_v6   ;;  %3115 = vperm.xlu0 %3792, %v3756_v2  }
 0x2fe   : > { %3127 = vperm.xlu1 %3793, %v3759_v43   ;;  %3123 = vperm.xlu0 %3792, %v3758_v63  }
 0x302   : > { %3135 = vperm.xlu1 %3793, %v3761_v34   ;;  %3131 = vperm.xlu0 %3792, %v3760_v47  }
 0x306   : > { %2948 = vrot.lane.b32.xlu1 %v3746_v19, %s3819_s19  ;;  %3139 = vperm.xlu0 %3792, %v3762_v3   ;;  %s3426_s19 = sshll.u32 %s657_s17, 4 }
 0x307   : > { %s5341_s11 = scalar_lea.vmem [#allocation6], %s3426_s19 }
 0x33c   : > { %v2921_v51 = vpop.permute.xlu1 %2920  ;;  %v2919_v30 = vpop.permute.xlu0 %2918 }
 0x33d   : > { %v2966_v62 = vadd.f32 %v2919_v30, %v5184_v38  ;;  %v2967_v48 = vadd.f32 %v2921_v51, %v5181_v0 }
 0x340   : > { %v2925_v4 = vpop.permute.xlu1 %2924  ;;  %v2923_v8 = vpop.permute.xlu0 %2922 }
 0x341   : > { %v2968_v14 = vadd.f32 %v2923_v8, %v5192_v59  ;;  %v2969_v42 = vadd.f32 %v2925_v4, %v5189_v52 }
 0x344   : > { %v2927_v26 = vpop.permute.xlu0 %2926  ;;  %v2929_v5 = vpop.permute.xlu1 %2928 }
 0x345   : > { %v2970_v46 = vadd.f32 %v2927_v26, %v5200_v31  ;;  %v2971_v32 = vadd.f32 %v2929_v5, %v5197_v41 }
 0x348   : > { %v2931_v22 = vpop.permute.xlu0 %2930  ;;  %v2933_v17 = vpop.permute.xlu1 %2932 }
 0x349   : > { %v2972_v39 = vadd.f32 %v2931_v22, %v5208_v20  ;;  %v2973_v44 = vadd.f32 %v2933_v17, %v5205_v58 }
 0x34c   : > { %v2935_v29 = vpop.permute.xlu0 %2934  ;;  %v2937_v35 = vpop.permute.xlu1 %2936 }
 0x34d   : > { %v2974_v6 = vadd.f32 %v2935_v29, %v5216_v54  ;;  %v2975_v34 = vadd.f32 %v2937_v35, %v5213_v45 }
 0x350   : > { %v2939_v37 = vpop.permute.xlu0 %2938  ;;  %v2941_v11 = vpop.permute.xlu1 %2940 }
 0x351   : > { %v2976_v47 = vadd.f32 %v2939_v37, %v5222_v50  ;;  %v2977_v51 = vadd.f32 %v2941_v11, %v5219_v16 }
 0x354   : > { %v2943_v28 = vpop.permute.xlu0 %2942  ;;  %v5332_v27 = vpop.permute.xlu1 %2944 }
 0x355   : > { %v2978_v30 = vadd.f32 %v2943_v28, %v5228_v10  ;;  %v2979_v22 = vadd.f32 %v5332_v27, %v5225_v57 }
 0x358   : > { %v5337_v40 = vpop.permute.xlu0 %2946 }
 0x359   : > { %v2980_v16 = vadd.f32 %v5337_v40, %v5235_v13 }
 0x361   : > { %v3080_v21 = vpop.permute.xlu1 %3079 }
 0x362   : > { %v3142_v49 = vadd.f32 %v3080_v21, %v2966_v62 }
 0x364   : > { %v3158_v1 = vpack.c.bf16 %v3142_v49, %v3142_v49 }
 0x365   : > { %v3088_v18 = vpop.permute.xlu1 %3087  ;;  %v3084_v60 = vpop.permute.xlu0 %3083 }
 0x366   : > { %3175 = vst.msk [vmem:[%s5341_s11] sm:$0x1] %vm3174_vm0, %v3158_v1  ;;  %v3144_v38 = vadd.f32 %v3088_v18, %v2968_v14  ;;  %v3143_v25 = vadd.f32 %v3084_v60, %v2967_v48 }
 0x368   : > { %v3160_v0 = vpack.c.bf16 %v3144_v38, %v3144_v38  ;;  %v3159_v59 = vpack.c.bf16 %v3143_v25, %v3143_v25 }
 0x369   : > { %v3096_v56 = vpop.permute.xlu1 %3095  ;;  %v3092_v36 = vpop.permute.xlu0 %3091 }
 0x36a   : > { %3177 = vst.msk [vmem:[%s5341_s11 + $0x2] sm:$0x1] %vm3174_vm0, %v3160_v0  ;;  %3176 = vst.msk [vmem:[%s5341_s11 + $0x1] sm:$0x1] %vm3174_vm0, %v3159_v59  ;;  %v3146_v61 = vadd.f32 %v3096_v56, %v2970_v46  ;;  %v3145_v53 = vadd.f32 %v3092_v36, %v2969_v42 }
 0x36c   : > { %v3162_v52 = vpack.c.bf16 %v3146_v61, %v3146_v61  ;;  %v3161_v24 = vpack.c.bf16 %v3145_v53, %v3145_v53 }
 0x36d   : > { %v3104_v31 = vpop.permute.xlu1 %3103  ;;  %v3100_v12 = vpop.permute.xlu0 %3099 }
 0x36e   : > { %3179 = vst.msk [vmem:[%s5341_s11 + $0x4] sm:$0x1] %vm3174_vm0, %v3162_v52  ;;  %3178 = vst.msk [vmem:[%s5341_s11 + $0x3] sm:$0x1] %vm3174_vm0, %v3161_v24  ;;  %v3148_v55 = vadd.f32 %v3104_v31, %v2972_v39  ;;  %v3147_v15 = vadd.f32 %v3100_v12, %v2971_v32 }
 0x370   : > { %v3164_v41 = vpack.c.bf16 %v3148_v55, %v3148_v55  ;;  %v3163_v2 = vpack.c.bf16 %v3147_v15, %v3147_v15 }
 0x371   : > { %v3112_v20 = vpop.permute.xlu1 %3111  ;;  %v3108_v43 = vpop.permute.xlu0 %3107  ;;  %v3217_v49 = vld [vmem:[%s5341_s11 + $0x1] sm:$0x1] (%p3889_p5)  ;;  %v3219_v48 = vld [vmem:[%s5341_s11 + $0x2] sm:$0x1] (%p3889_p5) }
 0x372   : > { %3181 = vst.msk [vmem:[%s5341_s11 + $0x6] sm:$0x1] %vm3174_vm0, %v3164_v41  ;;  %3180 = vst.msk [vmem:[%s5341_s11 + $0x5] sm:$0x1] %vm3174_vm0, %v3163_v2  ;;  %v3150_v63 = vadd.f32 %v3112_v20, %v2974_v6  ;;  %v3149_v33 = vadd.f32 %v3108_v43, %v2973_v44 }
 0x373   : > { %3218 = vst [vmem:[%s5397_s7 + $0x2] sm:$0x1] (%p3889_p5), %v3217_v49  ;;  %3220 = vst [vmem:[%s5397_s7 + $0x4] sm:$0x1] (%p3889_p5), %v3219_v48 }
 0x374   : > { %v3166_v58 = vpack.c.bf16 %v3150_v63, %v3150_v63  ;;  %v3165_v23 = vpack.c.bf16 %v3149_v33, %v3149_v33 }
 0x375   : > { %v3120_v54 = vpop.permute.xlu1 %3119  ;;  %v3116_v7 = vpop.permute.xlu0 %3115  ;;  %v3221_v14 = vld [vmem:[%s5341_s11 + $0x3] sm:$0x1] (%p3889_p5)  ;;  %v3223_v1 = vld [vmem:[%s5341_s11 + $0x4] sm:$0x1] (%p3889_p5) }
 0x376   : > { %3183 = vst.msk [vmem:[%s5341_s11 + $0x8] sm:$0x1] %vm3174_vm0, %v3166_v58  ;;  %3182 = vst.msk [vmem:[%s5341_s11 + $0x7] sm:$0x1] %vm3174_vm0, %v3165_v23  ;;  %v3152_v3 = vadd.f32 %v3120_v54, %v2976_v47  ;;  %v3151_v19 = vadd.f32 %v3116_v7, %v2975_v34 }
 0x377   : > { %3222 = vst [vmem:[%s5397_s7 + $0x6] sm:$0x1] (%p3889_p5), %v3221_v14  ;;  %3224 = vst [vmem:[%s5397_s7 + $0x8] sm:$0x1] (%p3889_p5), %v3223_v1 }
 0x378   : > { %v3168_v45 = vpack.c.bf16 %v3152_v3, %v3152_v3  ;;  %v3167_v4 = vpack.c.bf16 %v3151_v19, %v3151_v19 }
 0x379   : > { %v3128_v50 = vpop.permute.xlu1 %3127  ;;  %v3124_v8 = vpop.permute.xlu0 %3123  ;;  %v3225_v18 = vld [vmem:[%s5341_s11 + $0x5] sm:$0x1] (%p3889_p5)  ;;  %v3227_v60 = vld [vmem:[%s5341_s11 + $0x6] sm:$0x1] (%p3889_p5) }
 0x37a   : > { %3185 = vst.msk [vmem:[%s5341_s11 + $0xa] sm:$0x1] %vm3174_vm0, %v3168_v45  ;;  %3184 = vst.msk [vmem:[%s5341_s11 + $0x9] sm:$0x1] %vm3174_vm0, %v3167_v4  ;;  %v3154_v26 = vadd.f32 %v3128_v50, %v2978_v30  ;;  %v3153_v5 = vadd.f32 %v3124_v8, %v2977_v51 }
 0x37b   : > { %3226 = vst [vmem:[%s5397_s7 + $0xa] sm:$0x1] (%p3889_p5), %v3225_v18  ;;  %3228 = vst [vmem:[%s5397_s7 + $0xc] sm:$0x1] (%p3889_p5), %v3227_v60 }
 0x37c   : > { %v3170_v10 = vpack.c.bf16 %v3154_v26, %v3154_v26  ;;  %v3169_v17 = vpack.c.bf16 %v3153_v5, %v3153_v5 }
 0x37d   : > { %v3136_v29 = vpop.permute.xlu1 %3135  ;;  %v3132_v35 = vpop.permute.xlu0 %3131  ;;  %v3229_v38 = vld [vmem:[%s5341_s11 + $0x7] sm:$0x1] (%p3889_p5)  ;;  %v3231_v25 = vld [vmem:[%s5341_s11 + $0x8] sm:$0x1] (%p3889_p5) }
 0x37e   : > { %3187 = vst.msk [vmem:[%s5341_s11 + $0xc] sm:$0x1] %vm3174_vm0, %v3170_v10  ;;  %3186 = vst.msk [vmem:[%s5341_s11 + $0xb] sm:$0x1] %vm3174_vm0, %v3169_v17  ;;  %v3156_v37 = vadd.f32 %v3136_v29, %v2980_v16  ;;  %v3155_v11 = vadd.f32 %v3132_v35, %v2979_v22 }
 0x37f   : > { %3230 = vst [vmem:[%s5397_s7 + $0xe] sm:$0x1] (%p3889_p5), %v3229_v38  ;;  %3232 = vst [vmem:[%s5397_s7 + $0x10] sm:$0x1] (%p3889_p5), %v3231_v25 }
 0x380   : > { %v3172_v28 = vpack.c.bf16 %v3156_v37, %v3156_v37  ;;  %v3171_v62 = vpack.c.bf16 %v3155_v11, %v3155_v11 }
 0x381   : > { %v2949_v21 = vpop.permute.xlu1 %2948  ;;  %v3140_v13 = vpop.permute.xlu0 %3139  ;;  %v3233_v42 = vld [vmem:[%s5341_s11 + $0x9] sm:$0x1] (%p3889_p5)  ;;  %v3235_v46 = vld [vmem:[%s5341_s11 + $0xa] sm:$0x1] (%p3889_p5) }
 0x382   : > { %3189 = vst.msk [vmem:[%s5341_s11 + $0xe] sm:$0x1] %vm3174_vm0, %v3172_v28  ;;  %3188 = vst.msk [vmem:[%s5341_s11 + $0xd] sm:$0x1] %vm3174_vm0, %v3171_v62  ;;  %v2981_v57 = vadd.f32 %v2949_v21, %v5238_v9  ;;  %v3215_v9 = vld [vmem:[%s5341_s11] sm:$0x1] (%p3889_p5) }
 0x383   : > { %3216 = vst [vmem:[%s5397_s7] sm:$0x1] (%p3889_p5), %v3215_v9  ;;  %3234 = vst [vmem:[%s5397_s7 + $0x12] sm:$0x1] (%p3889_p5), %v3233_v42 }
 0x384   : > { %v3157_v27 = vadd.f32 %v3140_v13, %v2981_v57  ;;  %3197 = sbr.rel (!%p3889_p5) target bundleno = 913 (0x391), region = 212  ;;  %3236 = vst [vmem:[%s5397_s7 + $0x14] sm:$0x1] (%p3889_p5), %v3235_v46 }
 0x385   : > { %v3237_v0 = vld [vmem:[%s5341_s11 + $0xb] sm:$0x1] (%p3889_p5)  ;;  %v3239_v59 = vld [vmem:[%s5341_s11 + $0xc] sm:$0x1] (%p3889_p5) }
 0x386   : > { %v3173_v40 = vpack.c.bf16 %v3157_v27, %v3157_v27  ;;  %3238 = vst [vmem:[%s5397_s7 + $0x16] sm:$0x1] (%p3889_p5), %v3237_v0  ;;  %3240 = vst [vmem:[%s5397_s7 + $0x18] sm:$0x1] (%p3889_p5), %v3239_v59 }
 0x388   : > { %3190 = vst.msk [vmem:[%s5341_s11 + $0xf] sm:$0x1] %vm3174_vm0, %v3173_v40 }
 0x389   : > { %v3241_v56 = vld [vmem:[%s5341_s11 + $0xd] sm:$0x1]  ;;  %v3243_v36 = vld [vmem:[%s5341_s11 + $0xe] sm:$0x1] }
 0x38a   : > { %3242 = vst [vmem:[%s5397_s7 + $0x1a] sm:$0x1] %v3241_v56  ;;  %3244 = vst [vmem:[%s5397_s7 + $0x1c] sm:$0x1] %v3243_v36 }
 0x38f   : > { %v3245_v61 = vld [vmem:[%s5341_s11 + $0xf] sm:$0x1] }
 0x390   : > { %3246 = vst [vmem:[%s5397_s7 + $0x1e] sm:$0x1] %v3245_v61 }
 0x391 PF: > { %p13_p10 = scmp.ge.s32.totalorder %s3872_s25, 4   ;;  %s5560_s21 = smov %s3812_s22 }
 0x392   : > { %s5561_s22 = smov %s3883_s28  ;;  %s5562_s23 = smov %s3872_s25 }
 0x393   :  { %15 = sbr.rel (!%p13_p10) target bundleno = 2 (0x2), region = 316 }

// kernel: shufflenet_v2_forward.34
= control target key start
LH: loop header
LB: loop body
LE: loop exit
PB: predicated region body
PF: predicated region fallthrough
CT: control target
= control target key end

     0   :  { %s3569_s12 = smov 0   ;;  %s3571_s13 = smov 0   ;;  %s4990_s0 = inlined_call_operand.vmem [shape: bf16[16,2,4,4], index: 0, kind: input, shape index: {}]   ;;  %s4991_s1 = inlined_call_operand.vmem [shape: f32[9,16,1,1], index: 1, kind: input, shape index: {}]   ;;  %s4992_s2 = inlined_call_operand.vmem [shape: f32[16,1,1], index: 2, kind: input, shape index: {}]   ;;  %s4993_s3 = inlined_call_operand.vmem [shape: bf16[16,2,2,2], index: 3, kind: output, shape index: {}]  }
   0x1   :  { %s3573_s14 = smov 0  }
   0x2 LB: > { %s3097_s15 = sadd.s32 4294967295, %s3544_s14   ;;  %s3586_s16 = sadd.s32 1, %s3544_s14   ;;  %s3544_s14 = sphi %s3573_s14, %s5137_s14   ;;  %s3540_s13 = sphi %s3571_s13, %s5136_s13   ;;  %s3536_s12 = sphi %s3569_s12, %s5135_s12  }
   0x3   : > { %s17_s17 = ssub.s32 %s3544_s14, %s3586_s16  ;;  %s20_s18 = sadd.s32 1, %s3540_s13 }
   0x4   : > { %p18_p0 = scmp.eq.s32.totalorder %s17_s17, 0  ;;  %p27_p1 = scmp.ne.s32.totalorder %s3540_s13, %s3536_s12 }
   0x5   : > { %p28_p2 = scmp.eq.s32.totalorder %s3544_s14, 0  ;;  %p99_p3 = scmp.eq.s32.totalorder %s3097_s15, 1 }
   0x6   : > { %s3597_s19 = scalar_select %p18_p0, %s3540_s13, %s20_s18  }
   0x7   : > { %p29_p4 = por %p28_p2, %p27_p1  ;;  %p3599_p5 = por %p99_p3, %p27_p1 }
   0x8   : > { %p3100_p6 = scmp.ge.s32.totalorder %s3544_s14, 2 }
   0xa   : > { %127 = sbr.rel (%p3100_p6) target bundleno = 29 (0x1d), region = 24 }
   0xf   : > { %130 = sbr.rel (!%p29_p4) target bundleno = 29 (0x1d), region = 28  ;;  %s132_s21 = sand.u32 (%p29_p4), 1, %s3540_s13  }
  0x10   : > { %s3102_s22 = sshll.u32 (%p29_p4), %s3544_s14, 1  ;;  %s3101_s23 = sshll.u32 (%p29_p4), %s132_s21, 5 }
  0x11   : > { %s3609_s26 = scalar_lea.vmem (%p29_p4), %s4990_s0, %s3102_s22  ;;  %s134_s27 = scalar_lea.vmem (%p29_p4), [#allocation2], %s3101_s23 }
  0x12   : > { %v153_v0 = vld [vmem:[%s3609_s26] sm:$0x3] (%p29_p4)  ;;  %v155_v1 = vld [vmem:[%s3609_s26 + $0x4] sm:$0x3] (%p29_p4)  ;;  %v157_v2 = vld [vmem:[%s3609_s26 + $0x8] sm:$0x3] (%p29_p4) }
  0x13   : > { %154 = vst [vmem:[%s134_s27] sm:$0x3] (%p29_p4), %v153_v0  ;;  %156 = vst [vmem:[%s134_s27 + $0x2] sm:$0x3] (%p29_p4), %v155_v1  ;;  %v159_v3 = vld [vmem:[%s3609_s26 + $0xc] sm:$0x3] (%p29_p4) }
  0x14   : > { %v161_v4 = vld [vmem:[%s3609_s26 + $0x10] sm:$0x3]  ;;  %158 = vst [vmem:[%s134_s27 + $0x4] sm:$0x3] %v157_v2  ;;  %160 = vst [vmem:[%s134_s27 + $0x6] sm:$0x3] %v159_v3 }
  0x15   : > { %162 = vst [vmem:[%s134_s27 + $0x8] sm:$0x3] %v161_v4  ;;  %v163_v5 = vld [vmem:[%s3609_s26 + $0x14] sm:$0x3]  ;;  %v165_v6 = vld [vmem:[%s3609_s26 + $0x18] sm:$0x3] }
  0x16   : > { %v167_v7 = vld [vmem:[%s3609_s26 + $0x1c] sm:$0x3]  ;;  %164 = vst [vmem:[%s134_s27 + $0xa] sm:$0x3] %v163_v5  ;;  %166 = vst [vmem:[%s134_s27 + $0xc] sm:$0x3] %v165_v6 }
  0x17   : > { %168 = vst [vmem:[%s134_s27 + $0xe] sm:$0x3] %v167_v7  ;;  %v169_v8 = vld [vmem:[%s3609_s26 + $0x20] sm:$0x3]  ;;  %v171_v9 = vld [vmem:[%s3609_s26 + $0x24] sm:$0x3] }
  0x18   : > { %v173_v10 = vld [vmem:[%s3609_s26 + $0x28] sm:$0x3]  ;;  %170 = vst [vmem:[%s134_s27 + $0x10] sm:$0x3] %v169_v8  ;;  %172 = vst [vmem:[%s134_s27 + $0x12] sm:$0x3] %v171_v9 }
  0x19   : > { %174 = vst [vmem:[%s134_s27 + $0x14] sm:$0x3] %v173_v10  ;;  %v175_v11 = vld [vmem:[%s3609_s26 + $0x2c] sm:$0x3]  ;;  %v177_v12 = vld [vmem:[%s3609_s26 + $0x30] sm:$0x3] }
  0x1a   : > { %v179_v13 = vld [vmem:[%s3609_s26 + $0x34] sm:$0x3]  ;;  %176 = vst [vmem:[%s134_s27 + $0x16] sm:$0x3] %v175_v11  ;;  %178 = vst [vmem:[%s134_s27 + $0x18] sm:$0x3] %v177_v12 }
  0x1b   : > { %180 = vst [vmem:[%s134_s27 + $0x1a] sm:$0x3] %v179_v13  ;;  %v181_v14 = vld [vmem:[%s3609_s26 + $0x38] sm:$0x3]  ;;  %v183_v15 = vld [vmem:[%s3609_s26 + $0x3c] sm:$0x3] }
  0x1c   : > { %182 = vst [vmem:[%s134_s27 + $0x1c] sm:$0x3] %v181_v14  ;;  %184 = vst [vmem:[%s134_s27 + $0x1e] sm:$0x3] %v183_v15 }
  0x1d PF: > { %p3103_p7 = scmp.ge.s32.totalorder %s3544_s14, 1  ;;  %p239_p8 = scmp.lt.s32.totalorder %s3544_s14, 3 }
  0x1f   : > { %p240_p9 = pnand %p3103_p7, %p239_p8 }
  0x21   : > { %243 = sbr.rel (%p240_p9) target bundleno = 1133 (0x46d), region = 69 }
  0x26   : > { %v3108_v16 = vld [vmem:[%s4991_s1 + $0x2] ss:$0 sm:$0xff]  ;;  %v3106_v17 = vld [vmem:[%s4991_s1] ss:$0 sm:$0xff]  ;;  %v3546_v18 = vmov 0   ;;  %s246_s24 = sand.u32 1, %s3536_s12   ;;  %s4946_s11 = scalar_lea.vmem (%p3599_p5), %s4993_s3, %s3097_s15 }
  0x27   : > { %3521 = vset.pattern.permute.xlu1 %v3546_v18  ;;  %3520 = vset.pattern.permute.xlu0 %v3546_v18  ;;  %v3109_v19 = vld [vmem:[%s4991_s1 + $0x3] ss:$0 sm:$0xff]  ;;  %v3107_v20 = vld [vmem:[%s4991_s1 + $0x1] ss:$0 sm:$0xff]  ;;  %v3111_v21 = vld [vmem:[%s4991_s1 + $0x5] ss:$0 sm:$0xff] }
  0x28   : > { %405 = vperm.xlu1 %3521, %v3108_v16   ;;  %397 = vperm.xlu0 %3520, %v3106_v17   ;;  %v3110_v22 = vld [vmem:[%s4991_s1 + $0x4] ss:$0 sm:$0xff]  ;;  %v3113_v23 = vld [vmem:[%s4991_s1 + $0x7] ss:$0 sm:$0xff]  ;;  %v3112_v24 = vld [vmem:[%s4991_s1 + $0x6] ss:$0 sm:$0xff] }
  0x29   : > { %v3115_v25 = vld [vmem:[%s4991_s1 + $0x9] ss:$0 sm:$0xff]  ;;  %v3114_v26 = vld [vmem:[%s4991_s1 + $0x8] ss:$0 sm:$0xff]  ;;  %v3117_v27 = vld [vmem:[%s4991_s1 + $0xb] ss:$0 sm:$0xff] }
  0x2a   : > { %v3116_v28 = vld [vmem:[%s4991_s1 + $0xa] ss:$0 sm:$0xff]  ;;  %v3119_v29 = vld [vmem:[%s4991_s1 + $0xd] ss:$0 sm:$0xff]  ;;  %v3118_v30 = vld [vmem:[%s4991_s1 + $0xc] ss:$0 sm:$0xff] }
  0x2b   : > { %v3121_v31 = vld [vmem:[%s4991_s1 + $0xf] ss:$0 sm:$0xff]  ;;  %v3120_v32 = vld [vmem:[%s4991_s1 + $0xe] ss:$0 sm:$0xff]  ;;  %v3139_v33 = vld [vmem:[%s4991_s1 + $0x11] ss:$0 sm:$0xff] }
  0x2c   : > { %409 = vperm.xlu1 %3521, %v3109_v19   ;;  %401 = vperm.xlu0 %3520, %v3107_v20   ;;  %v3138_v34 = vld [vmem:[%s4991_s1 + $0x10] ss:$0 sm:$0xff]  ;;  %v3141_v35 = vld [vmem:[%s4991_s1 + $0x13] ss:$0 sm:$0xff]  ;;  %v3140_v36 = vld [vmem:[%s4991_s1 + $0x12] ss:$0 sm:$0xff] }
  0x2d   : > { %v3143_v37 = vld [vmem:[%s4991_s1 + $0x15] ss:$0 sm:$0xff]  ;;  %v3142_v38 = vld [vmem:[%s4991_s1 + $0x14] ss:$0 sm:$0xff]  ;;  %v3145_v39 = vld [vmem:[%s4991_s1 + $0x17] ss:$0 sm:$0xff] }
  0x2e   : > { %v3144_v40 = vld [vmem:[%s4991_s1 + $0x16] ss:$0 sm:$0xff]  ;;  %v3147_v41 = vld [vmem:[%s4991_s1 + $0x19] ss:$0 sm:$0xff]  ;;  %v3146_v42 = vld [vmem:[%s4991_s1 + $0x18] ss:$0 sm:$0xff] }
  0x2f   : > { %v3149_v43 = vld [vmem:[%s4991_s1 + $0x1b] ss:$0 sm:$0xff]  ;;  %v3148_v44 = vld [vmem:[%s4991_s1 + $0x1a] ss:$0 sm:$0xff]  ;;  %v3151_v45 = vld [vmem:[%s4991_s1 + $0x1d] ss:$0 sm:$0xff] }
  0x30   : > { %417 = vperm.xlu1 %3521, %v3111_v21   ;;  %413 = vperm.xlu0 %3520, %v3110_v22   ;;  %v3150_v46 = vld [vmem:[%s4991_s1 + $0x1c] ss:$0 sm:$0xff]  ;;  %v3153_v47 = vld [vmem:[%s4991_s1 + $0x1f] ss:$0 sm:$0xff]  ;;  %v3152_v48 = vld [vmem:[%s4991_s1 + $0x1e] ss:$0 sm:$0xff] }
  0x31   : > { %v3171_v49 = vld [vmem:[%s4991_s1 + $0x21] ss:$0 sm:$0xff]  ;;  %v3170_v50 = vld [vmem:[%s4991_s1 + $0x20] ss:$0 sm:$0xff]  ;;  %v3173_v51 = vld [vmem:[%s4991_s1 + $0x23] ss:$0 sm:$0xff] }
  0x32   : > { %v3172_v52 = vld [vmem:[%s4991_s1 + $0x22] ss:$0 sm:$0xff]  ;;  %v3175_v53 = vld [vmem:[%s4991_s1 + $0x25] ss:$0 sm:$0xff]  ;;  %v3174_v54 = vld [vmem:[%s4991_s1 + $0x24] ss:$0 sm:$0xff] }
  0x33   : > { %v3177_v55 = vld [vmem:[%s4991_s1 + $0x27] ss:$0 sm:$0xff]  ;;  %v3176_v56 = vld [vmem:[%s4991_s1 + $0x26] ss:$0 sm:$0xff]  ;;  %v3179_v57 = vld [vmem:[%s4991_s1 + $0x29] ss:$0 sm:$0xff] }
  0x34   : > { %425 = vperm.xlu1 %3521, %v3113_v23   ;;  %421 = vperm.xlu0 %3520, %v3112_v24   ;;  %v3178_v58 = vld [vmem:[%s4991_s1 + $0x28] ss:$0 sm:$0xff]  ;;  %v3181_v59 = vld [vmem:[%s4991_s1 + $0x2b] ss:$0 sm:$0xff]  ;;  %v3180_v60 = vld [vmem:[%s4991_s1 + $0x2a] ss:$0 sm:$0xff] }
  0x35   : > { %v3183_v61 = vld [vmem:[%s4991_s1 + $0x2d] ss:$0 sm:$0xff]  ;;  %v3182_v62 = vld [vmem:[%s4991_s1 + $0x2c] ss:$0 sm:$0xff]  ;;  %v3185_v63 = vld [vmem:[%s4991_s1 + $0x2f] ss:$0 sm:$0xff] }
  0x36   : > { %v3184_v0 = vld [vmem:[%s4991_s1 + $0x2e] ss:$0 sm:$0xff]  ;;  %s3104_s25 = sshll.u32 %s246_s24, 5  ;;  %s3547_s27 = smov 127   ;;  %vm2916_vm0 = vcmask 8192  }
  0x37   : > { %s3804_s26 = scalar_lea.vmem [#allocation2], %s3104_s25  ;;  %s3548_s28 = smov 126  }
  0x38   : > { %433 = vperm.xlu1 %3521, %v3115_v25   ;;  %429 = vperm.xlu0 %3520, %v3114_v26   ;;  %v268_v15 = vld [vmem:[%s3804_s26] sm:$0x1]  ;;  %v269_v16 = vld [vmem:[%s3804_s26 + $0x2] sm:$0x1]  ;;  %v270_v21 = vld [vmem:[%s3804_s26 + $0x4] sm:$0x1] }
  0x39   : > { %v3812_v19 = vunpack.c.l.bf16 %v268_v15  ;;  %v3814_v20 = vunpack.c.l.bf16 %v269_v16  ;;  %v271_v22 = vld [vmem:[%s3804_s26 + $0x6] sm:$0x1] }
  0x3c   : > { %441 = vperm.xlu1 %3521, %v3117_v27   ;;  %437 = vperm.xlu0 %3520, %v3116_v28   ;;  %v3820_v27 = vunpack.c.l.bf16 %v270_v21  ;;  %v3822_v28 = vunpack.c.l.bf16 %v271_v22 }
  0x3e   : > { %5002 = vst [vmem:[#allocation7_spill] sm:$0xff] %v3820_v27 }
  0x40   : > { %449 = vperm.xlu1 %3521, %v3119_v29   ;;  %445 = vperm.xlu0 %3520, %v3118_v30   ;;  %v273_v29 = vld [vmem:[%s3804_s26 + $0xa] sm:$0x1]  ;;  %v272_v30 = vld [vmem:[%s3804_s26 + $0x8] sm:$0x1] }
  0x44   : > { %457 = vperm.xlu1 %3521, %v3121_v31   ;;  %453 = vperm.xlu0 %3520, %v3120_v32  }
  0x48   : > { %578 = vperm.xlu1 %3521, %v3139_v33   ;;  %574 = vperm.xlu0 %3520, %v3138_v34  }
  0x4c   : > { %586 = vperm.xlu1 %3521, %v3141_v35   ;;  %582 = vperm.xlu0 %3520, %v3140_v36   ;;  %v3830_v35 = vunpack.c.l.bf16 %v273_v29  ;;  %v3832_v36 = vunpack.c.l.bf16 %v272_v30 }
  0x50   : > { %594 = vperm.xlu1 %3521, %v3143_v37   ;;  %590 = vperm.xlu0 %3520, %v3142_v38   ;;  %v275_v37 = vld [vmem:[%s3804_s26 + $0xe] sm:$0x1]  ;;  %v274_v38 = vld [vmem:[%s3804_s26 + $0xc] sm:$0x1] }
  0x54   : > { %602 = vperm.xlu1 %3521, %v3145_v39   ;;  %598 = vperm.xlu0 %3520, %v3144_v40  }
  0x58   : > { %610 = vperm.xlu1 %3521, %v3147_v41   ;;  %606 = vperm.xlu0 %3520, %v3146_v42  }
  0x5c   : > { %618 = vperm.xlu1 %3521, %v3149_v43   ;;  %614 = vperm.xlu0 %3520, %v3148_v44   ;;  %v3840_v43 = vunpack.c.l.bf16 %v275_v37  ;;  %v3842_v44 = vunpack.c.l.bf16 %v274_v38 }
  0x60   : > { %626 = vperm.xlu1 %3521, %v3151_v45   ;;  %622 = vperm.xlu0 %3520, %v3150_v46   ;;  %v277_v45 = vld [vmem:[%s3804_s26 + $0x12] sm:$0x1]  ;;  %v276_v46 = vld [vmem:[%s3804_s26 + $0x10] sm:$0x1] }
  0x64   : > { %634 = vperm.xlu1 %3521, %v3153_v47   ;;  %630 = vperm.xlu0 %3520, %v3152_v48  }
  0x68   : > { %835 = vperm.xlu1 %3521, %v3171_v49   ;;  %831 = vperm.xlu0 %3520, %v3170_v50  }
  0x6c   : > { %843 = vperm.xlu1 %3521, %v3173_v51   ;;  %839 = vperm.xlu0 %3520, %v3172_v52   ;;  %v3850_v51 = vunpack.c.l.bf16 %v277_v45  ;;  %v3852_v52 = vunpack.c.l.bf16 %v276_v46 }
  0x70   : > { %851 = vperm.xlu1 %3521, %v3175_v53   ;;  %847 = vperm.xlu0 %3520, %v3174_v54   ;;  %v279_v53 = vld [vmem:[%s3804_s26 + $0x16] sm:$0x1]  ;;  %v278_v54 = vld [vmem:[%s3804_s26 + $0x14] sm:$0x1] }
  0x74   : > { %859 = vperm.xlu1 %3521, %v3177_v55   ;;  %855 = vperm.xlu0 %3520, %v3176_v56  }
  0x78   : > { %867 = vperm.xlu1 %3521, %v3179_v57   ;;  %863 = vperm.xlu0 %3520, %v3178_v58  }
  0x7c   : > { %875 = vperm.xlu1 %3521, %v3181_v59   ;;  %871 = vperm.xlu0 %3520, %v3180_v60   ;;  %v3860_v59 = vunpack.c.l.bf16 %v279_v53  ;;  %v3862_v60 = vunpack.c.l.bf16 %v278_v54 }
  0x80   : > { %883 = vperm.xlu1 %3521, %v3183_v61   ;;  %879 = vperm.xlu0 %3520, %v3182_v62   ;;  %v281_v61 = vld [vmem:[%s3804_s26 + $0x1a] sm:$0x1]  ;;  %v280_v62 = vld [vmem:[%s3804_s26 + $0x18] sm:$0x1] }
  0x81   : > { %v3870_v21 = vunpack.c.l.bf16 %v281_v61  ;;  %v3872_v22 = vunpack.c.l.bf16 %v280_v62 }
  0x83   : > { %5003 = vst [vmem:[#allocation8_spill] sm:$0xff] %v3870_v21  ;;  %5004 = vst [vmem:[#allocation9_spill] sm:$0xff] %v3872_v22 }
  0x84   : > { %891 = vperm.xlu1 %3521, %v3185_v63   ;;  %887 = vperm.xlu0 %3520, %v3184_v0  }
  0xa3   : > { %v3773_v1 = vpop.permute.xlu1 %405  ;;  %v3775_v2 = vpop.permute.xlu0 %397 }
  0xa4   : > { %4999 = vst [vmem:[#allocation4_spill] sm:$0xff] %v3773_v1 }
  0xa7   : > { %v3777_v3 = vpop.permute.xlu1 %409  ;;  %v3779_v4 = vpop.permute.xlu0 %401 }
  0xab   : > { %v3781_v5 = vpop.permute.xlu1 %417  ;;  %v3783_v6 = vpop.permute.xlu0 %413 }
  0xaf   : > { %v3785_v7 = vpop.permute.xlu1 %425  ;;  %v3787_v8 = vpop.permute.xlu0 %421 }
  0xb3   : > { %v3789_v9 = vpop.permute.xlu1 %433  ;;  %v3791_v10 = vpop.permute.xlu0 %429 }
  0xb7   : > { %v3793_v11 = vpop.permute.xlu1 %441  ;;  %v3795_v12 = vpop.permute.xlu0 %437 }
  0xbb   : > { %v3800_v13 = vpop.permute.xlu1 %449  ;;  %v3802_v14 = vpop.permute.xlu0 %445 }
  0xbc   : > { %5000 = vst [vmem:[#allocation5_spill] sm:$0xff] %v3800_v13  ;;  %5001 = vst [vmem:[#allocation6_spill] sm:$0xff] %v3802_v14 }
  0xbf   : > { %v3808_v17 = vpop.permute.xlu1 %457  ;;  %v3810_v18 = vpop.permute.xlu0 %453 }
  0xc3   : > { %v579_v23 = vpop.permute.xlu1 %578  ;;  %v575_v24 = vpop.permute.xlu0 %574 }
  0xc4   : > { %v638_v25 = vmul.f32 %v579_v23, %v3814_v20  ;;  %v637_v26 = vmul.f32 %v575_v24, %v3812_v19  ;;  %v283_v23 = vld [vmem:[%s3804_s26 + $0x1e] sm:$0x1]  ;;  %v282_v24 = vld [vmem:[%s3804_s26 + $0x1c] sm:$0x1] }
  0xc6   : > { %671 = vrot.lane.b32.xlu1 %v638_v25, %s3547_s27  ;;  %669 = vrot.lane.b32.xlu0 %v637_v26, %s3547_s27 }
  0xc7   : > { %v587_v31 = vpop.permute.xlu1 %586  ;;  %v583_v32 = vpop.permute.xlu0 %582 }
  0xc8   : > { %v640_v33 = vmul.f32 %v587_v31, %v3822_v28  ;;  %v639_v34 = vmul.f32 %v583_v32, %v3820_v27  ;;  %v3880_v31 = vunpack.c.l.bf16 %v283_v23  ;;  %v3882_v32 = vunpack.c.l.bf16 %v282_v24 }
  0xca   : > { %675 = vrot.lane.b32.xlu1 %v640_v33, %s3547_s27  ;;  %673 = vrot.lane.b32.xlu0 %v639_v34, %s3547_s27 }
  0xcb   : > { %v595_v39 = vpop.permute.xlu1 %594  ;;  %v591_v40 = vpop.permute.xlu0 %590 }
  0xcc   : > { %v642_v41 = vmul.f32 %v595_v39, %v3830_v35  ;;  %v641_v42 = vmul.f32 %v591_v40, %v3832_v36 }
  0xce   : > { %679 = vrot.lane.b32.xlu1 %v642_v41, %s3547_s27  ;;  %677 = vrot.lane.b32.xlu0 %v641_v42, %s3547_s27 }
  0xcf   : > { %v603_v47 = vpop.permute.xlu1 %602  ;;  %v599_v48 = vpop.permute.xlu0 %598 }
  0xd0   : > { %v644_v49 = vmul.f32 %v603_v47, %v3840_v43  ;;  %v643_v50 = vmul.f32 %v599_v48, %v3842_v44 }
  0xd2   : > { %683 = vrot.lane.b32.xlu1 %v644_v49, %s3547_s27  ;;  %681 = vrot.lane.b32.xlu0 %v643_v50, %s3547_s27 }
  0xd3   : > { %v611_v55 = vpop.permute.xlu1 %610  ;;  %v607_v56 = vpop.permute.xlu0 %606 }
  0xd4   : > { %v646_v57 = vmul.f32 %v611_v55, %v3850_v51  ;;  %v645_v58 = vmul.f32 %v607_v56, %v3852_v52 }
  0xd6   : > { %687 = vrot.lane.b32.xlu1 %v646_v57, %s3547_s27  ;;  %685 = vrot.lane.b32.xlu0 %v645_v58, %s3547_s27 }
  0xd7   : > { %v619_v63 = vpop.permute.xlu1 %618  ;;  %v615_v0 = vpop.permute.xlu0 %614 }
  0xd8   : > { %v648_v15 = vmul.f32 %v619_v63, %v3860_v59  ;;  %v647_v16 = vmul.f32 %v615_v0, %v3862_v60 }
  0xda   : > { %691 = vrot.lane.b32.xlu1 %v648_v15, %s3547_s27  ;;  %689 = vrot.lane.b32.xlu0 %v647_v16, %s3547_s27 }
  0xdb   : > { %v627_v25 = vpop.permute.xlu1 %626  ;;  %v623_v26 = vpop.permute.xlu0 %622 }
  0xdc   : > { %v650_v29 = vmul.f32 %v627_v25, %v3870_v21  ;;  %v649_v30 = vmul.f32 %v623_v26, %v3872_v22 }
  0xde   : > { %695 = vrot.lane.b32.xlu1 %v650_v29, %s3547_s27  ;;  %693 = vrot.lane.b32.xlu0 %v649_v30, %s3547_s27 }
  0xdf   : > { %v635_v33 = vpop.permute.xlu1 %634  ;;  %v631_v34 = vpop.permute.xlu0 %630 }
  0xe0   : > { %v652_v37 = vmul.f32 %v635_v33, %v3880_v31  ;;  %v651_v38 = vmul.f32 %v631_v34, %v3882_v32 }
  0xe2   : > { %699 = vrot.lane.b32.xlu1 %v652_v37, %s3547_s27  ;;  %697 = vrot.lane.b32.xlu0 %v651_v38, %s3547_s27 }
  0xe3   : > { %v836_v39 = vpop.permute.xlu1 %835  ;;  %v832_v40 = vpop.permute.xlu0 %831 }
  0xe4   : > { %v895_v41 = vmul.f32 %v836_v39, %v3814_v20  ;;  %v894_v42 = vmul.f32 %v832_v40, %v3812_v19  ;;  %v3203_v39 = vld [vmem:[%s4991_s1 + $0x31] ss:$0 sm:$0xff]  ;;  %v3202_v40 = vld [vmem:[%s4991_s1 + $0x30] ss:$0 sm:$0xff] }
  0xe6   : > { %928 = vrot.lane.b32.xlu1 %v895_v41, %s3548_s28  ;;  %926 = vrot.lane.b32.xlu0 %v894_v42, %s3548_s28  ;;  %v3205_v41 = vld [vmem:[%s4991_s1 + $0x33] ss:$0 sm:$0xff]  ;;  %v3204_v42 = vld [vmem:[%s4991_s1 + $0x32] ss:$0 sm:$0xff] }
  0xe7   : > { %v844_v45 = vpop.permute.xlu1 %843  ;;  %v840_v46 = vpop.permute.xlu0 %839 }
  0xe8   : > { %v897_v47 = vmul.f32 %v844_v45, %v3822_v28  ;;  %v896_v48 = vmul.f32 %v840_v46, %v3820_v27  ;;  %v3207_v45 = vld [vmem:[%s4991_s1 + $0x35] ss:$0 sm:$0xff]  ;;  %v3206_v46 = vld [vmem:[%s4991_s1 + $0x34] ss:$0 sm:$0xff] }
  0xea   : > { %932 = vrot.lane.b32.xlu1 %v897_v47, %s3548_s28  ;;  %930 = vrot.lane.b32.xlu0 %v896_v48, %s3548_s28  ;;  %v3209_v47 = vld [vmem:[%s4991_s1 + $0x37] ss:$0 sm:$0xff]  ;;  %v3208_v48 = vld [vmem:[%s4991_s1 + $0x36] ss:$0 sm:$0xff] }
  0xeb   : > { %v852_v49 = vpop.permute.xlu1 %851  ;;  %v848_v50 = vpop.permute.xlu0 %847 }
  0xec   : > { %v899_v53 = vmul.f32 %v852_v49, %v3830_v35  ;;  %v898_v54 = vmul.f32 %v848_v50, %v3832_v36  ;;  %v3211_v49 = vld [vmem:[%s4991_s1 + $0x39] ss:$0 sm:$0xff]  ;;  %v3210_v50 = vld [vmem:[%s4991_s1 + $0x38] ss:$0 sm:$0xff] }
  0xee   : > { %936 = vrot.lane.b32.xlu1 %v899_v53, %s3548_s28  ;;  %934 = vrot.lane.b32.xlu0 %v898_v54, %s3548_s28  ;;  %v3213_v53 = vld [vmem:[%s4991_s1 + $0x3b] ss:$0 sm:$0xff]  ;;  %v3212_v54 = vld [vmem:[%s4991_s1 + $0x3a] ss:$0 sm:$0xff] }
  0xef   : > { %v860_v55 = vpop.permute.xlu1 %859  ;;  %v856_v56 = vpop.permute.xlu0 %855 }
  0xf0   : > { %v901_v57 = vmul.f32 %v860_v55, %v3840_v43  ;;  %v900_v58 = vmul.f32 %v856_v56, %v3842_v44  ;;  %v3215_v55 = vld [vmem:[%s4991_s1 + $0x3d] ss:$0 sm:$0xff]  ;;  %v3214_v56 = vld [vmem:[%s4991_s1 + $0x3c] ss:$0 sm:$0xff] }
  0xf2   : > { %940 = vrot.lane.b32.xlu1 %v901_v57, %s3548_s28  ;;  %938 = vrot.lane.b32.xlu0 %v900_v58, %s3548_s28  ;;  %v3217_v57 = vld [vmem:[%s4991_s1 + $0x3f] ss:$0 sm:$0xff]  ;;  %v3216_v58 = vld [vmem:[%s4991_s1 + $0x3e] ss:$0 sm:$0xff] }
  0xf3   : > { %v868_v61 = vpop.permute.xlu1 %867  ;;  %v864_v62 = vpop.permute.xlu0 %863 }
  0xf4   : > { %v903_v63 = vmul.f32 %v868_v61, %v3850_v51  ;;  %v902_v0 = vmul.f32 %v864_v62, %v3852_v52  ;;  %v3251_v61 = vld [vmem:[%s4991_s1 + $0x41] ss:$0 sm:$0xff]  ;;  %v3250_v62 = vld [vmem:[%s4991_s1 + $0x40] ss:$0 sm:$0xff] }
  0xf6   : > { %944 = vrot.lane.b32.xlu1 %v903_v63, %s3548_s28  ;;  %942 = vrot.lane.b32.xlu0 %v902_v0, %s3548_s28  ;;  %v3253_v63 = vld [vmem:[%s4991_s1 + $0x43] ss:$0 sm:$0xff]  ;;  %v3252_v0 = vld [vmem:[%s4991_s1 + $0x42] ss:$0 sm:$0xff] }
  0xf7   : > { %v876_v15 = vpop.permute.xlu1 %875  ;;  %v872_v16 = vpop.permute.xlu0 %871 }
  0xf8   : > { %v905_v23 = vmul.f32 %v876_v15, %v3860_v59  ;;  %v904_v24 = vmul.f32 %v872_v16, %v3862_v60  ;;  %v3255_v15 = vld [vmem:[%s4991_s1 + $0x45] ss:$0 sm:$0xff]  ;;  %v3254_v16 = vld [vmem:[%s4991_s1 + $0x44] ss:$0 sm:$0xff] }
  0xfa   : > { %948 = vrot.lane.b32.xlu1 %v905_v23, %s3548_s28  ;;  %946 = vrot.lane.b32.xlu0 %v904_v24, %s3548_s28  ;;  %v3257_v23 = vld [vmem:[%s4991_s1 + $0x47] ss:$0 sm:$0xff]  ;;  %v3256_v24 = vld [vmem:[%s4991_s1 + $0x46] ss:$0 sm:$0xff] }
  0xfb   : > { %v884_v25 = vpop.permute.xlu1 %883  ;;  %v880_v26 = vpop.permute.xlu0 %879 }
  0xfc   : > { %v907_v29 = vmul.f32 %v884_v25, %v3870_v21  ;;  %v906_v30 = vmul.f32 %v880_v26, %v3872_v22  ;;  %v3259_v25 = vld [vmem:[%s4991_s1 + $0x49] ss:$0 sm:$0xff]  ;;  %v3258_v26 = vld [vmem:[%s4991_s1 + $0x48] ss:$0 sm:$0xff] }
  0xfe   : > { %952 = vrot.lane.b32.xlu1 %v907_v29, %s3548_s28  ;;  %950 = vrot.lane.b32.xlu0 %v906_v30, %s3548_s28  ;;  %v3261_v29 = vld [vmem:[%s4991_s1 + $0x4b] ss:$0 sm:$0xff]  ;;  %v3260_v30 = vld [vmem:[%s4991_s1 + $0x4a] ss:$0 sm:$0xff] }
  0xff   : > { %v892_v33 = vpop.permute.xlu1 %891  ;;  %v888_v34 = vpop.permute.xlu0 %887 }
 0x100   : > { %v909_v37 = vmul.f32 %v892_v33, %v3880_v31  ;;  %v908_v38 = vmul.f32 %v888_v34, %v3882_v32 }
 0x102   : > { %956 = vrot.lane.b32.xlu1 %v909_v37, %s3548_s28  ;;  %954 = vrot.lane.b32.xlu0 %v908_v38, %s3548_s28  ;;  %v3263_v37 = vld [vmem:[%s4991_s1 + $0x4d] ss:$0 sm:$0xff]  ;;  %v3262_v38 = vld [vmem:[%s4991_s1 + $0x4c] ss:$0 sm:$0xff] }
 0x106   : > { %1124 = vperm.xlu1 %3521, %v3203_v39   ;;  %1120 = vperm.xlu0 %3520, %v3202_v40  }
 0x10a   : > { %1132 = vperm.xlu1 %3521, %v3205_v41   ;;  %1128 = vperm.xlu0 %3520, %v3204_v42   ;;  %v3265_v41 = vld [vmem:[%s4991_s1 + $0x4f] ss:$0 sm:$0xff]  ;;  %v3264_v42 = vld [vmem:[%s4991_s1 + $0x4e] ss:$0 sm:$0xff] }
 0x10e   : > { %1140 = vperm.xlu1 %3521, %v3207_v45   ;;  %1136 = vperm.xlu0 %3520, %v3206_v46  }
 0x112   : > { %1148 = vperm.xlu1 %3521, %v3209_v47   ;;  %1144 = vperm.xlu0 %3520, %v3208_v48  }
 0x116   : > { %1156 = vperm.xlu1 %3521, %v3211_v49   ;;  %1152 = vperm.xlu0 %3520, %v3210_v50  }
 0x11a   : > { %1164 = vperm.xlu1 %3521, %v3213_v53   ;;  %1160 = vperm.xlu0 %3520, %v3212_v54  }
 0x11e   : > { %1172 = vperm.xlu1 %3521, %v3215_v55   ;;  %1168 = vperm.xlu0 %3520, %v3214_v56  }
 0x122   : > { %1180 = vperm.xlu1 %3521, %v3217_v57   ;;  %1176 = vperm.xlu0 %3520, %v3216_v58  }
 0x126   : > { %1381 = vperm.xlu1 %3521, %v3251_v61   ;;  %1377 = vperm.xlu0 %3520, %v3250_v62  }
 0x12a   : > { %1389 = vperm.xlu1 %3521, %v3253_v63   ;;  %1385 = vperm.xlu0 %3520, %v3252_v0  }
 0x12e   : > { %1397 = vperm.xlu1 %3521, %v3255_v15   ;;  %1393 = vperm.xlu0 %3520, %v3254_v16  }
 0x132   : > { %1405 = vperm.xlu1 %3521, %v3257_v23   ;;  %1401 = vperm.xlu0 %3520, %v3256_v24  }
 0x136   : > { %1413 = vperm.xlu1 %3521, %v3259_v25   ;;  %1409 = vperm.xlu0 %3520, %v3258_v26  }
 0x138   : > { %v4006_v33 = vpop.permute.xlu1 %671  ;;  %v4008_v34 = vpop.permute.xlu0 %669 }
 0x139   : > { %5005 = vst [vmem:[#allocation10_spill] sm:$0xff] %v4006_v33  ;;  %5006 = vst [vmem:[#allocation11_spill] sm:$0xff] %v4008_v34 }
 0x13a   : > { %1421 = vperm.xlu1 %3521, %v3261_v29   ;;  %1417 = vperm.xlu0 %3520, %v3260_v30  }
 0x13c   : > { %v4016_v39 = vpop.permute.xlu1 %675  ;;  %v4018_v40 = vpop.permute.xlu0 %673 }
 0x13d   : > { %5007 = vst [vmem:[#allocation12_spill] sm:$0xff] %v4016_v39  ;;  %5008 = vst [vmem:[#allocation13_spill] sm:$0xff] %v4018_v40 }
 0x13e   : > { %1429 = vperm.xlu1 %3521, %v3263_v37   ;;  %1425 = vperm.xlu0 %3520, %v3262_v38  }
 0x140   : > { %v4026_v45 = vpop.permute.xlu1 %679  ;;  %v4028_v46 = vpop.permute.xlu0 %677 }
 0x141   : > { %5009 = vst [vmem:[#allocation14_spill] sm:$0xff] %v4026_v45  ;;  %5010 = vst [vmem:[#allocation15_spill] sm:$0xff] %v4028_v46 }
 0x142   : > { %1437 = vperm.xlu1 %3521, %v3265_v41   ;;  %1433 = vperm.xlu0 %3520, %v3264_v42  }
 0x144   : > { %v4030_v47 = vpop.permute.xlu1 %683  ;;  %v4032_v48 = vpop.permute.xlu0 %681 }
 0x145   : > { %5011 = vst [vmem:[#allocation16_spill] sm:$0xff] %v4030_v47  ;;  %5012 = vst [vmem:[#allocation17_spill] sm:$0xff] %v4032_v48 }
 0x148   : > { %v4034_v49 = vpop.permute.xlu1 %687  ;;  %v4036_v50 = vpop.permute.xlu0 %685 }
 0x149   : > { %5013 = vst [vmem:[#allocation18_spill] sm:$0xff] %v4034_v49  ;;  %5014 = vst [vmem:[#allocation19_spill] sm:$0xff] %v4036_v50 }
 0x14c   : > { %v4038_v53 = vpop.permute.xlu1 %691  ;;  %v4040_v54 = vpop.permute.xlu0 %689 }
 0x14d   : > { %5015 = vst [vmem:[#allocation20_spill] sm:$0xff] %v4038_v53  ;;  %5016 = vst [vmem:[#allocation21_spill] sm:$0xff] %v4040_v54  ;;  %v994_v54 = vld [vmem:[%s3804_s26 + $0x8] sm:$0x3] }
 0x150   : > { %v4042_v55 = vpop.permute.xlu1 %695  ;;  %v4044_v56 = vpop.permute.xlu0 %693 }
 0x151   : > { %5017 = vst [vmem:[#allocation22_spill] sm:$0xff] %v4042_v55  ;;  %5018 = vst [vmem:[#allocation23_spill] sm:$0xff] %v4044_v56 }
 0x154   : > { %v4046_v57 = vpop.permute.xlu1 %699  ;;  %v4048_v58 = vpop.permute.xlu0 %697 }
 0x158   : > { %v4050_v61 = vpop.permute.xlu1 %928  ;;  %v4052_v62 = vpop.permute.xlu0 %926 }
 0x159   : > { %5019 = vst [vmem:[#allocation24_spill] sm:$0xff] %v4050_v61  ;;  %5020 = vst [vmem:[#allocation25_spill] sm:$0xff] %v4052_v62 }
 0x15c   : > { %v4054_v63 = vpop.permute.xlu1 %932  ;;  %v4056_v0 = vpop.permute.xlu0 %930 }
 0x15d   : > { %5021 = vst [vmem:[#allocation26_spill] sm:$0xff] %v4054_v63  ;;  %5022 = vst [vmem:[#allocation27_spill] sm:$0xff] %v4056_v0 }
 0x160   : > { %v4058_v15 = vpop.permute.xlu1 %936  ;;  %v4060_v16 = vpop.permute.xlu0 %934 }
 0x161   : > { %5023 = vst [vmem:[#allocation28_spill] sm:$0xff] %v4058_v15  ;;  %5024 = vst [vmem:[#allocation29_spill] sm:$0xff] %v4060_v16 }
 0x164   : > { %v4062_v23 = vpop.permute.xlu1 %940  ;;  %v4064_v24 = vpop.permute.xlu0 %938 }
 0x165   : > { %5025 = vst [vmem:[#allocation30_spill] sm:$0xff] %v4062_v23  ;;  %5026 = vst [vmem:[#allocation31_spill] sm:$0xff] %v4064_v24 }
 0x168   : > { %v4066_v25 = vpop.permute.xlu1 %944  ;;  %v4068_v26 = vpop.permute.xlu0 %942 }
 0x169   : > { %5027 = vst [vmem:[#allocation32_spill] sm:$0xff] %v4066_v25  ;;  %5028 = vst [vmem:[#allocation33_spill] sm:$0xff] %v4068_v26 }
 0x16c   : > { %v4070_v29 = vpop.permute.xlu1 %948  ;;  %v4072_v30 = vpop.permute.xlu0 %946 }
 0x16d   : > { %5029 = vst [vmem:[#allocation34_spill] sm:$0xff] %v4070_v29  ;;  %5030 = vst [vmem:[#allocation35_spill] sm:$0xff] %v4072_v30 }
 0x170   : > { %v4074_v37 = vpop.permute.xlu1 %952  ;;  %v4076_v38 = vpop.permute.xlu0 %950 }
 0x171   : > { %5031 = vst [vmem:[#allocation36_spill] sm:$0xff] %v4074_v37  ;;  %5032 = vst [vmem:[#allocation37_spill] sm:$0xff] %v4076_v38 }
 0x174   : > { %v4078_v41 = vpop.permute.xlu1 %956  ;;  %v4080_v42 = vpop.permute.xlu0 %954 }
 0x181   : > { %v4082_v0 = vpop.permute.xlu1 %1124  ;;  %v4084_v40 = vpop.permute.xlu0 %1120 }
 0x182   : > { %5033 = vst [vmem:[#allocation38_spill] sm:$0xff] %v4082_v0  ;;  %5034 = vst [vmem:[#allocation39_spill] sm:$0xff] %v4084_v40 }
 0x185   : > { %v4086_v1 = vpop.permute.xlu1 %1132  ;;  %v4088_v27 = vpop.permute.xlu0 %1128 }
 0x186   : > { %5035 = vst [vmem:[#allocation40_spill] sm:$0xff] %v4086_v1  ;;  %5036 = vst [vmem:[#allocation41_spill] sm:$0xff] %v4088_v27 }
 0x189   : > { %v4090_v29 = vpop.permute.xlu1 %1140  ;;  %v4092_v37 = vpop.permute.xlu0 %1136 }
 0x18a   : > { %5037 = vst [vmem:[#allocation42_spill] sm:$0xff] %v4090_v29  ;;  %5038 = vst [vmem:[#allocation43_spill] sm:$0xff] %v4092_v37  ;;  %v991_v29 = vld [vmem:[%s3804_s26 + $0x2] sm:$0x3]  ;;  %v990_v37 = vld [vmem:[%s3804_s26] sm:$0x3] }
 0x18d   : > { %v4094_v38 = vpop.permute.xlu1 %1148  ;;  %v4096_v30 = vpop.permute.xlu0 %1144 }
 0x18e   : > { %5039 = vst [vmem:[#allocation44_spill] sm:$0xff] %v4094_v38  ;;  %5040 = vst [vmem:[#allocation45_spill] sm:$0xff] %v4096_v30  ;;  %v4116_v30 = vunpack.c.l.bf16 %v991_v29  ;;  %v995_v29 = vld [vmem:[%s3804_s26 + $0xa] sm:$0x3] }
 0x191   : > { %v4098_v26 = vpop.permute.xlu1 %1156  ;;  %v4100_v25 = vpop.permute.xlu0 %1152 }
 0x192   : > { %5041 = vst [vmem:[#allocation46_spill] sm:$0xff] %v4098_v26  ;;  %5042 = vst [vmem:[#allocation47_spill] sm:$0xff] %v4100_v25  ;;  %v4118_v26 = vunpack.c.l.bf16 %v990_v37  ;;  %v993_v25 = vld [vmem:[%s3804_s26 + $0x6] sm:$0x3] }
 0x193   : > { %v4124_v62 = vunpack.c.l.bf16 %v993_v25  ;;  %v996_v25 = vld [vmem:[%s3804_s26 + $0xc] sm:$0x3] }
 0x195   : > { %v4102_v24 = vpop.permute.xlu1 %1164  ;;  %v4104_v23 = vpop.permute.xlu0 %1160 }
 0x196   : > { %5043 = vst [vmem:[#allocation48_spill] sm:$0xff] %v4102_v24  ;;  %5044 = vst [vmem:[#allocation49_spill] sm:$0xff] %v4104_v23  ;;  %v992_v24 = vld [vmem:[%s3804_s26 + $0x4] sm:$0x3] }
 0x197   : > { %v4126_v61 = vunpack.c.l.bf16 %v992_v24  ;;  %v997_v24 = vld [vmem:[%s3804_s26 + $0xe] sm:$0x3] }
 0x199   : > { %v4106_v16 = vpop.permute.xlu1 %1172  ;;  %v4108_v27 = vpop.permute.xlu0 %1168  ;;  %5047 = vst [vmem:[#allocation52_spill] sm:$0xff] %v4126_v61 }
 0x19a   : > { %5045 = vst [vmem:[#allocation50_spill] sm:$0xff] %v4106_v16  ;;  %5046 = vst [vmem:[#allocation51_spill] sm:$0xff] %v4108_v27 }
 0x19d   : > { %v4112_v15 = vpop.permute.xlu1 %1180  ;;  %v4114_v38 = vpop.permute.xlu0 %1176 }
 0x1a1   : > { %v1382_v63 = vpop.permute.xlu1 %1381  ;;  %v1378_v23 = vpop.permute.xlu0 %1377 }
 0x1a2   : > { %v1441_v16 = vmul.f32 %v1382_v63, %v4116_v30  ;;  %v1440_v27 = vmul.f32 %v1378_v23, %v4118_v26  ;;  %v4134_v63 = vunpack.c.l.bf16 %v995_v29  ;;  %v4136_v23 = vunpack.c.l.bf16 %v994_v54  ;;  %v998_v29 = vld [vmem:[%s3804_s26 + $0x10] sm:$0x3] }
 0x1a3   : > { %v4146_v54 = vunpack.c.l.bf16 %v996_v25 }
 0x1a4   : > { %v3267_v56 = vrot.slane %v1441_v16, 9  ;;  %v3266_v55 = vrot.slane %v1440_v27, 9 }
 0x1a5   : > { %v1390_v37 = vpop.permute.xlu1 %1389  ;;  %v1386_v53 = vpop.permute.xlu0 %1385 }
 0x1a6   : > { %v1443_v50 = vmul.f32 %v1390_v37, %v4124_v62  ;;  %v1442_v49 = vmul.f32 %v1386_v53, %v4126_v61  ;;  %1506 = vrot.lane.b32.xlu1 %v3267_v56, %s3547_s27  ;;  %1504 = vrot.lane.b32.xlu0 %v3266_v55, %s3547_s27  ;;  %v4144_v55 = vunpack.c.l.bf16 %v997_v24  ;;  %v999_v56 = vld [vmem:[%s3804_s26 + $0x12] sm:$0x3] }
 0x1a8   : > { %v3269_v16 = vrot.slane %v1443_v50, 9  ;;  %v3268_v27 = vrot.slane %v1442_v49, 9 }
 0x1a9   : > { %v1398_v48 = vpop.permute.xlu1 %1397  ;;  %v1394_v1 = vpop.permute.xlu0 %1393 }
 0x1aa   : > { %v1445_v37 = vmul.f32 %v1398_v48, %v4134_v63  ;;  %v1444_v53 = vmul.f32 %v1394_v1, %v4136_v23  ;;  %1510 = vrot.lane.b32.xlu1 %v3269_v16, %s3547_s27  ;;  %1508 = vrot.lane.b32.xlu0 %v3268_v27, %s3547_s27  ;;  %v4154_v16 = vunpack.c.l.bf16 %v999_v56  ;;  %v4156_v27 = vunpack.c.l.bf16 %v998_v29 }
 0x1ac   : > { %v3271_v50 = vrot.slane %v1445_v37, 9  ;;  %v3270_v49 = vrot.slane %v1444_v53, 9  ;;  %v1001_v37 = vld [vmem:[%s3804_s26 + $0x16] sm:$0x3]  ;;  %v1000_v53 = vld [vmem:[%s3804_s26 + $0x14] sm:$0x3] }
 0x1ad   : > { %v1406_v47 = vpop.permute.xlu1 %1405  ;;  %v1402_v46 = vpop.permute.xlu0 %1401 }
 0x1ae   : > { %v1447_v48 = vmul.f32 %v1406_v47, %v4144_v55  ;;  %v1446_v1 = vmul.f32 %v1402_v46, %v4146_v54  ;;  %1514 = vrot.lane.b32.xlu1 %v3271_v50, %s3547_s27  ;;  %1512 = vrot.lane.b32.xlu0 %v3270_v49, %s3547_s27  ;;  %v4164_v50 = vunpack.c.l.bf16 %v1001_v37  ;;  %v4166_v49 = vunpack.c.l.bf16 %v1000_v53 }
 0x1b0   : > { %v3273_v24 = vrot.slane %v1447_v48, 9  ;;  %v3272_v25 = vrot.slane %v1446_v1, 9  ;;  %v1003_v48 = vld [vmem:[%s3804_s26 + $0x1a] sm:$0x3]  ;;  %v1002_v1 = vld [vmem:[%s3804_s26 + $0x18] sm:$0x3] }
 0x1b1   : > { %v1414_v45 = vpop.permute.xlu1 %1413  ;;  %v1410_v40 = vpop.permute.xlu0 %1409 }
 0x1b2   : > { %v1449_v47 = vmul.f32 %v1414_v45, %v4154_v16  ;;  %v1448_v46 = vmul.f32 %v1410_v40, %v4156_v27  ;;  %1518 = vrot.lane.b32.xlu1 %v3273_v24, %s3547_s27  ;;  %1516 = vrot.lane.b32.xlu0 %v3272_v25, %s3547_s27  ;;  %v4174_v24 = vunpack.c.l.bf16 %v1003_v48  ;;  %v4176_v25 = vunpack.c.l.bf16 %v1002_v1 }
 0x1b4   : > { %v3275_v56 = vrot.slane %v1449_v47, 9  ;;  %v3274_v29 = vrot.slane %v1448_v46, 9  ;;  %v1005_v47 = vld [vmem:[%s3804_s26 + $0x1e] sm:$0x3]  ;;  %v1004_v46 = vld [vmem:[%s3804_s26 + $0x1c] sm:$0x3] }
 0x1b5   : > { %v1422_v39 = vpop.permute.xlu1 %1421  ;;  %v1418_v34 = vpop.permute.xlu0 %1417 }
 0x1b6   : > { %v1451_v45 = vmul.f32 %v1422_v39, %v4164_v50  ;;  %v1450_v40 = vmul.f32 %v1418_v34, %v4166_v49  ;;  %1522 = vrot.lane.b32.xlu1 %v3275_v56, %s3547_s27  ;;  %1520 = vrot.lane.b32.xlu0 %v3274_v29, %s3547_s27  ;;  %v4184_v34 = vunpack.c.l.bf16 %v1005_v47  ;;  %v4186_v56 = vunpack.c.l.bf16 %v1004_v46  ;;  %v3303_v47 = vld [vmem:[%s4991_s1 + $0x55] ss:$0 sm:$0xff]  ;;  %v3302_v46 = vld [vmem:[%s4991_s1 + $0x54] ss:$0 sm:$0xff] }
 0x1b8   : > { %v3277_v37 = vrot.slane %v1451_v45, 9  ;;  %v3276_v53 = vrot.slane %v1450_v40, 9 }
 0x1b9   : > { %v1430_v33 = vpop.permute.xlu1 %1429  ;;  %v1426_v0 = vpop.permute.xlu0 %1425 }
 0x1ba   : > { %v1453_v14 = vmul.f32 %v1430_v33, %v4174_v24  ;;  %v1452_v39 = vmul.f32 %v1426_v0, %v4176_v25  ;;  %1526 = vrot.lane.b32.xlu1 %v3277_v37, %s3547_s27  ;;  %1524 = vrot.lane.b32.xlu0 %v3276_v53, %s3547_s27  ;;  %v3298_v37 = vld [vmem:[%s4991_s1 + $0x50] ss:$0 sm:$0xff]  ;;  %v3301_v53 = vld [vmem:[%s4991_s1 + $0x53] ss:$0 sm:$0xff] }
 0x1bc   : > { %v3279_v29 = vrot.slane %v1453_v14, 9  ;;  %v3278_v48 = vrot.slane %v1452_v39, 9  ;;  %v3299_v14 = vld [vmem:[%s4991_s1 + $0x51] ss:$0 sm:$0xff]  ;;  %v3305_v39 = vld [vmem:[%s4991_s1 + $0x57] ss:$0 sm:$0xff] }
 0x1bd   : > { %v1438_v1 = vpop.permute.xlu1 %1437  ;;  %v1434_v45 = vpop.permute.xlu0 %1433 }
 0x1be   : > { %v1455_v40 = vmul.f32 %v1438_v1, %v4184_v34  ;;  %v1454_v22 = vmul.f32 %v1434_v45, %v4186_v56  ;;  %1530 = vrot.lane.b32.xlu1 %v3279_v29, %s3547_s27  ;;  %1528 = vrot.lane.b32.xlu0 %v3278_v48, %s3547_s27  ;;  %v3304_v29 = vld [vmem:[%s4991_s1 + $0x56] ss:$0 sm:$0xff]  ;;  %v3307_v48 = vld [vmem:[%s4991_s1 + $0x59] ss:$0 sm:$0xff] }
 0x1bf   : > { %v3306_v1 = vld [vmem:[%s4991_s1 + $0x58] ss:$0 sm:$0xff]  ;;  %v3309_v45 = vld [vmem:[%s4991_s1 + $0x5b] ss:$0 sm:$0xff] }
 0x1c0   : > { %v3281_v33 = vrot.slane %v1455_v40, 9  ;;  %v3280_v0 = vrot.slane %v1454_v22, 9  ;;  %v3300_v22 = vld [vmem:[%s4991_s1 + $0x52] ss:$0 sm:$0xff]  ;;  %v3308_v40 = vld [vmem:[%s4991_s1 + $0x5a] ss:$0 sm:$0xff] }
 0x1c2   : > { %1534 = vrot.lane.b32.xlu1 %v3281_v33, %s3547_s27  ;;  %1532 = vrot.lane.b32.xlu0 %v3280_v0, %s3547_s27  ;;  %v3311_v33 = vld [vmem:[%s4991_s1 + $0x5d] ss:$0 sm:$0xff]  ;;  %v3310_v0 = vld [vmem:[%s4991_s1 + $0x5c] ss:$0 sm:$0xff] }
 0x1c6   : > { %1670 = vperm.xlu1 %3521, %v3299_v14   ;;  %1666 = vperm.xlu0 %3520, %v3298_v37   ;;  %v3313_v14 = vld [vmem:[%s4991_s1 + $0x5f] ss:$0 sm:$0xff]  ;;  %v3312_v37 = vld [vmem:[%s4991_s1 + $0x5e] ss:$0 sm:$0xff] }
 0x1ca   : > { %1678 = vperm.xlu1 %3521, %v3301_v53   ;;  %1674 = vperm.xlu0 %3520, %v3300_v22  }
 0x1ce   : > { %1686 = vperm.xlu1 %3521, %v3303_v47   ;;  %1682 = vperm.xlu0 %3520, %v3302_v46  }
 0x1d2   : > { %1694 = vperm.xlu1 %3521, %v3305_v39   ;;  %1690 = vperm.xlu0 %3520, %v3304_v29  }
 0x1d6   : > { %1702 = vperm.xlu1 %3521, %v3307_v48   ;;  %1698 = vperm.xlu0 %3520, %v3306_v1  }
 0x1da   : > { %1710 = vperm.xlu1 %3521, %v3309_v45   ;;  %1706 = vperm.xlu0 %3520, %v3308_v40  }
 0x1de   : > { %1718 = vperm.xlu1 %3521, %v3311_v33   ;;  %1714 = vperm.xlu0 %3520, %v3310_v0  }
 0x1e2   : > { %1726 = vperm.xlu1 %3521, %v3313_v14   ;;  %1722 = vperm.xlu0 %3520, %v3312_v37  }
 0x218   : > { %v4242_v53 = vpop.permute.xlu1 %1506  ;;  %v4244_v22 = vpop.permute.xlu0 %1504 }
 0x219   : > { %5048 = vst [vmem:[#allocation53_spill] sm:$0xff] %v4242_v53  ;;  %5049 = vst [vmem:[#allocation54_spill] sm:$0xff] %v4244_v22 }
 0x21c   : > { %v4246_v47 = vpop.permute.xlu1 %1510  ;;  %v4248_v46 = vpop.permute.xlu0 %1508 }
 0x21d   : > { %5050 = vst [vmem:[#allocation55_spill] sm:$0xff] %v4246_v47  ;;  %5051 = vst [vmem:[#allocation56_spill] sm:$0xff] %v4248_v46 }
 0x220   : > { %v4250_v39 = vpop.permute.xlu1 %1514  ;;  %v4252_v29 = vpop.permute.xlu0 %1512 }
 0x221   : > { %5052 = vst [vmem:[#allocation57_spill] sm:$0xff] %v4250_v39  ;;  %5053 = vst [vmem:[#allocation58_spill] sm:$0xff] %v4252_v29 }
 0x224   : > { %v4254_v48 = vpop.permute.xlu1 %1518  ;;  %v4256_v1 = vpop.permute.xlu0 %1516 }
 0x225   : > { %5054 = vst [vmem:[#allocation59_spill] sm:$0xff] %v4254_v48  ;;  %5055 = vst [vmem:[#allocation60_spill] sm:$0xff] %v4256_v1 }
 0x228   : > { %v4258_v45 = vpop.permute.xlu1 %1522  ;;  %v4260_v40 = vpop.permute.xlu0 %1520 }
 0x229   : > { %5056 = vst [vmem:[#allocation61_spill] sm:$0xff] %v4258_v45  ;;  %5057 = vst [vmem:[#allocation62_spill] sm:$0xff] %v4260_v40 }
 0x22c   : > { %v4262_v33 = vpop.permute.xlu1 %1526  ;;  %v4264_v0 = vpop.permute.xlu0 %1524 }
 0x22d   : > { %5058 = vst [vmem:[#allocation63_spill] sm:$0xff] %v4262_v33  ;;  %5059 = vst [vmem:[#allocation64_spill] sm:$0xff] %v4264_v0 }
 0x230   : > { %v4266_v14 = vpop.permute.xlu1 %1530  ;;  %v4268_v37 = vpop.permute.xlu0 %1528 }
 0x231   : > { %5060 = vst [vmem:[#allocation65_spill] sm:$0xff] %v4266_v14  ;;  %5061 = vst [vmem:[#allocation66_spill] sm:$0xff] %v4268_v37 }
 0x234   : > { %v4270_v46 = vpop.permute.xlu1 %1534  ;;  %v4272_v39 = vpop.permute.xlu0 %1532 }
 0x241   : > { %v1671_v29 = vpop.permute.xlu1 %1670  ;;  %v1667_v48 = vpop.permute.xlu0 %1666 }
 0x242   : > { %v1730_v1 = vmul.f32 %v1671_v29, %v4116_v30  ;;  %v1729_v45 = vmul.f32 %v1667_v48, %v4118_v26 }
 0x244   : > { %v3315_v47 = vrot.slane %v1730_v1, 9  ;;  %v3314_v40 = vrot.slane %v1729_v45, 9 }
 0x245   : > { %v1679_v22 = vpop.permute.xlu1 %1678  ;;  %v1675_v33 = vpop.permute.xlu0 %1674 }
 0x246   : > { %v1732_v0 = vmul.f32 %v1679_v22, %v4124_v62  ;;  %v1731_v14 = vmul.f32 %v1675_v33, %v4126_v61  ;;  %1795 = vrot.lane.b32.xlu1 %v3315_v47, %s3548_s28  ;;  %1793 = vrot.lane.b32.xlu0 %v3314_v40, %s3548_s28 }
 0x248   : > { %v3317_v37 = vrot.slane %v1732_v0, 9  ;;  %v3316_v53 = vrot.slane %v1731_v14, 9 }
 0x249   : > { %v1687_v13 = vpop.permute.xlu1 %1686  ;;  %v1683_v21 = vpop.permute.xlu0 %1682 }
 0x24a   : > { %v1734_v29 = vmul.f32 %v1687_v13, %v4134_v63  ;;  %v1733_v48 = vmul.f32 %v1683_v21, %v4136_v23  ;;  %1799 = vrot.lane.b32.xlu1 %v3317_v37, %s3548_s28  ;;  %1797 = vrot.lane.b32.xlu0 %v3316_v53, %s3548_s28 }
 0x24c   : > { %v3319_v1 = vrot.slane %v1734_v29, 9  ;;  %v3318_v22 = vrot.slane %v1733_v48, 9 }
 0x24d   : > { %v1695_v45 = vpop.permute.xlu1 %1694  ;;  %v1691_v33 = vpop.permute.xlu0 %1690 }
 0x24e   : > { %v1736_v47 = vmul.f32 %v1695_v45, %v4144_v55  ;;  %v1735_v40 = vmul.f32 %v1691_v33, %v4146_v54  ;;  %1803 = vrot.lane.b32.xlu1 %v3319_v1, %s3548_s28  ;;  %1801 = vrot.lane.b32.xlu0 %v3318_v22, %s3548_s28 }
 0x250   : > { %v3321_v0 = vrot.slane %v1736_v47, 9  ;;  %v3320_v13 = vrot.slane %v1735_v40, 9 }
 0x251   : > { %v1703_v14 = vpop.permute.xlu1 %1702  ;;  %v1699_v21 = vpop.permute.xlu0 %1698 }
 0x252   : > { %v1738_v37 = vmul.f32 %v1703_v14, %v4154_v16  ;;  %v1737_v53 = vmul.f32 %v1699_v21, %v4156_v27  ;;  %1807 = vrot.lane.b32.xlu1 %v3321_v0, %s3548_s28  ;;  %1805 = vrot.lane.b32.xlu0 %v3320_v13, %s3548_s28 }
 0x254   : > { %v3323_v29 = vrot.slane %v1738_v37, 9  ;;  %v3322_v48 = vrot.slane %v1737_v53, 9 }
 0x255   : > { %v1711_v45 = vpop.permute.xlu1 %1710  ;;  %v1707_v33 = vpop.permute.xlu0 %1706 }
 0x256   : > { %v1740_v1 = vmul.f32 %v1711_v45, %v4164_v50  ;;  %v1739_v22 = vmul.f32 %v1707_v33, %v4166_v49  ;;  %1811 = vrot.lane.b32.xlu1 %v3323_v29, %s3548_s28  ;;  %1809 = vrot.lane.b32.xlu0 %v3322_v48, %s3548_s28 }
 0x258   : > { %v3325_v47 = vrot.slane %v1740_v1, 9  ;;  %v3324_v40 = vrot.slane %v1739_v22, 9 }
 0x259   : > { %v1719_v14 = vpop.permute.xlu1 %1718  ;;  %v1715_v21 = vpop.permute.xlu0 %1714 }
 0x25a   : > { %v1742_v0 = vmul.f32 %v1719_v14, %v4174_v24  ;;  %v1741_v13 = vmul.f32 %v1715_v21, %v4176_v25  ;;  %1815 = vrot.lane.b32.xlu1 %v3325_v47, %s3548_s28  ;;  %1813 = vrot.lane.b32.xlu0 %v3324_v40, %s3548_s28  ;;  %v3347_v47 = vld [vmem:[%s4991_s1 + $0x61] ss:$0 sm:$0xff]  ;;  %v3346_v40 = vld [vmem:[%s4991_s1 + $0x60] ss:$0 sm:$0xff] }
 0x25b   : > { %v3349_v14 = vld [vmem:[%s4991_s1 + $0x63] ss:$0 sm:$0xff]  ;;  %v3348_v21 = vld [vmem:[%s4991_s1 + $0x62] ss:$0 sm:$0xff] }
 0x25c   : > { %v3327_v37 = vrot.slane %v1742_v0, 9  ;;  %v3326_v53 = vrot.slane %v1741_v13, 9  ;;  %v3351_v0 = vld [vmem:[%s4991_s1 + $0x65] ss:$0 sm:$0xff]  ;;  %v3350_v13 = vld [vmem:[%s4991_s1 + $0x64] ss:$0 sm:$0xff] }
 0x25d   : > { %v1727_v45 = vpop.permute.xlu1 %1726  ;;  %v1723_v33 = vpop.permute.xlu0 %1722 }
 0x25e   : > { %v1744_v29 = vmul.f32 %v1727_v45, %v4184_v34  ;;  %v1743_v48 = vmul.f32 %v1723_v33, %v4186_v56  ;;  %1819 = vrot.lane.b32.xlu1 %v3327_v37, %s3548_s28  ;;  %1817 = vrot.lane.b32.xlu0 %v3326_v53, %s3548_s28  ;;  %v3353_v37 = vld [vmem:[%s4991_s1 + $0x67] ss:$0 sm:$0xff]  ;;  %v3352_v53 = vld [vmem:[%s4991_s1 + $0x66] ss:$0 sm:$0xff] }
 0x25f   : > { %v3355_v45 = vld [vmem:[%s4991_s1 + $0x69] ss:$0 sm:$0xff]  ;;  %v3354_v33 = vld [vmem:[%s4991_s1 + $0x68] ss:$0 sm:$0xff] }
 0x260   : > { %v3329_v1 = vrot.slane %v1744_v29, 9  ;;  %v3328_v22 = vrot.slane %v1743_v48, 9  ;;  %v3357_v29 = vld [vmem:[%s4991_s1 + $0x6b] ss:$0 sm:$0xff]  ;;  %v3356_v48 = vld [vmem:[%s4991_s1 + $0x6a] ss:$0 sm:$0xff] }
 0x262   : > { %1823 = vrot.lane.b32.xlu1 %v3329_v1, %s3548_s28  ;;  %1821 = vrot.lane.b32.xlu0 %v3328_v22, %s3548_s28  ;;  %v3359_v1 = vld [vmem:[%s4991_s1 + $0x6d] ss:$0 sm:$0xff]  ;;  %v3358_v22 = vld [vmem:[%s4991_s1 + $0x6c] ss:$0 sm:$0xff] }
 0x266   : > { %1991 = vperm.xlu1 %3521, %v3347_v47   ;;  %1987 = vperm.xlu0 %3520, %v3346_v40   ;;  %v3361_v47 = vld [vmem:[%s4991_s1 + $0x6f] ss:$0 sm:$0xff]  ;;  %v3360_v40 = vld [vmem:[%s4991_s1 + $0x6e] ss:$0 sm:$0xff] }
 0x26a   : > { %1999 = vperm.xlu1 %3521, %v3349_v14   ;;  %1995 = vperm.xlu0 %3520, %v3348_v21   ;;  %v3395_v14 = vld [vmem:[%s4991_s1 + $0x71] ss:$0 sm:$0xff]  ;;  %v3394_v21 = vld [vmem:[%s4991_s1 + $0x70] ss:$0 sm:$0xff] }
 0x26e   : > { %2007 = vperm.xlu1 %3521, %v3351_v0   ;;  %2003 = vperm.xlu0 %3520, %v3350_v13   ;;  %v3397_v0 = vld [vmem:[%s4991_s1 + $0x73] ss:$0 sm:$0xff]  ;;  %v3396_v13 = vld [vmem:[%s4991_s1 + $0x72] ss:$0 sm:$0xff] }
 0x272   : > { %2015 = vperm.xlu1 %3521, %v3353_v37   ;;  %2011 = vperm.xlu0 %3520, %v3352_v53   ;;  %v3399_v37 = vld [vmem:[%s4991_s1 + $0x75] ss:$0 sm:$0xff]  ;;  %v3398_v53 = vld [vmem:[%s4991_s1 + $0x74] ss:$0 sm:$0xff] }
 0x276   : > { %2023 = vperm.xlu1 %3521, %v3355_v45   ;;  %2019 = vperm.xlu0 %3520, %v3354_v33   ;;  %v3401_v45 = vld [vmem:[%s4991_s1 + $0x77] ss:$0 sm:$0xff]  ;;  %v3400_v33 = vld [vmem:[%s4991_s1 + $0x76] ss:$0 sm:$0xff] }
 0x27a   : > { %2031 = vperm.xlu1 %3521, %v3357_v29   ;;  %2027 = vperm.xlu0 %3520, %v3356_v48   ;;  %v3403_v29 = vld [vmem:[%s4991_s1 + $0x79] ss:$0 sm:$0xff]  ;;  %v3402_v48 = vld [vmem:[%s4991_s1 + $0x78] ss:$0 sm:$0xff] }
 0x27e   : > { %2039 = vperm.xlu1 %3521, %v3359_v1   ;;  %2035 = vperm.xlu0 %3520, %v3358_v22   ;;  %v3405_v1 = vld [vmem:[%s4991_s1 + $0x7b] ss:$0 sm:$0xff]  ;;  %v3404_v22 = vld [vmem:[%s4991_s1 + $0x7a] ss:$0 sm:$0xff] }
 0x282   : > { %2047 = vperm.xlu1 %3521, %v3361_v47   ;;  %2043 = vperm.xlu0 %3520, %v3360_v40   ;;  %v3407_v47 = vld [vmem:[%s4991_s1 + $0x7d] ss:$0 sm:$0xff]  ;;  %v3406_v40 = vld [vmem:[%s4991_s1 + $0x7c] ss:$0 sm:$0xff] }
 0x286   : > { %2248 = vperm.xlu1 %3521, %v3395_v14   ;;  %2244 = vperm.xlu0 %3520, %v3394_v21   ;;  %v3409_v14 = vld [vmem:[%s4991_s1 + $0x7f] ss:$0 sm:$0xff]  ;;  %v3408_v21 = vld [vmem:[%s4991_s1 + $0x7e] ss:$0 sm:$0xff] }
 0x28a   : > { %2256 = vperm.xlu1 %3521, %v3397_v0   ;;  %2252 = vperm.xlu0 %3520, %v3396_v13  }
 0x28e   : > { %2264 = vperm.xlu1 %3521, %v3399_v37   ;;  %2260 = vperm.xlu0 %3520, %v3398_v53  }
 0x292   : > { %2272 = vperm.xlu1 %3521, %v3401_v45   ;;  %2268 = vperm.xlu0 %3520, %v3400_v33  }
 0x296   : > { %2280 = vperm.xlu1 %3521, %v3403_v29   ;;  %2276 = vperm.xlu0 %3520, %v3402_v48  }
 0x29a   : > { %2288 = vperm.xlu1 %3521, %v3405_v1   ;;  %2284 = vperm.xlu0 %3520, %v3404_v22  }
 0x29e   : > { %2296 = vperm.xlu1 %3521, %v3407_v47   ;;  %2292 = vperm.xlu0 %3520, %v3406_v40   ;;  %v1198_v47 = vmul.f32 %v4112_v15, %v4184_v34  ;;  %v1197_v40 = vmul.f32 %v4114_v38, %v4186_v56 }
 0x2a2   : > { %2304 = vperm.xlu1 %3521, %v3409_v14   ;;  %2300 = vperm.xlu0 %3520, %v3408_v21   ;;  %v475_v14 = vmul.f32 %v3808_v17, %v3880_v31  ;;  %v474_v21 = vmul.f32 %v3810_v18, %v3882_v32 }
 0x2b8   : > { %v4402_v0 = vpop.permute.xlu1 %1795  ;;  %v4404_v13 = vpop.permute.xlu0 %1793 }
 0x2bc   : > { %v4406_v37 = vpop.permute.xlu1 %1799  ;;  %v4408_v53 = vpop.permute.xlu0 %1797 }
 0x2bd   : > { %5062 = vst [vmem:[#allocation67_spill] sm:$0xff] %v4408_v53 }
 0x2c0   : > { %v4410_v45 = vpop.permute.xlu1 %1803  ;;  %v4412_v33 = vpop.permute.xlu0 %1801 }
 0x2c4   : > { %v4414_v29 = vpop.permute.xlu1 %1807  ;;  %v4416_v48 = vpop.permute.xlu0 %1805 }
 0x2c5   : > { %5063 = vst [vmem:[#allocation68_spill] sm:$0xff] %v4414_v29  ;;  %5064 = vst [vmem:[#allocation69_spill] sm:$0xff] %v4416_v48  ;;  %v3233_v48 = vrot.slane %v1198_v47, 9  ;;  %v3232_v29 = vrot.slane %v1197_v40, 9  ;;  %v5077_v40 = vld [vmem:[#allocation15_spill] sm:$0xff] }
 0x2c8   : > { %v4418_v1 = vpop.permute.xlu1 %1811  ;;  %v4420_v22 = vpop.permute.xlu0 %1809 }
 0x2c9   : > { %5065 = vst [vmem:[#allocation70_spill] sm:$0xff] %v4418_v1  ;;  %5066 = vst [vmem:[#allocation71_spill] sm:$0xff] %v4420_v22  ;;  %v732_v1 = vadd.f32 %v4046_v57, %v475_v14  ;;  %v731_v22 = vadd.f32 %v4048_v58, %v474_v21  ;;  %v460_v57 = vmul.f32 %v3775_v2, %v3812_v19  ;;  %v5078_v21 = vld [vmem:[#allocation16_spill] sm:$0xff] }
 0x2ca   : > { %v463_v58 = vmul.f32 %v3777_v3, %v3822_v28  ;;  %v466_v3 = vmul.f32 %v3787_v8, %v3842_v44  ;;  %v471_v19 = vmul.f32 %v3793_v11, %v3860_v59  ;;  %v5071_v8 = vld [vmem:[#allocation38_spill] sm:$0xff]  ;;  %v5075_v59 = vld [vmem:[#allocation39_spill] sm:$0xff] }
 0x2cb   : > { %v989_v15 = vadd.f32 %v4078_v41, %v732_v1  ;;  %v988_v38 = vadd.f32 %v4080_v42, %v731_v22  ;;  %v461_v41 = vmul.f32 %v3779_v4, %v3814_v20  ;;  %v465_v42 = vmul.f32 %v3781_v5, %v3830_v35  ;;  %v5068_v20 = vld [vmem:[#allocation5_spill] sm:$0xff] }
 0x2cc   : > { %v4430_v53 = vpop.permute.xlu1 %1815  ;;  %v4432_v61 = vpop.permute.xlu0 %1813  ;;  %v469_v4 = vmul.f32 %v3789_v9, %v3850_v51  ;;  %v468_v5 = vmul.f32 %v3791_v10, %v3852_v52  ;;  %v5069_v35 = vld [vmem:[#allocation9_spill] sm:$0xff]  ;;  %v1184_v44 = vmul.f32 %v5071_v8, %v4116_v30  ;;  %v5073_v51 = vld [vmem:[#allocation11_spill] sm:$0xff]  ;;  %v5074_v52 = vld [vmem:[#allocation12_spill] sm:$0xff] }
 0x2cd   : > { %v1278_v31 = vadd.f32 %v3233_v48, %v989_v15  ;;  %v1277_v18 = vadd.f32 %v3232_v29, %v988_v38  ;;  %v464_v29 = vmul.f32 %v3783_v6, %v3832_v36  ;;  %v470_v6 = vmul.f32 %v3795_v12, %v3862_v60  ;;  %v5070_v36 = vld [vmem:[#allocation6_spill] sm:$0xff]  ;;  %v5079_v38 = vld [vmem:[#allocation40_spill] sm:$0xff] }
 0x2ce   : > { %v5072_v48 = vld [vmem:[#allocation10_spill] sm:$0xff]  ;;  %v717_v10 = vadd.f32 %v5073_v51, %v460_v57  ;;  %v720_v11 = vadd.f32 %v5074_v52, %v463_v58  ;;  %v1183_v12 = vmul.f32 %v5075_v59, %v4118_v26  ;;  %v1186_v30 = vmul.f32 %v5079_v38, %v4124_v62  ;;  %v5082_v57 = vld [vmem:[#allocation19_spill] sm:$0xff]  ;;  %v5087_v8 = vld [vmem:[#allocation24_spill] sm:$0xff] }
 0x2cf   : > { %v1567_v32 = vadd.f32 %v4270_v46, %v1278_v31  ;;  %v1566_v56 = vadd.f32 %v4272_v39, %v1277_v18  ;;  %v467_v46 = vmul.f32 %v3785_v7, %v3840_v43  ;;  %v5067_v7 = vld [vmem:[#allocation8_spill] sm:$0xff]  ;;  %v472_v43 = vmul.f32 %v5070_v36, %v5069_v35  ;;  %v5076_v60 = vld [vmem:[#allocation14_spill] sm:$0xff]  ;;  %v5080_v31 = vld [vmem:[#allocation17_spill] sm:$0xff] }
 0x2d0   : > { %v4438_v34 = vpop.permute.xlu1 %1819  ;;  %v4440_v17 = vpop.permute.xlu0 %1817  ;;  %v473_v28 = vmul.f32 %v5068_v20, %v5067_v7  ;;  %v718_v9 = vadd.f32 %v5072_v48, %v461_v41  ;;  %v722_v47 = vadd.f32 %v5076_v60, %v465_v42  ;;  %v721_v14 = vadd.f32 %v5077_v40, %v464_v29  ;;  %v5085_v26 = vld [vmem:[#allocation22_spill] sm:$0xff]  ;;  %v5086_v42 = vld [vmem:[#allocation23_spill] sm:$0xff]  ;;  %v1858_v36 = vld [vmem:[%s3804_s26 + $0x2] sm:$0x2] }
 0x2d1   : > { %v724_v15 = vadd.f32 %v5078_v21, %v467_v46  ;;  %v723_v18 = vadd.f32 %v5080_v31, %v466_v3  ;;  %v725_v41 = vadd.f32 %v5082_v57, %v468_v5  ;;  %v729_v35 = vadd.f32 %v5086_v42, %v472_v43  ;;  %v1857_v46 = vld [vmem:[%s3804_s26] sm:$0x2]  ;;  %v5088_v62 = vld [vmem:[#allocation25_spill] sm:$0xff]  ;;  %v5089_v51 = vld [vmem:[#allocation26_spill] sm:$0xff] }
 0x2d2   : > { %v730_v20 = vadd.f32 %v5085_v26, %v473_v28  ;;  %v3219_v29 = vrot.slane %v1184_v44, 9  ;;  %v975_v48 = vadd.f32 %v5087_v8, %v718_v9  ;;  %v974_v3 = vadd.f32 %v5088_v62, %v717_v10  ;;  %v5090_v5 = vld [vmem:[#allocation28_spill] sm:$0xff]  ;;  %v5092_v28 = vld [vmem:[#allocation42_spill] sm:$0xff]  ;;  %v5094_v21 = vld [vmem:[#allocation31_spill] sm:$0xff] }
 0x2d3   : > { %v3218_v52 = vrot.slane %v1183_v12, 9  ;;  %v979_v59 = vadd.f32 %v5090_v5, %v722_v47  ;;  %v1188_v40 = vmul.f32 %v5092_v28, %v4134_v63  ;;  %v5093_v43 = vld [vmem:[#allocation30_spill] sm:$0xff]  ;;  %v980_v38 = vadd.f32 %v5094_v21, %v723_v18  ;;  %v5095_v10 = vld [vmem:[#allocation32_spill] sm:$0xff]  ;;  %v5098_v57 = vld [vmem:[#allocation33_spill] sm:$0xff] }
 0x2d4   : > { %v1824_v1 = vpop.permute.xlu1 %1823  ;;  %v1822_v22 = vpop.permute.xlu0 %1821  ;;  %v981_v44 = vadd.f32 %v5093_v43, %v724_v15  ;;  %v4504_v31 = vunpack.c.l.bf16 %v1858_v36  ;;  %v4506_v9 = vunpack.c.l.bf16 %v1857_v46  ;;  %v5097_v47 = vld [vmem:[#allocation44_spill] sm:$0xff]  ;;  %v982_v15 = vadd.f32 %v5098_v57, %v725_v41  ;;  %v5101_v36 = vld [vmem:[#allocation45_spill] sm:$0xff]  ;;  %v5103_v62 = vld [vmem:[#allocation54_spill] sm:$0xff] }
 0x2d5   : > { %v4456_v39 = vadd.f32 %v1824_v1, %v1567_v32  ;;  %v4458_v2 = vadd.f32 %v1822_v22, %v1566_v56  ;;  %v5081_v32 = vld [vmem:[#allocation18_spill] sm:$0xff]  ;;  %v5083_v1 = vld [vmem:[#allocation20_spill] sm:$0xff]  ;;  %v5084_v22 = vld [vmem:[#allocation21_spill] sm:$0xff]  ;;  %v1263_v42 = vadd.f32 %v3218_v52, %v974_v3 }
 0x2d6   : > { %v726_v56 = vadd.f32 %v5081_v32, %v469_v4  ;;  %v728_v58 = vadd.f32 %v5083_v1, %v471_v19  ;;  %v727_v7 = vadd.f32 %v5084_v22, %v470_v6  ;;  %v977_v4 = vadd.f32 %v5089_v51, %v720_v11  ;;  %v5091_v19 = vld [vmem:[#allocation29_spill] sm:$0xff]  ;;  %v5096_v11 = vld [vmem:[#allocation43_spill] sm:$0xff]  ;;  %v1860_v63 = vld [vmem:[%s3804_s26 + $0x6] sm:$0x2] }
 0x2d7   : > { %v978_v60 = vadd.f32 %v5091_v19, %v721_v14  ;;  %v3221_v6 = vrot.slane %v1186_v30, 9  ;;  %v1187_v12 = vmul.f32 %v5096_v11, %v4136_v23  ;;  %v1190_v14 = vmul.f32 %v5097_v47, %v4144_v55  ;;  %v5099_v1 = vld [vmem:[#allocation34_spill] sm:$0xff]  ;;  %v5100_v22 = vld [vmem:[#allocation35_spill] sm:$0xff]  ;;  %v5102_v46 = vld [vmem:[#allocation53_spill] sm:$0xff] }
 0x2d8   : > { %v4509_v32 = vadd.f32 %v5095_v10, %v726_v56  ;;  %v1264_v30 = vadd.f32 %v3219_v29, %v975_v48  ;;  %v4518_v18 = vadd.f32 %v5099_v1, %v728_v58  ;;  %v4521_v26 = vadd.f32 %v5100_v22, %v727_v7  ;;  %v1862_v7 = vld [vmem:[%s3804_s26 + $0xa] sm:$0x2]  ;;  %v5104_v19 = vld [vmem:[#allocation46_spill] sm:$0xff]  ;;  %v5105_v28 = vld [vmem:[#allocation47_spill] sm:$0xff] }
 0x2d9   : > { %v3223_v56 = vrot.slane %v1188_v40, 9  ;;  %v1189_v23 = vmul.f32 %v5101_v36, %v4146_v54  ;;  %v1266_v55 = vadd.f32 %v3221_v6, %v977_v4  ;;  %v1552_v51 = vadd.f32 %v5103_v62, %v1263_v42  ;;  %v1861_v6 = vld [vmem:[%s3804_s26 + $0x8] sm:$0x2]  ;;  %v5106_v11 = vld [vmem:[#allocation36_spill] sm:$0xff] }
 0x2da   : > { %v1553_v8 = vadd.f32 %v5102_v46, %v1264_v30  ;;  %v4529_v5 = vunpack.c.l.bf16 %v1860_v63  ;;  %v3222_v3 = vrot.slane %v1187_v12, 9  ;;  %v3225_v52 = vrot.slane %v1190_v14, 9  ;;  %v5107_v14 = vld [vmem:[#allocation55_spill] sm:$0xff]  ;;  %v1863_v46 = vld [vmem:[%s3804_s26 + $0xc] sm:$0x2] }
 0x2db   : > { %v1192_v54 = vmul.f32 %v5104_v19, %v4154_v16  ;;  %v1191_v4 = vmul.f32 %v5105_v28, %v4156_v27  ;;  %v1841_v43 = vadd.f32 %v4404_v13, %v1552_v51  ;;  %v4540_v47 = vadd.f32 %v5106_v11, %v730_v20  ;;  %v5109_v51 = vld [vmem:[#allocation57_spill] sm:$0xff] }
 0x2dc   : > { %v1842_v40 = vadd.f32 %v4402_v0, %v1553_v8  ;;  %v3224_v12 = vrot.slane %v1189_v23, 9  ;;  %v1555_v30 = vadd.f32 %v5107_v14, %v1266_v55  ;;  %v4545_v16 = vunpack.c.l.bf16 %v1862_v7  ;;  %v1864_v0 = vld [vmem:[%s3804_s26 + $0xe] sm:$0x2]  ;;  %v5113_v14 = vld [vmem:[#allocation59_spill] sm:$0xff] }
 0x2dd   : > { %v4548_v1 = vunpack.c.l.bf16 %v1861_v6  ;;  %v3227_v42 = vrot.slane %v1192_v54, 9  ;;  %v3226_v20 = vrot.slane %v1191_v4, 9  ;;  %v1268_v36 = vadd.f32 %v3223_v56, %v979_v59  ;;  %v5108_v8 = vld [vmem:[#allocation37_spill] sm:$0xff] }
 0x2de   : > { %v1267_v23 = vadd.f32 %v3222_v3, %v978_v60  ;;  %v4557_v55 = vadd.f32 %v5108_v8, %v729_v35  ;;  %v1269_v19 = vadd.f32 %v3224_v12, %v980_v38  ;;  %v4562_v4 = vunpack.c.l.bf16 %v1864_v0  ;;  %v1866_v35 = vld [vmem:[%s3804_s26 + $0x12] sm:$0x2]  ;;  %v5112_v6 = vld [vmem:[#allocation49_spill] sm:$0xff] }
 0x2df   : > { %v4566_v56 = vunpack.c.l.bf16 %v1863_v46  ;;  %v1193_v38 = vmul.f32 %v5112_v6, %v4166_v49  ;;  %v5115_v8 = vld [vmem:[#allocation50_spill] sm:$0xff] }
 0x2e1   : > { %v1992_v29 = vpop.permute.xlu1 %1991  ;;  %v1988_v48 = vpop.permute.xlu0 %1987  ;;  %v3228_v46 = vrot.slane %v1193_v38, 9  ;;  %v1870_v38 = vld [vmem:[%s3804_s26 + $0x1a] sm:$0x2] }
 0x2e2   : > { %v2051_v41 = vmul.f32 %v1992_v29, %v4504_v31  ;;  %v2050_v58 = vmul.f32 %v1988_v48, %v4506_v9  ;;  %v1270_v29 = vadd.f32 %v3225_v52, %v981_v44  ;;  %v1844_v48 = vadd.f32 %v4406_v37, %v1555_v30  ;;  %v1865_v44 = vld [vmem:[%s3804_s26 + $0x10] sm:$0x2]  ;;  %v5111_v37 = vld [vmem:[#allocation48_spill] sm:$0xff] }
 0x2e3   : > { %v1194_v52 = vmul.f32 %v5111_v37, %v4164_v50 }
 0x2e4   : > { %v3363_v21 = vrot.slane %v2051_v41, 10  ;;  %v3362_v10 = vrot.slane %v2050_v58, 10  ;;  %v1557_v41 = vadd.f32 %v5109_v51, %v1268_v36  ;;  %v5110_v58 = vld [vmem:[#allocation58_spill] sm:$0xff]  ;;  %v1559_v30 = vadd.f32 %v5113_v14, %v1270_v29  ;;  %v5117_v51 = vld [vmem:[#allocation68_spill] sm:$0xff] }
 0x2e5   : > { %v2000_v63 = vpop.permute.xlu1 %1999  ;;  %v4543_v57 = vpop.permute.xlu0 %1995  ;;  %v1556_v7 = vadd.f32 %v5110_v58, %v1267_v23  ;;  %v4581_v36 = vunpack.c.l.bf16 %v1866_v35  ;;  %v4583_v23 = vunpack.c.l.bf16 %v1865_v44  ;;  %v1196_v29 = vmul.f32 %v5115_v8, %v4174_v24  ;;  %v5118_v58 = vld [vmem:[#allocation69_spill] sm:$0xff] }
 0x2e6   : > { %v2053_v27 = vmul.f32 %v2000_v63, %v4529_v5  ;;  %v4551_v13 = vadd.f32 %v3363_v21, %v1842_v40  ;;  %v4553_v22 = vadd.f32 %v3362_v10, %v1841_v43  ;;  %v1272_v40 = vadd.f32 %v3227_v42, %v4509_v32  ;;  %v5114_v63 = vld [vmem:[#allocation60_spill] sm:$0xff] }
 0x2e7   : > { %v1271_v43 = vadd.f32 %v3226_v20, %v982_v15  ;;  %v1846_v21 = vadd.f32 %v4410_v45, %v1557_v41  ;;  %v1845_v10 = vadd.f32 %v4412_v33, %v1556_v7  ;;  %v1868_v15 = vld [vmem:[%s3804_s26 + $0x16] sm:$0x2]  ;;  %v1867_v45 = vld [vmem:[%s3804_s26 + $0x14] sm:$0x2]  ;;  %v3229_v20 = vrot.slane %v1194_v52, 9 }
 0x2e8   : > { %v3365_v62 = vrot.slane %v2053_v27, 10  ;;  %v1558_v27 = vadd.f32 %v5114_v63, %v1269_v19  ;;  %v1848_v41 = vadd.f32 %v5117_v51, %v1559_v30  ;;  %v4601_v52 = vunpack.c.l.bf16 %v1868_v15  ;;  %v5121_v30 = vld [vmem:[#allocation70_spill] sm:$0xff] }
 0x2e9   : > { %v2008_v28 = vpop.permute.xlu1 %2007  ;;  %v2004_v54 = vpop.permute.xlu0 %2003  ;;  %v4603_v6 = vunpack.c.l.bf16 %v1867_v45  ;;  %v1273_v14 = vadd.f32 %v3228_v46, %v4521_v26  ;;  %v5124_v45 = vld [vmem:[#allocation64_spill] sm:$0xff]  ;;  %v1871_v46 = vld [vmem:[%s3804_s26 + $0x1c] sm:$0x2] }
 0x2ea   : > { %v2055_v59 = vmul.f32 %v2008_v28, %v4545_v16  ;;  %v2054_v60 = vmul.f32 %v2004_v54, %v4548_v1  ;;  %v4570_v3 = vadd.f32 %v3365_v62, %v1844_v48  ;;  %v5116_v48 = vld [vmem:[#allocation51_spill] sm:$0xff]  ;;  %v1847_v7 = vadd.f32 %v5118_v58, %v1558_v27  ;;  %v5119_v54 = vld [vmem:[#allocation61_spill] sm:$0xff] }
 0x2eb   : > { %v1195_v62 = vmul.f32 %v5116_v48, %v4176_v25  ;;  %v5122_v27 = vld [vmem:[#allocation71_spill] sm:$0xff]  ;;  %v1562_v8 = vadd.f32 %v5124_v45, %v1273_v14 }
 0x2ec   : > { %v3367_v11 = vrot.slane %v2055_v59, 10  ;;  %v3366_v12 = vrot.slane %v2054_v60, 10  ;;  %v1561_v59 = vadd.f32 %v5119_v54, %v1272_v40  ;;  %v5120_v60 = vld [vmem:[#allocation62_spill] sm:$0xff] }
 0x2ed   : > { %v2016_v0 = vpop.permute.xlu1 %2015  ;;  %v2012_v50 = vpop.permute.xlu0 %2011  ;;  %v1560_v35 = vadd.f32 %v5120_v60, %v1271_v43  ;;  %v3230_v40 = vrot.slane %v1195_v62, 9  ;;  %v1274_v43 = vadd.f32 %v3229_v20, %v4518_v18  ;;  %v1872_v20 = vld [vmem:[%s3804_s26 + $0x1e] sm:$0x2]  ;;  %v1851_v54 = vadd.f32 %v4432_v61, %v1562_v8  ;;  %v1859_v8 = vld [vmem:[%s3804_s26 + $0x4] sm:$0x2] }
 0x2ee   : > { %v2057_v49 = vmul.f32 %v2016_v0, %v4562_v4  ;;  %v2056_v32 = vmul.f32 %v2012_v50, %v4566_v56  ;;  %v4589_v42 = vadd.f32 %v3367_v11, %v1846_v21  ;;  %v4591_v33 = vadd.f32 %v3366_v12, %v1845_v10  ;;  %v1869_v21 = vld [vmem:[%s3804_s26 + $0x18] sm:$0x2] }
 0x2ef   : > { %v3231_v12 = vrot.slane %v1196_v29, 9  ;;  %v1850_v63 = vadd.f32 %v5121_v30, %v1561_v59  ;;  %v1849_v0 = vadd.f32 %v5122_v27, %v1560_v35  ;;  %v4619_v29 = vunpack.c.l.bf16 %v1870_v38  ;;  %v5125_v35 = vld [vmem:[#allocation65_spill] sm:$0xff] }
 0x2f0   : > { %v3369_v19 = vrot.slane %v2057_v49, 10  ;;  %v3368_v28 = vrot.slane %v2056_v32, 10  ;;  %v5123_v32 = vld [vmem:[#allocation63_spill] sm:$0xff]  ;;  %v4621_v62 = vunpack.c.l.bf16 %v1869_v21  ;;  %v4637_v21 = vunpack.c.l.bf16 %v1872_v20 }
 0x2f1   : > { %v2024_v44 = vpop.permute.xlu1 %2023  ;;  %v2020_v37 = vpop.permute.xlu0 %2019  ;;  %v1563_v15 = vadd.f32 %v5123_v32, %v1274_v43  ;;  %v4639_v43 = vunpack.c.l.bf16 %v1871_v46  ;;  %v4664_v20 = vunpack.c.l.bf16 %v1859_v8 }
 0x2f2   : > { %v2059_v24 = vmul.f32 %v2024_v44, %v4581_v36  ;;  %v2058_v25 = vmul.f32 %v2020_v37, %v4583_v23  ;;  %v4609_v10 = vadd.f32 %v3369_v19, %v1848_v41  ;;  %v4611_v11 = vadd.f32 %v3368_v28, %v1847_v7  ;;  %v5126_v37 = vld [vmem:[#allocation66_spill] sm:$0xff] }
 0x2f3   : > { %v1276_v7 = vadd.f32 %v3231_v12, %v4540_v47  ;;  %v1275_v19 = vadd.f32 %v3230_v40, %v4557_v55  ;;  %v1852_v28 = vadd.f32 %v4430_v53, %v1563_v15 }
 0x2f4   : > { %v3371_v50 = vrot.slane %v2059_v24, 10  ;;  %v3370_v49 = vrot.slane %v2058_v25, 10 }
 0x2f5   : > { %v2032_v48 = vpop.permute.xlu1 %2031  ;;  %v2028_v51 = vpop.permute.xlu0 %2027  ;;  %v1565_v44 = vadd.f32 %v5125_v35, %v1276_v7  ;;  %v1564_v24 = vadd.f32 %v5126_v37, %v1275_v19 }
 0x2f6   : > { %v2061_v18 = vmul.f32 %v2032_v48, %v4601_v52  ;;  %v2060_v26 = vmul.f32 %v2028_v51, %v4603_v6  ;;  %v4627_v41 = vadd.f32 %v3371_v50, %v1850_v63  ;;  %v4629_v58 = vadd.f32 %v3370_v49, %v1849_v0 }
 0x2f7   : > { %v1854_v12 = vadd.f32 %v4438_v34, %v1565_v44  ;;  %v1853_v40 = vadd.f32 %v4440_v17, %v1564_v24 }
 0x2f8   : > { %v3373_v59 = vrot.slane %v2061_v18, 10  ;;  %v3372_v60 = vrot.slane %v2060_v26, 10 }
 0x2f9   : > { %v2040_v25 = vpop.permute.xlu1 %2039  ;;  %v2036_v38 = vpop.permute.xlu0 %2035 }
 0x2fa   : > { %v2063_v47 = vmul.f32 %v2040_v25, %v4619_v29  ;;  %v2062_v55 = vmul.f32 %v2036_v38, %v4621_v62  ;;  %v4643_v53 = vadd.f32 %v3373_v59, %v1852_v28  ;;  %v4645_v61 = vadd.f32 %v3372_v60, %v1851_v54 }
 0x2fc   : > { %v3375_v14 = vrot.slane %v2063_v47, 10  ;;  %v3374_v30 = vrot.slane %v2062_v55, 10 }
 0x2fd   : > { %v2048_v63 = vpop.permute.xlu1 %2047  ;;  %v2044_v27 = vpop.permute.xlu0 %2043 }
 0x2fe   : > { %v2065_v0 = vmul.f32 %v2048_v63, %v4637_v21  ;;  %v2064_v50 = vmul.f32 %v2044_v27, %v4639_v43  ;;  %v4651_v49 = vadd.f32 %v3375_v14, %v1854_v12  ;;  %v4653_v32 = vadd.f32 %v3374_v30, %v1853_v40 }
 0x300   : > { %v3377_v15 = vrot.slane %v2065_v0, 10  ;;  %v3376_v45 = vrot.slane %v2064_v50, 10 }
 0x301   : > { %v2249_v48 = vpop.permute.xlu1 %2248  ;;  %v2245_v51 = vpop.permute.xlu0 %2244 }
 0x302   : > { %v2308_v34 = vmul.f32 %v2249_v48, %v4504_v31  ;;  %v2307_v17 = vmul.f32 %v2245_v51, %v4506_v9  ;;  %v4659_v18 = vadd.f32 %v3377_v15, %v4456_v39  ;;  %v4662_v26 = vadd.f32 %v3376_v45, %v4458_v2 }
 0x304   : > { %v3411_v46 = vrot.slane %v2308_v34, 10  ;;  %v3410_v7 = vrot.slane %v2307_v17, 10 }
 0x305   : > { %v2257_v19 = vpop.permute.xlu1 %2256  ;;  %v2253_v28 = vpop.permute.xlu0 %2252 }
 0x306   : > { %v2310_v54 = vmul.f32 %v2257_v19, %v4529_v5  ;;  %v2309_v59 = vmul.f32 %v2253_v28, %v4664_v20  ;;  %2373 = vrot.lane.b32.xlu1 %v3411_v46, %s3547_s27  ;;  %2371 = vrot.lane.b32.xlu0 %v3410_v7, %s3547_s27 }
 0x308   : > { %v3413_v60 = vrot.slane %v2310_v54, 10  ;;  %v3412_v39 = vrot.slane %v2309_v59, 10 }
 0x309   : > { %v2265_v35 = vpop.permute.xlu1 %2264  ;;  %v2261_v44 = vpop.permute.xlu0 %2260 }
 0x30a   : > { %v2312_v2 = vmul.f32 %v2265_v35, %v4545_v16  ;;  %v2311_v37 = vmul.f32 %v2261_v44, %v4548_v1  ;;  %2377 = vrot.lane.b32.xlu1 %v3413_v60, %s3547_s27  ;;  %2375 = vrot.lane.b32.xlu0 %v3412_v39, %s3547_s27 }
 0x30c   : > { %v3415_v24 = vrot.slane %v2312_v2, 10  ;;  %v3414_v25 = vrot.slane %v2311_v37, 10 }
 0x30d   : > { %v2273_v38 = vpop.permute.xlu1 %2272  ;;  %v2269_v47 = vpop.permute.xlu0 %2268 }
 0x30e   : > { %v2314_v55 = vmul.f32 %v2273_v38, %v4562_v4  ;;  %v2313_v12 = vmul.f32 %v2269_v47, %v4566_v56  ;;  %2381 = vrot.lane.b32.xlu1 %v3415_v24, %s3547_s27  ;;  %2379 = vrot.lane.b32.xlu0 %v3414_v25, %s3547_s27  ;;  %v3443_v24 = vld [vmem:[%s4991_s1 + $0x81] ss:$0 sm:$0xff]  ;;  %v3442_v25 = vld [vmem:[%s4991_s1 + $0x80] ss:$0 sm:$0xff] }
 0x30f   : > { %v3445_v38 = vld [vmem:[%s4991_s1 + $0x83] ss:$0 sm:$0xff]  ;;  %v3444_v47 = vld [vmem:[%s4991_s1 + $0x82] ss:$0 sm:$0xff] }
 0x310   : > { %v3417_v40 = vrot.slane %v2314_v55, 10  ;;  %v3416_v14 = vrot.slane %v2313_v12, 10  ;;  %v3447_v55 = vld [vmem:[%s4991_s1 + $0x85] ss:$0 sm:$0xff]  ;;  %v3446_v12 = vld [vmem:[%s4991_s1 + $0x84] ss:$0 sm:$0xff] }
 0x311   : > { %v2281_v30 = vpop.permute.xlu1 %2280  ;;  %v2277_v63 = vpop.permute.xlu0 %2276 }
 0x312   : > { %v2316_v27 = vmul.f32 %v2281_v30, %v4581_v36  ;;  %v2315_v0 = vmul.f32 %v2277_v63, %v4583_v23  ;;  %2385 = vrot.lane.b32.xlu1 %v3417_v40, %s3547_s27  ;;  %2383 = vrot.lane.b32.xlu0 %v3416_v14, %s3547_s27  ;;  %v3449_v40 = vld [vmem:[%s4991_s1 + $0x87] ss:$0 sm:$0xff]  ;;  %v3448_v14 = vld [vmem:[%s4991_s1 + $0x86] ss:$0 sm:$0xff] }
 0x313   : > { %v3451_v30 = vld [vmem:[%s4991_s1 + $0x89] ss:$0 sm:$0xff]  ;;  %v3450_v63 = vld [vmem:[%s4991_s1 + $0x88] ss:$0 sm:$0xff] }
 0x314   : > { %v3419_v50 = vrot.slane %v2316_v27, 10  ;;  %v3418_v15 = vrot.slane %v2315_v0, 10  ;;  %v3453_v27 = vld [vmem:[%s4991_s1 + $0x8b] ss:$0 sm:$0xff]  ;;  %v3452_v0 = vld [vmem:[%s4991_s1 + $0x8a] ss:$0 sm:$0xff] }
 0x315   : > { %v2289_v45 = vpop.permute.xlu1 %2288  ;;  %v2285_v8 = vpop.permute.xlu0 %2284 }
 0x316   : > { %v2318_v48 = vmul.f32 %v2289_v45, %v4601_v52  ;;  %v2317_v51 = vmul.f32 %v2285_v8, %v4603_v6  ;;  %2389 = vrot.lane.b32.xlu1 %v3419_v50, %s3547_s27  ;;  %2387 = vrot.lane.b32.xlu0 %v3418_v15, %s3547_s27  ;;  %v3455_v50 = vld [vmem:[%s4991_s1 + $0x8d] ss:$0 sm:$0xff]  ;;  %v3454_v15 = vld [vmem:[%s4991_s1 + $0x8c] ss:$0 sm:$0xff] }
 0x317   : > { %v3457_v45 = vld [vmem:[%s4991_s1 + $0x8f] ss:$0 sm:$0xff]  ;;  %v3456_v8 = vld [vmem:[%s4991_s1 + $0x8e] ss:$0 sm:$0xff] }
 0x318   : > { %v3421_v34 = vrot.slane %v2318_v48, 10  ;;  %v3420_v17 = vrot.slane %v2317_v51, 10  ;;  %v5127_v48 = vld [vmem:[#allocation52_spill] sm:$0xff]  ;;  %v5128_v51 = vld [vmem:[#allocation41_spill] sm:$0xff] }
 0x319   : > { %v2297_v46 = vpop.permute.xlu1 %2296  ;;  %v2293_v7 = vpop.permute.xlu0 %2292 }
 0x31a   : > { %v2320_v19 = vmul.f32 %v2297_v46, %v4619_v29  ;;  %v2319_v28 = vmul.f32 %v2293_v7, %v4621_v62  ;;  %2393 = vrot.lane.b32.xlu1 %v3421_v34, %s3547_s27  ;;  %2391 = vrot.lane.b32.xlu0 %v3420_v17, %s3547_s27  ;;  %v1185_v34 = vmul.f32 %v5128_v51, %v5127_v48  ;;  %v5129_v17 = vld [vmem:[#allocation7_spill] sm:$0xff]  ;;  %v5130_v46 = vld [vmem:[#allocation4_spill] sm:$0xff] }
 0x31b   : > { %v462_v7 = vmul.f32 %v5130_v46, %v5129_v17 }
 0x31c   : > { %v3423_v54 = vrot.slane %v2320_v19, 10  ;;  %v3422_v59 = vrot.slane %v2319_v28, 10  ;;  %v5131_v19 = vld [vmem:[#allocation13_spill] sm:$0xff] }
 0x31d   : > { %v2305_v60 = vpop.permute.xlu1 %2304  ;;  %v2301_v39 = vpop.permute.xlu0 %2300  ;;  %v719_v28 = vadd.f32 %v5131_v19, %v462_v7 }
 0x31e   : > { %v2322_v35 = vmul.f32 %v2305_v60, %v4637_v21  ;;  %v2321_v44 = vmul.f32 %v2301_v39, %v4639_v43  ;;  %2397 = vrot.lane.b32.xlu1 %v3423_v54, %s3547_s27  ;;  %2395 = vrot.lane.b32.xlu0 %v3422_v59, %s3547_s27  ;;  %v3220_v54 = vrot.slane %v1185_v34, 9  ;;  %v5132_v59 = vld [vmem:[#allocation27_spill] sm:$0xff]  ;;  %v2052_v39 = vmul.f32 %v4543_v57, %v4664_v20 }
 0x31f   : > { %v976_v60 = vadd.f32 %v5132_v59, %v719_v28 }
 0x320   : > { %v3425_v2 = vrot.slane %v2322_v35, 10  ;;  %v3424_v37 = vrot.slane %v2321_v44, 10  ;;  %v5133_v44 = vld [vmem:[#allocation56_spill] sm:$0xff] }
 0x321   : > { %v1265_v35 = vadd.f32 %v3220_v54, %v976_v60 }
 0x322   : > { %2401 = vrot.lane.b32.xlu1 %v3425_v2, %s3547_s27  ;;  %2399 = vrot.lane.b32.xlu0 %v3424_v37, %s3547_s27  ;;  %v3364_v37 = vrot.slane %v2052_v39, 10 }
 0x323   : > { %v1554_v2 = vadd.f32 %v5133_v44, %v1265_v35 }
 0x326   : > { %2537 = vperm.xlu1 %3521, %v3443_v24   ;;  %2533 = vperm.xlu0 %3520, %v3442_v25  }
 0x32a   : > { %2545 = vperm.xlu1 %3521, %v3445_v38   ;;  %2541 = vperm.xlu0 %3520, %v3444_v47   ;;  %v5134_v38 = vld [vmem:[#allocation67_spill] sm:$0xff] }
 0x32b   : > { %v1843_v47 = vadd.f32 %v5134_v38, %v1554_v2 }
 0x32e   : > { %2553 = vperm.xlu1 %3521, %v3447_v55   ;;  %2549 = vperm.xlu0 %3520, %v3446_v12  }
 0x332   : > { %2561 = vperm.xlu1 %3521, %v3449_v40   ;;  %2557 = vperm.xlu0 %3520, %v3448_v14   ;;  %v2132_v40 = vadd.f32 %v3364_v37, %v1843_v47 }
 0x336   : > { %2569 = vperm.xlu1 %3521, %v3451_v30   ;;  %2565 = vperm.xlu0 %3520, %v3450_v63  }
 0x33a   : > { %2577 = vperm.xlu1 %3521, %v3453_v27   ;;  %2573 = vperm.xlu0 %3520, %v3452_v0  }
 0x33e   : > { %2585 = vperm.xlu1 %3521, %v3455_v50   ;;  %2581 = vperm.xlu0 %3520, %v3454_v15  }
 0x342   : > { %2593 = vperm.xlu1 %3521, %v3457_v45   ;;  %2589 = vperm.xlu0 %3520, %v3456_v8  }
 0x378   : > { %v2374_v24 = vpop.permute.xlu1 %2373  ;;  %v2372_v25 = vpop.permute.xlu0 %2371 }
 0x379   : > { %v4755_v55 = vadd.f32 %v2374_v24, %v4551_v13  ;;  %v4758_v12 = vadd.f32 %v2372_v25, %v4553_v22 }
 0x37c   : > { %v2378_v14 = vpop.permute.xlu1 %2377  ;;  %v2376_v30 = vpop.permute.xlu0 %2375 }
 0x37d   : > { %v4761_v63 = vadd.f32 %v2378_v14, %v4570_v3  ;;  %v4763_v57 = vadd.f32 %v2376_v30, %v2132_v40 }
 0x380   : > { %v2382_v27 = vpop.permute.xlu1 %2381  ;;  %v2380_v0 = vpop.permute.xlu0 %2379 }
 0x381   : > { %v4766_v50 = vadd.f32 %v2382_v27, %v4589_v42  ;;  %v4769_v15 = vadd.f32 %v2380_v0, %v4591_v33 }
 0x384   : > { %v2386_v13 = vpop.permute.xlu1 %2385  ;;  %v2384_v45 = vpop.permute.xlu0 %2383 }
 0x385   : > { %v4772_v22 = vadd.f32 %v2386_v13, %v4609_v10  ;;  %v4775_v8 = vadd.f32 %v2384_v45, %v4611_v11 }
 0x388   : > { %v2390_v3 = vpop.permute.xlu1 %2389  ;;  %v2388_v48 = vpop.permute.xlu0 %2387 }
 0x389   : > { %v4778_v51 = vadd.f32 %v2390_v3, %v4627_v41  ;;  %v4781_v34 = vadd.f32 %v2388_v48, %v4629_v58 }
 0x38c   : > { %v2394_v42 = vpop.permute.xlu1 %2393  ;;  %v2392_v17 = vpop.permute.xlu0 %2391 }
 0x38d   : > { %v4784_v33 = vadd.f32 %v2394_v42, %v4643_v53  ;;  %v4787_v46 = vadd.f32 %v2392_v17, %v4645_v61 }
 0x390   : > { %v2398_v10 = vpop.permute.xlu1 %2397  ;;  %v2396_v7 = vpop.permute.xlu0 %2395 }
 0x391   : > { %v4790_v11 = vadd.f32 %v2398_v10, %v4651_v49  ;;  %v4793_v19 = vadd.f32 %v2396_v7, %v4653_v32 }
 0x394   : > { %v2402_v41 = vpop.permute.xlu1 %2401  ;;  %v2400_v28 = vpop.permute.xlu0 %2399 }
 0x395   : > { %v4796_v58 = vadd.f32 %v2402_v41, %v4659_v18  ;;  %v4799_v54 = vadd.f32 %v2400_v28, %v4662_v26 }
 0x3a1   : > { %v2538_v53 = vpop.permute.xlu1 %2537  ;;  %v2534_v59 = vpop.permute.xlu0 %2533 }
 0x3a2   : > { %v2597_v61 = vmul.f32 %v2538_v53, %v4504_v31  ;;  %v2596_v60 = vmul.f32 %v2534_v59, %v4506_v9  ;;  %v3474_v53 = vld [vmem:[%s4992_s2] ss:$0 sm:$0xff]  ;;  %v3478_v59 = vld [vmem:[%s4992_s2 + $0x4] ss:$0 sm:$0xff] }
 0x3a4   : > { %v3459_v39 = vrot.slane %v2597_v61, 10  ;;  %v3458_v49 = vrot.slane %v2596_v60, 10  ;;  %v3477_v61 = vld [vmem:[%s4992_s2 + $0x3] ss:$0 sm:$0xff]  ;;  %v3480_v60 = vld [vmem:[%s4992_s2 + $0x6] ss:$0 sm:$0xff] }
 0x3a5   : > { %v2546_v35 = vpop.permute.xlu1 %2545  ;;  %v2542_v44 = vpop.permute.xlu0 %2541 }
 0x3a6   : > { %v2599_v32 = vmul.f32 %v2546_v35, %v4529_v5  ;;  %v2598_v2 = vmul.f32 %v2542_v44, %v4664_v20  ;;  %2662 = vrot.lane.b32.xlu1 %v3459_v39, %s3548_s28  ;;  %2660 = vrot.lane.b32.xlu0 %v3458_v49, %s3548_s28  ;;  %v3479_v39 = vld [vmem:[%s4992_s2 + $0x5] ss:$0 sm:$0xff]  ;;  %v3482_v49 = vld [vmem:[%s4992_s2 + $0x8] ss:$0 sm:$0xff] }
 0x3a7   : > { %v3481_v35 = vld [vmem:[%s4992_s2 + $0x7] ss:$0 sm:$0xff]  ;;  %v3484_v44 = vld [vmem:[%s4992_s2 + $0xa] ss:$0 sm:$0xff] }
 0x3a8   : > { %v3461_v18 = vrot.slane %v2599_v32, 10  ;;  %v3460_v26 = vrot.slane %v2598_v2, 10  ;;  %v3483_v32 = vld [vmem:[%s4992_s2 + $0x9] ss:$0 sm:$0xff]  ;;  %v3486_v2 = vld [vmem:[%s4992_s2 + $0xc] ss:$0 sm:$0xff] }
 0x3a9   : > { %v2554_v37 = vpop.permute.xlu1 %2553  ;;  %v2550_v24 = vpop.permute.xlu0 %2549 }
 0x3aa   : > { %v2601_v31 = vmul.f32 %v2554_v37, %v4545_v16  ;;  %v2600_v9 = vmul.f32 %v2550_v24, %v4548_v1  ;;  %2666 = vrot.lane.b32.xlu1 %v3461_v18, %s3548_s28  ;;  %2664 = vrot.lane.b32.xlu0 %v3460_v26, %s3548_s28  ;;  %v3485_v18 = vld [vmem:[%s4992_s2 + $0xb] ss:$0 sm:$0xff]  ;;  %v3488_v37 = vld [vmem:[%s4992_s2 + $0xe] ss:$0 sm:$0xff] }
 0x3ab   : > { %v3487_v24 = vld [vmem:[%s4992_s2 + $0xd] ss:$0 sm:$0xff] }
 0x3ac   : > { %v3463_v25 = vrot.slane %v2601_v31, 10  ;;  %v3462_v5 = vrot.slane %v2600_v9, 10  ;;  %v3489_v9 = vld [vmem:[%s4992_s2 + $0xf] ss:$0 sm:$0xff] }
 0x3ad   : > { %v2562_v38 = vpop.permute.xlu1 %2561  ;;  %v2558_v20 = vpop.permute.xlu0 %2557 }
 0x3ae   : > { %v2603_v47 = vmul.f32 %v2562_v38, %v4562_v4  ;;  %v2602_v40 = vmul.f32 %v2558_v20, %v4566_v56  ;;  %2670 = vrot.lane.b32.xlu1 %v3463_v25, %s3548_s28  ;;  %2668 = vrot.lane.b32.xlu0 %v3462_v5, %s3548_s28 }
 0x3b0   : > { %v3465_v14 = vrot.slane %v2603_v47, 10  ;;  %v3464_v16 = vrot.slane %v2602_v40, 10 }
 0x3b1   : > { %v2570_v30 = vpop.permute.xlu1 %2569  ;;  %v2566_v1 = vpop.permute.xlu0 %2565 }
 0x3b2   : > { %v2605_v27 = vmul.f32 %v2570_v30, %v4581_v36  ;;  %v2604_v0 = vmul.f32 %v2566_v1, %v4583_v23  ;;  %2674 = vrot.lane.b32.xlu1 %v3465_v14, %s3548_s28  ;;  %2672 = vrot.lane.b32.xlu0 %v3464_v16, %s3548_s28 }
 0x3b4   : > { %v3467_v13 = vrot.slane %v2605_v27, 10  ;;  %v3466_v4 = vrot.slane %v2604_v0, 10 }
 0x3b5   : > { %v2578_v45 = vpop.permute.xlu1 %2577  ;;  %v2574_v56 = vpop.permute.xlu0 %2573 }
 0x3b6   : > { %v2607_v3 = vmul.f32 %v2578_v45, %v4601_v52  ;;  %v2606_v48 = vmul.f32 %v2574_v56, %v4603_v6  ;;  %2678 = vrot.lane.b32.xlu1 %v3467_v13, %s3548_s28  ;;  %2676 = vrot.lane.b32.xlu0 %v3466_v4, %s3548_s28 }
 0x3b8   : > { %v3469_v42 = vrot.slane %v2607_v3, 10  ;;  %v3468_v36 = vrot.slane %v2606_v48, 10 }
 0x3b9   : > { %v2586_v17 = vpop.permute.xlu1 %2585  ;;  %v2582_v23 = vpop.permute.xlu0 %2581 }
 0x3ba   : > { %v2609_v10 = vmul.f32 %v2586_v17, %v4619_v29  ;;  %v2608_v7 = vmul.f32 %v2582_v23, %v4621_v62  ;;  %2682 = vrot.lane.b32.xlu1 %v3469_v42, %s3548_s28  ;;  %2680 = vrot.lane.b32.xlu0 %v3468_v36, %s3548_s28  ;;  %v3476_v62 = vld [vmem:[%s4992_s2 + $0x2] ss:$0 sm:$0xff] }
 0x3bc   : > { %v3471_v41 = vrot.slane %v2609_v10, 10  ;;  %v3470_v52 = vrot.slane %v2608_v7, 10 }
 0x3bd   : > { %v2590_v28 = vpop.permute.xlu0 %2589  ;;  %v2594_v26 = vpop.permute.xlu1 %2593 }
 0x3be   : > { %v2610_v6 = vmul.f32 %v2590_v28, %v4639_v43  ;;  %2686 = vrot.lane.b32.xlu1 %v3471_v41, %s3548_s28  ;;  %2684 = vrot.lane.b32.xlu0 %v3470_v52, %s3548_s28  ;;  %v3475_v43 = vld [vmem:[%s4992_s2 + $0x1] ss:$0 sm:$0xff]  ;;  %v2611_v31 = vmul.f32 %v2594_v26, %v4637_v21 }
 0x3c0   : > { %v3472_v29 = vrot.slane %v2610_v6, 10  ;;  %v3473_v25 = vrot.slane %v2611_v31, 10 }
 0x3c2   : > { %2821 = vperm.xlu1 %3521, %v3474_v53   ;;  %2688 = vrot.lane.b32.xlu0 %v3472_v29, %s3548_s28 }
 0x3c6   : > { %2829 = vperm.xlu1 %3521, %v3476_v62   ;;  %2825 = vperm.xlu0 %3520, %v3475_v43  }
 0x3ca   : > { %2837 = vperm.xlu1 %3521, %v3478_v59   ;;  %2833 = vperm.xlu0 %3520, %v3477_v61  }
 0x3ce   : > { %2845 = vperm.xlu1 %3521, %v3480_v60   ;;  %2841 = vperm.xlu0 %3520, %v3479_v39  }
 0x3d2   : > { %2853 = vperm.xlu1 %3521, %v3482_v49   ;;  %2849 = vperm.xlu0 %3520, %v3481_v35  }
 0x3d6   : > { %2861 = vperm.xlu1 %3521, %v3484_v44   ;;  %2857 = vperm.xlu0 %3520, %v3483_v32  }
 0x3da   : > { %2869 = vperm.xlu1 %3521, %v3486_v2   ;;  %2865 = vperm.xlu0 %3520, %v3485_v18  }
 0x3de   : > { %2877 = vperm.xlu1 %3521, %v3488_v37   ;;  %2873 = vperm.xlu0 %3520, %v3487_v24  }
 0x3e2   : > { %2690 = vrot.lane.b32.xlu1 %v3473_v25, %s3548_s28  ;;  %2881 = vperm.xlu0 %3520, %v3489_v9   ;;  %s3105_s28 = sshll.u32 %s246_s24, 4 }
 0x3e3   : > { %s4890_s10 = scalar_lea.vmem [#allocation3], %s3105_s28 }
 0x418   : > { %v2663_v5 = vpop.permute.xlu1 %2662  ;;  %v2661_v38 = vpop.permute.xlu0 %2660 }
 0x419   : > { %v2708_v45 = vadd.f32 %v2661_v38, %v4758_v12  ;;  %v2709_v42 = vadd.f32 %v2663_v5, %v4755_v55 }
 0x41c   : > { %v2667_v20 = vpop.permute.xlu1 %2666  ;;  %v2665_v47 = vpop.permute.xlu0 %2664 }
 0x41d   : > { %v2710_v36 = vadd.f32 %v2665_v47, %v4763_v57  ;;  %v2711_v41 = vadd.f32 %v2667_v20, %v4761_v63 }
 0x420   : > { %v2669_v40 = vpop.permute.xlu0 %2668  ;;  %v2671_v14 = vpop.permute.xlu1 %2670 }
 0x421   : > { %v2712_v52 = vadd.f32 %v2669_v40, %v4769_v15  ;;  %v2713_v62 = vadd.f32 %v2671_v14, %v4766_v50 }
 0x424   : > { %v2673_v16 = vpop.permute.xlu0 %2672  ;;  %v2675_v30 = vpop.permute.xlu1 %2674 }
 0x425   : > { %v2714_v43 = vadd.f32 %v2673_v16, %v4775_v8  ;;  %v2715_v49 = vadd.f32 %v2675_v30, %v4772_v22 }
 0x428   : > { %v2677_v21 = vpop.permute.xlu0 %2676  ;;  %v2679_v1 = vpop.permute.xlu1 %2678 }
 0x429   : > { %v2716_v35 = vadd.f32 %v2677_v21, %v4781_v34  ;;  %v2717_v26 = vadd.f32 %v2679_v1, %v4778_v51 }
 0x42c   : > { %v2681_v27 = vpop.permute.xlu0 %2680  ;;  %v2683_v0 = vpop.permute.xlu1 %2682 }
 0x42d   : > { %v2718_v37 = vadd.f32 %v2681_v27, %v4787_v46  ;;  %v2719_v5 = vadd.f32 %v2683_v0, %v4784_v33 }
 0x430   : > { %v2685_v13 = vpop.permute.xlu0 %2684  ;;  %v4881_v4 = vpop.permute.xlu1 %2686 }
 0x431   : > { %v2720_v38 = vadd.f32 %v2685_v13, %v4793_v19  ;;  %v2721_v16 = vadd.f32 %v4881_v4, %v4790_v11 }
 0x434   : > { %v4886_v56 = vpop.permute.xlu0 %2688 }
 0x435   : > { %v2722_v33 = vadd.f32 %v4886_v56, %v4799_v54 }
 0x43d   : > { %v2822_v3 = vpop.permute.xlu1 %2821 }
 0x43e   : > { %v2884_v48 = vadd.f32 %v2822_v3, %v2708_v45 }
 0x440   : > { %v2900_v17 = vpack.c.bf16 %v2884_v48, %v2884_v48 }
 0x441   : > { %v2830_v23 = vpop.permute.xlu1 %2829  ;;  %v2826_v10 = vpop.permute.xlu0 %2825 }
 0x442   : > { %2917 = vst.msk [vmem:[%s4890_s10] sm:$0x1] %vm2916_vm0, %v2900_v17  ;;  %v2886_v12 = vadd.f32 %v2830_v23, %v2710_v36  ;;  %v2885_v7 = vadd.f32 %v2826_v10, %v2709_v42 }
 0x444   : > { %v2902_v55 = vpack.c.bf16 %v2886_v12, %v2886_v12  ;;  %v2901_v57 = vpack.c.bf16 %v2885_v7, %v2885_v7 }
 0x445   : > { %v2838_v28 = vpop.permute.xlu1 %2837  ;;  %v2834_v6 = vpop.permute.xlu0 %2833 }
 0x446   : > { %2919 = vst.msk [vmem:[%s4890_s10 + $0x2] sm:$0x1] %vm2916_vm0, %v2902_v55  ;;  %2918 = vst.msk [vmem:[%s4890_s10 + $0x1] sm:$0x1] %vm2916_vm0, %v2901_v57  ;;  %v2888_v53 = vadd.f32 %v2838_v28, %v2712_v52  ;;  %v2887_v29 = vadd.f32 %v2834_v6, %v2711_v41 }
 0x448   : > { %v2904_v63 = vpack.c.bf16 %v2888_v53, %v2888_v53  ;;  %v2903_v59 = vpack.c.bf16 %v2887_v29, %v2887_v29 }
 0x449   : > { %v2846_v15 = vpop.permute.xlu1 %2845  ;;  %v2842_v61 = vpop.permute.xlu0 %2841 }
 0x44a   : > { %2921 = vst.msk [vmem:[%s4890_s10 + $0x4] sm:$0x1] %vm2916_vm0, %v2904_v63  ;;  %2920 = vst.msk [vmem:[%s4890_s10 + $0x3] sm:$0x1] %vm2916_vm0, %v2903_v59  ;;  %v2890_v60 = vadd.f32 %v2846_v15, %v2714_v43  ;;  %v2889_v39 = vadd.f32 %v2842_v61, %v2713_v62 }
 0x44c   : > { %v2906_v50 = vpack.c.bf16 %v2890_v60, %v2890_v60  ;;  %v2905_v44 = vpack.c.bf16 %v2889_v39, %v2889_v39 }
 0x44d   : > { %v2854_v8 = vpop.permute.xlu1 %2853  ;;  %v2850_v32 = vpop.permute.xlu0 %2849  ;;  %v2959_v48 = vld [vmem:[%s4890_s10 + $0x1] sm:$0x1] (%p3599_p5)  ;;  %v2961_v42 = vld [vmem:[%s4890_s10 + $0x2] sm:$0x1] (%p3599_p5) }
 0x44e   : > { %2923 = vst.msk [vmem:[%s4890_s10 + $0x6] sm:$0x1] %vm2916_vm0, %v2906_v50  ;;  %2922 = vst.msk [vmem:[%s4890_s10 + $0x5] sm:$0x1] %vm2916_vm0, %v2905_v44  ;;  %v2892_v2 = vadd.f32 %v2854_v8, %v2716_v35  ;;  %v2891_v18 = vadd.f32 %v2850_v32, %v2715_v49 }
 0x44f   : > { %2960 = vst [vmem:[%s4946_s11 + $0x2] sm:$0x1] (%p3599_p5), %v2959_v48  ;;  %2962 = vst [vmem:[%s4946_s11 + $0x4] sm:$0x1] (%p3599_p5), %v2961_v42 }
 0x450   : > { %v2908_v22 = vpack.c.bf16 %v2892_v2, %v2892_v2  ;;  %v2907_v24 = vpack.c.bf16 %v2891_v18, %v2891_v18 }
 0x451   : > { %v2862_v34 = vpop.permute.xlu1 %2861  ;;  %v2858_v31 = vpop.permute.xlu0 %2857  ;;  %v2963_v36 = vld [vmem:[%s4890_s10 + $0x3] sm:$0x1] (%p3599_p5)  ;;  %v2965_v17 = vld [vmem:[%s4890_s10 + $0x4] sm:$0x1] (%p3599_p5) }
 0x452   : > { %2925 = vst.msk [vmem:[%s4890_s10 + $0x8] sm:$0x1] %vm2916_vm0, %v2908_v22  ;;  %2924 = vst.msk [vmem:[%s4890_s10 + $0x7] sm:$0x1] %vm2916_vm0, %v2907_v24  ;;  %v2894_v9 = vadd.f32 %v2862_v34, %v2718_v37  ;;  %v2893_v25 = vadd.f32 %v2858_v31, %v2717_v26 }
 0x453   : > { %2964 = vst [vmem:[%s4946_s11 + $0x6] sm:$0x1] (%p3599_p5), %v2963_v36  ;;  %2966 = vst [vmem:[%s4946_s11 + $0x8] sm:$0x1] (%p3599_p5), %v2965_v17 }
 0x454   : > { %v2910_v51 = vpack.c.bf16 %v2894_v9, %v2894_v9  ;;  %v2909_v20 = vpack.c.bf16 %v2893_v25, %v2893_v25 }
 0x455   : > { %v2870_v46 = vpop.permute.xlu1 %2869  ;;  %v2866_v47 = vpop.permute.xlu0 %2865  ;;  %v2967_v23 = vld [vmem:[%s4890_s10 + $0x5] sm:$0x1] (%p3599_p5)  ;;  %v2969_v10 = vld [vmem:[%s4890_s10 + $0x6] sm:$0x1] (%p3599_p5) }
 0x456   : > { %2927 = vst.msk [vmem:[%s4890_s10 + $0xa] sm:$0x1] %vm2916_vm0, %v2910_v51  ;;  %2926 = vst.msk [vmem:[%s4890_s10 + $0x9] sm:$0x1] %vm2916_vm0, %v2909_v20  ;;  %v2896_v40 = vadd.f32 %v2870_v46, %v2720_v38  ;;  %v2895_v14 = vadd.f32 %v2866_v47, %v2719_v5 }
 0x457   : > { %2968 = vst [vmem:[%s4946_s11 + $0xa] sm:$0x1] (%p3599_p5), %v2967_v23  ;;  %2970 = vst [vmem:[%s4946_s11 + $0xc] sm:$0x1] (%p3599_p5), %v2969_v10 }
 0x458   : > { %v2912_v19 = vpack.c.bf16 %v2896_v40, %v2896_v40  ;;  %v2911_v30 = vpack.c.bf16 %v2895_v14, %v2895_v14 }
 0x459   : > { %v2878_v21 = vpop.permute.xlu1 %2877  ;;  %v2874_v1 = vpop.permute.xlu0 %2873  ;;  %v2971_v12 = vld [vmem:[%s4890_s10 + $0x7] sm:$0x1] (%p3599_p5)  ;;  %v2973_v7 = vld [vmem:[%s4890_s10 + $0x8] sm:$0x1] (%p3599_p5) }
 0x45a   : > { %2929 = vst.msk [vmem:[%s4890_s10 + $0xc] sm:$0x1] %vm2916_vm0, %v2912_v19  ;;  %2928 = vst.msk [vmem:[%s4890_s10 + $0xb] sm:$0x1] %vm2916_vm0, %v2911_v30  ;;  %v2898_v27 = vadd.f32 %v2878_v21, %v2722_v33  ;;  %v2897_v0 = vadd.f32 %v2874_v1, %v2721_v16 }
 0x45b   : > { %2972 = vst [vmem:[%s4946_s11 + $0xe] sm:$0x1] (%p3599_p5), %v2971_v12  ;;  %2974 = vst [vmem:[%s4946_s11 + $0x10] sm:$0x1] (%p3599_p5), %v2973_v7 }
 0x45c   : > { %v2914_v13 = vpack.c.bf16 %v2898_v27, %v2898_v27  ;;  %v2913_v45 = vpack.c.bf16 %v2897_v0, %v2897_v0 }
 0x45d   : > { %v2691_v3 = vpop.permute.xlu1 %2690  ;;  %v2882_v54 = vpop.permute.xlu0 %2881  ;;  %v2975_v41 = vld [vmem:[%s4890_s10 + $0x9] sm:$0x1] (%p3599_p5)  ;;  %v2977_v52 = vld [vmem:[%s4890_s10 + $0xa] sm:$0x1] (%p3599_p5) }
 0x45e   : > { %2931 = vst.msk [vmem:[%s4890_s10 + $0xe] sm:$0x1] %vm2916_vm0, %v2914_v13  ;;  %2930 = vst.msk [vmem:[%s4890_s10 + $0xd] sm:$0x1] %vm2916_vm0, %v2913_v45  ;;  %v2723_v11 = vadd.f32 %v2691_v3, %v4796_v58  ;;  %v2957_v58 = vld [vmem:[%s4890_s10] sm:$0x1] (%p3599_p5) }
 0x45f   : > { %2958 = vst [vmem:[%s4946_s11] sm:$0x1] (%p3599_p5), %v2957_v58  ;;  %2976 = vst [vmem:[%s4946_s11 + $0x12] sm:$0x1] (%p3599_p5), %v2975_v41 }
 0x460   : > { %v2899_v4 = vadd.f32 %v2882_v54, %v2723_v11  ;;  %2939 = sbr.rel (!%p3599_p5) target bundleno = 1133 (0x46d), region = 77  ;;  %2978 = vst [vmem:[%s4946_s11 + $0x14] sm:$0x1] (%p3599_p5), %v2977_v52 }
 0x461   : > { %v2979_v55 = vld [vmem:[%s4890_s10 + $0xb] sm:$0x1] (%p3599_p5)  ;;  %v2981_v57 = vld [vmem:[%s4890_s10 + $0xc] sm:$0x1] (%p3599_p5) }
 0x462   : > { %v2915_v56 = vpack.c.bf16 %v2899_v4, %v2899_v4  ;;  %2980 = vst [vmem:[%s4946_s11 + $0x16] sm:$0x1] (%p3599_p5), %v2979_v55  ;;  %2982 = vst [vmem:[%s4946_s11 + $0x18] sm:$0x1] (%p3599_p5), %v2981_v57 }
 0x464   : > { %2932 = vst.msk [vmem:[%s4890_s10 + $0xf] sm:$0x1] %vm2916_vm0, %v2915_v56 }
 0x465   : > { %v2983_v28 = vld [vmem:[%s4890_s10 + $0xd] sm:$0x1]  ;;  %v2985_v6 = vld [vmem:[%s4890_s10 + $0xe] sm:$0x1] }
 0x466   : > { %2984 = vst [vmem:[%s4946_s11 + $0x1a] sm:$0x1] %v2983_v28  ;;  %2986 = vst [vmem:[%s4946_s11 + $0x1c] sm:$0x1] %v2985_v6 }
 0x46b   : > { %v2987_v53 = vld [vmem:[%s4890_s10 + $0xf] sm:$0x1] }
 0x46c   : > { %2988 = vst [vmem:[%s4946_s11 + $0x1e] sm:$0x1] %v2987_v53 }
 0x46d PF: > { %p10_p10 = scmp.ge.s32.totalorder %s3586_s16, 4   ;;  %s5135_s12 = smov %s3540_s13 }
 0x46e   : > { %s5136_s13 = smov %s3597_s19  ;;  %s5137_s14 = smov %s3586_s16 }
 0x46f   :  { %12 = sbr.rel (!%p10_p10) target bundleno = 2 (0x2), region = 157 }

</bundles_post_ra>
